<compile_context>
chip_gen: v7x
topology: tpu7x:2x2x1
jax: 0.10.0
libtpu: 0.0.40
codegen_flags: <defaults>
</compile_context>

<pallas_src>
import numpy as np
import jax
import jax.numpy as jnp
from jax.experimental import pallas as pl
from jax.experimental.pallas import tpu as pltpu

ENCODED_DIM = 4          # latent dim of the MNIST auto-encoder (synthetic choice)
BATCH = 2
BN_EPS = 1e-5

# (Cin, Cout, Hin, padding) of the three ConvTranspose2d(k=3, stride=2) layers.
_CONV_GEOM = ((32, 16, 3, 0), (16, 8, 7, 1), (8, 1, 13, 1))


def _out_hw(hi, p):
    return 2 * hi + 1 - 2 * p


# ----------------------------------------------------------------------------- kernel
def _bn_relu(t, red, expand, gamma, beta_full):
    """Training-mode BatchNorm2d + ReLU on a (rows=batch, cols=(y,x,c)) tile.

    Channels are interleaved along the lane axis, so the per-channel reduce /
    expand are tiny constant 0/1 GEMMs.  Two-pass (numerically safe) variance.
    """
    f32 = jnp.float32
    hw = red.shape[0] // red.shape[1]
    inv_cnt = 1.0 / float(t.shape[0] * hw)
    s1 = jnp.sum(t, axis=0, keepdims=True)                               # (1, HWC)
    m_c = jnp.dot(s1, red, preferred_element_type=f32) * inv_cnt         # (1, C)
    m_full = jnp.dot(m_c, expand, preferred_element_type=f32)            # (1, HWC)
    d = t - m_full
    s2 = jnp.sum(d * d, axis=0, keepdims=True)
    var_c = jnp.dot(s2, red, preferred_element_type=f32) * inv_cnt       # biased var
    scale_c = gamma * jax.lax.rsqrt(var_c + BN_EPS)                      # gamma folded
    scale_full = jnp.dot(scale_c, expand, preferred_element_type=f32)
    return jnp.maximum(d * scale_full + beta_full, 0.0)                  # BN + ReLU


def _decoder_kernel(x_ref, w1_ref, b1_ref,
                    m1_ref, c1_ref, red1_ref, exp1_ref, g1_ref, bet1_ref,
                    m2_ref, c2_ref, red2_ref, exp2_ref, g2_ref, bet2_ref,
                    m3_ref, c3_ref, o_ref):
    f32 = jnp.float32
    # Linear(E,128) + ReLU
    h = jnp.dot(x_ref[...], w1_ref[...], preferred_element_type=f32) + b1_ref[...]
    h = jnp.maximum(h, 0.0)
    # Linear(128,288) + Unflatten + ConvTranspose2d(32->16) fused into ONE GEMM.
    t = jnp.dot(h, m1_ref[...], preferred_element_type=f32) + c1_ref[...]
    t = _bn_relu(t, red1_ref[...], exp1_ref[...], g1_ref[...], bet1_ref[...])
    # ConvTranspose2d(16->8) as one GEMM.
    t = jnp.dot(t, m2_ref[...], preferred_element_type=f32) + c2_ref[...]
    t = _bn_relu(t, red2_ref[...], exp2_ref[...], g2_ref[...], bet2_ref[...])
    # ConvTranspose2d(8->1): rows=batch, cols=(y,x)=625 -> lane-dense output store.
    o_ref[...] = jnp.dot(t, m3_ref[...], preferred_element_type=f32) + c3_ref[...]


# ----------------------------------------------------------------------------- hoisted weight preprocessing
def _conv_t_as_matrix(wt, hi, pad):
    """Dense (Hi*Wi*Ci, Ho*Wo*Co) float64 matrix M such that, for a feature map
    laid out rows=batch, cols=(i, j, ci) row-major, `x @ M` equals
    ConvTranspose2d(kernel=3, stride=2, padding=pad)(x) with cols=(y, x, co),
    without the bias."""
    wt = np.asarray(wt, np.float64)
    cin, cout, k, _ = wt.shape
    ho = 2 * hi + (k - 2) - 2 * pad
    m = np.zeros((hi * hi * cin, ho * ho * cout), np.float64)
    for i in range(hi):
        for y in range(ho):
            ky = y + pad - 2 * i
            if not (0 <= ky < k):
                continue
            for j in range(hi):
                for x in range(ho):
                    kx = x + pad - 2 * j
                    if not (0 <= kx < k):
                        continue
                    r = (i * hi + j) * cin
                    c = (y * ho + x) * cout
                    m[r:r + cin, c:c + cout] = wt[:, :, ky, kx]
    return m, ho


def prepare_params(params):
    """One-time host-side preprocessing of the PyTorch-style parameters into the
    operand layouts the fused kernel consumes (run OUTSIDE jit, once).
    Batch-independent: the same `pre` dict works for any batch size."""
    f64, f32 = np.float64, np.float32
    w1 = np.asarray(params["w1"], f64)
    b1 = np.asarray(params["b1"], f64)
    w2 = np.asarray(params["w2"], f64)
    b2 = np.asarray(params["b2"], f64)

    c0, h0 = 32, 3
    # PyTorch Unflatten(dim=1, (32,3,3)): linear-output index = ci*9 + i*3 + j.
    # The conv matrices index their input columns as (i, j, ci) row-major.
    perm = np.array([ci * h0 * h0 + i * h0 + j
                     for i in range(h0) for j in range(h0) for ci in range(c0)],
                    np.int64)
    w2s, b2s = w2[:, perm], b2[perm]

    mc1, ho1 = _conv_t_as_matrix(params["wt1"], 3, 0)     # (288, 784),  ho1 = 7
    mc2, ho2 = _conv_t_as_matrix(params["wt2"], ho1, 1)   # (784, 1352), ho2 = 13
    mc3, ho3 = _conv_t_as_matrix(params["wt3"], ho2, 1)   # (1352, 625), ho3 = 25

    def ch_reduce(co, hw):                                 # (HW*C, C) 0/1 matrix
        return np.tile(np.eye(co, dtype=f32), (hw, 1))

    pre = {
        "w1": jnp.asarray(w1, jnp.float32),
        "b1": jnp.asarray(b1.reshape(1, -1), jnp.float32),
        # Linear2 + Unflatten + ConvT1 folded in float64 on the host.
        "m1": jnp.asarray(w2s @ mc1, jnp.float32),
        "c1": jnp.asarray((b2s @ mc1
                           + np.tile(np.asarray(params["bc1"], f64), ho1 * ho1)
                           ).reshape(1, -1), jnp.float32),
        "red1": jnp.asarray(ch_reduce(16, ho1 * ho1)),
        "exp1": jnp.asarray(np.ascontiguousarray(ch_reduce(16, ho1 * ho1).T)),
        "g1": jnp.asarray(np.asarray(params["g1"], f32).reshape(1, -1)),
        "bet1": jnp.asarray(np.tile(np.asarray(params["be1"], f32),
                                    ho1 * ho1).reshape(1, -1)),
        "m2": jnp.asarray(mc2, jnp.float32),
        "c2": jnp.asarray(np.tile(np.asarray(params["bc2"], f64),
                                  ho2 * ho2).reshape(1, -1).astype(f32)),
        "red2": jnp.asarray(ch_reduce(8, ho2 * ho2)),
        "exp2": jnp.asarray(np.ascontiguousarray(ch_reduce(8, ho2 * ho2).T)),
        "g2": jnp.asarray(np.asarray(params["g2"], f32).reshape(1, -1)),
        "bet2": jnp.asarray(np.tile(np.asarray(params["be2"], f32),
                                    ho2 * ho2).reshape(1, -1)),
        "m3": jnp.asarray(mc3, jnp.float32),
        "c3": jnp.asarray(np.tile(np.asarray(params["bc3"], f64),
                                  ho3 * ho3).reshape(1, -1).astype(f32)),
    }
    return pre


_ARG_ORDER = ("w1", "b1", "m1", "c1", "red1", "exp1", "g1", "bet1",
              "m2", "c2", "red2", "exp2", "g2", "bet2", "m3", "c3")


# ----------------------------------------------------------------------------- wrapper
def decoder_forward(x, pre, batch_tile=256):
    n, e = x.shape
    ho = _out_hw(_CONV_GEOM[-1][2], _CONV_GEOM[-1][3])    # 25
    if n <= batch_tile:
        tile_n = n                                        # single tile (exact BN)
    else:
        tile_n = batch_tile
        if n % tile_n or tile_n % 8:
            raise ValueError("when tiling, batch must split into sublane-aligned tiles")
    weights = tuple(pre[k] for k in _ARG_ORDER)

    # x / out tiles pipeline over the batch grid; weights use constant index_maps
    # so they are DMA'd once and stay VMEM-resident across grid steps.
    in_specs = [pl.BlockSpec((tile_n, e), lambda b: (b, 0))]
    in_specs += [pl.BlockSpec(w.shape, lambda b: (0, 0)) for w in weights]

    weight_bytes = sum(int(np.prod(w.shape)) * w.dtype.itemsize for w in weights)
    mac = (e * 128 + 128 * 784 + 784 * 1352 + 1352 * 625
           + 3 * 784 * 16 + 16 * 784 + 3 * 1352 * 8 + 8 * 1352)
    cost = pl.CostEstimate(
        flops=int(2 * n * mac),
        transcendentals=int(24 * (n // tile_n)),
        bytes_accessed=int(weight_bytes + x.size * 4 + n * ho * ho * 4))

    out = pl.pallas_call(
        _decoder_kernel,
        out_shape=jax.ShapeDtypeStruct((n, ho * ho), jnp.float32),
        grid=(n // tile_n,),
        in_specs=in_specs,
        out_specs=pl.BlockSpec((tile_n, ho * ho), lambda b: (b, 0)),
        compiler_params=pltpu.CompilerParams(
            dimension_semantics=("parallel",),            # v7x: 2 TCs split tiles
            vmem_limit_bytes=40 * 1024 * 1024),
        cost_estimate=cost,
    )(x, *weights)
    return out.reshape(n, 1, ho, ho)                      # NCHW (N, 1, 25, 25)


# ----------------------------------------------------------------------------- numpy reference (float64)
def _ref_conv_transpose(x, wt, b, stride, pad):
    n, cin, h, w = x.shape
    cout, k = wt.shape[1], wt.shape[2]
    hf = (h - 1) * stride + k
    full = np.zeros((n, cout, hf, hf), dtype=np.float64)
    for y in range(h):
        for xx in range(w):
            contrib = np.einsum("ni,iokl->nokl", x[:, :, y, xx], wt)
            full[:, :, y * stride:y * stride + k, xx * stride:xx * stride + k] += contrib
    out = full[:, :, pad:hf - pad, pad:hf - pad]
    return out + b[None, :, None, None]


def _ref_bn_relu(x, g, be):
    mean = x.mean(axis=(0, 2, 3), keepdims=True)
    var = x.var(axis=(0, 2, 3), keepdims=True)     # biased (PyTorch fwd)
    xn = (x - mean) / np.sqrt(var + BN_EPS)
    return np.maximum(g[None, :, None, None] * xn + be[None, :, None, None], 0.0)


def _ref_forward(x, p):
    n = x.shape[0]
    h = np.maximum(x @ p["w1"] + p["b1"], 0.0)
    lin = h @ p["w2"] + p["b2"]
    feat = lin.reshape(n, 32, 3, 3)
    feat = _ref_conv_transpose(feat, p["wt1"], p["bc1"], 2, 0)
    feat = _ref_bn_relu(feat, p["g1"], p["be1"])
    feat = _ref_conv_transpose(feat, p["wt2"], p["bc2"], 2, 1)
    feat = _ref_bn_relu(feat, p["g2"], p["be2"])
    feat = _ref_conv_transpose(feat, p["wt3"], p["bc3"], 2, 1)
    return feat


# ----------------------------------------------------------------------------- main
if __name__ == "__main__":
    key = jax.random.PRNGKey(0)
    ks = jax.random.split(key, 16)

    def nrm(k, shape, scale=0.1):
        return scale * jax.random.normal(k, shape, jnp.float32)

    params = dict(
        w1=nrm(ks[0], (ENCODED_DIM, 128)), b1=nrm(ks[1], (128,)),
        w2=nrm(ks[2], (128, 3 * 3 * 32)), b2=nrm(ks[3], (288,)),
        wt1=nrm(ks[4], (32, 16, 3, 3)), bc1=nrm(ks[5], (16,)),
        g1=1.0 + nrm(ks[6], (16,)), be1=nrm(ks[7], (16,)),
        wt2=nrm(ks[8], (16, 8, 3, 3)), bc2=nrm(ks[9], (8,)),
        g2=1.0 + nrm(ks[10], (8,)), be2=nrm(ks[11], (8,)),
        wt3=nrm(ks[12], (8, 1, 3, 3)), bc3=nrm(ks[13], (1,)),
    )
    x = jax.random.normal(ks[14], (BATCH, ENCODED_DIM), jnp.float32)

    pre = prepare_params(params)            # hoisted: runs once, outside jit
    forward = jax.jit(decoder_forward)
    out = jax.block_until_ready(forward(x, pre))
    assert out.shape == (BATCH, 1, 25, 25), out.shape

    # correctness check against a pure-numpy float64 reference of the PyTorch module
    p64 = {k: np.asarray(v, dtype=np.float64) for k, v in params.items()}
    ref = _ref_forward(np.asarray(x, dtype=np.float64), p64)
    np.testing.assert_allclose(np.asarray(out, dtype=np.float64), ref, rtol=5e-3, atol=5e-3)

    print("KERNEL_OK")
</pallas_src>

<mosaic_0001>
module attributes {stable_mosaic.version = 11 : i64} {
  func.func @_decoder_kernel(%arg0: i32, %arg1: memref<2x4xf32, #tpu.memory_space<vmem>>, %arg2: memref<4x128xf32, #tpu.memory_space<vmem>>, %arg3: memref<1x128xf32, #tpu.memory_space<vmem>>, %arg4: memref<128x784xf32, #tpu.memory_space<vmem>>, %arg5: memref<1x784xf32, #tpu.memory_space<vmem>>, %arg6: memref<784x16xf32, #tpu.memory_space<vmem>>, %arg7: memref<16x784xf32, #tpu.memory_space<vmem>>, %arg8: memref<1x16xf32, #tpu.memory_space<vmem>>, %arg9: memref<1x784xf32, #tpu.memory_space<vmem>>, %arg10: memref<784x1352xf32, #tpu.memory_space<vmem>>, %arg11: memref<1x1352xf32, #tpu.memory_space<vmem>>, %arg12: memref<1352x8xf32, #tpu.memory_space<vmem>>, %arg13: memref<8x1352xf32, #tpu.memory_space<vmem>>, %arg14: memref<1x8xf32, #tpu.memory_space<vmem>>, %arg15: memref<1x1352xf32, #tpu.memory_space<vmem>>, %arg16: memref<1352x625xf32, #tpu.memory_space<vmem>>, %arg17: memref<1x625xf32, #tpu.memory_space<vmem>>, %arg18: memref<2x625xf32, #tpu.memory_space<vmem>>) attributes {dimension_semantics = [#tpu.dimension_semantics<parallel>], iteration_bounds = array<i64: 1>, scalar_prefetch = 0 : i64, scratch_operands = 0 : i64, tpu.core_type = #tpu.core_type<tc>, window_params = [{transform_indices = @transform_0, window_bounds = array<i64: 2, 4>}, {pipeline_mode = #tpu.pipeline_mode<synchronous>, transform_indices = @transform_1, window_bounds = array<i64: 4, 128>}, {pipeline_mode = #tpu.pipeline_mode<synchronous>, transform_indices = @transform_2, window_bounds = array<i64: 1, 128>}, {pipeline_mode = #tpu.pipeline_mode<synchronous>, transform_indices = @transform_3, window_bounds = array<i64: 128, 784>}, {pipeline_mode = #tpu.pipeline_mode<synchronous>, transform_indices = @transform_4, window_bounds = array<i64: 1, 784>}, {pipeline_mode = #tpu.pipeline_mode<synchronous>, transform_indices = @transform_5, window_bounds = array<i64: 784, 16>}, {pipeline_mode = #tpu.pipeline_mode<synchronous>, transform_indices = @transform_6, window_bounds = array<i64: 16, 784>}, {pipeline_mode = #tpu.pipeline_mode<synchronous>, transform_indices = @transform_7, window_bounds = array<i64: 1, 16>}, {pipeline_mode = #tpu.pipeline_mode<synchronous>, transform_indices = @transform_8, window_bounds = array<i64: 1, 784>}, {pipeline_mode = #tpu.pipeline_mode<synchronous>, transform_indices = @transform_9, window_bounds = array<i64: 784, 1352>}, {pipeline_mode = #tpu.pipeline_mode<synchronous>, transform_indices = @transform_10, window_bounds = array<i64: 1, 1352>}, {pipeline_mode = #tpu.pipeline_mode<synchronous>, transform_indices = @transform_11, window_bounds = array<i64: 1352, 8>}, {pipeline_mode = #tpu.pipeline_mode<synchronous>, transform_indices = @transform_12, window_bounds = array<i64: 8, 1352>}, {pipeline_mode = #tpu.pipeline_mode<synchronous>, transform_indices = @transform_13, window_bounds = array<i64: 1, 8>}, {pipeline_mode = #tpu.pipeline_mode<synchronous>, transform_indices = @transform_14, window_bounds = array<i64: 1, 1352>}, {pipeline_mode = #tpu.pipeline_mode<synchronous>, transform_indices = @transform_15, window_bounds = array<i64: 1352, 625>}, {pipeline_mode = #tpu.pipeline_mode<synchronous>, transform_indices = @transform_16, window_bounds = array<i64: 1, 625>}, {transform_indices = @transform_17, window_bounds = array<i64: 2, 625>}]} {
    %c0 = arith.constant 0 : index
    %c0_0 = arith.constant 0 : index
    %0 = vector.load %arg1[%c0, %c0_0] : memref<2x4xf32, #tpu.memory_space<vmem>>, vector<2x4xf32>
    %c0_1 = arith.constant 0 : index
    %c0_2 = arith.constant 0 : index
    %1 = vector.load %arg2[%c0_1, %c0_2] : memref<4x128xf32, #tpu.memory_space<vmem>>, vector<4x128xf32>
    %cst = arith.constant dense<0.000000e+00> : vector<2x128xf32>
    %2 = tpu.matmul %0, %1, %cst {dimension_numbers = #tpu.dot_dimension_numbers<[1], [0], [0], [1], [0, 0, 1, 1], [], []>} : vector<2x4xf32>, vector<4x128xf32>, vector<2x128xf32> -> vector<2x128xf32>
    %c0_3 = arith.constant 0 : index
    %c0_4 = arith.constant 0 : index
    %3 = vector.load %arg3[%c0_3, %c0_4] : memref<1x128xf32, #tpu.memory_space<vmem>>, vector<1x128xf32>
    %4 = vector.broadcast %3 : vector<1x128xf32> to vector<2x128xf32>
    %5 = arith.addf %2, %4 : vector<2x128xf32>
    %cst_5 = arith.constant 0.000000e+00 : f32
    %6 = vector.broadcast %cst_5 : f32 to vector<2x128xf32>
    %7 = arith.maximumf %5, %6 : vector<2x128xf32>
    %c0_6 = arith.constant 0 : index
    %c0_7 = arith.constant 0 : index
    %8 = vector.load %arg4[%c0_6, %c0_7] : memref<128x784xf32, #tpu.memory_space<vmem>>, vector<128x784xf32>
    %cst_8 = arith.constant dense<0.000000e+00> : vector<2x784xf32>
    %9 = tpu.matmul %7, %8, %cst_8 {dimension_numbers = #tpu.dot_dimension_numbers<[1], [0], [0], [1], [0, 0, 1, 1], [], []>} : vector<2x128xf32>, vector<128x784xf32>, vector<2x784xf32> -> vector<2x784xf32>
    %c0_9 = arith.constant 0 : index
    %c0_10 = arith.constant 0 : index
    %10 = vector.load %arg5[%c0_9, %c0_10] : memref<1x784xf32, #tpu.memory_space<vmem>>, vector<1x784xf32>
    %11 = vector.broadcast %10 : vector<1x784xf32> to vector<2x784xf32>
    %12 = arith.addf %9, %11 : vector<2x784xf32>
    %c0_11 = arith.constant 0 : index
    %c0_12 = arith.constant 0 : index
    %13 = vector.load %arg6[%c0_11, %c0_12] : memref<784x16xf32, #tpu.memory_space<vmem>>, vector<784x16xf32>
    %c0_13 = arith.constant 0 : index
    %c0_14 = arith.constant 0 : index
    %14 = vector.load %arg7[%c0_13, %c0_14] : memref<16x784xf32, #tpu.memory_space<vmem>>, vector<16x784xf32>
    %c0_15 = arith.constant 0 : index
    %c0_16 = arith.constant 0 : index
    %15 = vector.load %arg8[%c0_15, %c0_16] : memref<1x16xf32, #tpu.memory_space<vmem>>, vector<1x16xf32>
    %c0_17 = arith.constant 0 : index
    %c0_18 = arith.constant 0 : index
    %16 = vector.load %arg9[%c0_17, %c0_18] : memref<1x784xf32, #tpu.memory_space<vmem>>, vector<1x784xf32>
    %cst_19 = arith.constant dense<0.000000e+00> : vector<784xf32>
    %17 = vector.multi_reduction <add>, %12, %cst_19 [0] : vector<2x784xf32> to vector<784xf32>
    %18 = vector.shape_cast %17 : vector<784xf32> to vector<1x784xf32>
    %cst_20 = arith.constant dense<0.000000e+00> : vector<1x16xf32>
    %19 = tpu.matmul %18, %13, %cst_20 {dimension_numbers = #tpu.dot_dimension_numbers<[1], [0], [0], [1], [0, 0, 1, 1], [], []>} : vector<1x784xf32>, vector<784x16xf32>, vector<1x16xf32> -> vector<1x16xf32>
    %cst_21 = arith.constant 0.0102040814 : f32
    %20 = vector.broadcast %cst_21 : f32 to vector<1x16xf32>
    %21 = arith.mulf %19, %20 : vector<1x16xf32>
    %cst_22 = arith.constant dense<0.000000e+00> : vector<1x784xf32>
    %22 = tpu.matmul %21, %14, %cst_22 {dimension_numbers = #tpu.dot_dimension_numbers<[1], [0], [0], [1], [0, 0, 1, 1], [], []>} : vector<1x16xf32>, vector<16x784xf32>, vector<1x784xf32> -> vector<1x784xf32>
    %23 = vector.broadcast %22 : vector<1x784xf32> to vector<2x784xf32>
    %24 = arith.subf %12, %23 : vector<2x784xf32>
    %25 = arith.mulf %24, %24 : vector<2x784xf32>
    %cst_23 = arith.constant dense<0.000000e+00> : vector<784xf32>
    %26 = vector.multi_reduction <add>, %25, %cst_23 [0] : vector<2x784xf32> to vector<784xf32>
    %27 = vector.shape_cast %26 : vector<784xf32> to vector<1x784xf32>
    %cst_24 = arith.constant dense<0.000000e+00> : vector<1x16xf32>
    %28 = tpu.matmul %27, %13, %cst_24 {dimension_numbers = #tpu.dot_dimension_numbers<[1], [0], [0], [1], [0, 0, 1, 1], [], []>} : vector<1x784xf32>, vector<784x16xf32>, vector<1x16xf32> -> vector<1x16xf32>
    %cst_25 = arith.constant 0.0102040814 : f32
    %29 = vector.broadcast %cst_25 : f32 to vector<1x16xf32>
    %30 = arith.mulf %28, %29 : vector<1x16xf32>
    %cst_26 = arith.constant 9.99999974E-6 : f32
    %31 = vector.broadcast %cst_26 : f32 to vector<1x16xf32>
    %32 = arith.addf %30, %31 : vector<1x16xf32>
    %33 = math.rsqrt %32 : vector<1x16xf32>
    %34 = arith.mulf %15, %33 : vector<1x16xf32>
    %cst_27 = arith.constant dense<0.000000e+00> : vector<1x784xf32>
    %35 = tpu.matmul %34, %14, %cst_27 {dimension_numbers = #tpu.dot_dimension_numbers<[1], [0], [0], [1], [0, 0, 1, 1], [], []>} : vector<1x16xf32>, vector<16x784xf32>, vector<1x784xf32> -> vector<1x784xf32>
    %36 = vector.broadcast %35 : vector<1x784xf32> to vector<2x784xf32>
    %37 = arith.mulf %24, %36 : vector<2x784xf32>
    %38 = vector.broadcast %16 : vector<1x784xf32> to vector<2x784xf32>
    %39 = arith.addf %37, %38 : vector<2x784xf32>
    %cst_28 = arith.constant 0.000000e+00 : f32
    %40 = vector.broadcast %cst_28 : f32 to vector<2x784xf32>
    %41 = arith.maximumf %39, %40 : vector<2x784xf32>
    %c0_29 = arith.constant 0 : index
    %c0_30 = arith.constant 0 : index
    %42 = vector.load %arg10[%c0_29, %c0_30] : memref<784x1352xf32, #tpu.memory_space<vmem>>, vector<784x1352xf32>
    %cst_31 = arith.constant dense<0.000000e+00> : vector<2x1352xf32>
    %43 = tpu.matmul %41, %42, %cst_31 {dimension_numbers = #tpu.dot_dimension_numbers<[1], [0], [0], [1], [0, 0, 1, 1], [], []>} : vector<2x784xf32>, vector<784x1352xf32>, vector<2x1352xf32> -> vector<2x1352xf32>
    %c0_32 = arith.constant 0 : index
    %c0_33 = arith.constant 0 : index
    %44 = vector.load %arg11[%c0_32, %c0_33] : memref<1x1352xf32, #tpu.memory_space<vmem>>, vector<1x1352xf32>
    %45 = vector.broadcast %44 : vector<1x1352xf32> to vector<2x1352xf32>
    %46 = arith.addf %43, %45 : vector<2x1352xf32>
    %c0_34 = arith.constant 0 : index
    %c0_35 = arith.constant 0 : index
    %47 = vector.load %arg12[%c0_34, %c0_35] : memref<1352x8xf32, #tpu.memory_space<vmem>>, vector<1352x8xf32>
    %c0_36 = arith.constant 0 : index
    %c0_37 = arith.constant 0 : index
    %48 = vector.load %arg13[%c0_36, %c0_37] : memref<8x1352xf32, #tpu.memory_space<vmem>>, vector<8x1352xf32>
    %c0_38 = arith.constant 0 : index
    %c0_39 = arith.constant 0 : index
    %49 = vector.load %arg14[%c0_38, %c0_39] : memref<1x8xf32, #tpu.memory_space<vmem>>, vector<1x8xf32>
    %c0_40 = arith.constant 0 : index
    %c0_41 = arith.constant 0 : index
    %50 = vector.load %arg15[%c0_40, %c0_41] : memref<1x1352xf32, #tpu.memory_space<vmem>>, vector<1x1352xf32>
    %cst_42 = arith.constant dense<0.000000e+00> : vector<1352xf32>
    %51 = vector.multi_reduction <add>, %46, %cst_42 [0] : vector<2x1352xf32> to vector<1352xf32>
    %52 = vector.shape_cast %51 : vector<1352xf32> to vector<1x1352xf32>
    %cst_43 = arith.constant dense<0.000000e+00> : vector<1x8xf32>
    %53 = tpu.matmul %52, %47, %cst_43 {dimension_numbers = #tpu.dot_dimension_numbers<[1], [0], [0], [1], [0, 0, 1, 1], [], []>} : vector<1x1352xf32>, vector<1352x8xf32>, vector<1x8xf32> -> vector<1x8xf32>
    %cst_44 = arith.constant 2.958580e-03 : f32
    %54 = vector.broadcast %cst_44 : f32 to vector<1x8xf32>
    %55 = arith.mulf %53, %54 : vector<1x8xf32>
    %cst_45 = arith.constant dense<0.000000e+00> : vector<1x1352xf32>
    %56 = tpu.matmul %55, %48, %cst_45 {dimension_numbers = #tpu.dot_dimension_numbers<[1], [0], [0], [1], [0, 0, 1, 1], [], []>} : vector<1x8xf32>, vector<8x1352xf32>, vector<1x1352xf32> -> vector<1x1352xf32>
    %57 = vector.broadcast %56 : vector<1x1352xf32> to vector<2x1352xf32>
    %58 = arith.subf %46, %57 : vector<2x1352xf32>
    %59 = arith.mulf %58, %58 : vector<2x1352xf32>
    %cst_46 = arith.constant dense<0.000000e+00> : vector<1352xf32>
    %60 = vector.multi_reduction <add>, %59, %cst_46 [0] : vector<2x1352xf32> to vector<1352xf32>
    %61 = vector.shape_cast %60 : vector<1352xf32> to vector<1x1352xf32>
    %cst_47 = arith.constant dense<0.000000e+00> : vector<1x8xf32>
    %62 = tpu.matmul %61, %47, %cst_47 {dimension_numbers = #tpu.dot_dimension_numbers<[1], [0], [0], [1], [0, 0, 1, 1], [], []>} : vector<1x1352xf32>, vector<1352x8xf32>, vector<1x8xf32> -> vector<1x8xf32>
    %cst_48 = arith.constant 2.958580e-03 : f32
    %63 = vector.broadcast %cst_48 : f32 to vector<1x8xf32>
    %64 = arith.mulf %62, %63 : vector<1x8xf32>
    %cst_49 = arith.constant 9.99999974E-6 : f32
    %65 = vector.broadcast %cst_49 : f32 to vector<1x8xf32>
    %66 = arith.addf %64, %65 : vector<1x8xf32>
    %67 = math.rsqrt %66 : vector<1x8xf32>
    %68 = arith.mulf %49, %67 : vector<1x8xf32>
    %cst_50 = arith.constant dense<0.000000e+00> : vector<1x1352xf32>
    %69 = tpu.matmul %68, %48, %cst_50 {dimension_numbers = #tpu.dot_dimension_numbers<[1], [0], [0], [1], [0, 0, 1, 1], [], []>} : vector<1x8xf32>, vector<8x1352xf32>, vector<1x1352xf32> -> vector<1x1352xf32>
    %70 = vector.broadcast %69 : vector<1x1352xf32> to vector<2x1352xf32>
    %71 = arith.mulf %58, %70 : vector<2x1352xf32>
    %72 = vector.broadcast %50 : vector<1x1352xf32> to vector<2x1352xf32>
    %73 = arith.addf %71, %72 : vector<2x1352xf32>
    %cst_51 = arith.constant 0.000000e+00 : f32
    %74 = vector.broadcast %cst_51 : f32 to vector<2x1352xf32>
    %75 = arith.maximumf %73, %74 : vector<2x1352xf32>
    %c0_52 = arith.constant 0 : index
    %c0_53 = arith.constant 0 : index
    %76 = vector.load %arg16[%c0_52, %c0_53] : memref<1352x625xf32, #tpu.memory_space<vmem>>, vector<1352x625xf32>
    %cst_54 = arith.constant dense<0.000000e+00> : vector<2x625xf32>
    %77 = tpu.matmul %75, %76, %cst_54 {dimension_numbers = #tpu.dot_dimension_numbers<[1], [0], [0], [1], [0, 0, 1, 1], [], []>} : vector<2x1352xf32>, vector<1352x625xf32>, vector<2x625xf32> -> vector<2x625xf32>
    %c0_55 = arith.constant 0 : index
    %c0_56 = arith.constant 0 : index
    %78 = vector.load %arg17[%c0_55, %c0_56] : memref<1x625xf32, #tpu.memory_space<vmem>>, vector<1x625xf32>
    %79 = vector.broadcast %78 : vector<1x625xf32> to vector<2x625xf32>
    %80 = arith.addf %77, %79 : vector<2x625xf32>
    %c0_57 = arith.constant 0 : index
    %c0_58 = arith.constant 0 : index
    %81 = vector.load %arg18[%c0_57, %c0_58] : memref<2x625xf32, #tpu.memory_space<vmem>>, vector<2x625xf32>
    tpu.vector_store %arg18[%c0_57, %c0_58], %80 {strides = array<i32>} : memref<2x625xf32, #tpu.memory_space<vmem>>, vector<2x625xf32>,
    return
  }
  func.func @transform_0(%arg0: i32) -> (i32, i32) {
    %c0_i32 = arith.constant 0 : i32
    %c0_i32_0 = arith.constant 0 : i32
    return %arg0, %c0_i32 : i32, i32
  }
  func.func @transform_1(%arg0: i32) -> (i32, i32) {
    %c0_i32 = arith.constant 0 : i32
    %c0_i32_0 = arith.constant 0 : i32
    %c0_i32_1 = arith.constant 0 : i32
    return %c0_i32, %c0_i32_0 : i32, i32
  }
  func.func @transform_2(%arg0: i32) -> (i32, i32) {
    %c0_i32 = arith.constant 0 : i32
    %c0_i32_0 = arith.constant 0 : i32
    %c0_i32_1 = arith.constant 0 : i32
    return %c0_i32, %c0_i32_0 : i32, i32
  }
  func.func @transform_3(%arg0: i32) -> (i32, i32) {
    %c0_i32 = arith.constant 0 : i32
    %c0_i32_0 = arith.constant 0 : i32
    %c0_i32_1 = arith.constant 0 : i32
    return %c0_i32, %c0_i32_0 : i32, i32
  }
  func.func @transform_4(%arg0: i32) -> (i32, i32) {
    %c0_i32 = arith.constant 0 : i32
    %c0_i32_0 = arith.constant 0 : i32
    %c0_i32_1 = arith.constant 0 : i32
    return %c0_i32, %c0_i32_0 : i32, i32
  }
  func.func @transform_5(%arg0: i32) -> (i32, i32) {
    %c0_i32 = arith.constant 0 : i32
    %c0_i32_0 = arith.constant 0 : i32
    %c0_i32_1 = arith.constant 0 : i32
    return %c0_i32, %c0_i32_0 : i32, i32
  }
  func.func @transform_6(%arg0: i32) -> (i32, i32) {
    %c0_i32 = arith.constant 0 : i32
    %c0_i32_0 = arith.constant 0 : i32
    %c0_i32_1 = arith.constant 0 : i32
    return %c0_i32, %c0_i32_0 : i32, i32
  }
  func.func @transform_7(%arg0: i32) -> (i32, i32) {
    %c0_i32 = arith.constant 0 : i32
    %c0_i32_0 = arith.constant 0 : i32
    %c0_i32_1 = arith.constant 0 : i32
    return %c0_i32, %c0_i32_0 : i32, i32
  }
  func.func @transform_8(%arg0: i32) -> (i32, i32) {
    %c0_i32 = arith.constant 0 : i32
    %c0_i32_0 = arith.constant 0 : i32
    %c0_i32_1 = arith.constant 0 : i32
    return %c0_i32, %c0_i32_0 : i32, i32
  }
  func.func @transform_9(%arg0: i32) -> (i32, i32) {
    %c0_i32 = arith.constant 0 : i32
    %c0_i32_0 = arith.constant 0 : i32
    %c0_i32_1 = arith.constant 0 : i32
    return %c0_i32, %c0_i32_0 : i32, i32
  }
  func.func @transform_10(%arg0: i32) -> (i32, i32) {
    %c0_i32 = arith.constant 0 : i32
    %c0_i32_0 = arith.constant 0 : i32
    %c0_i32_1 = arith.constant 0 : i32
    return %c0_i32, %c0_i32_0 : i32, i32
  }
  func.func @transform_11(%arg0: i32) -> (i32, i32) {
    %c0_i32 = arith.constant 0 : i32
    %c0_i32_0 = arith.constant 0 : i32
    %c0_i32_1 = arith.constant 0 : i32
    return %c0_i32, %c0_i32_0 : i32, i32
  }
  func.func @transform_12(%arg0: i32) -> (i32, i32) {
    %c0_i32 = arith.constant 0 : i32
    %c0_i32_0 = arith.constant 0 : i32
    %c0_i32_1 = arith.constant 0 : i32
    return %c0_i32, %c0_i32_0 : i32, i32
  }
  func.func @transform_13(%arg0: i32) -> (i32, i32) {
    %c0_i32 = arith.constant 0 : i32
    %c0_i32_0 = arith.constant 0 : i32
    %c0_i32_1 = arith.constant 0 : i32
    return %c0_i32, %c0_i32_0 : i32, i32
  }
  func.func @transform_14(%arg0: i32) -> (i32, i32) {
    %c0_i32 = arith.constant 0 : i32
    %c0_i32_0 = arith.constant 0 : i32
    %c0_i32_1 = arith.constant 0 : i32
    return %c0_i32, %c0_i32_0 : i32, i32
  }
  func.func @transform_15(%arg0: i32) -> (i32, i32) {
    %c0_i32 = arith.constant 0 : i32
    %c0_i32_0 = arith.constant 0 : i32
    %c0_i32_1 = arith.constant 0 : i32
    return %c0_i32, %c0_i32_0 : i32, i32
  }
  func.func @transform_16(%arg0: i32) -> (i32, i32) {
    %c0_i32 = arith.constant 0 : i32
    %c0_i32_0 = arith.constant 0 : i32
    %c0_i32_1 = arith.constant 0 : i32
    return %c0_i32, %c0_i32_0 : i32, i32
  }
  func.func @transform_17(%arg0: i32) -> (i32, i32) {
    %c0_i32 = arith.constant 0 : i32
    %c0_i32_0 = arith.constant 0 : i32
    return %arg0, %c0_i32 : i32, i32
  }
}

</mosaic_0001>

<bundles_post_ra>
// kernel: decoder_forward.1
= control target key start
LH: loop header
LB: loop body
LE: loop exit
PB: predicated region body
PF: predicated region fallthrough
CT: control target
= control target key end

     0   :  { %s16312_s0 = inlined_call_operand.hbm [shape: f32[2,4], index: 0, kind: input, shape index: {}]   ;;  %s16313_s1 = inlined_call_operand.hbm [shape: f32[4,128], index: 1, kind: input, shape index: {}]   ;;  %s16314_s2 = inlined_call_operand.hbm [shape: f32[1,128], index: 2, kind: input, shape index: {}]   ;;  %s16315_s3 = inlined_call_operand.vmem [shape: f32[128,784], index: 3, kind: input, shape index: {}]   ;;  %s16316_s4 = inlined_call_operand.hbm [shape: f32[1,784], index: 4, kind: input, shape index: {}]   ;;  %s16317_s5 = inlined_call_operand.vmem [shape: f32[784,16], index: 5, kind: input, shape index: {}]   ;;  %s16318_s6 = inlined_call_operand.hbm [shape: f32[16,784], index: 6, kind: input, shape index: {}]   ;;  %s16319_s7 = inlined_call_operand.hbm [shape: f32[1,16], index: 7, kind: input, shape index: {}]   ;;  %s16320_s8 = inlined_call_operand.hbm [shape: f32[1,784], index: 8, kind: input, shape index: {}]   ;;  %s16321_s9 = inlined_call_operand.hbm [shape: f32[784,1352], index: 9, kind: input, shape index: {}]   ;;  %s16322_s10 = inlined_call_operand.hbm [shape: f32[1,1352], index: 10, kind: input, shape index: {}]   ;;  %s16323_s11 = inlined_call_operand.vmem [shape: f32[1352,8], index: 11, kind: input, shape index: {}]   ;;  %s16324_s12 = inlined_call_operand.hbm [shape: f32[8,1352], index: 12, kind: input, shape index: {}]   ;;  %s16325_s13 = inlined_call_operand.hbm [shape: f32[1,8], index: 13, kind: input, shape index: {}]   ;;  %s16326_s14 = inlined_call_operand.hbm [shape: f32[1,1352], index: 14, kind: input, shape index: {}]   ;;  %s16327_s15 = inlined_call_operand.hbm [shape: f32[1352,625], index: 15, kind: input, shape index: {}]   ;;  %s16328_s16 = inlined_call_operand.hbm [shape: f32[1,625], index: 16, kind: input, shape index: {}]   ;;  %s16329_s17 = inlined_call_operand.vmem [shape: f32[2,625], index: 17, kind: output, shape index: {}]  }
   0x1   :  { %16422 = sst [smem:[#allocation94_spill]] %s16312_s0 }
   0x2   :  { %16423 = sst [smem:[#allocation95_spill]] %s16313_s1 }
   0x3   :  { %22 = vsyncpa [#allocation3], 0 }
   0x4   :  { %23 = vsyncpa [#allocation5], 0 }
   0x5   :  { %24 = vsyncpa [#allocation8], 0 }
   0x6   :  { %25 = vsyncpa [#allocation11], 0 }
   0x7   :  { %26 = vsyncpa [#allocation14], 0 }
   0x8   :  { %27 = vsyncpa [#allocation17], 0 }
   0x9   :  { %28 = vsyncpa [#allocation20], 0 }
   0xa   :  { %29 = vsyncpa [#allocation23], 0  ;;  %s13634_s24 = smov [#allocation4]   ;;  %s13635_s26 = smov [#allocation7]  }
   0xb   :  { %s46_s25 = sshll.u32 %s13634_s24, 4  ;;  %s68_s27 = sshll.u32 %s13635_s26, 4  ;;  %s47_s25 = int_to_ptr.vmem [resolvable:$true] %s46_s25  ;;  %s69_s27 = int_to_ptr.vmem [resolvable:$true] %s68_s27 }
   0xc   :  { %s16424_s0 = sld [smem:[#allocation95_spill]] }
  0x12   :  { %s13310_s30 = scalar_lea.hbm %s16424_s0, 64 }
  0x13   :  { %p13311_p0 = scmp.ne.s32.totalorder %s16424_s0, %s13310_s30  ;;  %p13314_p1 = scmp.lt.u32.totalorder %s13310_s30, %s16424_s0 }
  0x15   :  { %p13316_p2 = pnand %p13314_p1, %p13311_p0 }
  0x17   :  { %13319 = shalt.err (!%p13316_p2)
}
  0x18   :  { %s13320_s21 = scalar_lea.vmem %s47_s25, 64  ;;  %p13325_p4 = scmp.lt.s32.totalorder %s47_s25, %s47_s25 }
  0x19   :  { %p13321_p3 = scmp.ne.s32.totalorder %s47_s25, %s13320_s21  ;;  %p13326_p5 = scmp.lt.s32.totalorder %s13320_s21, %s13320_s21 }
  0x1b   :  { %p13327_p6 = por %p13326_p5, %p13325_p4 }
  0x1d   :  { %p13328_p7 = pnand %p13327_p6, %p13321_p3 }
  0x1f   :  { %13331 = shalt.err (!%p13328_p7)
}
  0x20   :  { %49 = dma.hbm_to_vmem [thread:$0]  %s16424_s0, 64, %s47_s25, [#allocation5]  }
  0x21   :  { %s13332_s28 = scalar_lea.hbm %s16316_s4, 112 }
  0x22   :  { %p13333_p8 = scmp.ne.s32.totalorder %s16316_s4, %s13332_s28  ;;  %p13336_p9 = scmp.lt.u32.totalorder %s13332_s28, %s16316_s4 }
  0x24   :  { %p13338_p10 = pnand %p13336_p9, %p13333_p8 }
  0x26   :  { %13341 = shalt.err (!%p13338_p10)
}
  0x27   :  { %s13342_s1 = scalar_lea.vmem %s69_s27, 112  ;;  %s13346_s20 = scalar_lea.vmem %s69_s27, 128 }
  0x28   :  { %p13343_p11 = scmp.ne.s32.totalorder %s69_s27, %s13342_s1  ;;  %p13347_p12 = scmp.lt.s32.totalorder %s69_s27, %s69_s27 }
  0x29   :  { %p13348_p13 = scmp.lt.s32.totalorder %s13346_s20, %s13342_s1 }
  0x2b   :  { %p13349_p0 = por %p13348_p13, %p13347_p12 }
  0x2d   :  { %p13350_p1 = pnand %p13349_p0, %p13343_p11 }
  0x2f   :  { %13353 = shalt.err (!%p13350_p1)
}
  0x30   :  { %71 = dma.hbm_to_vmem [thread:$0]  %s16316_s4, 112, %s69_s27, [#allocation8]  }
  0x31   :  { %s13636_s21 = smov [#allocation10]   ;;  %s13637_s23 = smov [#allocation13]  }
  0x32   :  { %s92_s22 = sshll.u32 %s13636_s21, 4  ;;  %s111_s24 = sshll.u32 %s13637_s23, 4  ;;  %s93_s22 = int_to_ptr.vmem [resolvable:$true] %s92_s22  ;;  %s13772_s24 = int_to_ptr.vmem [resolvable:$true] %s111_s24 }
  0x33   :  { %s13354_s29 = scalar_lea.hbm %s16319_s7, 16 }
  0x34   :  { %p13355_p2 = scmp.ne.s32.totalorder %s16319_s7, %s13354_s29  ;;  %p13358_p3 = scmp.lt.u32.totalorder %s13354_s29, %s16319_s7 }
  0x36   :  { %p13360_p4 = pnand %p13358_p3, %p13355_p2 }
  0x38   :  { %13363 = shalt.err (!%p13360_p4)
}
  0x39   :  { %s13364_s4 = scalar_lea.vmem %s93_s22, 16  ;;  %s13368_s27 = scalar_lea.vmem %s93_s22, 32 }
  0x3a   :  { %p13365_p5 = scmp.ne.s32.totalorder %s93_s22, %s13364_s4  ;;  %p13369_p6 = scmp.lt.s32.totalorder %s93_s22, %s93_s22 }
  0x3b   :  { %p13370_p7 = scmp.lt.s32.totalorder %s13368_s27, %s13364_s4 }
  0x3d   :  { %p13371_p8 = por %p13370_p7, %p13369_p6 }
  0x3f   :  { %p13372_p9 = pnand %p13371_p8, %p13365_p5 }
  0x41   :  { %13375 = shalt.err (!%p13372_p9)
}
  0x42   :  { %95 = dma.hbm_to_vmem [thread:$0]  %s16319_s7, 16, %s93_s22, [#allocation11]  }
  0x43   :  { %s13376_s23 = scalar_lea.hbm %s16321_s9, 137984 }
  0x44   :  { %p13377_p10 = scmp.ne.s32.totalorder %s16321_s9, %s13376_s23  ;;  %p13380_p11 = scmp.lt.u32.totalorder %s13376_s23, %s16321_s9 }
  0x46   :  { %p13382_p12 = pnand %p13380_p11, %p13377_p10 }
  0x48   :  { %13385 = shalt.err (!%p13382_p12)
}
  0x49   :  { %s13386_s30 = scalar_lea.vmem %s13772_s24, 137984  ;;  %p13391_p0 = scmp.lt.s32.totalorder %s13772_s24, %s13772_s24 }
  0x4a   :  { %p13387_p13 = scmp.ne.s32.totalorder %s13772_s24, %s13386_s30  ;;  %p13392_p1 = scmp.lt.s32.totalorder %s13386_s30, %s13386_s30 }
  0x4c   :  { %p13393_p2 = por %p13392_p1, %p13391_p0 }
  0x4e   :  { %p13394_p3 = pnand %p13393_p2, %p13387_p13 }
  0x50   :  { %13397 = shalt.err (!%p13394_p3)
}
  0x51   :  { %s13638_s7 = smov 1408   ;;  %s13639_s22 = smov 88  }
  0x52   :  { %117 = dma.hbm_to_vmem [thread:$0]  %s16321_s9, 137984, %s13772_s24, [#allocation14], %s13638_s7, %s13638_s7, %s13639_s22  }
  0x53   :  { %s13640_s4 = smov [#allocation16]   ;;  %s13641_s20 = smov [#allocation19]  }
  0x54   :  { %s136_s27 = sshll.u32 %s13640_s4, 4  ;;  %s156_s25 = sshll.u32 %s13641_s20, 4  ;;  %s137_s27 = int_to_ptr.vmem [resolvable:$true] %s136_s27  ;;  %s157_s25 = int_to_ptr.vmem [resolvable:$true] %s156_s25 }
  0x55   :  { %s13398_s23 = scalar_lea.hbm %s16324_s12, 1408 }
  0x56   :  { %p13399_p4 = scmp.ne.s32.totalorder %s16324_s12, %s13398_s23  ;;  %p13402_p5 = scmp.lt.u32.totalorder %s13398_s23, %s16324_s12 }
  0x58   :  { %p13404_p6 = pnand %p13402_p5, %p13399_p4 }
  0x5a   :  { %13407 = shalt.err (!%p13404_p6)
}
  0x5b   :  { %s13408_s9 = scalar_lea.vmem %s137_s27, 1408  ;;  %p13413_p8 = scmp.lt.s32.totalorder %s137_s27, %s137_s27 }
  0x5c   :  { %p13409_p7 = scmp.ne.s32.totalorder %s137_s27, %s13408_s9  ;;  %p13414_p9 = scmp.lt.s32.totalorder %s13408_s9, %s13408_s9 }
  0x5e   :  { %p13415_p10 = por %p13414_p9, %p13413_p8 }
  0x60   :  { %p13416_p11 = pnand %p13415_p10, %p13409_p7 }
  0x62   :  { %13419 = shalt.err (!%p13416_p11)
}
  0x63   :  { %139 = dma.hbm_to_vmem [thread:$0]  %s16324_s12, 1408, %s137_s27, [#allocation17]  }
  0x64   :  { %s13420_s19 = scalar_lea.hbm %s16326_s14, 176 }
  0x65   :  { %p13421_p12 = scmp.ne.s32.totalorder %s16326_s14, %s13420_s19  ;;  %p13424_p13 = scmp.lt.u32.totalorder %s13420_s19, %s16326_s14 }
  0x67   :  { %p13426_p0 = pnand %p13424_p13, %p13421_p12 }
  0x69   :  { %13429 = shalt.err (!%p13426_p0)
}
  0x6a   :  { %s13430_s21 = scalar_lea.vmem %s157_s25, 176  ;;  %s13434_s23 = scalar_lea.vmem %s157_s25, 192 }
  0x6b   :  { %p13431_p1 = scmp.ne.s32.totalorder %s157_s25, %s13430_s21  ;;  %p13435_p2 = scmp.lt.s32.totalorder %s157_s25, %s157_s25 }
  0x6c   :  { %p13436_p3 = scmp.lt.s32.totalorder %s13434_s23, %s13430_s21 }
  0x6e   :  { %p13437_p4 = por %p13436_p3, %p13435_p2 }
  0x70   :  { %p13438_p5 = pnand %p13437_p4, %p13431_p1 }
  0x72   :  { %13441 = shalt.err (!%p13438_p5)
}
  0x73   :  { %159 = dma.hbm_to_vmem [thread:$0]  %s16326_s14, 176, %s157_s25, [#allocation20]  }
  0x74   :  { %s13642_s26 = smov [#allocation2]   ;;  %s13643_s29 = smov [#allocation6]  }
  0x75   :  { %s36_s28 = sshll.u32 %s13642_s26, 4  ;;  %s56_s18 = sshll.u32 %s13643_s29, 4  ;;  %s37_s28 = int_to_ptr.vmem [resolvable:$true] %s36_s28  ;;  %s57_s18 = int_to_ptr.vmem [resolvable:$true] %s56_s18 }
  0x76   :  { %s16425_s30 = sld [smem:[#allocation94_spill]] }
  0x7c   :  { %s13442_s7 = scalar_lea.hbm %s16425_s30, 32 }
  0x7d   :  { %p13443_p6 = scmp.ne.s32.totalorder %s16425_s30, %s13442_s7  ;;  %p13446_p7 = scmp.lt.u32.totalorder %s13442_s7, %s16425_s30 }
  0x7f   :  { %p13448_p8 = pnand %p13446_p7, %p13443_p6 }
  0x81   :  { %13451 = shalt.err (!%p13448_p8)
}
  0x82   :  { %s13452_s14 = scalar_lea.vmem %s37_s28, 32  ;;  %p13457_p10 = scmp.lt.s32.totalorder %s37_s28, %s37_s28 }
  0x83   :  { %p13453_p9 = scmp.ne.s32.totalorder %s37_s28, %s13452_s14  ;;  %p13458_p11 = scmp.lt.s32.totalorder %s13452_s14, %s13452_s14 }
  0x85   :  { %p13459_p12 = por %p13458_p11, %p13457_p10 }
  0x87   :  { %p13460_p13 = pnand %p13459_p12, %p13453_p9 }
  0x89   :  { %13463 = shalt.err (!%p13460_p13)
}
  0x8a   :  { %39 = dma.hbm_to_vmem [thread:$0]  %s16425_s30, 32, %s37_s28, [#allocation3]  }
  0x8b   :  { %s13464_s23 = scalar_lea.hbm %s16314_s2, 16 }
  0x8c   :  { %p13465_p0 = scmp.ne.s32.totalorder %s16314_s2, %s13464_s23  ;;  %p13468_p1 = scmp.lt.u32.totalorder %s13464_s23, %s16314_s2 }
  0x8e   :  { %p13470_p2 = pnand %p13468_p1, %p13465_p0 }
  0x90   :  { %13473 = shalt.err (!%p13470_p2)
}
  0x91   :  { %s13474_s9 = scalar_lea.vmem %s57_s18, 16  ;;  %s13478_s24 = scalar_lea.vmem %s57_s18, 32 }
  0x92   :  { %p13475_p3 = scmp.ne.s32.totalorder %s57_s18, %s13474_s9  ;;  %p13479_p4 = scmp.lt.s32.totalorder %s57_s18, %s57_s18 }
  0x93   :  { %p13480_p5 = scmp.lt.s32.totalorder %s13478_s24, %s13474_s9 }
  0x95   :  { %p13481_p6 = por %p13480_p5, %p13479_p4 }
  0x97   :  { %p13482_p7 = pnand %p13481_p6, %p13475_p3 }
  0x99   :  { %13485 = shalt.err (!%p13482_p7)
}
  0x9a   :  { %59 = dma.hbm_to_vmem [thread:$0]  %s16314_s2, 16, %s57_s18, [#allocation5]  }
  0x9b   :  { %s13644_s7 = smov [#allocation9]   ;;  %s13486_s4 = scalar_lea.hbm %s16318_s6, 1792 }
  0x9c   :  { %s79_s22 = sshll.u32 %s13644_s7, 4  ;;  %p13487_p8 = scmp.ne.s32.totalorder %s16318_s6, %s13486_s4  ;;  %s80_s22 = int_to_ptr.vmem [resolvable:$true] %s79_s22 }
  0x9d   :  { %p13490_p9 = scmp.lt.u32.totalorder %s13486_s4, %s16318_s6 }
  0x9f   :  { %p13492_p10 = pnand %p13490_p9, %p13487_p8 }
  0xa1   :  { %13495 = shalt.err (!%p13492_p10)
}
  0xa2   :  { %s13496_s21 = scalar_lea.vmem %s80_s22, 1792  ;;  %p13501_p12 = scmp.lt.s32.totalorder %s80_s22, %s80_s22 }
  0xa3   :  { %p13497_p11 = scmp.ne.s32.totalorder %s80_s22, %s13496_s21  ;;  %p13502_p13 = scmp.lt.s32.totalorder %s13496_s21, %s13496_s21 }
  0xa5   :  { %p13503_p0 = por %p13502_p13, %p13501_p12 }
  0xa7   :  { %p13504_p1 = pnand %p13503_p0, %p13497_p11 }
  0xa9   :  { %13507 = shalt.err (!%p13504_p1)
}
  0xaa   :  { %s13645_s2 = smov 896   ;;  %s13646_s18 = smov 56  }
  0xab   :  { %85 = dma.hbm_to_vmem [thread:$0]  %s16318_s6, 1792, %s80_s22, [#allocation8], %s13645_s2, %s13645_s2, %s13646_s18  }
  0xac   :  { %s13647_s27 = smov [#allocation12]   ;;  %s13648_s29 = smov [#allocation15]  }
  0xad   :  { %s102_s26 = sshll.u32 %s13647_s27, 4  ;;  %s124_s9 = sshll.u32 %s13648_s29, 4  ;;  %s103_s26 = int_to_ptr.vmem [resolvable:$true] %s102_s26  ;;  %s125_s9 = int_to_ptr.vmem [resolvable:$true] %s124_s9 }
  0xae   :  { %s13508_s30 = scalar_lea.hbm %s16320_s8, 112 }
  0xaf   :  { %p13509_p2 = scmp.ne.s32.totalorder %s16320_s8, %s13508_s30  ;;  %p13512_p3 = scmp.lt.u32.totalorder %s13508_s30, %s16320_s8 }
  0xb1   :  { %p13514_p4 = pnand %p13512_p3, %p13509_p2 }
  0xb3   :  { %13517 = shalt.err (!%p13514_p4)
}
  0xb4   :  { %s13518_s6 = scalar_lea.vmem %s103_s26, 112  ;;  %s13522_s22 = scalar_lea.vmem %s103_s26, 128 }
  0xb5   :  { %p13519_p5 = scmp.ne.s32.totalorder %s103_s26, %s13518_s6  ;;  %p13523_p6 = scmp.lt.s32.totalorder %s103_s26, %s103_s26 }
  0xb6   :  { %p13524_p7 = scmp.lt.s32.totalorder %s13522_s22, %s13518_s6 }
  0xb8   :  { %p13525_p8 = por %p13524_p7, %p13523_p6 }
  0xba   :  { %p13526_p9 = pnand %p13525_p8, %p13519_p5 }
  0xbc   :  { %13529 = shalt.err (!%p13526_p9)
}
  0xbd   :  { %105 = dma.hbm_to_vmem [thread:$0]  %s16320_s8, 112, %s103_s26, [#allocation11]  }
  0xbe   :  { %s13530_s21 = scalar_lea.hbm %s16322_s10, 176 }
  0xbf   :  { %p13531_p10 = scmp.ne.s32.totalorder %s16322_s10, %s13530_s21  ;;  %p13534_p11 = scmp.lt.u32.totalorder %s13530_s21, %s16322_s10 }
  0xc1   :  { %p13536_p12 = pnand %p13534_p11, %p13531_p10 }
  0xc3   :  { %13539 = shalt.err (!%p13536_p12)
}
  0xc4   :  { %s13540_s27 = scalar_lea.vmem %s125_s9, 176  ;;  %s13544_s29 = scalar_lea.vmem %s125_s9, 192 }
  0xc5   :  { %p13541_p13 = scmp.ne.s32.totalorder %s125_s9, %s13540_s27  ;;  %p13545_p0 = scmp.lt.s32.totalorder %s125_s9, %s125_s9 }
  0xc6   :  { %p13546_p1 = scmp.lt.s32.totalorder %s13544_s29, %s13540_s27 }
  0xc8   :  { %p13547_p2 = por %p13546_p1, %p13545_p0 }
  0xca   :  { %p13548_p3 = pnand %p13547_p2, %p13541_p13 }
  0xcc   :  { %13551 = shalt.err (!%p13548_p3)
}
  0xcd   :  { %127 = dma.hbm_to_vmem [thread:$0]  %s16322_s10, 176, %s125_s9, [#allocation14]  }
  0xce   :  { %s13649_s24 = smov [#allocation18]   ;;  %s13650_s30 = smov [#allocation21]  }
  0xcf   :  { %s146_s28 = sshll.u32 %s13649_s24, 4  ;;  %s165_s7 = sshll.u32 %s13650_s30, 4  ;;  %s147_s28 = int_to_ptr.vmem [resolvable:$true] %s146_s28  ;;  %s166_s7 = int_to_ptr.vmem [resolvable:$true] %s165_s7 }
  0xd0   :  { %s13552_s4 = scalar_lea.hbm %s16325_s13, 16 }
  0xd1   :  { %p13553_p4 = scmp.ne.s32.totalorder %s16325_s13, %s13552_s4  ;;  %p13556_p5 = scmp.lt.u32.totalorder %s13552_s4, %s16325_s13 }
  0xd3   :  { %p13558_p6 = pnand %p13556_p5, %p13553_p4 }
  0xd5   :  { %13561 = shalt.err (!%p13558_p6)
}
  0xd6   :  { %s13562_s10 = scalar_lea.vmem %s147_s28, 16  ;;  %s13566_s9 = scalar_lea.vmem %s147_s28, 32 }
  0xd7   :  { %p13563_p7 = scmp.ne.s32.totalorder %s147_s28, %s13562_s10  ;;  %p13567_p8 = scmp.lt.s32.totalorder %s147_s28, %s147_s28 }
  0xd8   :  { %p13568_p9 = scmp.lt.s32.totalorder %s13566_s9, %s13562_s10 }
  0xda   :  { %p13569_p10 = por %p13568_p9, %p13567_p8 }
  0xdc   :  { %p13570_p11 = pnand %p13569_p10, %p13563_p7 }
  0xde   :  { %13573 = shalt.err (!%p13570_p11)
}
  0xdf   :  { %149 = dma.hbm_to_vmem [thread:$0]  %s16325_s13, 16, %s147_s28, [#allocation17]  }
  0xe0   :  { %s13574_s18 = scalar_lea.hbm %s16327_s15, 108160 }
  0xe1   :  { %p13575_p12 = scmp.ne.s32.totalorder %s16327_s15, %s13574_s18  ;;  %p13578_p13 = scmp.lt.u32.totalorder %s13574_s18, %s16327_s15 }
  0xe3   :  { %p13580_p0 = pnand %p13578_p13, %p13575_p12 }
  0xe5   :  { %13583 = shalt.err (!%p13580_p0)
}
  0xe6   :  { %s13584_s8 = scalar_lea.vmem %s166_s7, 108160  ;;  %p13589_p2 = scmp.lt.s32.totalorder %s166_s7, %s166_s7 }
  0xe7   :  { %p13585_p1 = scmp.ne.s32.totalorder %s166_s7, %s13584_s8  ;;  %p13590_p3 = scmp.lt.s32.totalorder %s13584_s8, %s13584_s8 }
  0xe9   :  { %p13591_p4 = por %p13590_p3, %p13589_p2 }
  0xeb   :  { %p13592_p5 = pnand %p13591_p4, %p13585_p1 }
  0xed   :  { %13595 = shalt.err (!%p13592_p5)
}
  0xee   :  { %s13651_s13 = smov 640   ;;  %s13652_s26 = smov 40  }
  0xef   :  { %171 = dma.hbm_to_vmem [thread:$0]  %s16327_s15, 108160, %s166_s7, [#allocation20], %s13651_s13, %s13651_s13, %s13652_s26  }
  0xf0   :  { %s13653_s30 = smov [#allocation22]   ;;  %s13596_s6 = scalar_lea.hbm %s16328_s16, 80 }
  0xf1   :  { %s178_s19 = sshll.u32 %s13653_s30, 4  ;;  %p13597_p6 = scmp.ne.s32.totalorder %s16328_s16, %s13596_s6  ;;  %s179_s19 = int_to_ptr.vmem [resolvable:$true] %s178_s19 }
  0xf2   :  { %p13600_p7 = scmp.lt.u32.totalorder %s13596_s6, %s16328_s16 }
  0xf4   :  { %p13602_p8 = pnand %p13600_p7, %p13597_p6 }
  0xf6   :  { %13605 = shalt.err (!%p13602_p8)
}
  0xf7   :  { %s13606_s9 = scalar_lea.vmem %s179_s19, 80  ;;  %s13610_s15 = scalar_lea.vmem %s179_s19, 96 }
  0xf8   :  { %p13607_p9 = scmp.ne.s32.totalorder %s179_s19, %s13606_s9  ;;  %p13611_p10 = scmp.lt.s32.totalorder %s179_s19, %s179_s19 }
  0xf9   :  { %p13612_p11 = scmp.lt.s32.totalorder %s13610_s15, %s13606_s9 }
  0xfb   :  { %p13613_p12 = por %p13612_p11, %p13611_p10 }
  0xfd   :  { %p13614_p13 = pnand %p13613_p12, %p13607_p9 }
  0xff   :  { %13617 = shalt.err (!%p13614_p13)
}
 0x100   :  { %181 = dma.hbm_to_vmem [thread:$0]  %s16328_s16, 80, %s179_s19, [#allocation23]  }
 0x101   :  { %13618 = dma.done.wait [#allocation3], 32  }
 0x102   :  { %13619 = vsyncadd [#allocation3], 4294967264 }
 0x103   :  { %13620 = dma.done.wait [#allocation5], 80  }
 0x104   :  { %13621 = vsyncadd [#allocation5], 4294967216 }
 0x105   :  { %13622 = dma.done.wait [#allocation8], 1904  }
 0x106   :  { %13623 = vsyncadd [#allocation8], 4294965392 }
 0x107   :  { %13624 = dma.done.wait [#allocation11], 128  }
 0x108   :  { %13625 = vsyncadd [#allocation11], 4294967168 }
 0x109   :  { %13626 = dma.done.wait [#allocation14], 138160  }
 0x10a   :  { %13627 = vsyncadd [#allocation14], 4294829136 }
 0x10b   :  { %13628 = dma.done.wait [#allocation17], 1424  }
 0x10c   :  { %13629 = vsyncadd [#allocation17], 4294965872 }
 0x10d   :  { %13630 = dma.done.wait [#allocation20], 108336  }
 0x10e   :  { %13631 = vsyncadd [#allocation20], 4294858960 }
 0x10f   :  { %13632 = dma.done.wait [#allocation23], 80  }
 0x110   :  { %13633 = vsyncadd [#allocation23], 4294967216  ;;  %v16334_v0 = vmov 0.0   ;;  %vm13655_vm0 = vmmov 0   ;;  %vm237_vm1 = vcmask 1043456   ;;  %vm233_vm2 = vcmask 31744  }
 0x111   :  { %10453 = vmatprep.subr.mxu1 %v16334_v0  ;;  %10455 = vmatprep.mubr.msk.f32.mxu1 %vm13655_vm0, %v16334_v0  ;;  %v225_v1 = vld [vmem:[#allocation4] sm:$0xf]  ;;  %v224_v2 = vld [vmem:[#allocation2] sm:$0x3]  ;;  %v313_v3 = vld [vmem:[%s16315_s3 + $0x8] sm:$0xff]  ;;  %vm858_vm3 = vcmask 1041408  }
 0x112   :  { %596 = vmatprep.mubr.f32.mxu0 %v16334_v0  ;;  %10454 = vmatpush3.msk.msra.mxu1 %vm237_vm1, %v225_v1  ;;  %v320_v4 = vld [vmem:[%s16315_s3 + $0x40] sm:$0xff]  ;;  %v315_v5 = vld [vmem:[%s16315_s3 + $0x18] sm:$0xff]  ;;  %v322_v6 = vld [vmem:[%s16315_s3 + $0x50] sm:$0xff]  ;;  %vm901_vm4 = vcmask 123904   ;;  %vm909_vm5 = vcmask 130048   ;;  %vm5322_vm6 = vcmask 582656  }
 0x113   :  { %10456 = vmatmul.mubr.msk.f32.vlgmr.msra.gmra.mrb[0].mxu1 %vm233_vm2, %v224_v2  ;;  %v10601_v7 = vpack.c.bf16 %v320_v4, %v313_v3  ;;  %v10633_v8 = vpack.c.bf16 %v322_v6, %v315_v5  ;;  %v312_v9 = vld [vmem:[%s16315_s3] sm:$0xff]  ;;  %v319_v10 = vld [vmem:[%s16315_s3 + $0x38] sm:$0xff]  ;;  %v314_v11 = vld [vmem:[%s16315_s3 + $0x10] sm:$0xff]  ;;  %vm5330_vm7 = vcmask 588800   ;;  %vm5755_vm8 = vcmask 64512  }
 0x114   :  { %v10603_v12 = vpack.c.bf16 %v319_v10, %v312_v9  ;;  %v321_v13 = vld [vmem:[%s16315_s3 + $0x48] sm:$0xff]  ;;  %v327_v14 = vld [vmem:[%s16315_s3 + $0x78] sm:$0xff]  ;;  %v334_v15 = vld [vmem:[%s16315_s3 + $0xb0] sm:$0xff]  ;;  %525 = vmatprep.mubr.f32.mxu1 %v16334_v0  ;;  %vm9495_vm9 = vcmask 918528  }
 0x115   :  { %10602 = vmatprep.subr.bf16.mxu1 %v10601_v7  ;;  %10634 = vmatprep.subr.bf16.mxu0 %v10633_v8  ;;  %v10635_v16 = vpack.c.bf16 %v321_v13, %v314_v11  ;;  %v10605_v17 = vpack.c.bf16 %v334_v15, %v327_v14  ;;  %v329_v18 = vld [vmem:[%s16315_s3 + $0x88] sm:$0xff]  ;;  %v336_v19 = vld [vmem:[%s16315_s3 + $0xc0] sm:$0xff]  ;;  %v326_v20 = vld [vmem:[%s16315_s3 + $0x70] sm:$0xff] }
 0x116   :  { %10604 = vmatpush1.bf16.msra.mxu1 %v10603_v12  ;;  %v10637_v21 = vpack.c.bf16 %v336_v19, %v329_v18  ;;  %v333_v22 = vld [vmem:[%s16315_s3 + $0xa8] sm:$0xff]  ;;  %v328_v23 = vld [vmem:[%s16315_s3 + $0x80] sm:$0xff]  ;;  %v335_v24 = vld [vmem:[%s16315_s3 + $0xb8] sm:$0xff] }
 0x117   :  { %10636 = vmatpush1.bf16.msra.mxu0 %v10635_v16  ;;  %10606 = vmatprep.subr.bf16.mxu1 %v10605_v17  ;;  %v10607_v25 = vpack.c.bf16 %v333_v22, %v326_v20  ;;  %v10639_v26 = vpack.c.bf16 %v335_v24, %v328_v23  ;;  %v341_v27 = vld [vmem:[%s16315_s3 + $0xe8] sm:$0xff]  ;;  %v348_v28 = vld [vmem:[%s16315_s3 + $0x120] sm:$0xff]  ;;  %v343_v29 = vld [vmem:[%s16315_s3 + $0xf8] sm:$0xff] }
 0x118   :  { %10638 = vmatprep.subr.bf16.mxu0 %v10637_v21  ;;  %v10609_v30 = vpack.c.bf16 %v348_v28, %v341_v27  ;;  %v350_v31 = vld [vmem:[%s16315_s3 + $0x130] sm:$0xff]  ;;  %v340_v32 = vld [vmem:[%s16315_s3 + $0xe0] sm:$0xff]  ;;  %v347_v33 = vld [vmem:[%s16315_s3 + $0x118] sm:$0xff] }
 0x119   :  { %v10641_v34 = vpack.c.bf16 %v350_v31, %v343_v29  ;;  %v342_v35 = vld [vmem:[%s16315_s3 + $0xf0] sm:$0xff]  ;;  %v349_v36 = vld [vmem:[%s16315_s3 + $0x128] sm:$0xff]  ;;  %v355_v37 = vld [vmem:[%s16315_s3 + $0x158] sm:$0xff]  ;;  %v10611_v38 = vpack.c.bf16 %v347_v33, %v340_v32 }
 0x11a   :  { %10608 = vmatpush1.bf16.msra.mxu1 %v10607_v25  ;;  %v362_v39 = vld [vmem:[%s16315_s3 + $0x190] sm:$0xff]  ;;  %v357_v40 = vld [vmem:[%s16315_s3 + $0x168] sm:$0xff]  ;;  %v364_v41 = vld [vmem:[%s16315_s3 + $0x1a0] sm:$0xff]  ;;  %v10643_v42 = vpack.c.bf16 %v349_v36, %v342_v35 }
 0x11b   :  { %10640 = vmatpush1.bf16.msra.mxu0 %v10639_v26  ;;  %10610 = vmatprep.subr.bf16.mxu1 %v10609_v30  ;;  %v10613_v43 = vpack.c.bf16 %v362_v39, %v355_v37  ;;  %v354_v44 = vld [vmem:[%s16315_s3 + $0x150] sm:$0xff]  ;;  %v361_v45 = vld [vmem:[%s16315_s3 + $0x188] sm:$0xff]  ;;  %v356_v46 = vld [vmem:[%s16315_s3 + $0x160] sm:$0xff]  ;;  %v10645_v47 = vpack.c.bf16 %v364_v41, %v357_v40  ;;  %v16332_v39 = vmov 0.0|0.0  }
 0x11c   :  { %10642 = vmatprep.subr.bf16.mxu0 %v10641_v34  ;;  %v363_v48 = vld [vmem:[%s16315_s3 + $0x198] sm:$0xff]  ;;  %v369_v49 = vld [vmem:[%s16315_s3 + $0x1c8] sm:$0xff]  ;;  %v376_v50 = vld [vmem:[%s16315_s3 + $0x200] sm:$0xff]  ;;  %v10615_v53 = vpack.c.bf16 %v361_v45, %v354_v44 }
 0x11d   :  { %v371_v51 = vld [vmem:[%s16315_s3 + $0x1d8] sm:$0xff]  ;;  %v378_v52 = vld [vmem:[%s16315_s3 + $0x210] sm:$0xff]  ;;  %v10647_v54 = vpack.c.bf16 %v363_v48, %v356_v46  ;;  %v10617_v55 = vpack.c.bf16 %v376_v50, %v369_v49  ;;  %v368_v56 = vld [vmem:[%s16315_s3 + $0x1c0] sm:$0xff] }
 0x11e   :  { %10612 = vmatpush1.bf16.msra.mxu1 %v10611_v38  ;;  %v375_v57 = vld [vmem:[%s16315_s3 + $0x1f8] sm:$0xff]  ;;  %v370_v58 = vld [vmem:[%s16315_s3 + $0x1d0] sm:$0xff]  ;;  %v10649_v59 = vpack.c.bf16 %v378_v52, %v371_v51  ;;  %v377_v60 = vld [vmem:[%s16315_s3 + $0x208] sm:$0xff] }
 0x11f   :  { %10644 = vmatpush1.bf16.msra.mxu0 %v10643_v42  ;;  %10614 = vmatprep.subr.bf16.mxu1 %v10613_v43  ;;  %v383_v61 = vld [vmem:[%s16315_s3 + $0x238] sm:$0xff]  ;;  %v390_v62 = vld [vmem:[%s16315_s3 + $0x270] sm:$0xff]  ;;  %v385_v63 = vld [vmem:[%s16315_s3 + $0x248] sm:$0xff]  ;;  %v10619_v2 = vpack.c.bf16 %v375_v57, %v368_v56  ;;  %v10651_v3 = vpack.c.bf16 %v377_v60, %v370_v58 }
 0x120   :  { %10646 = vmatprep.subr.bf16.mxu0 %v10645_v47  ;;  %v392_v1 = vld [vmem:[%s16315_s3 + $0x280] sm:$0xff]  ;;  %v10621_v4 = vpack.c.bf16 %v390_v62, %v383_v61  ;;  %v382_v5 = vld [vmem:[%s16315_s3 + $0x230] sm:$0xff]  ;;  %v389_v6 = vld [vmem:[%s16315_s3 + $0x268] sm:$0xff] }
 0x121   :  { %v384_v7 = vld [vmem:[%s16315_s3 + $0x240] sm:$0xff]  ;;  %v10653_v8 = vpack.c.bf16 %v392_v1, %v385_v63  ;;  %v391_v9 = vld [vmem:[%s16315_s3 + $0x278] sm:$0xff]  ;;  %v397_v10 = vld [vmem:[%s16315_s3 + $0x2a8] sm:$0xff]  ;;  %v10623_v14 = vpack.c.bf16 %v389_v6, %v382_v5 }
 0x122   :  { %10616 = vmatpush1.bf16.msra.mxu1 %v10615_v53  ;;  %v404_v11 = vld [vmem:[%s16315_s3 + $0x2e0] sm:$0xff]  ;;  %v399_v12 = vld [vmem:[%s16315_s3 + $0x2b8] sm:$0xff]  ;;  %v406_v13 = vld [vmem:[%s16315_s3 + $0x2f0] sm:$0xff]  ;;  %v10655_v15 = vpack.c.bf16 %v391_v9, %v384_v7 }
 0x123   :  { %10648 = vmatpush1.bf16.msra.mxu0 %v10647_v54  ;;  %10618 = vmatprep.subr.bf16.mxu1 %v10617_v55  ;;  %v10625_v16 = vpack.c.bf16 %v404_v11, %v397_v10  ;;  %v396_v17 = vld [vmem:[%s16315_s3 + $0x2a0] sm:$0xff]  ;;  %v403_v18 = vld [vmem:[%s16315_s3 + $0x2d8] sm:$0xff]  ;;  %v10657_v19 = vpack.c.bf16 %v406_v13, %v399_v12  ;;  %v398_v20 = vld [vmem:[%s16315_s3 + $0x2b0] sm:$0xff] }
 0x124   :  { %10650 = vmatprep.subr.bf16.mxu0 %v10649_v59  ;;  %v405_v21 = vld [vmem:[%s16315_s3 + $0x2e8] sm:$0xff]  ;;  %v10627_v22 = vpack.c.bf16 %v403_v18, %v396_v17  ;;  %v411_v24 = vld [vmem:[%s16315_s3 + $0x318] sm:$0xff]  ;;  %v418_v25 = vld [vmem:[%s16315_s3 + $0x350] sm:$0xff] }
 0x125   :  { %v10659_v23 = vpack.c.bf16 %v405_v21, %v398_v20  ;;  %v413_v26 = vld [vmem:[%s16315_s3 + $0x328] sm:$0xff]  ;;  %v10629_v27 = vpack.c.bf16 %v418_v25, %v411_v24  ;;  %v420_v28 = vld [vmem:[%s16315_s3 + $0x360] sm:$0xff]  ;;  %v410_v29 = vld [vmem:[%s16315_s3 + $0x310] sm:$0xff] }
 0x126   :  { %10620 = vmatpush1.bf16.msra.mxu1 %v10619_v2  ;;  %v417_v30 = vld [vmem:[%s16315_s3 + $0x348] sm:$0xff]  ;;  %v10661_v31 = vpack.c.bf16 %v420_v28, %v413_v26  ;;  %v412_v33 = vld [vmem:[%s16315_s3 + $0x320] sm:$0xff]  ;;  %v419_v34 = vld [vmem:[%s16315_s3 + $0x358] sm:$0xff] }
 0x127   :  { %10652 = vmatpush1.bf16.msra.mxu0 %v10651_v3  ;;  %10622 = vmatprep.subr.bf16.mxu1 %v10621_v4  ;;  %v10631_v32 = vpack.c.bf16 %v417_v30, %v410_v29  ;;  %v10663_v35 = vpack.c.bf16 %v419_v34, %v412_v33  ;;  %v317_v36 = vld [vmem:[%s16315_s3 + $0x28] sm:$0xff]  ;;  %v324_v37 = vld [vmem:[%s16315_s3 + $0x60] sm:$0xff]  ;;  %v323_v42 = vld [vmem:[%s16315_s3 + $0x58] sm:$0xff] }
 0x128   :  { %10654 = vmatprep.subr.bf16.mxu0 %v10653_v8  ;;  %v10665_v38 = vpack.c.bf16 %v324_v37, %v317_v36  ;;  %v9509_v40 = vld [vmem:[#allocation6] ss:$0 sm:$0xff]  ;;  %v318_v43 = vld [vmem:[%s16315_s3 + $0x30] sm:$0xff]  ;;  %v325_v44 = vld [vmem:[%s16315_s3 + $0x68] sm:$0xff] }
 0x129   :  { %v316_v41 = vld [vmem:[%s16315_s3 + $0x20] sm:$0xff]  ;;  %v331_v46 = vld [vmem:[%s16315_s3 + $0x98] sm:$0xff]  ;;  %v338_v47 = vld [vmem:[%s16315_s3 + $0xd0] sm:$0xff]  ;;  %v10698_v51 = vpack.c.bf16 %v325_v44, %v318_v43 }
 0x12a   :  { %10624 = vmatpush1.bf16.msra.mxu1 %v10623_v14  ;;  %v10667_v50 = vpack.c.bf16 %v323_v42, %v316_v41  ;;  %v330_v52 = vld [vmem:[%s16315_s3 + $0x90] sm:$0xff]  ;;  %v10669_v54 = vpack.c.bf16 %v338_v47, %v331_v46  ;;  %v337_v55 = vld [vmem:[%s16315_s3 + $0xc8] sm:$0xff]  ;;  %v332_v56 = vld [vmem:[%s16315_s3 + $0xa0] sm:$0xff] }
 0x12b   :  { %10656 = vmatpush1.bf16.msra.mxu0 %v10655_v15  ;;  %10626 = vmatprep.subr.bf16.mxu1 %v10625_v16  ;;  %v339_v57 = vld [vmem:[%s16315_s3 + $0xd8] sm:$0xff]  ;;  %v345_v58 = vld [vmem:[%s16315_s3 + $0x108] sm:$0xff]  ;;  %v352_v59 = vld [vmem:[%s16315_s3 + $0x140] sm:$0xff]  ;;  %v10671_v60 = vpack.c.bf16 %v337_v55, %v330_v52 }
 0x12c   :  { %10658 = vmatprep.subr.bf16.mxu0 %v10657_v19  ;;  %v10701_v61 = vpack.c.bf16 %v339_v57, %v332_v56  ;;  %v344_v62 = vld [vmem:[%s16315_s3 + $0x100] sm:$0xff]  ;;  %v10673_v63 = vpack.c.bf16 %v352_v59, %v345_v58  ;;  %v351_v1 = vld [vmem:[%s16315_s3 + $0x138] sm:$0xff]  ;;  %v346_v2 = vld [vmem:[%s16315_s3 + $0x110] sm:$0xff] }
 0x12d   :  { %v353_v3 = vld [vmem:[%s16315_s3 + $0x148] sm:$0xff]  ;;  %v359_v4 = vld [vmem:[%s16315_s3 + $0x178] sm:$0xff]  ;;  %v366_v5 = vld [vmem:[%s16315_s3 + $0x1b0] sm:$0xff]  ;;  %v10675_v6 = vpack.c.bf16 %v351_v1, %v344_v62 }
 0x12e   :  { %10628 = vmatpush1.bf16.msra.mxu1 %v10627_v22  ;;  %v10704_v7 = vpack.c.bf16 %v353_v3, %v346_v2  ;;  %v358_v8 = vld [vmem:[%s16315_s3 + $0x170] sm:$0xff]  ;;  %v10677_v9 = vpack.c.bf16 %v366_v5, %v359_v4  ;;  %v365_v10 = vld [vmem:[%s16315_s3 + $0x1a8] sm:$0xff]  ;;  %v360_v11 = vld [vmem:[%s16315_s3 + $0x180] sm:$0xff] }
 0x12f   :  { %10660 = vmatpush1.bf16.msra.mxu0 %v10659_v23  ;;  %10630 = vmatprep.subr.bf16.mxu1 %v10629_v27  ;;  %v367_v12 = vld [vmem:[%s16315_s3 + $0x1b8] sm:$0xff]  ;;  %v373_v13 = vld [vmem:[%s16315_s3 + $0x1e8] sm:$0xff]  ;;  %v380_v14 = vld [vmem:[%s16315_s3 + $0x220] sm:$0xff]  ;;  %v10679_v15 = vpack.c.bf16 %v365_v10, %v358_v8 }
 0x130   :  { %10662 = vmatprep.subr.bf16.mxu0 %v10661_v31  ;;  %v10707_v16 = vpack.c.bf16 %v367_v12, %v360_v11  ;;  %v372_v17 = vld [vmem:[%s16315_s3 + $0x1e0] sm:$0xff]  ;;  %v10681_v18 = vpack.c.bf16 %v380_v14, %v373_v13  ;;  %v379_v19 = vld [vmem:[%s16315_s3 + $0x218] sm:$0xff]  ;;  %v374_v20 = vld [vmem:[%s16315_s3 + $0x1f0] sm:$0xff] }
 0x131   :  { %v381_v21 = vld [vmem:[%s16315_s3 + $0x228] sm:$0xff]  ;;  %v387_v22 = vld [vmem:[%s16315_s3 + $0x258] sm:$0xff]  ;;  %v394_v23 = vld [vmem:[%s16315_s3 + $0x290] sm:$0xff]  ;;  %v10683_v24 = vpack.c.bf16 %v379_v19, %v372_v17 }
 0x132   :  { %10632 = vmatpush1.bf16.msra.mxu1 %v10631_v32  ;;  %v10710_v25 = vpack.c.bf16 %v381_v21, %v374_v20  ;;  %v386_v26 = vld [vmem:[%s16315_s3 + $0x250] sm:$0xff]  ;;  %v10685_v27 = vpack.c.bf16 %v394_v23, %v387_v22  ;;  %v393_v28 = vld [vmem:[%s16315_s3 + $0x288] sm:$0xff]  ;;  %v388_v29 = vld [vmem:[%s16315_s3 + $0x260] sm:$0xff] }
 0x133   :  { %10664 = vmatpush1.bf16.msra.mxu0 %v10663_v35  ;;  %10666 = vmatprep.subr.bf16.mxu1 %v10665_v38  ;;  %v395_v30 = vld [vmem:[%s16315_s3 + $0x298] sm:$0xff]  ;;  %v401_v31 = vld [vmem:[%s16315_s3 + $0x2c8] sm:$0xff]  ;;  %v408_v32 = vld [vmem:[%s16315_s3 + $0x300] sm:$0xff]  ;;  %v10687_v33 = vpack.c.bf16 %v393_v28, %v386_v26 }
 0x134   :  { %10697 = vmatprep.subr.bf16.mxu0 %v16332_v39  ;;  %v10713_v34 = vpack.c.bf16 %v395_v30, %v388_v29  ;;  %v400_v35 = vld [vmem:[%s16315_s3 + $0x2c0] sm:$0xff]  ;;  %v10689_v36 = vpack.c.bf16 %v408_v32, %v401_v31  ;;  %v407_v37 = vld [vmem:[%s16315_s3 + $0x2f8] sm:$0xff]  ;;  %v402_v38 = vld [vmem:[%s16315_s3 + $0x2d0] sm:$0xff] }
 0x135   :  { %v415_v41 = vld [vmem:[%s16315_s3 + $0x338] sm:$0xff]  ;;  %v422_v42 = vld [vmem:[%s16315_s3 + $0x370] sm:$0xff]  ;;  %v10691_v43 = vpack.c.bf16 %v407_v37, %v400_v35  ;;  %v421_v46 = vld [vmem:[%s16315_s3 + $0x368] sm:$0xff] }
 0x136   :  { %v10693_v47 = vpack.c.bf16 %v422_v42, %v415_v41  ;;  %v792_v52 = vld [vmem:[%s16317_s5 + $0x180] sm:$0xff]  ;;  %v745_v58 = vld [vmem:[%s16317_s5 + $0x8] sm:$0xff]  ;;  %v763_v1 = vld [vmem:[%s16317_s5 + $0x98] sm:$0xff] }
 0x137   :  { %v744_v57 = vld [vmem:[%s16317_s5] sm:$0xff]  ;;  %v777_v62 = vld [vmem:[%s16317_s5 + $0x108] sm:$0xff]  ;;  %v794_v2 = vld [vmem:[%s16317_s5 + $0x190] sm:$0xff] }
 0x138   :  { %v795_v3 = vld [vmem:[%s16317_s5 + $0x198] sm:$0xff]  ;;  %v14319_v4 = vpack.c.bf16 %v745_v58, %v744_v57  ;;  %v778_v10 = vld [vmem:[%s16317_s5 + $0x110] sm:$0xff]  ;;  %v764_v12 = vld [vmem:[%s16317_s5 + $0xa0] sm:$0xff] }
 0x139   :  { %v779_v11 = vld [vmem:[%s16317_s5 + $0x118] sm:$0xff]  ;;  %v765_v13 = vld [vmem:[%s16317_s5 + $0xa8] sm:$0xff]  ;;  %v796_v14 = vld [vmem:[%s16317_s5 + $0x1a0] sm:$0xff] }
 0x13a   :  { %v14359_v17 = vpack.c.bf16 %v779_v11, %v778_v10  ;;  %v749_v19 = vld [vmem:[%s16317_s5 + $0x28] sm:$0xff]  ;;  %v780_v21 = vld [vmem:[%s16317_s5 + $0x120] sm:$0xff]  ;;  %v766_v23 = vld [vmem:[%s16317_s5 + $0xb0] sm:$0xff] }
 0x13b   :  { %v781_v22 = vld [vmem:[%s16317_s5 + $0x128] sm:$0xff]  ;;  %v799_v26 = vld [vmem:[%s16317_s5 + $0x1b8] sm:$0xff]  ;;  %v750_v29 = vld [vmem:[%s16317_s5 + $0x30] sm:$0xff] }
 0x13c   :  { %v14395_v28 = vpack.c.bf16 %v781_v22, %v780_v21  ;;  %v751_v31 = vld [vmem:[%s16317_s5 + $0x38] sm:$0xff]  ;;  %v768_v37 = vld [vmem:[%s16317_s5 + $0xc0] sm:$0xff]  ;;  %v753_v42 = vld [vmem:[%s16317_s5 + $0x48] sm:$0xff] }
 0x13d   :  { %v14417_v35 = vpack.c.bf16 %v751_v31, %v750_v29  ;;  %v752_v41 = vld [vmem:[%s16317_s5 + $0x40] sm:$0xff]  ;;  %v803_v58 = vld [vmem:[%s16317_s5 + $0x1d8] sm:$0xff]  ;;  %v757_v10 = vld [vmem:[%s16317_s5 + $0x68] sm:$0xff] }
 0x13e   :  { %v804_v11 = vld [vmem:[%s16317_s5 + $0x1e0] sm:$0xff]  ;;  %v774_v21 = vld [vmem:[%s16317_s5 + $0xf0] sm:$0xff]  ;;  %v775_v22 = vld [vmem:[%s16317_s5 + $0xf8] sm:$0xff] }
 0x13f   :  { %v807_v31 = vld [vmem:[%s16317_s5 + $0x1f8] sm:$0xff] }
 0x1e6   :  { %v307_v45 = vpop.f32.mrb[0].mxu1 }
 0x1e7   :  { %v308_v48 = vadd.f32 %v9509_v40, %v307_v45  ;;  %v10457_v49 = vpop.f32.mrb[1].mxu1  ;;  %v409_v40 = vld [vmem:[%s16315_s3 + $0x308] sm:$0xff]  ;;  %v414_v45 = vld [vmem:[%s16315_s3 + $0x330] sm:$0xff] }
 0x1e8   :  { %v10716_v44 = vpack.c.bf16 %v409_v40, %v402_v38  ;;  %v423_v49 = vld [vmem:[%s16315_s3 + $0x378] sm:$0xff]  ;;  %v10695_v55 = vpack.c.bf16 %v421_v46, %v414_v45  ;;  %v769_v38 = vld [vmem:[%s16317_s5 + $0xc8] sm:$0xff]  ;;  %v784_v46 = vld [vmem:[%s16317_s5 + $0x140] sm:$0xff] }
 0x1e9   :  { %v14148_v53 = vmax.f32 %v308_v48, 0.0  ;;  %v416_v48 = vld [vmem:[%s16315_s3 + $0x340] sm:$0xff]  ;;  %v14431_v40 = vpack.c.bf16 %v769_v38, %v768_v37  ;;  %v801_v45 = vld [vmem:[%s16317_s5 + $0x1c8] sm:$0xff] }
 0x1ea   :  { %v10719_v56 = vpack.c.bf16 %v423_v49, %v416_v48 }
 0x1eb   :  { %526 = vmatmul.mubr.f32.vlgmr.msra.gmra.mrb[2].mxu1 %v14148_v53  ;;  %597 = vmatmul.mubr.f32.vlgmr.msra.gmra.mrb[0].mxu0 %v14148_v53 }
 0x1ec   :  { %10668 = vmatpush1.bf16.msra.mxu1 %v10667_v50  ;;  %10699 = vmatpush3.bf16.msra.mxu0 %v10698_v51  ;;  %v760_v50 = vld [vmem:[%s16317_s5 + $0x80] sm:$0xff]  ;;  %v761_v51 = vld [vmem:[%s16317_s5 + $0x88] sm:$0xff] }
 0x1ed   :  { %10670 = vmatprep.subr.bf16.mxu1 %v10669_v54  ;;  %10700 = vmatprep.subr.bf16.mxu0 %v16332_v39  ;;  %v793_v54 = vld [vmem:[%s16317_s5 + $0x188] sm:$0xff]  ;;  %v14297_v59 = vpack.c.bf16 %v761_v51, %v760_v50  ;;  %v770_v50 = vld [vmem:[%s16317_s5 + $0xd0] sm:$0xff]  ;;  %v771_v51 = vld [vmem:[%s16317_s5 + $0xd8] sm:$0xff] }
 0x1ee   :  { %667 = vmatprep.mubr.f32.mxu1 %v16334_v0  ;;  %10490 = vmatprep.mubr.msk.f32.mxu0 %vm13655_vm0, %v16334_v0 }
 0x1f0   :  { %10672 = vmatpush1.bf16.msra.mxu1 %v10671_v60  ;;  %10702 = vmatpush3.bf16.msra.mxu0 %v10701_v61  ;;  %v14299_v60 = vpack.c.bf16 %v793_v54, %v792_v52  ;;  %v776_v61 = vld [vmem:[%s16317_s5 + $0x100] sm:$0xff]  ;;  %v14466_v52 = vpack.c.bf16 %v771_v51, %v770_v50  ;;  %v754_v54 = vld [vmem:[%s16317_s5 + $0x50] sm:$0xff]  ;;  %v14586_v51 = vld [vmem:[#allocation7] sm:$0x7f] }
 0x1f1   :  { %10674 = vmatprep.subr.bf16.mxu1 %v10673_v63  ;;  %10703 = vmatprep.subr.bf16.mxu0 %v16332_v39  ;;  %v762_v63 = vld [vmem:[%s16317_s5 + $0x90] sm:$0xff]  ;;  %v14321_v5 = vpack.c.bf16 %v777_v62, %v776_v61  ;;  %v787_v62 = vld [vmem:[%s16317_s5 + $0x158] sm:$0xff] }
 0x1f2   :  { %v14331_v8 = vpack.c.bf16 %v763_v1, %v762_v63  ;;  %v786_v61 = vld [vmem:[%s16317_s5 + $0x150] sm:$0xff] }
 0x1f3   :  { %v14492_v1 = vpack.c.bf16 %v787_v62, %v786_v61 }
 0x1f4   :  { %10676 = vmatpush1.bf16.msra.mxu1 %v10675_v6  ;;  %10705 = vmatpush3.bf16.msra.mxu0 %v10704_v7  ;;  %v746_v6 = vld [vmem:[%s16317_s5 + $0x10] sm:$0xff]  ;;  %v747_v7 = vld [vmem:[%s16317_s5 + $0x18] sm:$0xff] }
 0x1f5   :  { %10678 = vmatprep.subr.bf16.mxu1 %v10677_v9  ;;  %10706 = vmatprep.subr.bf16.mxu0 %v16332_v39  ;;  %v14333_v9 = vpack.c.bf16 %v795_v3, %v794_v2  ;;  %v772_v2 = vld [vmem:[%s16317_s5 + $0xe0] sm:$0xff]  ;;  %v773_v3 = vld [vmem:[%s16317_s5 + $0xe8] sm:$0xff] }
 0x1f8   :  { %10680 = vmatpush1.bf16.msra.mxu1 %v10679_v15  ;;  %10708 = vmatpush3.bf16.msra.mxu0 %v10707_v16  ;;  %v797_v15 = vld [vmem:[%s16317_s5 + $0x1a8] sm:$0xff]  ;;  %v14357_v16 = vpack.c.bf16 %v747_v7, %v746_v6  ;;  %v14502_v6 = vpack.c.bf16 %v773_v3, %v772_v2  ;;  %v756_v7 = vld [vmem:[%s16317_s5 + $0x60] sm:$0xff] }
 0x1f9   :  { %10682 = vmatprep.subr.bf16.mxu1 %v10681_v18  ;;  %10709 = vmatprep.subr.bf16.mxu0 %v16332_v39  ;;  %v748_v18 = vld [vmem:[%s16317_s5 + $0x20] sm:$0xff]  ;;  %v14371_v20 = vpack.c.bf16 %v797_v15, %v796_v14  ;;  %v789_v15 = vld [vmem:[%s16317_s5 + $0x168] sm:$0xff] }
 0x1fa   :  { %v788_v14 = vld [vmem:[%s16317_s5 + $0x160] sm:$0xff] }
 0x1fc   :  { %10684 = vmatpush1.bf16.msra.mxu1 %v10683_v24  ;;  %10711 = vmatpush3.bf16.msra.mxu0 %v10710_v25  ;;  %v767_v24 = vld [vmem:[%s16317_s5 + $0xb8] sm:$0xff]  ;;  %v798_v25 = vld [vmem:[%s16317_s5 + $0x1b0] sm:$0xff] }
 0x1fd   :  { %10686 = vmatprep.subr.bf16.mxu1 %v10685_v27  ;;  %10712 = vmatprep.subr.bf16.mxu0 %v16332_v39  ;;  %v14393_v27 = vpack.c.bf16 %v749_v19, %v748_v18  ;;  %v14402_v30 = vpack.c.bf16 %v767_v24, %v766_v23  ;;  %v14407_v32 = vpack.c.bf16 %v799_v26, %v798_v25  ;;  %v758_v24 = vld [vmem:[%s16317_s5 + $0x70] sm:$0xff]  ;;  %v759_v25 = vld [vmem:[%s16317_s5 + $0x78] sm:$0xff] }
 0x1fe   :  { %v14528_v19 = vpack.c.bf16 %v789_v15, %v788_v14  ;;  %v14538_v23 = vpack.c.bf16 %v775_v22, %v774_v21  ;;  %v806_v26 = vld [vmem:[%s16317_s5 + $0x1f0] sm:$0xff]  ;;  %v14550_v29 = vpack.c.bf16 %v759_v25, %v758_v24 }
 0x1ff   :  { %v14562_v37 = vpack.c.bf16 %v807_v31, %v806_v26 }
 0x200   :  { %10688 = vmatpush1.bf16.msra.mxu1 %v10687_v33  ;;  %10714 = vmatpush3.bf16.msra.mxu0 %v10713_v34  ;;  %v782_v33 = vld [vmem:[%s16317_s5 + $0x130] sm:$0xff]  ;;  %v783_v34 = vld [vmem:[%s16317_s5 + $0x138] sm:$0xff] }
 0x201   :  { %10690 = vmatprep.subr.bf16.mxu1 %v10689_v36  ;;  %10715 = vmatprep.subr.bf16.mxu0 %v16332_v39  ;;  %v14419_v36 = vpack.c.bf16 %v783_v34, %v782_v33  ;;  %v790_v33 = vld [vmem:[%s16317_s5 + $0x170] sm:$0xff]  ;;  %v791_v34 = vld [vmem:[%s16317_s5 + $0x178] sm:$0xff] }
 0x202   :  { %v14564_v38 = vpack.c.bf16 %v791_v34, %v790_v33 }
 0x204   :  { %10692 = vmatpush1.bf16.msra.mxu1 %v10691_v43  ;;  %10717 = vmatpush3.bf16.msra.mxu0 %v10716_v44  ;;  %v800_v43 = vld [vmem:[%s16317_s5 + $0x1c0] sm:$0xff]  ;;  %v14442_v44 = vpack.c.bf16 %v753_v42, %v752_v41  ;;  %v825_v42 = vld [vmem:[%s16317_s5 + $0x288] sm:$0xff] }
 0x205   :  { %10694 = vmatprep.subr.bf16.mxu1 %v10693_v47  ;;  %10718 = vmatprep.subr.bf16.mxu0 %v16332_v39  ;;  %v785_v47 = vld [vmem:[%s16317_s5 + $0x148] sm:$0xff]  ;;  %v14454_v48 = vpack.c.bf16 %v801_v45, %v800_v43  ;;  %v824_v41 = vld [vmem:[%s16317_s5 + $0x280] sm:$0xff]  ;;  %v426_v45 = vlaneseq }
 0x206   :  { %v14456_v49 = vpack.c.bf16 %v785_v47, %v784_v46  ;;  %v14574_v43 = vpack.c.bf16 %v825_v42, %v824_v41 }
 0x207   :  { %v14578_v46 = vshrl.u32 %v426_v45, 7 }
 0x208   :  { %10696 = vmatpush1.bf16.msra.mxu1 %v10695_v55  ;;  %10720 = vmatpush3.bf16.msra.mxu0 %v10719_v56  ;;  %v755_v55 = vld [vmem:[%s16317_s5 + $0x58] sm:$0xff]  ;;  %v802_v56 = vld [vmem:[%s16317_s5 + $0x1d0] sm:$0xff] }
 0x209   :  { %10722 = vmatprep.subr.bf16.mxu1 %v14297_v59  ;;  %10754 = vmatprep.subr.bf16.mxu0 %v14299_v60  ;;  %v14478_v57 = vpack.c.bf16 %v755_v55, %v754_v54  ;;  %v14490_v63 = vpack.c.bf16 %v803_v58, %v802_v56  ;;  %16426 = vst [vmem:[#allocation32_spill] sm:$0xff] %v14578_v46  ;;  %v14581_v47 = vsub.s32 0, %v14578_v46  ;;  %v14584_v50 = vsub.s32 2, %v14578_v46 }
 0x20a   :  { %v14589_v54 = vsub.s32 1, %v14578_v46  ;;  %v14592_v55 = vsub.s32 3, %v14578_v46 }
 0x20b   :  { %668 = vmatmul.mubr.f32.vlgmr.msra.gmra.mrb[4].mxu1 %v14148_v53  ;;  %10491 = vmatmul.mubr.f32.vlgmr.msra.gmra.mrb[2].mxu0 %v14148_v53  ;;  %v14369_v53 = vpack.c.bf16 %v765_v13, %v764_v12  ;;  %v14514_v12 = vpack.c.bf16 %v757_v10, %v756_v7  ;;  %v805_v13 = vld [vmem:[%s16317_s5 + $0x1e8] sm:$0xff]  ;;  %16427 = vst [vmem:[#allocation33_spill] sm:$0xff] %v14584_v50 }
 0x20c   :  { %10724 = vmatpush3.bf16.msra.mxu1 %v14319_v4  ;;  %10756 = vmatpush3.bf16.msra.mxu0 %v14321_v5  ;;  %v14526_v18 = vpack.c.bf16 %v805_v13, %v804_v11  ;;  %16428 = vst [vmem:[#allocation34_spill] sm:$0xff] %v14589_v54  ;;  %16429 = vst [vmem:[#allocation35_spill] sm:$0xff] %v14592_v55  ;;  %v429_v56 = vrot.slane %v14586_v51, %v14581_v47 }
 0x20d   :  { %10726 = vmatprep.subr.bf16.mxu1 %v14331_v8  ;;  %10758 = vmatprep.subr.bf16.mxu0 %v14333_v9  ;;  %v437_v58 = vrot.slane %v14586_v51, %v14584_v50  ;;  %v433_v61 = vrot.slane %v14586_v51, %v14589_v54  ;;  %v441_v62 = vrot.slane %v14586_v51, %v14592_v55  ;;  %v808_v50 = vld [vmem:[%s16317_s5 + $0x200] sm:$0xff] }
 0x210   :  { %10728 = vmatpush3.bf16.msra.mxu1 %v14357_v16  ;;  %10760 = vmatpush3.bf16.msra.mxu0 %v14359_v17 }
 0x211   :  { %10730 = vmatprep.subr.bf16.mxu1 %v14369_v53  ;;  %10762 = vmatprep.subr.bf16.mxu0 %v14371_v20 }
 0x214   :  { %10732 = vmatpush3.bf16.msra.mxu1 %v14393_v27  ;;  %10764 = vmatpush3.bf16.msra.mxu0 %v14395_v28 }
 0x215   :  { %10734 = vmatprep.subr.bf16.mxu1 %v14402_v30  ;;  %10766 = vmatprep.subr.bf16.mxu0 %v14407_v32 }
 0x218   :  { %10736 = vmatpush3.bf16.msra.mxu1 %v14417_v35  ;;  %10768 = vmatpush3.bf16.msra.mxu0 %v14419_v36 }
 0x219   :  { %10738 = vmatprep.subr.bf16.mxu1 %v14431_v40  ;;  %10770 = vmatprep.subr.bf16.mxu0 %v14454_v48 }
 0x21c   :  { %10740 = vmatpush3.bf16.msra.mxu1 %v14442_v44  ;;  %10772 = vmatpush3.bf16.msra.mxu0 %v14456_v49 }
 0x21d   :  { %10742 = vmatprep.subr.bf16.mxu1 %v14466_v52  ;;  %10774 = vmatprep.subr.bf16.mxu0 %v14490_v63 }
 0x220   :  { %10744 = vmatpush3.bf16.msra.mxu1 %v14478_v57  ;;  %10776 = vmatpush3.bf16.msra.mxu0 %v14492_v1 }
 0x221   :  { %10746 = vmatprep.subr.bf16.mxu1 %v14502_v6  ;;  %10778 = vmatprep.subr.bf16.mxu0 %v14526_v18 }
 0x224   :  { %10748 = vmatpush3.bf16.msra.mxu1 %v14514_v12  ;;  %10780 = vmatpush3.bf16.msra.mxu0 %v14528_v19 }
 0x225   :  { %10750 = vmatprep.subr.bf16.mxu1 %v14538_v23  ;;  %10782 = vmatprep.subr.bf16.mxu0 %v14562_v37 }
 0x228   :  { %10752 = vmatpush3.bf16.msra.mxu1 %v14550_v29  ;;  %10784 = vmatpush3.bf16.msra.mxu0 %v14564_v38 }
 0x229   :  { %10786 = vmatprep.subr.bf16.mxu1 %v14574_v43 }
 0x2be   :  { %v527_v2 = vpop.f32.mrb[2].mxu1  ;;  %v598_v3 = vpop.f32.mrb[0].mxu0 }
 0x2bf   :  { %v14602_v7 = vadd.f32 %v527_v2, %v429_v56  ;;  %v14604_v10 = vadd.f32 %v598_v3, %v437_v58  ;;  %v529_v11 = vpop.f32.mrb[3].mxu1  ;;  %v600_v13 = vpop.f32.mrb[1].mxu0 }
 0x2c0   :  { %v14606_v14 = vadd.f32 %v529_v11, %v433_v61  ;;  %v14608_v15 = vadd.f32 %v600_v13, %v441_v62 }
 0x2c1   :  { %v859_v21 = vsel %vm858_vm3, %v14602_v7, 0.0  ;;  %v873_v22 = vsel %vm858_vm3, %v14604_v10, 0.0 }
 0x2c2   :  { %v860_v24 = vrot.slane %v859_v21, 4  ;;  %v874_v25 = vrot.slane %v873_v22, 4  ;;  %v866_v26 = vsel %vm858_vm3, %v14606_v14, 0.0  ;;  %v880_v31 = vsel %vm858_vm3, %v14608_v15, 0.0 }
 0x2c3   :  { %v867_v33 = vrot.slane %v866_v26, 4  ;;  %v881_v34 = vrot.slane %v880_v31, 4 }
 0x2c4   :  { %v861_v41 = vadd.f32 %v860_v24, %v859_v21  ;;  %v875_v42 = vadd.f32 %v874_v25, %v873_v22  ;;  %v809_v21 = vld [vmem:[%s16317_s5 + $0x208] sm:$0xff]  ;;  %v826_v25 = vld [vmem:[%s16317_s5 + $0x290] sm:$0xff] }
 0x2c5   :  { %v868_v45 = vadd.f32 %v867_v33, %v866_v26  ;;  %v882_v56 = vadd.f32 %v881_v34, %v880_v31  ;;  %v827_v26 = vld [vmem:[%s16317_s5 + $0x298] sm:$0xff]  ;;  %v14630_v34 = vpack.c.bf16 %v809_v21, %v808_v50 }
 0x2c6   :  { %v862_v58 = vrot.slane %v861_v41, 2  ;;  %v876_v61 = vrot.slane %v875_v42, 2 }
 0x2c7   :  { %v869_v62 = vrot.slane %v868_v45, 2  ;;  %v883_v2 = vrot.slane %v882_v56, 2 }
 0x2c8   :  { %v863_v3 = vadd.f32 %v862_v58, %v861_v41  ;;  %v877_v11 = vadd.f32 %v876_v61, %v875_v42  ;;  %v811_v58 = vld [vmem:[%s16317_s5 + $0x218] sm:$0xff] }
 0x2c9   :  { %v870_v13 = vadd.f32 %v869_v62, %v868_v45  ;;  %v884_v39 = vadd.f32 %v883_v2, %v882_v56  ;;  %v14632_v45 = vpack.c.bf16 %v827_v26, %v826_v25  ;;  %v810_v56 = vld [vmem:[%s16317_s5 + $0x210] sm:$0xff]  ;;  %v812_v62 = vld [vmem:[%s16317_s5 + $0x220] sm:$0xff]  ;;  %v813_v2 = vld [vmem:[%s16317_s5 + $0x228] sm:$0xff]  ;;  %v14678_v25 = vsub.s32 4, %v14578_v46 }
 0x2ca   :  { %v864_v0 = vrot.slane %v863_v3, 1  ;;  %v878_v55 = vrot.slane %v877_v11, 1  ;;  %v14647_v50 = vpack.c.bf16 %v811_v58, %v810_v56  ;;  %v14681_v26 = vsub.s32 6, %v14578_v46  ;;  %v816_v58 = vld [vmem:[%s16317_s5 + $0x240] sm:$0xff] }
 0x2cb   :  { %v871_v22 = vrot.slane %v870_v13, 1  ;;  %v885_v24 = vrot.slane %v884_v39, 1  ;;  %16435 = vst [vmem:[#allocation40_spill] sm:$0xff] %v14678_v25 }
 0x2cc   :  { %v865_v41 = vadd.f32 %v864_v0, %v863_v3  ;;  %v879_v42 = vadd.f32 %v878_v55, %v877_v11  ;;  %v829_v0 = vld [vmem:[%s16317_s5 + $0x2a8] sm:$0xff]  ;;  %16430 = vst [vmem:[#allocation36_spill] sm:$0xff] %v14647_v50  ;;  %v16431_v55 = vmov 0.0   ;;  %v830_v3 = vld [vmem:[%s16317_s5 + $0x2b0] sm:$0xff]  ;;  %v831_v11 = vld [vmem:[%s16317_s5 + $0x2b8] sm:$0xff] }
 0x2cd   :  { %v872_v31 = vadd.f32 %v871_v22, %v870_v13  ;;  %v886_v33 = vadd.f32 %v885_v24, %v884_v39  ;;  %v828_v39 = vld [vmem:[%s16317_s5 + $0x2a0] sm:$0xff]  ;;  %v14666_v13 = vpack.c.bf16 %v813_v2, %v812_v62  ;;  %v14669_v21 = vpack.c.bf16 %v831_v11, %v830_v3  ;;  %v814_v22 = vld [vmem:[%s16317_s5 + $0x230] sm:$0xff]  ;;  %v815_v24 = vld [vmem:[%s16317_s5 + $0x238] sm:$0xff]  ;;  %16436 = vst [vmem:[#allocation41_spill] sm:$0xff] %v14681_v26 }
 0x2ce   :  { %v14651_v61 = vpack.c.bf16 %v829_v0, %v828_v39  ;;  %v817_v39 = vld [vmem:[%s16317_s5 + $0x248] sm:$0xff]  ;;  %v445_v0 = vrot.slane %v14586_v51, %v14678_v25  ;;  %v453_v62 = vrot.slane %v14586_v51, %v14681_v26  ;;  %v834_v2 = vld [vmem:[%s16317_s5 + $0x2d0] sm:$0xff]  ;;  %v835_v3 = vld [vmem:[%s16317_s5 + $0x2d8] sm:$0xff] }
 0x2cf   :  { %977 = vmatprep.mubr.f32.mxu1 %v872_v31  ;;  %1047 = vmatprep.mubr.f32.mxu0 %v886_v33  ;;  %16433 = vst [vmem:[#allocation38_spill] sm:$0xff] %v14666_v13  ;;  %16434 = vst [vmem:[#allocation39_spill] sm:$0xff] %v14669_v21  ;;  %v832_v31 = vld [vmem:[%s16317_s5 + $0x2c0] sm:$0xff]  ;;  %v833_v33 = vld [vmem:[%s16317_s5 + $0x2c8] sm:$0xff] }
 0x2d0   :  { %978 = vmatmul.mubr.f32.vlgmr.msra.gmra.mrb[6].mxu1 %v865_v41  ;;  %1048 = vmatmul.mubr.f32.vlgmr.msra.gmra.mrb[4].mxu0 %v879_v42  ;;  %16432 = vst [vmem:[#allocation37_spill] sm:$0xff] %v14651_v61  ;;  %v14690_v41 = vsub.s32 5, %v14578_v46  ;;  %v14693_v42 = vpack.c.bf16 %v815_v24, %v814_v22  ;;  %v14696_v56 = vpack.c.bf16 %v833_v33, %v832_v31  ;;  %v818_v46 = vld [vmem:[%s16317_s5 + $0x250] sm:$0xff]  ;;  %v819_v26 = vld [vmem:[%s16317_s5 + $0x258] sm:$0xff]  ;;  %v836_v25 = vld [vmem:[%s16317_s5 + $0x2e0] sm:$0xff] }
 0x2d1   :  { %10788 = vmatpush3.bf16.msra.mxu1 %v14630_v34  ;;  %1261 = vmatprep.mubr.f32.mxu0 %v16431_v55  ;;  %v14717_v22 = vpack.c.bf16 %v817_v39, %v816_v58  ;;  %v14720_v33 = vpack.c.bf16 %v835_v3, %v834_v2  ;;  %v837_v2 = vld [vmem:[%s16317_s5 + $0x2e8] sm:$0xff] }
 0x2d2   :  { %10790 = vmatprep.subr.bf16.mxu1 %v14632_v45  ;;  %16437 = vst [vmem:[#allocation42_spill] sm:$0xff] %v14690_v41  ;;  %16438 = vst [vmem:[#allocation43_spill] sm:$0xff] %v14693_v42  ;;  %v449_v11 = vrot.slane %v14586_v51, %v14690_v41 }
 0x2d3   :  { %16439 = vst [vmem:[#allocation44_spill] sm:$0xff] %v14696_v56  ;;  %16440 = vst [vmem:[#allocation45_spill] sm:$0xff] %v14717_v22 }
 0x2d4   :  { %16441 = vst [vmem:[#allocation46_spill] sm:$0xff] %v14720_v33 }
 0x2d5   :  { %10792 = vmatpush3.bf16.msra.mxu1 %v14647_v50  ;;  %v822_v50 = vld [vmem:[%s16317_s5 + $0x270] sm:$0xff] }
 0x2d6   :  { %10794 = vmatprep.subr.bf16.mxu1 %v14651_v61 }
 0x2d9   :  { %10796 = vmatpush3.bf16.msra.mxu1 %v14666_v13 }
 0x2da   :  { %10798 = vmatprep.subr.bf16.mxu1 %v14669_v21 }
 0x2dd   :  { %10800 = vmatpush3.bf16.msra.mxu1 %v14693_v42 }
 0x2de   :  { %v669_v24 = vpop.f32.mrb[4].mxu1  ;;  %v740_v31 = vpop.f32.mrb[2].mxu0  ;;  %10802 = vmatprep.subr.bf16.mxu1 %v14696_v56  ;;  %v14750_v56 = vpack.c.bf16 %v837_v2, %v836_v25 }
 0x2df   :  { %v14728_v51 = vadd.f32 %v669_v24, %v445_v0  ;;  %v14730_v41 = vadd.f32 %v740_v31, %v453_v62  ;;  %v671_v58 = vpop.f32.mrb[5].mxu1  ;;  %v10492_v39 = vpop.f32.mrb[3].mxu0  ;;  %v14745_v62 = vpack.c.bf16 %v819_v26, %v818_v46  ;;  %v838_v46 = vld [vmem:[%s16317_s5 + $0x2f0] sm:$0xff]  ;;  %v839_v26 = vld [vmem:[%s16317_s5 + $0x2f8] sm:$0xff] }
 0x2e0   :  { %v14738_v3 = vadd.f32 %v671_v58, %v449_v11  ;;  %v820_v11 = vld [vmem:[%s16317_s5 + $0x260] sm:$0xff]  ;;  %v821_v58 = vld [vmem:[%s16317_s5 + $0x268] sm:$0xff]  ;;  %v14768_v61 = vpack.c.bf16 %v839_v26, %v838_v46 }
 0x2e1   :  { %v887_v54 = vsel %vm858_vm3, %v14728_v51, 0.0  ;;  %v902_v0 = vsel %vm901_vm4, %v14730_v41, 0.0  ;;  %10804 = vmatpush3.bf16.msra.mxu1 %v14717_v22  ;;  %v14765_v42 = vpack.c.bf16 %v821_v58, %v820_v11  ;;  %v840_v58 = vld [vmem:[%s16317_s5 + $0x300] sm:$0xff]  ;;  %v841_v46 = vld [vmem:[%s16317_s5 + $0x308] sm:$0xff] }
 0x2e2   :  { %v888_v24 = vrot.slane %v887_v54, 4  ;;  %v903_v31 = vrot.slane %v902_v0, 4  ;;  %v894_v39 = vsel %vm858_vm3, %v14738_v3, 0.0  ;;  %10806 = vmatprep.subr.bf16.mxu1 %v14720_v33 }
 0x2e3   :  { %v895_v22 = vrot.slane %v894_v39, 4 }
 0x2e4   :  { %v889_v33 = vadd.f32 %v888_v24, %v887_v54  ;;  %v904_v25 = vadd.f32 %v903_v31, %v902_v0  ;;  %v823_v54 = vld [vmem:[%s16317_s5 + $0x278] sm:$0xff] }
 0x2e5   :  { %v896_v2 = vadd.f32 %v895_v22, %v894_v39  ;;  %10808 = vmatpush3.bf16.msra.mxu1 %v14745_v62  ;;  %v14777_v31 = vpack.c.bf16 %v823_v54, %v822_v50  ;;  %v16442_v54 = vmov 0.0|0.0  }
 0x2e6   :  { %v890_v21 = vrot.slane %v889_v33, 2  ;;  %v905_v13 = vrot.slane %v904_v25, 2  ;;  %10810 = vmatprep.subr.bf16.mxu1 %v14750_v56 }
 0x2e7   :  { %v897_v0 = vrot.slane %v896_v2, 2 }
 0x2e8   :  { %v891_v22 = vadd.f32 %v890_v21, %v889_v33  ;;  %v906_v11 = vadd.f32 %v905_v13, %v904_v25  ;;  %v14787_v33 = vpack.c.bf16 %v841_v46, %v840_v58  ;;  %v851_v58 = vld [vmem:[#allocation9 + $0x48] sm:$0xff] }
 0x2e9   :  { %v898_v24 = vadd.f32 %v897_v0, %v896_v2  ;;  %10812 = vmatpush3.bf16.msra.mxu1 %v14765_v42 }
 0x2ea   :  { %v892_v39 = vrot.slane %v891_v22, 1  ;;  %10814 = vmatprep.subr.bf16.mxu1 %v14768_v61  ;;  %v907_v50 = vrot.slane %v906_v11, 1 }
 0x2eb   :  { %v899_v26 = vrot.slane %v898_v24, 1 }
 0x2ec   :  { %v893_v2 = vadd.f32 %v892_v39, %v891_v22  ;;  %v908_v13 = vadd.f32 %v907_v50, %v906_v11  ;;  %v844_v11 = vld [vmem:[#allocation9 + $0x10] sm:$0xff] }
 0x2ed   :  { %10816 = vmatpush3.bf16.msra.mxu1 %v14777_v31  ;;  %v900_v21 = vadd.f32 %v899_v26, %v898_v24  ;;  %v847_v26 = vld [vmem:[#allocation9 + $0x28] sm:$0xff] }
 0x2ee   :  { %10817 = vmatprep.subr.bf16.mxu1 %v16442_v54 }
 0x2ef   :  { %1117 = vmatprep.mubr.f32.mxu1 %v900_v21  ;;  %v854_v21 = vld [vmem:[#allocation9 + $0x60] sm:$0xff] }
 0x2f0   :  { %1118 = vmatmul.mubr.f32.vlgmr.msra.gmra.mrb[8].mxu1 %v893_v2  ;;  %v14820_v2 = vpack.c.bf16 %v851_v58, %v844_v11 }
 0x2f1   :  { %10819 = vmatpush3.bf16.msra.mxu1 %v14787_v33  ;;  %10497 = vmatprep.mubr.msk.f32.mxu1 %vm13655_vm0, %v16431_v55 }
 0x2f2   :  { %10868 = vmatprep.subr.bf16.mxu1 %v14299_v60  ;;  %v843_v60 = vld [vmem:[#allocation9 + $0x8] sm:$0xff] }
 0x2f4   :  { %10498 = vmatmul.mubr.msk.f32.vlgmr.msra.gmra.mrb[10].mxu1 %vm909_vm5, %v908_v13 }
 0x2f5   :  { %10870 = vmatpush3.bf16.msra.mxu1 %v14321_v5  ;;  %v850_v5 = vld [vmem:[#allocation9 + $0x40] sm:$0xff] }
 0x2f6   :  { %10872 = vmatprep.subr.bf16.mxu1 %v14333_v9  ;;  %v14811_v9 = vpack.c.bf16 %v850_v5, %v843_v60  ;;  %v14822_v60 = vpack.c.bf16 %v854_v21, %v847_v26  ;;  %v846_v5 = vld [vmem:[#allocation9 + $0x20] sm:$0xff] }
 0x2f8   :  { %10821 = vmatprep.subr.bf16.mxu0 %v14811_v9 }
 0x2f9   :  { %10874 = vmatpush3.bf16.msra.mxu1 %v14359_v17  ;;  %v842_v17 = vld [vmem:[#allocation9] sm:$0xff] }
 0x2fa   :  { %10876 = vmatprep.subr.bf16.mxu1 %v14371_v20  ;;  %v849_v20 = vld [vmem:[#allocation9 + $0x38] sm:$0xff] }
 0x2fd   :  { %10878 = vmatpush3.bf16.msra.mxu1 %v14395_v28  ;;  %v14813_v28 = vpack.c.bf16 %v849_v20, %v842_v17  ;;  %v853_v17 = vld [vmem:[#allocation9 + $0x58] sm:$0xff] }
 0x2fe   :  { %10880 = vmatprep.subr.bf16.mxu1 %v14407_v32  ;;  %v845_v32 = vld [vmem:[#allocation9 + $0x18] sm:$0xff]  ;;  %v14827_v20 = vpack.c.bf16 %v853_v17, %v846_v5 }
 0x2ff   :  { %10823 = vmatpush1.bf16.msra.mxu0 %v14813_v28 }
 0x301   :  { %10882 = vmatpush3.bf16.msra.mxu1 %v14419_v36  ;;  %v852_v36 = vld [vmem:[#allocation9 + $0x50] sm:$0xff] }
 0x302   :  { %10884 = vmatprep.subr.bf16.mxu1 %v14454_v48  ;;  %v14817_v48 = vpack.c.bf16 %v852_v36, %v845_v32  ;;  %v848_v32 = vld [vmem:[#allocation9 + $0x30] sm:$0xff]  ;;  %v855_v36 = vld [vmem:[#allocation9 + $0x68] sm:$0xff] }
 0x304   :  { %10825 = vmatprep.subr.bf16.mxu0 %v14817_v48 }
 0x305   :  { %10886 = vmatpush3.bf16.msra.mxu1 %v14456_v49 }
 0x306   :  { %10888 = vmatprep.subr.bf16.mxu1 %v14490_v63 }
 0x309   :  { %10890 = vmatpush3.bf16.msra.mxu1 %v14492_v1 }
 0x30a   :  { %10892 = vmatprep.subr.bf16.mxu1 %v14526_v18 }
 0x30d   :  { %10894 = vmatpush3.bf16.msra.mxu1 %v14528_v19 }
 0x30e   :  { %10896 = vmatprep.subr.bf16.mxu1 %v14562_v37 }
 0x311   :  { %10898 = vmatpush3.bf16.msra.mxu1 %v14564_v38 }
 0x312   :  { %10931 = vmatprep.subr.bf16.mxu1 %v16442_v54 }
 0x3a3   :  { %v9596_v49 = vpop.f32.mrb[6].mxu1  ;;  %v9631_v63 = vpop.f32.mrb[4].mxu0 }
 0x3a4   :  { %v9597_v1 = vpop.f32.mrb[7].mxu1  ;;  %v9632_v18 = vpop.f32.mrb[5].mxu0 }
 0x3a5   :  { %v9598_v19 = vadd.f32 %v9597_v1, %v9596_v49  ;;  %v9633_v37 = vadd.f32 %v9632_v18, %v9631_v63  ;;  %v14833_v49 = vpack.c.bf16 %v855_v36, %v848_v32 }
 0x3a7   :  { %v1050_v38 = vadd.f32 %v9633_v37, %v9598_v19 }
 0x3c3   :  { %v9666_v25 = vpop.f32.mrb[8].mxu1 }
 0x3c4   :  { %v9667_v0 = vpop.f32.mrb[9].mxu1 }
 0x3c5   :  { %v9668_v22 = vadd.f32 %v9667_v0, %v9666_v25 }
 0x3c7   :  { %v1120_v24 = vadd.f32 %v9668_v22, %v1050_v38  ;;  %v1189_v39 = vpop.f32.mrb[10].mxu1 }
 0x3c8   :  { %v10499_v46 = vpop.f32.mrb[11].mxu1 }
 0x3c9   :  { %v1190_v50 = vadd.f32 %v1189_v39, %v1120_v24 }
 0x3cb   :  { %v1193_v13 = vmul.f32 0.010204081, %v1190_v50 }
 0x3cd   :  { %9513 = vmatmul.mubr.msk.f32.vlgmr.msra.gmra.mrb[6].mxu0 %vm909_vm5, %v1193_v13 }
 0x3ce   :  { %10827 = vmatpush1.bf16.msra.mxu0 %v14820_v2  ;;  %1332 = vmatprep.mubr.f32.mxu0 %v16431_v55 }
 0x3cf   :  { %10829 = vmatprep.subr.bf16.mxu0 %v14822_v60 }
 0x3d1   :  { %9514 = vmatmul.mubr.msk.f32.vlgmr.msra.gmra.mrb[8].mxu0 %vm909_vm5, %v1193_v13 }
 0x3d2   :  { %10831 = vmatpush1.bf16.msra.mxu0 %v14827_v20  ;;  %1403 = vmatprep.mubr.f32.mxu0 %v16431_v55 }
 0x3d3   :  { %10832 = vmatprep.subr.bf16.mxu0 %v16442_v54 }
 0x3d5   :  { %9515 = vmatmul.mubr.msk.f32.vlgmr.msra.gmra.mrb[10].mxu0 %vm909_vm5, %v1193_v13 }
 0x3d6   :  { %10834 = vmatpush3.bf16.msra.mxu0 %v14833_v49  ;;  %10504 = vmatprep.mubr.msk.f32.mxu0 %vm13655_vm0, %v16431_v55 }
 0x3d7   :  { %10836 = vmatprep.subr.bf16.mxu0 %v14297_v59 }
 0x3d9   :  { %10505 = vmatmul.mubr.msk.f32.vlgmr.msra.gmra.mrb[12].mxu0 %vm909_vm5, %v1193_v13 }
 0x3da   :  { %10838 = vmatpush3.bf16.msra.mxu0 %v14319_v4 }
 0x3db   :  { %10840 = vmatprep.subr.bf16.mxu0 %v14331_v8 }
 0x3de   :  { %10842 = vmatpush3.bf16.msra.mxu0 %v14357_v16 }
 0x3df   :  { %10844 = vmatprep.subr.bf16.mxu0 %v14369_v53 }
 0x3e2   :  { %10846 = vmatpush3.bf16.msra.mxu0 %v14393_v27 }
 0x3e3   :  { %10848 = vmatprep.subr.bf16.mxu0 %v14402_v30 }
 0x3e6   :  { %10850 = vmatpush3.bf16.msra.mxu0 %v14417_v35 }
 0x3e7   :  { %10852 = vmatprep.subr.bf16.mxu0 %v14431_v40 }
 0x3ea   :  { %10854 = vmatpush3.bf16.msra.mxu0 %v14442_v44 }
 0x3eb   :  { %10856 = vmatprep.subr.bf16.mxu0 %v14466_v52 }
 0x3ee   :  { %10858 = vmatpush3.bf16.msra.mxu0 %v14478_v57 }
 0x3ef   :  { %10860 = vmatprep.subr.bf16.mxu0 %v14502_v6 }
 0x3f2   :  { %10862 = vmatpush3.bf16.msra.mxu0 %v14514_v12 }
 0x3f3   :  { %10864 = vmatprep.subr.bf16.mxu0 %v14538_v23 }
 0x3f6   :  { %10866 = vmatpush3.bf16.msra.mxu0 %v14550_v29 }
 0x3f7   :  { %10900 = vmatprep.subr.bf16.mxu0 %v14574_v43 }
 0x4a0   :  { %v1263_v59 = vpop.f32.mrb[6].mxu0 }
 0x4a1   :  { %v1483_v4 = vrot.slane %v1263_v59, %v14581_v47  ;;  %v1265_v8 = vpop.f32.mrb[7].mxu0 }
 0x4a2   :  { %v1487_v16 = vrot.slane %v1265_v8, %v14581_v47 }
 0x4a3   :  { %v14861_v53 = vsub.f32 %v14602_v7, %v1483_v4 }
 0x4a4   :  { %v14864_v27 = vsub.f32 %v14606_v14, %v1487_v16  ;;  %v1334_v30 = vpop.f32.mrb[8].mxu0 }
 0x4a5   :  { %v1515_v35 = vmul.f32 %v14861_v53, %v14861_v53  ;;  %v1491_v40 = vrot.slane %v1334_v30, %v14581_v47  ;;  %v1336_v44 = vpop.f32.mrb[9].mxu0 }
 0x4a6   :  { %v1516_v52 = vmul.f32 %v14864_v27, %v14864_v27  ;;  %v1495_v57 = vrot.slane %v1336_v44, %v14581_v47 }
 0x4a7   :  { %v1522_v6 = vsel %vm858_vm3, %v1515_v35, 0.0  ;;  %v14874_v12 = vsub.f32 %v14604_v10, %v1491_v40 }
 0x4a8   :  { %v1523_v23 = vrot.slane %v1522_v6, 4  ;;  %v1529_v29 = vsel %vm858_vm3, %v1516_v52, 0.0  ;;  %v14878_v43 = vsub.f32 %v14608_v15, %v1495_v57  ;;  %v1405_v7 = vpop.f32.mrb[10].mxu0 }
 0x4a9   :  { %v1530_v14 = vrot.slane %v1529_v29, 4  ;;  %v1517_v63 = vmul.f32 %v14874_v12, %v14874_v12  ;;  %v1407_v1 = vpop.f32.mrb[11].mxu0 }
 0x4aa   :  { %v1524_v18 = vadd.f32 %v1523_v23, %v1522_v6  ;;  %v1518_v19 = vmul.f32 %v14878_v43, %v14878_v43  ;;  %v1503_v37 = vrot.slane %v1407_v1, %v14581_v47 }
 0x4ab   :  { %v1531_v10 = vadd.f32 %v1530_v14, %v1529_v29  ;;  %v1536_v38 = vsel %vm858_vm3, %v1517_v63, 0.0 }
 0x4ac   :  { %v1525_v25 = vrot.slane %v1524_v18, 2  ;;  %v1537_v0 = vrot.slane %v1536_v38, 4  ;;  %v1543_v15 = vsel %vm858_vm3, %v1518_v19, 0.0  ;;  %v14888_v22 = vsub.f32 %v14738_v3, %v1503_v37  ;;  %v1476_v24 = vpop.f32.mrb[12].mxu0 }
 0x4ad   :  { %v1544_v39 = vrot.slane %v1543_v15, 4  ;;  %v1507_v11 = vrot.slane %v1476_v24, %v14581_v47  ;;  %v10506_v58 = vpop.f32.mrb[13].mxu0  ;;  %v1532_v46 = vrot.slane %v1531_v10, 2  ;;  %v1499_v3 = vrot.slane %v1405_v7, %v14581_v47 }
 0x4ae   :  { %v1538_v26 = vadd.f32 %v1537_v0, %v1536_v38  ;;  %v1520_v21 = vmul.f32 %v14888_v22, %v14888_v22  ;;  %v1526_v50 = vadd.f32 %v1525_v25, %v1524_v18  ;;  %v16443_v25 = vld [vmem:[#allocation36_spill] sm:$0xff]  ;;  %v16446_v58 = vld [vmem:[#allocation39_spill] sm:$0xff] }
 0x4af   :  { %v1545_v13 = vadd.f32 %v1544_v39, %v1543_v15  ;;  %v14894_v5 = vsub.f32 %v14730_v41, %v1507_v11  ;;  %v1533_v17 = vadd.f32 %v1532_v46, %v1531_v10  ;;  %v14902_v29 = vsub.f32 %v14728_v51, %v1499_v3  ;;  %v16445_v39 = vld [vmem:[#allocation38_spill] sm:$0xff] }
 0x4b0   :  { %v1539_v32 = vrot.slane %v1538_v26, 2  ;;  %v1557_v36 = vsel %vm858_vm3, %v1520_v21, 0.0  ;;  %v1527_v59 = vrot.slane %v1526_v50, 1 }
 0x4b1   :  { %v1558_v4 = vrot.slane %v1557_v36, 4  ;;  %v1521_v8 = vmul.f32 %v14894_v5, %v14894_v5  ;;  %v1534_v16 = vrot.slane %v1533_v17, 1  ;;  %v1546_v30 = vrot.slane %v1545_v13, 2 }
 0x4b2   :  { %v1540_v35 = vadd.f32 %v1539_v32, %v1538_v26  ;;  %v1528_v6 = vadd.f32 %v1527_v59, %v1526_v50  ;;  %v1519_v10 = vmul.f32 %v14902_v29, %v14902_v29  ;;  %v16448_v26 = vld [vmem:[#allocation44_spill] sm:$0xff]  ;;  %v16450_v50 = vld [vmem:[#allocation46_spill] sm:$0xff]  ;;  %v2242_v59 = vld [vmem:[#allocation13 + $0x68] sm:$0xff] }
 0x4b3   :  { %v1559_v40 = vadd.f32 %v1558_v4, %v1557_v36  ;;  %v1564_v44 = vsel %vm901_vm4, %v1521_v8, 0.0  ;;  %v1535_v52 = vadd.f32 %v1534_v16, %v1533_v17  ;;  %v1547_v41 = vadd.f32 %v1546_v30, %v1545_v13  ;;  %v2232_v17 = vld [vmem:[#allocation13 + $0x18] sm:$0xff]  ;;  %v2243_v32 = vld [vmem:[#allocation13 + $0x70] sm:$0xff]  ;;  %v2254_v8 = vld [vmem:[#allocation13 + $0xc8] sm:$0xff] }
 0x4b4   :  { %v1565_v57 = vrot.slane %v1564_v44, 4  ;;  %v1541_v23 = vrot.slane %v1540_v35, 1  ;;  %v11145_v3 = vpack.c.bf16 %v2243_v32, %v2232_v17  ;;  %v2231_v36 = vld [vmem:[#allocation13 + $0x10] sm:$0xff]  ;;  %v2253_v16 = vld [vmem:[#allocation13 + $0xc0] sm:$0xff]  ;;  %v2276_v30 = vld [vmem:[#allocation13 + $0x178] sm:$0xff] }
 0x4b5   :  { %1638 = vmatprep.mubr.f32.mxu0 %v1535_v52  ;;  %v1548_v7 = vrot.slane %v1547_v41, 1  ;;  %v1560_v14 = vrot.slane %v1559_v40, 2  ;;  %v11147_v4 = vpack.c.bf16 %v2242_v59, %v2231_v36  ;;  %v2407_v32 = vld [vmem:[#allocation13 + $0x590] sm:$0xff]  ;;  %v2430_v59 = vld [vmem:[#allocation13 + $0x648] sm:$0xff] }
 0x4b6   :  { %v1566_v63 = vadd.f32 %v1565_v57, %v1564_v44  ;;  %1639 = vmatmul.mubr.f32.vlgmr.msra.gmra.mrb[14].mxu0 %v1528_v6  ;;  %v1542_v37 = vadd.f32 %v1541_v23, %v1540_v35  ;;  %v2287_v35 = vld [vmem:[#allocation13 + $0x1d0] sm:$0xff]  ;;  %v2286_v44 = vld [vmem:[#allocation13 + $0x1c8] sm:$0xff]  ;;  %v2309_v57 = vld [vmem:[#allocation13 + $0x280] sm:$0xff] }
 0x4b7   :  { %10902 = vmatpush3.bf16.msra.mxu0 %v14630_v34  ;;  %v1549_v1 = vadd.f32 %v1548_v7, %v1547_v41  ;;  %v1561_v18 = vadd.f32 %v1560_v14, %v1559_v40  ;;  %v16444_v34 = vld [vmem:[#allocation37_spill] sm:$0xff]  ;;  %v2275_v40 = vld [vmem:[#allocation13 + $0x170] sm:$0xff]  ;;  %v2298_v41 = vld [vmem:[#allocation13 + $0x228] sm:$0xff] }
 0x4b8   :  { %v1567_v19 = vrot.slane %v1566_v63, 2  ;;  %10904 = vmatprep.subr.bf16.mxu0 %v14632_v45  ;;  %v1550_v45 = vsel %vm858_vm3, %v1519_v10, 0.0  ;;  %v11155_v52 = vpack.c.bf16 %v2286_v44, %v2275_v40  ;;  %v11157_v6 = vpack.c.bf16 %v2309_v57, %v2298_v41  ;;  %v2297_v23 = vld [vmem:[#allocation13 + $0x220] sm:$0xff]  ;;  %v2308_v7 = vld [vmem:[#allocation13 + $0x278] sm:$0xff]  ;;  %v2474_v44 = vld [vmem:[#allocation13 + $0x7a8] sm:$0xff] }
 0x4b9   :  { %1708 = vmatprep.mubr.f32.mxu1 %v1549_v1  ;;  %v1562_v38 = vrot.slane %v1561_v18, 1  ;;  %v1551_v11 = vrot.slane %v1550_v45, 4  ;;  %v11159_v14 = vpack.c.bf16 %v2308_v7, %v2297_v23  ;;  %v2331_v1 = vld [vmem:[#allocation13 + $0x330] sm:$0xff]  ;;  %v2473_v57 = vld [vmem:[#allocation13 + $0x7a0] sm:$0xff]  ;;  %v2496_v7 = vld [vmem:[#allocation13 + $0x858] sm:$0xff] }
 0x4ba   :  { %v1568_v51 = vadd.f32 %v1567_v19, %v1566_v63  ;;  %1709 = vmatmul.mubr.f32.vlgmr.msra.gmra.mrb[12].mxu1 %v1542_v37  ;;  %v2320_v63 = vld [vmem:[#allocation13 + $0x2d8] sm:$0xff]  ;;  %v2319_v19 = vld [vmem:[#allocation13 + $0x2d0] sm:$0xff]  ;;  %v2330_v37 = vld [vmem:[#allocation13 + $0x328] sm:$0xff] }
 0x4bb   :  { %10906 = vmatpush3.bf16.msra.mxu0 %v16443_v25  ;;  %v1563_v0 = vadd.f32 %v1562_v38, %v1561_v18  ;;  %10933 = vmatpush3.bf16.msra.mxu1 %v14787_v33  ;;  %v16447_v33 = vld [vmem:[#allocation43_spill] sm:$0xff]  ;;  %v1552_v46 = vadd.f32 %v1551_v11, %v1550_v45  ;;  %v11161_v18 = vpack.c.bf16 %v2331_v1, %v2320_v63  ;;  %v2364_v45 = vld [vmem:[#allocation13 + $0x438] sm:$0xff]  ;;  %v2363_v11 = vld [vmem:[#allocation13 + $0x430] sm:$0xff] }
 0x4bc   :  { %v1569_v15 = vrot.slane %v1568_v51, 1  ;;  %10908 = vmatprep.subr.bf16.mxu0 %v16444_v34  ;;  %10511 = vmatprep.mubr.msk.f32.mxu1 %vm13655_vm0, %v16431_v55  ;;  %v11163_v10 = vpack.c.bf16 %v2330_v37, %v2319_v19  ;;  %v2342_v38 = vld [vmem:[#allocation13 + $0x388] sm:$0xff]  ;;  %v2495_v1 = vld [vmem:[#allocation13 + $0x850] sm:$0xff] }
 0x4bd   :  { %1778 = vmatprep.mubr.f32.mxu0 %v1563_v0  ;;  %10935 = vmatprep.subr.bf16.mxu1 %v14811_v9  ;;  %v16449_v9 = vld [vmem:[#allocation45_spill] sm:$0xff]  ;;  %v1553_v21 = vrot.slane %v1552_v46, 2  ;;  %v2341_v0 = vld [vmem:[#allocation13 + $0x380] sm:$0xff]  ;;  %v2518_v37 = vld [vmem:[#allocation13 + $0x908] sm:$0xff] }
 0x4be   :  { %v1570_v24 = vadd.f32 %v1569_v15, %v1568_v51  ;;  %v2353_v51 = vld [vmem:[#allocation13 + $0x3e0] sm:$0xff]  ;;  %v2352_v15 = vld [vmem:[#allocation13 + $0x3d8] sm:$0xff] }
 0x4bf   :  { %10910 = vmatpush3.bf16.msra.mxu0 %v16445_v39  ;;  %v1554_v13 = vadd.f32 %v1553_v21, %v1552_v46  ;;  %v11165_v25 = vpack.c.bf16 %v2353_v51, %v2342_v38  ;;  %v11167_v34 = vpack.c.bf16 %v2352_v15, %v2341_v0  ;;  %v2386_v46 = vld [vmem:[#allocation13 + $0x4e8] sm:$0xff]  ;;  %v2385_v21 = vld [vmem:[#allocation13 + $0x4e0] sm:$0xff] }
 0x4c0   :  { %10512 = vmatmul.mubr.msk.f32.vlgmr.msra.gmra.mrb[14].mxu1 %vm909_vm5, %v1570_v24  ;;  %10912 = vmatprep.subr.bf16.mxu0 %v16446_v58  ;;  %v2375_v24 = vld [vmem:[#allocation13 + $0x490] sm:$0xff]  ;;  %v2374_v58 = vld [vmem:[#allocation13 + $0x488] sm:$0xff]  ;;  %v2517_v51 = vld [vmem:[#allocation13 + $0x900] sm:$0xff] }
 0x4c1   :  { %10937 = vmatpush1.bf16.msra.mxu1 %v14813_v28  ;;  %1925 = vmatprep.mubr.f32.mxu1 %v16431_v55  ;;  %v1555_v28 = vrot.slane %v1554_v13, 1  ;;  %v11169_v39 = vpack.c.bf16 %v2375_v24, %v2364_v45 }
 0x4c2   :  { %10939 = vmatprep.subr.bf16.mxu1 %v14817_v48 }
 0x4c3   :  { %10914 = vmatpush3.bf16.msra.mxu0 %v16447_v33  ;;  %v1556_v48 = vadd.f32 %v1555_v28, %v1554_v13  ;;  %v11171_v33 = vpack.c.bf16 %v2374_v58, %v2363_v11  ;;  %v2408_v28 = vld [vmem:[#allocation13 + $0x598] sm:$0xff] }
 0x4c4   :  { %10916 = vmatprep.subr.bf16.mxu0 %v16448_v26  ;;  %v2397_v26 = vld [vmem:[#allocation13 + $0x540] sm:$0xff] }
 0x4c7   :  { %10918 = vmatpush3.bf16.msra.mxu0 %v16449_v9  ;;  %v11173_v9 = vpack.c.bf16 %v2397_v26, %v2386_v46 }
 0x4c8   :  { %10920 = vmatprep.subr.bf16.mxu0 %v16450_v50  ;;  %v2396_v50 = vld [vmem:[#allocation13 + $0x538] sm:$0xff] }
 0x4c9   :  { %v11175_v13 = vpack.c.bf16 %v2396_v50, %v2385_v21 }
 0x4cb   :  { %10922 = vmatpush3.bf16.msra.mxu0 %v14745_v62  ;;  %v2265_v62 = vld [vmem:[#allocation13 + $0x120] sm:$0xff] }
 0x4cc   :  { %10924 = vmatprep.subr.bf16.mxu0 %v14750_v56  ;;  %v11149_v56 = vpack.c.bf16 %v2265_v62, %v2254_v8  ;;  %v2429_v62 = vld [vmem:[#allocation13 + $0x640] sm:$0xff] }
 0x4cf   :  { %10926 = vmatpush3.bf16.msra.mxu0 %v14765_v42  ;;  %v2264_v42 = vld [vmem:[#allocation13 + $0x118] sm:$0xff] }
 0x4d0   :  { %10928 = vmatprep.subr.bf16.mxu0 %v14768_v61  ;;  %v11151_v61 = vpack.c.bf16 %v2264_v42, %v2253_v16  ;;  %v2452_v42 = vld [vmem:[#allocation13 + $0x6f8] sm:$0xff] }
 0x4d3   :  { %10930 = vmatpush3.bf16.msra.mxu0 %v14777_v31  ;;  %v11153_v31 = vpack.c.bf16 %v2287_v35, %v2276_v30  ;;  %v2451_v35 = vld [vmem:[#allocation13 + $0x6f0] sm:$0xff] }
 0x4d4   :  { %11146 = vmatprep.subr.bf16.mxu0 %v11145_v3  ;;  %v2418_v3 = vld [vmem:[#allocation13 + $0x5e8] sm:$0xff] }
 0x4d5   :  { %v11179_v36 = vpack.c.bf16 %v2418_v3, %v2407_v32 }
 0x4d6   :  { %1779 = vmatmul.mubr.f32.vlgmr.msra.gmra.mrb[16].mxu0 %v1556_v48  ;;  %v2419_v48 = vld [vmem:[#allocation13 + $0x5f0] sm:$0xff] }
 0x4d7   :  { %11148 = vmatpush1.bf16.msra.mxu0 %v11147_v4  ;;  %v11177_v17 = vpack.c.bf16 %v2419_v48, %v2408_v28  ;;  %v2441_v4 = vld [vmem:[#allocation13 + $0x6a0] sm:$0xff] }
 0x4d8   :  { %11150 = vmatprep.subr.bf16.mxu0 %v11149_v56  ;;  %v11181_v8 = vpack.c.bf16 %v2441_v4, %v2430_v59  ;;  %v2440_v56 = vld [vmem:[#allocation13 + $0x698] sm:$0xff]  ;;  %v2241_v59 = vld [vmem:[#allocation13 + $0x60] sm:$0xff] }
 0x4d9   :  { %v11183_v16 = vpack.c.bf16 %v2440_v56, %v2429_v62  ;;  %v2240_v62 = vld [vmem:[#allocation13 + $0x58] sm:$0xff] }
 0x4da   :  { %v2252_v56 = vld [vmem:[#allocation13 + $0xb8] sm:$0xff] }
 0x4db   :  { %11152 = vmatpush1.bf16.msra.mxu0 %v11151_v61  ;;  %v2463_v61 = vld [vmem:[#allocation13 + $0x750] sm:$0xff] }
 0x4dc   :  { %11154 = vmatprep.subr.bf16.mxu0 %v11153_v31  ;;  %v11185_v30 = vpack.c.bf16 %v2463_v61, %v2452_v42  ;;  %v2462_v31 = vld [vmem:[#allocation13 + $0x748] sm:$0xff] }
 0x4dd   :  { %v11187_v40 = vpack.c.bf16 %v2462_v31, %v2451_v35  ;;  %v2262_v42 = vld [vmem:[#allocation13 + $0x108] sm:$0xff] }
 0x4de   :  { %v2274_v61 = vld [vmem:[#allocation13 + $0x168] sm:$0xff] }
 0x4df   :  { %11156 = vmatpush1.bf16.msra.mxu0 %v11155_v52  ;;  %v2485_v52 = vld [vmem:[#allocation13 + $0x800] sm:$0xff] }
 0x4e0   :  { %11158 = vmatprep.subr.bf16.mxu0 %v11157_v6  ;;  %v11189_v41 = vpack.c.bf16 %v2485_v52, %v2474_v44  ;;  %v2484_v6 = vld [vmem:[#allocation13 + $0x7f8] sm:$0xff] }
 0x4e1   :  { %v11191_v23 = vpack.c.bf16 %v2484_v6, %v2473_v57  ;;  %v2284_v44 = vld [vmem:[#allocation13 + $0x1b8] sm:$0xff]  ;;  %v2295_v6 = vld [vmem:[#allocation13 + $0x210] sm:$0xff] }
 0x4e2   :  { %v2296_v52 = vld [vmem:[#allocation13 + $0x218] sm:$0xff] }
 0x4e3   :  { %11160 = vmatpush1.bf16.msra.mxu0 %v11159_v14  ;;  %v2507_v14 = vld [vmem:[#allocation13 + $0x8b0] sm:$0xff] }
 0x4e4   :  { %11162 = vmatprep.subr.bf16.mxu0 %v11161_v18  ;;  %v11193_v63 = vpack.c.bf16 %v2507_v14, %v2496_v7  ;;  %v2506_v18 = vld [vmem:[#allocation13 + $0x8a8] sm:$0xff]  ;;  %v2329_v14 = vld [vmem:[#allocation13 + $0x320] sm:$0xff] }
 0x4e5   :  { %v11195_v19 = vpack.c.bf16 %v2506_v18, %v2495_v1  ;;  %v2318_v7 = vld [vmem:[#allocation13 + $0x2c8] sm:$0xff]  ;;  %v2317_v18 = vld [vmem:[#allocation13 + $0x2c0] sm:$0xff] }
 0x4e6   :  { %v10965_v1 = vpack.c.bf16 %v2329_v14, %v2318_v7  ;;  %v2516_v7 = vld [vmem:[#allocation13 + $0x8f8] sm:$0xff]  ;;  %v2527_v14 = vld [vmem:[#allocation13 + $0x950] sm:$0xff] }
 0x4e7   :  { %11164 = vmatpush1.bf16.msra.mxu0 %v11163_v10  ;;  %v2529_v10 = vld [vmem:[#allocation13 + $0x960] sm:$0xff] }
 0x4e8   :  { %11166 = vmatprep.subr.bf16.mxu0 %v11165_v25  ;;  %v11197_v38 = vpack.c.bf16 %v2529_v10, %v2518_v37  ;;  %v2528_v25 = vld [vmem:[#allocation13 + $0x958] sm:$0xff]  ;;  %v2351_v10 = vld [vmem:[#allocation13 + $0x3d0] sm:$0xff] }
 0x4e9   :  { %v11199_v0 = vpack.c.bf16 %v2528_v25, %v2517_v51  ;;  %v2340_v37 = vld [vmem:[#allocation13 + $0x378] sm:$0xff]  ;;  %v2339_v25 = vld [vmem:[#allocation13 + $0x370] sm:$0xff] }
 0x4ea   :  { %v10969_v51 = vpack.c.bf16 %v2351_v10, %v2340_v37  ;;  %v2538_v10 = vld [vmem:[#allocation13 + $0x9a8] sm:$0xff] }
 0x4eb   :  { %11168 = vmatpush1.bf16.msra.mxu0 %v11167_v34 }
 0x4ec   :  { %11170 = vmatprep.subr.bf16.mxu0 %v11169_v39 }
 0x4ef   :  { %11172 = vmatpush1.bf16.msra.mxu0 %v11171_v33 }
 0x4f0   :  { %11174 = vmatprep.subr.bf16.mxu0 %v11173_v9 }
 0x4f3   :  { %11176 = vmatpush1.bf16.msra.mxu0 %v11175_v13 }
 0x4f4   :  { %11178 = vmatprep.subr.bf16.mxu0 %v11177_v17  ;;  %v856_v17 = vld [vmem:[#allocation10] sm:$0x1] }
 0x4f7   :  { %11180 = vmatpush1.bf16.msra.mxu0 %v11179_v36  ;;  %v2230_v36 = vld [vmem:[#allocation13 + $0x8] sm:$0xff] }
 0x4f8   :  { %11182 = vmatprep.subr.bf16.mxu0 %v11181_v8  ;;  %v10949_v4 = vpack.c.bf16 %v2241_v59, %v2230_v36  ;;  %v2229_v8 = vld [vmem:[#allocation13] sm:$0xff]  ;;  %v2439_v36 = vld [vmem:[#allocation13 + $0x690] sm:$0xff] }
 0x4fb   :  { %11184 = vmatpush1.bf16.msra.mxu0 %v11183_v16  ;;  %v2263_v16 = vld [vmem:[#allocation13 + $0x110] sm:$0xff] }
 0x4fc   :  { %11186 = vmatprep.subr.bf16.mxu0 %v11185_v30  ;;  %v2285_v30 = vld [vmem:[#allocation13 + $0x1c0] sm:$0xff] }
 0x4fd   :  { %v10957_v31 = vpack.c.bf16 %v2285_v30, %v2274_v61  ;;  %v2472_v61 = vld [vmem:[#allocation13 + $0x798] sm:$0xff]  ;;  %v2483_v30 = vld [vmem:[#allocation13 + $0x7f0] sm:$0xff] }
 0x4ff   :  { %11188 = vmatpush1.bf16.msra.mxu0 %v11187_v40  ;;  %v2273_v40 = vld [vmem:[#allocation13 + $0x160] sm:$0xff] }
 0x500   :  { %11190 = vmatprep.subr.bf16.mxu0 %v11189_v41  ;;  %v10959_v41 = vpack.c.bf16 %v2284_v44, %v2273_v40  ;;  %v2471_v40 = vld [vmem:[#allocation13 + $0x790] sm:$0xff]  ;;  %v2482_v44 = vld [vmem:[#allocation13 + $0x7e8] sm:$0xff] }
 0x503   :  { %11192 = vmatpush1.bf16.msra.mxu0 %v11191_v23  ;;  %v2306_v23 = vld [vmem:[#allocation13 + $0x268] sm:$0xff] }
 0x504   :  { %11194 = vmatprep.subr.bf16.mxu0 %v11193_v63  ;;  %v10963_v63 = vpack.c.bf16 %v2306_v23, %v2295_v6  ;;  %v2493_v6 = vld [vmem:[#allocation13 + $0x840] sm:$0xff]  ;;  %v2504_v23 = vld [vmem:[#allocation13 + $0x898] sm:$0xff] }
 0x507   :  { %11196 = vmatpush1.bf16.msra.mxu0 %v11195_v19  ;;  %v2328_v19 = vld [vmem:[#allocation13 + $0x318] sm:$0xff] }
 0x508   :  { %11198 = vmatprep.subr.bf16.mxu0 %v11197_v38  ;;  %v10967_v38 = vpack.c.bf16 %v2328_v19, %v2317_v18  ;;  %v2515_v18 = vld [vmem:[#allocation13 + $0x8f0] sm:$0xff]  ;;  %v2526_v19 = vld [vmem:[#allocation13 + $0x948] sm:$0xff] }
 0x509   :  { %v11003_v37 = vpack.c.bf16 %v2526_v19, %v2515_v18  ;;  %v2615_v18 = vld [vmem:[#allocation13 + $0xc10] sm:$0xff] }
 0x50b   :  { %11200 = vmatpush1.bf16.msra.mxu0 %v11199_v0  ;;  %v2350_v0 = vld [vmem:[#allocation13 + $0x3c8] sm:$0xff] }
 0x589   :  { %v9707_v15 = vpop.f32.mrb[14].mxu0 }
 0x58a   :  { %v9708_v34 = vpop.f32.mrb[15].mxu0 }
 0x58b   :  { %v9709_v45 = vadd.f32 %v9708_v34, %v9707_v15  ;;  %v2362_v15 = vld [vmem:[#allocation13 + $0x428] sm:$0xff]  ;;  %v2373_v34 = vld [vmem:[#allocation13 + $0x480] sm:$0xff] }
 0x58d   :  { %v9742_v24 = vpop.f32.mrb[12].mxu1 }
 0x58e   :  { %v9743_v39 = vpop.f32.mrb[13].mxu1 }
 0x58f   :  { %v9744_v11 = vadd.f32 %v9743_v39, %v9742_v24  ;;  %v10973_v24 = vpack.c.bf16 %v2373_v34, %v2362_v15  ;;  %v2361_v39 = vld [vmem:[#allocation13 + $0x420] sm:$0xff]  ;;  %v2548_v34 = vld [vmem:[#allocation13 + $0x9f8] sm:$0xff] }
 0x590   :  { %v2537_v15 = vld [vmem:[#allocation13 + $0x9a0] sm:$0xff] }
 0x591   :  { %v1711_v58 = vadd.f32 %v9744_v11, %v9709_v45  ;;  %v10971_v45 = vpack.c.bf16 %v2350_v0, %v2339_v25  ;;  %v2372_v11 = vld [vmem:[#allocation13 + $0x478] sm:$0xff]  ;;  %v2551_v0 = vld [vmem:[#allocation13 + $0xa10] sm:$0xff] }
 0x593   :  { %v1850_v33 = vpop.f32.mrb[14].mxu1 }
 0x594   :  { %v10513_v46 = vpop.f32.mrb[15].mxu1 }
 0x595   :  { %v10975_v46 = vpack.c.bf16 %v2372_v11, %v2361_v39  ;;  %v2539_v39 = vld [vmem:[#allocation13 + $0x9b0] sm:$0xff]  ;;  %v2550_v11 = vld [vmem:[#allocation13 + $0xa08] sm:$0xff] }
 0x5a9   :  { %v9777_v26 = vpop.f32.mrb[16].mxu0 }
 0x5aa   :  { %v9778_v9 = vpop.f32.mrb[17].mxu0 }
 0x5ab   :  { %v9779_v21 = vadd.f32 %v9778_v9, %v9777_v26  ;;  %v2383_v9 = vld [vmem:[#allocation13 + $0x4d0] sm:$0xff] }
 0x5ad   :  { %v1781_v50 = vadd.f32 %v9779_v21, %v1711_v58  ;;  %v2384_v58 = vld [vmem:[#allocation13 + $0x4d8] sm:$0xff]  ;;  %v2394_v21 = vld [vmem:[#allocation13 + $0x528] sm:$0xff] }
 0x5af   :  { %v1851_v13 = vadd.f32 %v1850_v33, %v1781_v50  ;;  %v2395_v33 = vld [vmem:[#allocation13 + $0x530] sm:$0xff]  ;;  %v2406_v50 = vld [vmem:[#allocation13 + $0x588] sm:$0xff] }
 0x5b0   :  { %v10977_v26 = vpack.c.bf16 %v2395_v33, %v2384_v58  ;;  %v11203_v58 = vpack.c.bf16 %v2550_v11, %v2539_v39  ;;  %v2560_v33 = vld [vmem:[#allocation13 + $0xa58] sm:$0xff]  ;;  %v16454_v39 = vld [vmem:[#allocation40_spill] sm:$0xff] }
 0x5b1   :  { %v1854_v28 = vmul.f32 0.010204081, %v1851_v13  ;;  %v2417_v13 = vld [vmem:[#allocation13 + $0x5e0] sm:$0xff] }
 0x5b3   :  { %v1855_v48 = vadd.f32 1e-05, %v1854_v28  ;;  %v10979_v28 = vpack.c.bf16 %v2394_v21, %v2383_v9  ;;  %v2573_v21 = vld [vmem:[#allocation13 + $0xac0] sm:$0xff] }
 0x5b5   :  { %13304 = vrsqrt.f32 %v1855_v48  ;;  %v10981_v48 = vpack.c.bf16 %v2417_v13, %v2406_v50  ;;  %v2559_v50 = vld [vmem:[#allocation13 + $0xa50] sm:$0xff]  ;;  %v2570_v13 = vld [vmem:[#allocation13 + $0xaa8] sm:$0xff] }
 0x5bf   :  { %v13305_v32 = vpop.eup %13304 }
 0x5c0   :  { %v1857_v3 = vmul.f32 %v13305_v32, %v856_v17  ;;  %v2405_v17 = vld [vmem:[#allocation13 + $0x580] sm:$0xff]  ;;  %v2416_v32 = vld [vmem:[#allocation13 + $0x5d8] sm:$0xff] }
 0x5c1   :  { %v10983_v59 = vpack.c.bf16 %v2416_v32, %v2405_v17  ;;  %v2561_v17 = vld [vmem:[#allocation13 + $0xa60] sm:$0xff]  ;;  %v2572_v32 = vld [vmem:[#allocation13 + $0xab8] sm:$0xff] }
 0x5c2   :  { %9518 = vmatmul.mubr.msk.f32.vlgmr.msra.gmra.mrb[16].mxu1 %vm909_vm5, %v1857_v3 }
 0x5c3   :  { %10941 = vmatpush1.bf16.msra.mxu1 %v14820_v2  ;;  %1996 = vmatprep.mubr.f32.mxu1 %v16431_v55  ;;  %v10951_v2 = vpack.c.bf16 %v2240_v62, %v2229_v8  ;;  %v2427_v8 = vld [vmem:[#allocation13 + $0x630] sm:$0xff]  ;;  %v2438_v62 = vld [vmem:[#allocation13 + $0x688] sm:$0xff] }
 0x5c4   :  { %10943 = vmatprep.subr.bf16.mxu1 %v14822_v60  ;;  %v10953_v60 = vpack.c.bf16 %v2263_v16, %v2252_v56  ;;  %v2450_v56 = vld [vmem:[#allocation13 + $0x6e8] sm:$0xff]  ;;  %v2461_v16 = vld [vmem:[#allocation13 + $0x740] sm:$0xff] }
 0x5c6   :  { %9519 = vmatmul.mubr.msk.f32.vlgmr.msra.gmra.mrb[18].mxu1 %vm909_vm5, %v1857_v3 }
 0x5c7   :  { %10945 = vmatpush1.bf16.msra.mxu1 %v14827_v20  ;;  %2067 = vmatprep.mubr.f32.mxu1 %v16431_v55  ;;  %v2251_v20 = vld [vmem:[#allocation13 + $0xb0] sm:$0xff] }
 0x5c8   :  { %10946 = vmatprep.subr.bf16.mxu1 %v16442_v54  ;;  %v10955_v35 = vpack.c.bf16 %v2262_v42, %v2251_v20  ;;  %v2449_v20 = vld [vmem:[#allocation13 + $0x6e0] sm:$0xff]  ;;  %v2460_v42 = vld [vmem:[#allocation13 + $0x738] sm:$0xff] }
 0x5ca   :  { %9520 = vmatmul.mubr.msk.f32.vlgmr.msra.gmra.mrb[20].mxu1 %vm909_vm5, %v1857_v3 }
 0x5cb   :  { %10948 = vmatpush3.bf16.msra.mxu1 %v14833_v49  ;;  %10518 = vmatprep.mubr.msk.f32.mxu1 %vm13655_vm0, %v16431_v55  ;;  %v2307_v49 = vld [vmem:[#allocation13 + $0x270] sm:$0xff] }
 0x5cc   :  { %10950 = vmatprep.subr.bf16.mxu1 %v10949_v4  ;;  %v10961_v57 = vpack.c.bf16 %v2307_v49, %v2296_v52  ;;  %v2494_v52 = vld [vmem:[#allocation13 + $0x848] sm:$0xff]  ;;  %v2505_v49 = vld [vmem:[#allocation13 + $0x8a0] sm:$0xff] }
 0x5ce   :  { %10519 = vmatmul.mubr.msk.f32.vlgmr.msra.gmra.mrb[22].mxu1 %vm909_vm5, %v1857_v3  ;;  %v2428_v3 = vld [vmem:[#allocation13 + $0x638] sm:$0xff] }
 0x5cf   :  { %10952 = vmatpush1.bf16.msra.mxu1 %v10951_v2  ;;  %v10985_v4 = vpack.c.bf16 %v2439_v36, %v2428_v3  ;;  %v10987_v2 = vpack.c.bf16 %v2438_v62, %v2427_v8  ;;  %v11207_v3 = vpack.c.bf16 %v2572_v32, %v2561_v17  ;;  %v2582_v36 = vld [vmem:[#allocation13 + $0xb08] sm:$0xff]  ;;  %v2595_v62 = vld [vmem:[#allocation13 + $0xb70] sm:$0xff]  ;;  %v16455_v32 = vld [vmem:[#allocation42_spill] sm:$0xff] }
 0x5d0   :  { %10954 = vmatprep.subr.bf16.mxu1 %v10953_v60  ;;  %v10989_v60 = vpack.c.bf16 %v2461_v16, %v2450_v56  ;;  %v14943_v16 = vld [vmem:[#allocation12] sm:$0x7f] }
 0x5d1   :  { %v2199_v11 = vrot.slane %v14943_v16, %v16454_v39 }
 0x5d3   :  { %10956 = vmatpush1.bf16.msra.mxu1 %v10955_v35  ;;  %v10991_v35 = vpack.c.bf16 %v2460_v42, %v2449_v20  ;;  %v2183_v20 = vrot.slane %v14943_v16, %v14581_v47 }
 0x5d4   :  { %10958 = vmatprep.subr.bf16.mxu1 %v10957_v31  ;;  %v10993_v31 = vpack.c.bf16 %v2483_v30, %v2472_v61  ;;  %v16451_v30 = vld [vmem:[#allocation34_spill] sm:$0xff] }
 0x5d7   :  { %10960 = vmatpush1.bf16.msra.mxu1 %v10959_v41  ;;  %v10995_v41 = vpack.c.bf16 %v2482_v44, %v2471_v40  ;;  %v2581_v40 = vld [vmem:[#allocation13 + $0xb00] sm:$0xff] }
 0x5d8   :  { %10962 = vmatprep.subr.bf16.mxu1 %v10961_v57  ;;  %v10997_v57 = vpack.c.bf16 %v2505_v49, %v2494_v52  ;;  %v2592_v49 = vld [vmem:[#allocation13 + $0xb58] sm:$0xff] }
 0x5db   :  { %10964 = vmatpush1.bf16.msra.mxu1 %v10963_v63  ;;  %v10999_v63 = vpack.c.bf16 %v2504_v23, %v2493_v6 }
 0x5dc   :  { %10966 = vmatprep.subr.bf16.mxu1 %v10965_v1  ;;  %v11001_v1 = vpack.c.bf16 %v2527_v14, %v2516_v7  ;;  %v16452_v7 = vld [vmem:[#allocation33_spill] sm:$0xff] }
 0x5dd   :  { %v2191_v14 = vrot.slane %v14943_v16, %v16452_v7 }
 0x5df   :  { %10968 = vmatpush1.bf16.msra.mxu1 %v10967_v38  ;;  %v2549_v38 = vld [vmem:[#allocation13 + $0xa00] sm:$0xff] }
 0x5e0   :  { %10970 = vmatprep.subr.bf16.mxu1 %v10969_v51  ;;  %v2540_v51 = vld [vmem:[#allocation13 + $0x9b8] sm:$0xff]  ;;  %v11005_v25 = vpack.c.bf16 %v2549_v38, %v2538_v10  ;;  %v2617_v38 = vld [vmem:[#allocation13 + $0xc20] sm:$0xff] }
 0x5e3   :  { %10972 = vmatpush1.bf16.msra.mxu1 %v10971_v45  ;;  %v11201_v45 = vpack.c.bf16 %v2551_v0, %v2540_v51 }
 0x5e4   :  { %10974 = vmatprep.subr.bf16.mxu1 %v10973_v24  ;;  %v11007_v24 = vpack.c.bf16 %v2548_v34, %v2537_v15  ;;  %v2603_v15 = vld [vmem:[#allocation13 + $0xbb0] sm:$0xff] }
 0x5e5   :  { %11202 = vmatprep.subr.bf16.mxu0 %v11201_v45 }
 0x5e6   :  { %11204 = vmatpush1.bf16.msra.mxu0 %v11203_v58 }
 0x5e7   :  { %10976 = vmatpush1.bf16.msra.mxu1 %v10975_v46  ;;  %v2571_v46 = vld [vmem:[#allocation13 + $0xab0] sm:$0xff] }
 0x5e8   :  { %10978 = vmatprep.subr.bf16.mxu1 %v10977_v26  ;;  %v2562_v26 = vld [vmem:[#allocation13 + $0xa68] sm:$0xff]  ;;  %v11009_v9 = vpack.c.bf16 %v2571_v46, %v2560_v33  ;;  %v2605_v46 = vld [vmem:[#allocation13 + $0xbc0] sm:$0xff] }
 0x5e9   :  { %v2614_v33 = vld [vmem:[#allocation13 + $0xc08] sm:$0xff] }
 0x5eb   :  { %10980 = vmatpush1.bf16.msra.mxu1 %v10979_v28  ;;  %v11205_v28 = vpack.c.bf16 %v2573_v21, %v2562_v26  ;;  %v2616_v26 = vld [vmem:[#allocation13 + $0xc18] sm:$0xff] }
 0x5ec   :  { %10982 = vmatprep.subr.bf16.mxu1 %v10981_v48  ;;  %v11011_v48 = vpack.c.bf16 %v2570_v13, %v2559_v50 }
 0x5ed   :  { %11206 = vmatprep.subr.bf16.mxu0 %v11205_v28  ;;  %v2626_v28 = vld [vmem:[#allocation13 + $0xc68] sm:$0xff] }
 0x5ee   :  { %11208 = vmatpush1.bf16.msra.mxu0 %v11207_v3  ;;  %v2203_v3 = vrot.slane %v14943_v16, %v16455_v32 }
 0x5ef   :  { %10984 = vmatpush1.bf16.msra.mxu1 %v10983_v59  ;;  %v2593_v59 = vld [vmem:[#allocation13 + $0xb60] sm:$0xff] }
 0x5f0   :  { %10986 = vmatprep.subr.bf16.mxu1 %v10985_v4  ;;  %v2584_v4 = vld [vmem:[#allocation13 + $0xb18] sm:$0xff]  ;;  %v11013_v8 = vpack.c.bf16 %v2593_v59, %v2582_v36  ;;  %v2639_v59 = vld [vmem:[#allocation13 + $0xcd0] sm:$0xff] }
 0x5f1   :  { %v11209_v56 = vpack.c.bf16 %v2595_v62, %v2584_v4  ;;  %v2628_v36 = vld [vmem:[#allocation13 + $0xc78] sm:$0xff]  ;;  %v11215_v62 = vpack.c.bf16 %v2616_v26, %v2605_v46  ;;  %v2671_v26 = vld [vmem:[#allocation13 + $0xdd0] sm:$0xff] }
 0x5f3   :  { %10988 = vmatpush1.bf16.msra.mxu1 %v10987_v2  ;;  %11210 = vmatprep.subr.bf16.mxu0 %v11209_v56 }
 0x5f4   :  { %10990 = vmatprep.subr.bf16.mxu1 %v10989_v60 }
 0x5f7   :  { %10992 = vmatpush1.bf16.msra.mxu1 %v10991_v35  ;;  %v2187_v35 = vrot.slane %v14943_v16, %v16451_v30 }
 0x5f8   :  { %10994 = vmatprep.subr.bf16.mxu1 %v10993_v31 }
 0x5fb   :  { %10996 = vmatpush1.bf16.msra.mxu1 %v10995_v41  ;;  %v2583_v41 = vld [vmem:[#allocation13 + $0xb10] sm:$0xff] }
 0x5fc   :  { %10998 = vmatprep.subr.bf16.mxu1 %v10997_v57  ;;  %v2594_v57 = vld [vmem:[#allocation13 + $0xb68] sm:$0xff] }
 0x5fd   :  { %v11211_v0 = vpack.c.bf16 %v2594_v57, %v2583_v41  ;;  %v2638_v41 = vld [vmem:[#allocation13 + $0xcc8] sm:$0xff] }
 0x5ff   :  { %11000 = vmatpush1.bf16.msra.mxu1 %v10999_v63 }
 0x600   :  { %11002 = vmatprep.subr.bf16.mxu1 %v11001_v1  ;;  %v2604_v1 = vld [vmem:[#allocation13 + $0xbb8] sm:$0xff] }
 0x601   :  { %v11017_v58 = vpack.c.bf16 %v2615_v18, %v2604_v1  ;;  %v2647_v18 = vld [vmem:[#allocation13 + $0xd10] sm:$0xff] }
 0x603   :  { %11004 = vmatpush1.bf16.msra.mxu1 %v11003_v37 }
 0x604   :  { %11006 = vmatprep.subr.bf16.mxu1 %v11005_v25  ;;  %v11015_v25 = vpack.c.bf16 %v2592_v49, %v2581_v40  ;;  %v2627_v49 = vld [vmem:[#allocation13 + $0xc70] sm:$0xff] }
 0x605   :  { %v11219_v1 = vpack.c.bf16 %v2638_v41, %v2627_v49  ;;  %v2715_v41 = vld [vmem:[#allocation13 + $0xf30] sm:$0xff] }
 0x607   :  { %11008 = vmatpush1.bf16.msra.mxu1 %v11007_v24 }
 0x608   :  { %11010 = vmatprep.subr.bf16.mxu1 %v11009_v9 }
 0x60b   :  { %11012 = vmatpush1.bf16.msra.mxu1 %v11011_v48  ;;  %v2637_v48 = vld [vmem:[#allocation13 + $0xcc0] sm:$0xff] }
 0x60c   :  { %11014 = vmatprep.subr.bf16.mxu1 %v11013_v8  ;;  %v11019_v8 = vpack.c.bf16 %v2614_v33, %v2603_v15  ;;  %v2672_v15 = vld [vmem:[#allocation13 + $0xdd8] sm:$0xff] }
 0x695   :  { %v1927_v2 = vpop.f32.mrb[16].mxu1 }
 0x696   :  { %v2147_v60 = vrot.slane %v1927_v2, %v14581_v47  ;;  %v1929_v42 = vpop.f32.mrb[17].mxu1 }
 0x697   :  { %v2151_v61 = vrot.slane %v1929_v42, %v14581_v47 }
 0x698   :  { %v2172_v31 = vmul.f32 %v2147_v60, %v14861_v53  ;;  %v16453_v53 = vld [vmem:[#allocation35_spill] sm:$0xff] }
 0x699   :  { %v2173_v44 = vmul.f32 %v2151_v61, %v14864_v27  ;;  %v1998_v52 = vpop.f32.mrb[18].mxu1  ;;  %v2195_v10 = vrot.slane %v14943_v16, %v16453_v53  ;;  %v2606_v27 = vld [vmem:[#allocation13 + $0xbc8] sm:$0xff]  ;;  %v11021_v61 = vpack.c.bf16 %v2637_v48, %v2626_v28  ;;  %v2705_v48 = vld [vmem:[#allocation13 + $0xee0] sm:$0xff] }
 0x69a   :  { %v2215_v6 = vadd.f32 %v2183_v20, %v2172_v31  ;;  %v2155_v23 = vrot.slane %v1998_v52, %v14581_v47  ;;  %v2000_v63 = vpop.f32.mrb[19].mxu1  ;;  %v11213_v13 = vpack.c.bf16 %v2617_v38, %v2606_v27  ;;  %v16456_v20 = vld [vmem:[#allocation41_spill] sm:$0xff]  ;;  %v11217_v52 = vpack.c.bf16 %v2639_v59, %v2628_v36  ;;  %v2649_v38 = vld [vmem:[#allocation13 + $0xd20] sm:$0xff]  ;;  %v2694_v28 = vld [vmem:[#allocation13 + $0xe88] sm:$0xff] }
 0x69b   :  { %v2216_v19 = vadd.f32 %v2187_v35, %v2173_v44  ;;  %v2159_v37 = vrot.slane %v2000_v63, %v14581_v47  ;;  %v2207_v42 = vrot.slane %v14943_v16, %v16456_v20  ;;  %v2625_v35 = vld [vmem:[#allocation13 + $0xc60] sm:$0xff]  ;;  %v2636_v31 = vld [vmem:[#allocation13 + $0xcb8] sm:$0xff]  ;;  %v2659_v16 = vld [vmem:[#allocation13 + $0xd70] sm:$0xff] }
 0x69c   :  { %v2174_v51 = vmul.f32 %v2155_v23, %v14874_v12  ;;  %v14965_v9 = vmax.f32 %v2215_v6, 0.0  ;;  %v2650_v6 = vld [vmem:[#allocation13 + $0xd28] sm:$0xff]  ;;  %v2661_v23 = vld [vmem:[#allocation13 + $0xd80] sm:$0xff]  ;;  %v11023_v63 = vpack.c.bf16 %v2636_v31, %v2625_v35 }
 0x69d   :  { %v14960_v34 = vmax.f32 %v2216_v19, 0.0  ;;  %v2175_v45 = vmul.f32 %v2159_v37, %v14878_v43  ;;  %v2069_v24 = vpop.f32.mrb[20].mxu1  ;;  %v2658_v19 = vld [vmem:[#allocation13 + $0xd68] sm:$0xff]  ;;  %v11221_v27 = vpack.c.bf16 %v2661_v23, %v2650_v6  ;;  %v2747_v6 = vld [vmem:[#allocation13 + $0x1030] sm:$0xff] }
 0x69e   :  { %v14967_v21 = vadd.f32 %v2191_v14, %v2174_v51  ;;  %v2163_v12 = vrot.slane %v2069_v24, %v14581_v47  ;;  %v2071_v50 = vpop.f32.mrb[21].mxu1  ;;  %v2660_v51 = vld [vmem:[#allocation13 + $0xd78] sm:$0xff]  ;;  %v2702_v36 = vld [vmem:[#allocation13 + $0xec8] sm:$0xff] }
 0x69f   :  { %v2218_v17 = vadd.f32 %v2195_v10, %v2175_v45  ;;  %v2167_v43 = vrot.slane %v2071_v50, %v14581_v47  ;;  %3433 = vmatprep.mubr.f32.mxu1 %v14960_v34  ;;  %3717 = vmatprep.mubr.f32.mxu0 %v14960_v34  ;;  %v2683_v45 = vld [vmem:[#allocation13 + $0xe30] sm:$0xff]  ;;  %v11223_v24 = vpack.c.bf16 %v2660_v51, %v2649_v38  ;;  %v2692_v50 = vld [vmem:[#allocation13 + $0xe78] sm:$0xff]  ;;  %v2738_v23 = vld [vmem:[#allocation13 + $0xfe8] sm:$0xff] }
 0x6a0   :  { %v2176_v4 = vmul.f32 %v2163_v12, %v14902_v29  ;;  %3434 = vmatmul.mubr.f32.vlgmr.msra.gmra.mrb[24].mxu1 %v14965_v9  ;;  %3718 = vmatmul.mubr.f32.vlgmr.msra.gmra.mrb[18].mxu0 %v14965_v9  ;;  %v11225_v46 = vpack.c.bf16 %v2683_v45, %v2672_v15  ;;  %v2682_v12 = vld [vmem:[#allocation13 + $0xe28] sm:$0xff]  ;;  %v2737_v38 = vld [vmem:[#allocation13 + $0xfe0] sm:$0xff]  ;;  %v2748_v51 = vld [vmem:[#allocation13 + $0x1038] sm:$0xff] }
 0x6a1   :  { %v14978_v56 = vmax.f32 %v2218_v17, 0.0  ;;  %v2177_v2 = vmul.f32 %v2167_v43, %v14888_v22  ;;  %11016 = vmatpush1.bf16.msra.mxu1 %v11015_v25  ;;  %11212 = vmatpush1.bf16.msra.mxu0 %v11211_v0  ;;  %v2140_v60 = vpop.f32.mrb[22].mxu1  ;;  %v2648_v22 = vld [vmem:[#allocation13 + $0xd18] sm:$0xff]  ;;  %v2670_v25 = vld [vmem:[#allocation13 + $0xdc8] sm:$0xff]  ;;  %v2681_v0 = vld [vmem:[#allocation13 + $0xe20] sm:$0xff]  ;;  %v11227_v43 = vpack.c.bf16 %v2682_v12, %v2671_v26 }
 0x6a2   :  { %v14983_v29 = vadd.f32 %v2199_v11, %v2176_v4  ;;  %v2171_v40 = vrot.slane %v2140_v60, %v14581_v47  ;;  %v10520_v44 = vpop.f32.mrb[23].mxu1  ;;  %11018 = vmatprep.subr.bf16.mxu1 %v11017_v58  ;;  %11214 = vmatprep.subr.bf16.mxu0 %v11213_v13  ;;  %v11025_v10 = vpack.c.bf16 %v2659_v16, %v2648_v22  ;;  %v2669_v11 = vld [vmem:[#allocation13 + $0xdc0] sm:$0xff]  ;;  %v2680_v58 = vld [vmem:[#allocation13 + $0xe18] sm:$0xff]  ;;  %v2703_v13 = vld [vmem:[#allocation13 + $0xed0] sm:$0xff] }
 0x6a3   :  { %v14986_v57 = vadd.f32 %v2203_v3, %v2177_v2  ;;  %3504 = vmatprep.mubr.f32.mxu1 %v14978_v56  ;;  %3788 = vmatprep.mubr.f32.mxu0 %v14978_v56  ;;  %v11029_v33 = vpack.c.bf16 %v2681_v0, %v2670_v25  ;;  %v11031_v17 = vpack.c.bf16 %v2680_v58, %v2669_v11  ;;  %v2691_v3 = vld [vmem:[#allocation13 + $0xe70] sm:$0xff]  ;;  %v2714_v2 = vld [vmem:[#allocation13 + $0xf28] sm:$0xff]  ;;  %v2725_v60 = vld [vmem:[#allocation13 + $0xf80] sm:$0xff] }
 0x6a4   :  { %v2178_v14 = vmul.f32 %v2171_v40, %v14894_v5  ;;  %v11027_v5 = vpack.c.bf16 %v2658_v19, %v2647_v18  ;;  %v11033_v59 = vpack.c.bf16 %v2703_v13, %v2692_v50  ;;  %v11229_v4 = vpack.c.bf16 %v2705_v48, %v2694_v28  ;;  %v2713_v40 = vld [vmem:[#allocation13 + $0xf20] sm:$0xff]  ;;  %v2724_v44 = vld [vmem:[#allocation13 + $0xf78] sm:$0xff]  ;;  %v2726_v22 = vld [vmem:[#allocation13 + $0xf88] sm:$0xff] }
 0x6a5   :  { %11020 = vmatpush1.bf16.msra.mxu1 %v11019_v8  ;;  %11216 = vmatpush1.bf16.msra.mxu0 %v11215_v62  ;;  %v2693_v8 = vld [vmem:[#allocation13 + $0xe80] sm:$0xff]  ;;  %v2704_v62 = vld [vmem:[#allocation13 + $0xed8] sm:$0xff]  ;;  %v11035_v35 = vpack.c.bf16 %v2702_v36, %v2691_v3  ;;  %v2735_v18 = vld [vmem:[#allocation13 + $0xfd0] sm:$0xff] }
 0x6a6   :  { %v14991_v37 = vadd.f32 %v2207_v42, %v2178_v14  ;;  %11022 = vmatprep.subr.bf16.mxu1 %v11021_v61  ;;  %11218 = vmatprep.subr.bf16.mxu0 %v11217_v52  ;;  %v2716_v42 = vld [vmem:[#allocation13 + $0xf38] sm:$0xff]  ;;  %v2727_v61 = vld [vmem:[#allocation13 + $0xf90] sm:$0xff]  ;;  %v11231_v31 = vpack.c.bf16 %v2704_v62, %v2693_v8  ;;  %v11037_v52 = vpack.c.bf16 %v2725_v60, %v2714_v2  ;;  %v2749_v14 = vld [vmem:[#allocation13 + $0x1040] sm:$0xff] }
 0x6a7   :  { %v11233_v49 = vpack.c.bf16 %v2727_v61, %v2716_v42  ;;  %v2736_v16 = vld [vmem:[#allocation13 + $0xfd8] sm:$0xff]  ;;  %v2746_v19 = vld [vmem:[#allocation13 + $0x1028] sm:$0xff]  ;;  %v2769_v0 = vld [vmem:[#allocation13 + $0x10e0] sm:$0xff] }
 0x6a8   :  { %v2758_v25 = vld [vmem:[#allocation13 + $0x1088] sm:$0xff]  ;;  %v2760_v15 = vld [vmem:[#allocation13 + $0x1098] sm:$0xff]  ;;  %v2771_v45 = vld [vmem:[#allocation13 + $0x10f0] sm:$0xff] }
 0x6a9   :  { %11024 = vmatpush1.bf16.msra.mxu1 %v11023_v63  ;;  %11220 = vmatpush1.bf16.msra.mxu0 %v11219_v1  ;;  %v11039_v63 = vpack.c.bf16 %v2724_v44, %v2713_v40  ;;  %v11235_v1 = vpack.c.bf16 %v2726_v22, %v2715_v41  ;;  %v2757_v11 = vld [vmem:[#allocation13 + $0x1080] sm:$0xff]  ;;  %v2768_v58 = vld [vmem:[#allocation13 + $0x10d8] sm:$0xff]  ;;  %v2759_v26 = vld [vmem:[#allocation13 + $0x1090] sm:$0xff] }
 0x6aa   :  { %11026 = vmatprep.subr.bf16.mxu1 %v11025_v10  ;;  %11222 = vmatprep.subr.bf16.mxu0 %v11221_v27  ;;  %v11041_v10 = vpack.c.bf16 %v2747_v6, %v2736_v16  ;;  %v11237_v27 = vpack.c.bf16 %v2749_v14, %v2738_v23  ;;  %v2770_v12 = vld [vmem:[#allocation13 + $0x10e8] sm:$0xff]  ;;  %v2780_v50 = vld [vmem:[#allocation13 + $0x1138] sm:$0xff]  ;;  %v2791_v13 = vld [vmem:[#allocation13 + $0x1190] sm:$0xff] }
 0x6ab   :  { %v2782_v28 = vld [vmem:[#allocation13 + $0x1148] sm:$0xff]  ;;  %v2793_v48 = vld [vmem:[#allocation13 + $0x11a0] sm:$0xff]  ;;  %v2779_v3 = vld [vmem:[#allocation13 + $0x1130] sm:$0xff] }
 0x6ac   :  { %v2790_v36 = vld [vmem:[#allocation13 + $0x1188] sm:$0xff]  ;;  %v2781_v8 = vld [vmem:[#allocation13 + $0x1140] sm:$0xff]  ;;  %v2792_v62 = vld [vmem:[#allocation13 + $0x1198] sm:$0xff] }
 0x6ad   :  { %11028 = vmatpush1.bf16.msra.mxu1 %v11027_v5  ;;  %11224 = vmatpush1.bf16.msra.mxu0 %v11223_v24  ;;  %v11043_v5 = vpack.c.bf16 %v2746_v19, %v2735_v18  ;;  %v11239_v24 = vpack.c.bf16 %v2748_v51, %v2737_v38  ;;  %v2802_v2 = vld [vmem:[#allocation13 + $0x11e8] sm:$0xff]  ;;  %v2813_v60 = vld [vmem:[#allocation13 + $0x1240] sm:$0xff]  ;;  %v2804_v42 = vld [vmem:[#allocation13 + $0x11f8] sm:$0xff] }
 0x6ae   :  { %11030 = vmatprep.subr.bf16.mxu1 %v11029_v33  ;;  %11226 = vmatprep.subr.bf16.mxu0 %v11225_v46  ;;  %v11045_v33 = vpack.c.bf16 %v2769_v0, %v2758_v25  ;;  %v11241_v46 = vpack.c.bf16 %v2771_v45, %v2760_v15  ;;  %v2815_v61 = vld [vmem:[#allocation13 + $0x1250] sm:$0xff]  ;;  %v2801_v40 = vld [vmem:[#allocation13 + $0x11e0] sm:$0xff]  ;;  %v2812_v44 = vld [vmem:[#allocation13 + $0x1238] sm:$0xff] }
 0x6af   :  { %v2803_v41 = vld [vmem:[#allocation13 + $0x11f0] sm:$0xff]  ;;  %v2814_v22 = vld [vmem:[#allocation13 + $0x1248] sm:$0xff]  ;;  %v2824_v16 = vld [vmem:[#allocation13 + $0x1298] sm:$0xff] }
 0x6b0   :  { %v2835_v6 = vld [vmem:[#allocation13 + $0x12f0] sm:$0xff]  ;;  %v2826_v23 = vld [vmem:[#allocation13 + $0x12a8] sm:$0xff]  ;;  %v2837_v14 = vld [vmem:[#allocation13 + $0x1300] sm:$0xff] }
 0x6b1   :  { %11032 = vmatpush1.bf16.msra.mxu1 %v11031_v17  ;;  %11228 = vmatpush1.bf16.msra.mxu0 %v11227_v43  ;;  %v11047_v17 = vpack.c.bf16 %v2768_v58, %v2757_v11  ;;  %v11243_v43 = vpack.c.bf16 %v2770_v12, %v2759_v26  ;;  %v2823_v18 = vld [vmem:[#allocation13 + $0x1290] sm:$0xff]  ;;  %v2834_v19 = vld [vmem:[#allocation13 + $0x12e8] sm:$0xff]  ;;  %v2825_v38 = vld [vmem:[#allocation13 + $0x12a0] sm:$0xff] }
 0x6b2   :  { %11034 = vmatprep.subr.bf16.mxu1 %v11033_v59  ;;  %11230 = vmatprep.subr.bf16.mxu0 %v11229_v4  ;;  %v11049_v59 = vpack.c.bf16 %v2791_v13, %v2780_v50  ;;  %v11245_v4 = vpack.c.bf16 %v2793_v48, %v2782_v28  ;;  %v2836_v51 = vld [vmem:[#allocation13 + $0x12f8] sm:$0xff]  ;;  %v2846_v25 = vld [vmem:[#allocation13 + $0x1348] sm:$0xff]  ;;  %v2857_v0 = vld [vmem:[#allocation13 + $0x13a0] sm:$0xff] }
 0x6b3   :  { %v2848_v15 = vld [vmem:[#allocation13 + $0x1358] sm:$0xff]  ;;  %v2859_v45 = vld [vmem:[#allocation13 + $0x13b0] sm:$0xff]  ;;  %v2845_v11 = vld [vmem:[#allocation13 + $0x1340] sm:$0xff] }
 0x6b4   :  { %v2856_v58 = vld [vmem:[#allocation13 + $0x1398] sm:$0xff]  ;;  %v2847_v26 = vld [vmem:[#allocation13 + $0x1350] sm:$0xff]  ;;  %v2858_v12 = vld [vmem:[#allocation13 + $0x13a8] sm:$0xff] }
 0x6b5   :  { %11036 = vmatpush1.bf16.msra.mxu1 %v11035_v35  ;;  %11232 = vmatpush1.bf16.msra.mxu0 %v11231_v31  ;;  %v11051_v35 = vpack.c.bf16 %v2790_v36, %v2779_v3  ;;  %v11247_v31 = vpack.c.bf16 %v2792_v62, %v2781_v8  ;;  %v2868_v50 = vld [vmem:[#allocation13 + $0x13f8] sm:$0xff]  ;;  %v2879_v13 = vld [vmem:[#allocation13 + $0x1450] sm:$0xff]  ;;  %v2870_v28 = vld [vmem:[#allocation13 + $0x1408] sm:$0xff] }
 0x6b6   :  { %11038 = vmatprep.subr.bf16.mxu1 %v11037_v52  ;;  %11234 = vmatprep.subr.bf16.mxu0 %v11233_v49  ;;  %v11053_v52 = vpack.c.bf16 %v2813_v60, %v2802_v2  ;;  %v11249_v49 = vpack.c.bf16 %v2815_v61, %v2804_v42  ;;  %v2881_v48 = vld [vmem:[#allocation13 + $0x1460] sm:$0xff]  ;;  %v2867_v3 = vld [vmem:[#allocation13 + $0x13f0] sm:$0xff]  ;;  %v2878_v36 = vld [vmem:[#allocation13 + $0x1448] sm:$0xff] }
 0x6b7   :  { %v2869_v8 = vld [vmem:[#allocation13 + $0x1400] sm:$0xff]  ;;  %v2880_v62 = vld [vmem:[#allocation13 + $0x1458] sm:$0xff]  ;;  %v2890_v2 = vld [vmem:[#allocation13 + $0x14a8] sm:$0xff] }
 0x6b8   :  { %v2901_v60 = vld [vmem:[#allocation13 + $0x1500] sm:$0xff]  ;;  %v2892_v42 = vld [vmem:[#allocation13 + $0x14b8] sm:$0xff]  ;;  %v2903_v61 = vld [vmem:[#allocation13 + $0x1510] sm:$0xff] }
 0x6b9   :  { %11040 = vmatpush1.bf16.msra.mxu1 %v11039_v63  ;;  %11236 = vmatpush1.bf16.msra.mxu0 %v11235_v1  ;;  %v11055_v63 = vpack.c.bf16 %v2812_v44, %v2801_v40  ;;  %v11251_v1 = vpack.c.bf16 %v2814_v22, %v2803_v41  ;;  %v2889_v40 = vld [vmem:[#allocation13 + $0x14a0] sm:$0xff]  ;;  %v2900_v44 = vld [vmem:[#allocation13 + $0x14f8] sm:$0xff]  ;;  %v2891_v41 = vld [vmem:[#allocation13 + $0x14b0] sm:$0xff] }
 0x6ba   :  { %11042 = vmatprep.subr.bf16.mxu1 %v11041_v10  ;;  %11238 = vmatprep.subr.bf16.mxu0 %v11237_v27  ;;  %v11057_v10 = vpack.c.bf16 %v2835_v6, %v2824_v16  ;;  %v11253_v27 = vpack.c.bf16 %v2837_v14, %v2826_v23  ;;  %v2902_v22 = vld [vmem:[#allocation13 + $0x1508] sm:$0xff]  ;;  %v2912_v16 = vld [vmem:[#allocation13 + $0x1558] sm:$0xff]  ;;  %v2923_v6 = vld [vmem:[#allocation13 + $0x15b0] sm:$0xff] }
 0x6bb   :  { %v2914_v23 = vld [vmem:[#allocation13 + $0x1568] sm:$0xff]  ;;  %v2925_v14 = vld [vmem:[#allocation13 + $0x15c0] sm:$0xff] }
 0x6bd   :  { %11044 = vmatpush1.bf16.msra.mxu1 %v11043_v5  ;;  %11240 = vmatpush1.bf16.msra.mxu0 %v11239_v24  ;;  %v11059_v5 = vpack.c.bf16 %v2834_v19, %v2823_v18  ;;  %v11255_v24 = vpack.c.bf16 %v2836_v51, %v2825_v38  ;;  %v2911_v18 = vld [vmem:[#allocation13 + $0x1550] sm:$0xff]  ;;  %v2922_v19 = vld [vmem:[#allocation13 + $0x15a8] sm:$0xff]  ;;  %v2913_v38 = vld [vmem:[#allocation13 + $0x1560] sm:$0xff] }
 0x6be   :  { %11046 = vmatprep.subr.bf16.mxu1 %v11045_v33  ;;  %11242 = vmatprep.subr.bf16.mxu0 %v11241_v46  ;;  %v11061_v33 = vpack.c.bf16 %v2857_v0, %v2846_v25  ;;  %v11257_v46 = vpack.c.bf16 %v2859_v45, %v2848_v15  ;;  %v2924_v51 = vld [vmem:[#allocation13 + $0x15b8] sm:$0xff]  ;;  %v2934_v25 = vld [vmem:[#allocation13 + $0x1608] sm:$0xff]  ;;  %v2945_v0 = vld [vmem:[#allocation13 + $0x1660] sm:$0xff] }
 0x6bf   :  { %v2936_v15 = vld [vmem:[#allocation13 + $0x1618] sm:$0xff]  ;;  %v2947_v45 = vld [vmem:[#allocation13 + $0x1670] sm:$0xff] }
 0x6c1   :  { %11048 = vmatpush1.bf16.msra.mxu1 %v11047_v17  ;;  %11244 = vmatpush1.bf16.msra.mxu0 %v11243_v43  ;;  %v11063_v17 = vpack.c.bf16 %v2856_v58, %v2845_v11  ;;  %v11259_v43 = vpack.c.bf16 %v2858_v12, %v2847_v26  ;;  %v11077_v11 = vpack.c.bf16 %v2945_v0, %v2934_v25  ;;  %v2935_v26 = vld [vmem:[#allocation13 + $0x1610] sm:$0xff]  ;;  %v2946_v12 = vld [vmem:[#allocation13 + $0x1668] sm:$0xff]  ;;  %v3033_v0 = vld [vmem:[#allocation13 + $0x1920] sm:$0xff] }
 0x6c2   :  { %11050 = vmatprep.subr.bf16.mxu1 %v11049_v59  ;;  %11246 = vmatprep.subr.bf16.mxu0 %v11245_v4  ;;  %v11065_v59 = vpack.c.bf16 %v2879_v13, %v2868_v50  ;;  %v11261_v4 = vpack.c.bf16 %v2881_v48, %v2870_v28  ;;  %v11273_v58 = vpack.c.bf16 %v2947_v45, %v2936_v15  ;;  %v2956_v50 = vld [vmem:[#allocation13 + $0x16b8] sm:$0xff]  ;;  %v2967_v13 = vld [vmem:[#allocation13 + $0x1710] sm:$0xff]  ;;  %v2958_v28 = vld [vmem:[#allocation13 + $0x16c8] sm:$0xff] }
 0x6c3   :  { %v2969_v48 = vld [vmem:[#allocation13 + $0x1720] sm:$0xff]  ;;  %v3022_v25 = vld [vmem:[#allocation13 + $0x18c8] sm:$0xff]  ;;  %v3024_v15 = vld [vmem:[#allocation13 + $0x18d8] sm:$0xff] }
 0x6c4   :  { %v3035_v45 = vld [vmem:[#allocation13 + $0x1930] sm:$0xff] }
 0x6c5   :  { %11052 = vmatpush1.bf16.msra.mxu1 %v11051_v35  ;;  %11248 = vmatpush1.bf16.msra.mxu0 %v11247_v31  ;;  %v11067_v35 = vpack.c.bf16 %v2878_v36, %v2867_v3  ;;  %v11263_v31 = vpack.c.bf16 %v2880_v62, %v2869_v8  ;;  %v11275_v3 = vpack.c.bf16 %v2946_v12, %v2935_v26  ;;  %v2955_v36 = vld [vmem:[#allocation13 + $0x16b0] sm:$0xff]  ;;  %v14997_v8 = vmax.f32 %v14986_v57, 0.0  ;;  %v3034_v12 = vld [vmem:[#allocation13 + $0x1928] sm:$0xff] }
 0x6c6   :  { %11054 = vmatprep.subr.bf16.mxu1 %v11053_v52  ;;  %11250 = vmatprep.subr.bf16.mxu0 %v11249_v49  ;;  %v11069_v52 = vpack.c.bf16 %v2901_v60, %v2890_v2  ;;  %v11265_v49 = vpack.c.bf16 %v2903_v61, %v2892_v42  ;;  %v11081_v62 = vpack.c.bf16 %v2967_v13, %v2956_v50  ;;  %v2968_v60 = vld [vmem:[#allocation13 + $0x1718] sm:$0xff]  ;;  %v2978_v42 = vld [vmem:[#allocation13 + $0x1768] sm:$0xff]  ;;  %v2989_v61 = vld [vmem:[#allocation13 + $0x17c0] sm:$0xff] }
 0x6c7   :  { %v11277_v2 = vpack.c.bf16 %v2969_v48, %v2958_v28  ;;  %v11289_v26 = vpack.c.bf16 %v3035_v45, %v3024_v15  ;;  %v3044_v50 = vld [vmem:[#allocation13 + $0x1978] sm:$0xff]  ;;  %v3055_v13 = vld [vmem:[#allocation13 + $0x19d0] sm:$0xff]  ;;  %v3046_v28 = vld [vmem:[#allocation13 + $0x1988] sm:$0xff] }
 0x6c8   :  { %v3057_v48 = vld [vmem:[#allocation13 + $0x19e0] sm:$0xff]  ;;  %v3112_v15 = vld [vmem:[#allocation13 + $0x1b98] sm:$0xff]  ;;  %v3123_v45 = vld [vmem:[#allocation13 + $0x1bf0] sm:$0xff] }
 0x6c9   :  { %11056 = vmatpush1.bf16.msra.mxu1 %v11055_v63  ;;  %11252 = vmatpush1.bf16.msra.mxu0 %v11251_v1  ;;  %v11071_v63 = vpack.c.bf16 %v2900_v44, %v2889_v40  ;;  %v11267_v1 = vpack.c.bf16 %v2902_v22, %v2891_v41  ;;  %v11085_v40 = vpack.c.bf16 %v2989_v61, %v2978_v42  ;;  %v2977_v44 = vld [vmem:[#allocation13 + $0x1760] sm:$0xff]  ;;  %v2990_v22 = vld [vmem:[#allocation13 + $0x17c8] sm:$0xff] }
 0x6ca   :  { %11058 = vmatprep.subr.bf16.mxu1 %v11057_v10  ;;  %11254 = vmatprep.subr.bf16.mxu0 %v11253_v27  ;;  %v11073_v10 = vpack.c.bf16 %v2923_v6, %v2912_v16  ;;  %v11269_v27 = vpack.c.bf16 %v2925_v14, %v2914_v23  ;;  %v3000_v16 = vld [vmem:[#allocation13 + $0x1818] sm:$0xff]  ;;  %v3011_v6 = vld [vmem:[#allocation13 + $0x1870] sm:$0xff]  ;;  %v3002_v23 = vld [vmem:[#allocation13 + $0x1828] sm:$0xff] }
 0x6cb   :  { %v3013_v14 = vld [vmem:[#allocation13 + $0x1880] sm:$0xff]  ;;  %v3066_v42 = vld [vmem:[#allocation13 + $0x1a28] sm:$0xff] }
 0x6cc   :  { %v3077_v61 = vld [vmem:[#allocation13 + $0x1a80] sm:$0xff] }
 0x6cd   :  { %11060 = vmatpush1.bf16.msra.mxu1 %v11059_v5  ;;  %11256 = vmatpush1.bf16.msra.mxu0 %v11255_v24  ;;  %v11075_v5 = vpack.c.bf16 %v2922_v19, %v2911_v18  ;;  %v11271_v24 = vpack.c.bf16 %v2924_v51, %v2913_v38  ;;  %v11089_v18 = vpack.c.bf16 %v3011_v6, %v3000_v16  ;;  %v2999_v19 = vld [vmem:[#allocation13 + $0x1810] sm:$0xff]  ;;  %v3012_v51 = vld [vmem:[#allocation13 + $0x1878] sm:$0xff] }
 0x6ce   :  { %11062 = vmatprep.subr.bf16.mxu1 %v11061_v33  ;;  %11258 = vmatprep.subr.bf16.mxu0 %v11257_v46  ;;  %v2933_v33 = vld [vmem:[#allocation13 + $0x1600] sm:$0xff]  ;;  %v2944_v46 = vld [vmem:[#allocation13 + $0x1658] sm:$0xff]  ;;  %v11285_v38 = vpack.c.bf16 %v3013_v14, %v3002_v23  ;;  %v3099_v6 = vld [vmem:[#allocation13 + $0x1b30] sm:$0xff] }
 0x6cf   :  { %v3088_v16 = vld [vmem:[#allocation13 + $0x1ad8] sm:$0xff]  ;;  %v3090_v23 = vld [vmem:[#allocation13 + $0x1ae8] sm:$0xff]  ;;  %v3101_v14 = vld [vmem:[#allocation13 + $0x1b40] sm:$0xff] }
 0x6d1   :  { %11064 = vmatpush1.bf16.msra.mxu1 %v11063_v17  ;;  %11260 = vmatpush1.bf16.msra.mxu0 %v11259_v43  ;;  %v11079_v17 = vpack.c.bf16 %v2944_v46, %v2933_v33  ;;  %v14994_v43 = vmax.f32 %v14967_v21, 0.0  ;;  %v2980_v21 = vld [vmem:[#allocation13 + $0x1778] sm:$0xff]  ;;  %v3023_v46 = vld [vmem:[#allocation13 + $0x18d0] sm:$0xff] }
 0x6d2   :  { %11066 = vmatprep.subr.bf16.mxu1 %v11065_v59  ;;  %11262 = vmatprep.subr.bf16.mxu0 %v11261_v4  ;;  %v2966_v59 = vld [vmem:[#allocation13 + $0x1708] sm:$0xff]  ;;  %v2957_v4 = vld [vmem:[#allocation13 + $0x16c0] sm:$0xff]  ;;  %v3032_v33 = vld [vmem:[#allocation13 + $0x1918] sm:$0xff] }
 0x6d3   :  { %v11279_v57 = vpack.c.bf16 %v2968_v60, %v2957_v4  ;;  %v3054_v4 = vld [vmem:[#allocation13 + $0x19c8] sm:$0xff]  ;;  %v3056_v60 = vld [vmem:[#allocation13 + $0x19d8] sm:$0xff] }
 0x6d5   :  { %11068 = vmatpush1.bf16.msra.mxu1 %v11067_v35  ;;  %11264 = vmatpush1.bf16.msra.mxu0 %v11263_v31  ;;  %v2991_v35 = vld [vmem:[#allocation13 + $0x17d0] sm:$0xff]  ;;  %v11083_v31 = vpack.c.bf16 %v2966_v59, %v2955_v36  ;;  %v11097_v36 = vpack.c.bf16 %v3055_v13, %v3044_v50  ;;  %v3132_v50 = vld [vmem:[#allocation13 + $0x1c38] sm:$0xff] }
 0x6d6   :  { %11070 = vmatprep.subr.bf16.mxu1 %v11069_v52  ;;  %11266 = vmatprep.subr.bf16.mxu0 %v11265_v49  ;;  %v2988_v52 = vld [vmem:[#allocation13 + $0x17b8] sm:$0xff]  ;;  %v2979_v49 = vld [vmem:[#allocation13 + $0x1770] sm:$0xff]  ;;  %v11281_v41 = vpack.c.bf16 %v2991_v35, %v2980_v21 }
 0x6d7   :  { %v3043_v59 = vld [vmem:[#allocation13 + $0x1970] sm:$0xff]  ;;  %v3068_v21 = vld [vmem:[#allocation13 + $0x1a38] sm:$0xff] }
 0x6d8   :  { %v3079_v35 = vld [vmem:[#allocation13 + $0x1a90] sm:$0xff] }
 0x6d9   :  { %11072 = vmatpush1.bf16.msra.mxu1 %v11071_v63  ;;  %11268 = vmatpush1.bf16.msra.mxu0 %v11267_v1  ;;  %v11087_v63 = vpack.c.bf16 %v2988_v52, %v2977_v44  ;;  %v11283_v1 = vpack.c.bf16 %v2990_v22, %v2979_v49  ;;  %v3065_v44 = vld [vmem:[#allocation13 + $0x1a20] sm:$0xff]  ;;  %v3076_v52 = vld [vmem:[#allocation13 + $0x1a78] sm:$0xff]  ;;  %v3067_v49 = vld [vmem:[#allocation13 + $0x1a30] sm:$0xff] }
 0x6da   :  { %11074 = vmatprep.subr.bf16.mxu1 %v11073_v10  ;;  %11270 = vmatprep.subr.bf16.mxu0 %v11269_v27  ;;  %v3010_v10 = vld [vmem:[#allocation13 + $0x1868] sm:$0xff]  ;;  %v3001_v27 = vld [vmem:[#allocation13 + $0x1820] sm:$0xff]  ;;  %v3143_v13 = vld [vmem:[#allocation13 + $0x1c90] sm:$0xff] }
 0x6db   :  { %v3078_v22 = vld [vmem:[#allocation13 + $0x1a88] sm:$0xff] }
 0x6dd   :  { %11076 = vmatpush1.bf16.msra.mxu1 %v11075_v5  ;;  %11272 = vmatpush1.bf16.msra.mxu0 %v11271_v24  ;;  %v11091_v5 = vpack.c.bf16 %v3010_v10, %v2999_v19  ;;  %v11287_v24 = vpack.c.bf16 %v3012_v51, %v3001_v27  ;;  %v3087_v19 = vld [vmem:[#allocation13 + $0x1ad0] sm:$0xff]  ;;  %v3098_v10 = vld [vmem:[#allocation13 + $0x1b28] sm:$0xff]  ;;  %v3089_v27 = vld [vmem:[#allocation13 + $0x1ae0] sm:$0xff] }
 0x6de   :  { %11078 = vmatprep.subr.bf16.mxu1 %v11077_v11  ;;  %11274 = vmatprep.subr.bf16.mxu0 %v11273_v58  ;;  %v11093_v11 = vpack.c.bf16 %v3033_v0, %v3022_v25  ;;  %v3021_v58 = vld [vmem:[#allocation13 + $0x18c0] sm:$0xff]  ;;  %v3100_v51 = vld [vmem:[#allocation13 + $0x1b38] sm:$0xff]  ;;  %v3110_v25 = vld [vmem:[#allocation13 + $0x1b88] sm:$0xff] }
 0x6df   :  { %v3121_v0 = vld [vmem:[#allocation13 + $0x1be0] sm:$0xff] }
 0x6e0   :  { %3505 = vmatmul.mubr.f32.vlgmr.msra.gmra.mrb[24].mxu1 %v14994_v43  ;;  %3789 = vmatmul.mubr.f32.vlgmr.msra.gmra.mrb[18].mxu0 %v14994_v43 }
 0x6e1   :  { %11080 = vmatpush1.bf16.msra.mxu1 %v11079_v17  ;;  %3575 = vmatprep.mubr.f32.mxu1 %v14997_v8  ;;  %v11095_v17 = vpack.c.bf16 %v3032_v33, %v3021_v58  ;;  %v3109_v58 = vld [vmem:[#allocation13 + $0x1b80] sm:$0xff]  ;;  %v3120_v33 = vld [vmem:[#allocation13 + $0x1bd8] sm:$0xff] }
 0x6e2   :  { %11276 = vmatpush1.bf16.msra.mxu0 %v11275_v3  ;;  %3859 = vmatprep.mubr.f32.mxu0 %v14997_v8  ;;  %v11291_v3 = vpack.c.bf16 %v3034_v12, %v3023_v46  ;;  %v3111_v46 = vld [vmem:[#allocation13 + $0x1b90] sm:$0xff]  ;;  %v3122_v12 = vld [vmem:[#allocation13 + $0x1be8] sm:$0xff] }
 0x6e3   :  { %11082 = vmatprep.subr.bf16.mxu1 %v11081_v62  ;;  %11278 = vmatprep.subr.bf16.mxu0 %v11277_v2  ;;  %v3045_v62 = vld [vmem:[#allocation13 + $0x1980] sm:$0xff]  ;;  %v11293_v2 = vpack.c.bf16 %v3057_v48, %v3046_v28  ;;  %v3134_v28 = vld [vmem:[#allocation13 + $0x1c48] sm:$0xff] }
 0x6e4   :  { %v3145_v48 = vld [vmem:[#allocation13 + $0x1ca0] sm:$0xff] }
 0x6e5   :  { %11084 = vmatpush1.bf16.msra.mxu1 %v11083_v31  ;;  %v11099_v31 = vpack.c.bf16 %v3054_v4, %v3043_v59  ;;  %v3131_v59 = vld [vmem:[#allocation13 + $0x1c30] sm:$0xff]  ;;  %v3142_v4 = vld [vmem:[#allocation13 + $0x1c88] sm:$0xff] }
 0x6e6   :  { %11280 = vmatpush1.bf16.msra.mxu0 %v11279_v57  ;;  %11086 = vmatprep.subr.bf16.mxu1 %v11085_v40  ;;  %v11295_v57 = vpack.c.bf16 %v3056_v60, %v3045_v62  ;;  %v11101_v40 = vpack.c.bf16 %v3077_v61, %v3066_v42  ;;  %v3133_v62 = vld [vmem:[#allocation13 + $0x1c40] sm:$0xff]  ;;  %v3144_v60 = vld [vmem:[#allocation13 + $0x1c98] sm:$0xff]  ;;  %v3154_v42 = vld [vmem:[#allocation13 + $0x1ce8] sm:$0xff] }
 0x6e7   :  { %11282 = vmatprep.subr.bf16.mxu0 %v11281_v41  ;;  %v11297_v41 = vpack.c.bf16 %v3079_v35, %v3068_v21  ;;  %v3165_v61 = vld [vmem:[#allocation13 + $0x1d40] sm:$0xff]  ;;  %v3156_v21 = vld [vmem:[#allocation13 + $0x1cf8] sm:$0xff]  ;;  %v3167_v35 = vld [vmem:[#allocation13 + $0x1d50] sm:$0xff] }
 0x6e9   :  { %11088 = vmatpush1.bf16.msra.mxu1 %v11087_v63  ;;  %v11103_v63 = vpack.c.bf16 %v3076_v52, %v3065_v44  ;;  %v3153_v44 = vld [vmem:[#allocation13 + $0x1ce0] sm:$0xff]  ;;  %v3164_v52 = vld [vmem:[#allocation13 + $0x1d38] sm:$0xff] }
 0x6ea   :  { %11284 = vmatpush1.bf16.msra.mxu0 %v11283_v1  ;;  %11090 = vmatprep.subr.bf16.mxu1 %v11089_v18  ;;  %v11299_v1 = vpack.c.bf16 %v3078_v22, %v3067_v49  ;;  %v11105_v18 = vpack.c.bf16 %v3099_v6, %v3088_v16  ;;  %v3155_v49 = vld [vmem:[#allocation13 + $0x1cf0] sm:$0xff]  ;;  %v3166_v22 = vld [vmem:[#allocation13 + $0x1d48] sm:$0xff]  ;;  %v3176_v16 = vld [vmem:[#allocation13 + $0x1d98] sm:$0xff] }
 0x6eb   :  { %11286 = vmatprep.subr.bf16.mxu0 %v11285_v38  ;;  %v11301_v38 = vpack.c.bf16 %v3101_v14, %v3090_v23  ;;  %v3187_v6 = vld [vmem:[#allocation13 + $0x1df0] sm:$0xff]  ;;  %v3178_v23 = vld [vmem:[#allocation13 + $0x1da8] sm:$0xff]  ;;  %v3189_v14 = vld [vmem:[#allocation13 + $0x1e00] sm:$0xff] }
 0x6ed   :  { %11092 = vmatpush1.bf16.msra.mxu1 %v11091_v5  ;;  %v11107_v5 = vpack.c.bf16 %v3098_v10, %v3087_v19  ;;  %v3175_v19 = vld [vmem:[#allocation13 + $0x1d90] sm:$0xff]  ;;  %v3186_v10 = vld [vmem:[#allocation13 + $0x1de8] sm:$0xff] }
 0x6ee   :  { %11288 = vmatpush1.bf16.msra.mxu0 %v11287_v24  ;;  %11094 = vmatprep.subr.bf16.mxu1 %v11093_v11  ;;  %v11303_v24 = vpack.c.bf16 %v3100_v51, %v3089_v27  ;;  %v11109_v11 = vpack.c.bf16 %v3121_v0, %v3110_v25  ;;  %v3177_v27 = vld [vmem:[#allocation13 + $0x1da0] sm:$0xff]  ;;  %v3188_v51 = vld [vmem:[#allocation13 + $0x1df8] sm:$0xff]  ;;  %v3198_v25 = vld [vmem:[#allocation13 + $0x1e48] sm:$0xff] }
 0x6ef   :  { %11290 = vmatprep.subr.bf16.mxu0 %v11289_v26  ;;  %v11305_v26 = vpack.c.bf16 %v3123_v45, %v3112_v15  ;;  %v3209_v0 = vld [vmem:[#allocation13 + $0x1ea0] sm:$0xff]  ;;  %v3200_v15 = vld [vmem:[#allocation13 + $0x1e58] sm:$0xff]  ;;  %v3211_v45 = vld [vmem:[#allocation13 + $0x1eb0] sm:$0xff] }
 0x6f1   :  { %11096 = vmatpush1.bf16.msra.mxu1 %v11095_v17  ;;  %v11111_v17 = vpack.c.bf16 %v3120_v33, %v3109_v58  ;;  %v3197_v58 = vld [vmem:[#allocation13 + $0x1e40] sm:$0xff]  ;;  %v3208_v33 = vld [vmem:[#allocation13 + $0x1e98] sm:$0xff] }
 0x6f2   :  { %11292 = vmatpush1.bf16.msra.mxu0 %v11291_v3  ;;  %11098 = vmatprep.subr.bf16.mxu1 %v11097_v36  ;;  %v11307_v3 = vpack.c.bf16 %v3122_v12, %v3111_v46  ;;  %v11113_v36 = vpack.c.bf16 %v3143_v13, %v3132_v50  ;;  %v3199_v46 = vld [vmem:[#allocation13 + $0x1e50] sm:$0xff]  ;;  %v3210_v12 = vld [vmem:[#allocation13 + $0x1ea8] sm:$0xff]  ;;  %v3220_v50 = vld [vmem:[#allocation13 + $0x1ef8] sm:$0xff] }
 0x6f3   :  { %11294 = vmatprep.subr.bf16.mxu0 %v11293_v2  ;;  %v11309_v2 = vpack.c.bf16 %v3145_v48, %v3134_v28  ;;  %v3231_v13 = vld [vmem:[#allocation13 + $0x1f50] sm:$0xff]  ;;  %v3222_v28 = vld [vmem:[#allocation13 + $0x1f08] sm:$0xff]  ;;  %v3233_v48 = vld [vmem:[#allocation13 + $0x1f60] sm:$0xff] }
 0x6f5   :  { %11100 = vmatpush1.bf16.msra.mxu1 %v11099_v31  ;;  %v11115_v31 = vpack.c.bf16 %v3142_v4, %v3131_v59  ;;  %v3219_v59 = vld [vmem:[#allocation13 + $0x1ef0] sm:$0xff]  ;;  %v3230_v4 = vld [vmem:[#allocation13 + $0x1f48] sm:$0xff] }
 0x6f6   :  { %11296 = vmatpush1.bf16.msra.mxu0 %v11295_v57  ;;  %11102 = vmatprep.subr.bf16.mxu1 %v11101_v40  ;;  %v11311_v57 = vpack.c.bf16 %v3144_v60, %v3133_v62  ;;  %v11117_v40 = vpack.c.bf16 %v3165_v61, %v3154_v42  ;;  %v3221_v62 = vld [vmem:[#allocation13 + $0x1f00] sm:$0xff]  ;;  %v3232_v60 = vld [vmem:[#allocation13 + $0x1f58] sm:$0xff]  ;;  %v3242_v42 = vld [vmem:[#allocation13 + $0x1fa8] sm:$0xff] }
 0x6f7   :  { %11298 = vmatprep.subr.bf16.mxu0 %v11297_v41  ;;  %v11313_v41 = vpack.c.bf16 %v3167_v35, %v3156_v21  ;;  %v3253_v61 = vld [vmem:[#allocation13 + $0x2000] sm:$0xff]  ;;  %v3244_v21 = vld [vmem:[#allocation13 + $0x1fb8] sm:$0xff]  ;;  %v3255_v35 = vld [vmem:[#allocation13 + $0x2010] sm:$0xff] }
 0x6f9   :  { %11104 = vmatpush1.bf16.msra.mxu1 %v11103_v63  ;;  %v11119_v63 = vpack.c.bf16 %v3164_v52, %v3153_v44  ;;  %v3241_v44 = vld [vmem:[#allocation13 + $0x1fa0] sm:$0xff]  ;;  %v3252_v52 = vld [vmem:[#allocation13 + $0x1ff8] sm:$0xff] }
 0x6fa   :  { %11300 = vmatpush1.bf16.msra.mxu0 %v11299_v1  ;;  %11106 = vmatprep.subr.bf16.mxu1 %v11105_v18  ;;  %v11315_v1 = vpack.c.bf16 %v3166_v22, %v3155_v49  ;;  %v11121_v18 = vpack.c.bf16 %v3187_v6, %v3176_v16  ;;  %v3243_v49 = vld [vmem:[#allocation13 + $0x1fb0] sm:$0xff]  ;;  %v3254_v22 = vld [vmem:[#allocation13 + $0x2008] sm:$0xff]  ;;  %v3264_v16 = vld [vmem:[#allocation13 + $0x2058] sm:$0xff] }
 0x6fb   :  { %11302 = vmatprep.subr.bf16.mxu0 %v11301_v38  ;;  %v11317_v38 = vpack.c.bf16 %v3189_v14, %v3178_v23  ;;  %v3275_v6 = vld [vmem:[#allocation13 + $0x20b0] sm:$0xff]  ;;  %v3266_v23 = vld [vmem:[#allocation13 + $0x2068] sm:$0xff]  ;;  %v3277_v14 = vld [vmem:[#allocation13 + $0x20c0] sm:$0xff] }
 0x6fd   :  { %11108 = vmatpush1.bf16.msra.mxu1 %v11107_v5  ;;  %v11123_v5 = vpack.c.bf16 %v3186_v10, %v3175_v19  ;;  %v3263_v19 = vld [vmem:[#allocation13 + $0x2050] sm:$0xff]  ;;  %v3274_v10 = vld [vmem:[#allocation13 + $0x20a8] sm:$0xff] }
 0x6fe   :  { %11304 = vmatpush1.bf16.msra.mxu0 %v11303_v24  ;;  %11110 = vmatprep.subr.bf16.mxu1 %v11109_v11  ;;  %v11319_v24 = vpack.c.bf16 %v3188_v51, %v3177_v27  ;;  %v11125_v11 = vpack.c.bf16 %v3209_v0, %v3198_v25  ;;  %v3265_v27 = vld [vmem:[#allocation13 + $0x2060] sm:$0xff]  ;;  %v3276_v51 = vld [vmem:[#allocation13 + $0x20b8] sm:$0xff]  ;;  %v3286_v25 = vld [vmem:[#allocation13 + $0x2108] sm:$0xff] }
 0x6ff   :  { %11306 = vmatprep.subr.bf16.mxu0 %v11305_v26  ;;  %v11321_v26 = vpack.c.bf16 %v3211_v45, %v3200_v15  ;;  %v3297_v0 = vld [vmem:[#allocation13 + $0x2160] sm:$0xff]  ;;  %v3288_v15 = vld [vmem:[#allocation13 + $0x2118] sm:$0xff]  ;;  %v3299_v45 = vld [vmem:[#allocation13 + $0x2170] sm:$0xff] }
 0x701   :  { %11112 = vmatpush1.bf16.msra.mxu1 %v11111_v17  ;;  %v11127_v17 = vpack.c.bf16 %v3208_v33, %v3197_v58  ;;  %v3285_v58 = vld [vmem:[#allocation13 + $0x2100] sm:$0xff]  ;;  %v3296_v33 = vld [vmem:[#allocation13 + $0x2158] sm:$0xff] }
 0x702   :  { %11308 = vmatpush1.bf16.msra.mxu0 %v11307_v3  ;;  %11114 = vmatprep.subr.bf16.mxu1 %v11113_v36  ;;  %v11323_v3 = vpack.c.bf16 %v3210_v12, %v3199_v46  ;;  %v11129_v36 = vpack.c.bf16 %v3231_v13, %v3220_v50  ;;  %v11337_v46 = vpack.c.bf16 %v3299_v45, %v3288_v15  ;;  %v3298_v12 = vld [vmem:[#allocation13 + $0x2168] sm:$0xff]  ;;  %v2245_v13 = vld [vmem:[#allocation13 + $0x80] sm:$0xff] }
 0x703   :  { %11310 = vmatprep.subr.bf16.mxu0 %v11309_v2  ;;  %v11325_v2 = vpack.c.bf16 %v3233_v48, %v3222_v28  ;;  %v2234_v50 = vld [vmem:[#allocation13 + $0x28] sm:$0xff]  ;;  %v11143_v28 = vpack.c.bf16 %v3296_v33, %v3285_v58  ;;  %v2236_v48 = vld [vmem:[#allocation13 + $0x38] sm:$0xff]  ;;  %v2313_v45 = vld [vmem:[#allocation13 + $0x2a0] sm:$0xff] }
 0x704   :  { %v2302_v15 = vld [vmem:[#allocation13 + $0x248] sm:$0xff]  ;;  %v2299_v58 = vld [vmem:[#allocation13 + $0x230] sm:$0xff] }
 0x705   :  { %11116 = vmatpush1.bf16.msra.mxu1 %v11115_v31  ;;  %v11131_v31 = vpack.c.bf16 %v3230_v4, %v3219_v59  ;;  %v11341_v59 = vpack.c.bf16 %v2245_v13, %v2234_v50  ;;  %v2310_v33 = vld [vmem:[#allocation13 + $0x288] sm:$0xff]  ;;  %v2333_v13 = vld [vmem:[#allocation13 + $0x340] sm:$0xff] }
 0x706   :  { %11312 = vmatpush1.bf16.msra.mxu0 %v11311_v57  ;;  %11118 = vmatprep.subr.bf16.mxu1 %v11117_v40  ;;  %v11327_v57 = vpack.c.bf16 %v3232_v60, %v3221_v62  ;;  %v11133_v40 = vpack.c.bf16 %v3253_v61, %v3242_v42  ;;  %v2233_v62 = vld [vmem:[#allocation13 + $0x20] sm:$0xff]  ;;  %v2246_v60 = vld [vmem:[#allocation13 + $0x88] sm:$0xff]  ;;  %v2256_v42 = vld [vmem:[#allocation13 + $0xd8] sm:$0xff] }
 0x707   :  { %11314 = vmatprep.subr.bf16.mxu0 %v11313_v41  ;;  %v11329_v41 = vpack.c.bf16 %v3255_v35, %v3244_v21  ;;  %v2267_v61 = vld [vmem:[#allocation13 + $0x130] sm:$0xff]  ;;  %v2258_v35 = vld [vmem:[#allocation13 + $0xe8] sm:$0xff] }
 0x708   :  { %v2322_v50 = vld [vmem:[#allocation13 + $0x2e8] sm:$0xff] }
 0x709   :  { %11120 = vmatpush1.bf16.msra.mxu1 %v11119_v63  ;;  %v11135_v63 = vpack.c.bf16 %v3252_v52, %v3241_v44  ;;  %v2255_v44 = vld [vmem:[#allocation13 + $0xd0] sm:$0xff]  ;;  %v2266_v52 = vld [vmem:[#allocation13 + $0x128] sm:$0xff] }
 0x70a   :  { %11316 = vmatpush1.bf16.msra.mxu0 %v11315_v1  ;;  %11122 = vmatprep.subr.bf16.mxu1 %v11121_v18  ;;  %v11331_v1 = vpack.c.bf16 %v3254_v22, %v3243_v49  ;;  %v11137_v18 = vpack.c.bf16 %v3275_v6, %v3264_v16  ;;  %v2257_v49 = vld [vmem:[#allocation13 + $0xe0] sm:$0xff]  ;;  %v2268_v22 = vld [vmem:[#allocation13 + $0x138] sm:$0xff]  ;;  %v2278_v16 = vld [vmem:[#allocation13 + $0x188] sm:$0xff] }
 0x70b   :  { %11318 = vmatprep.subr.bf16.mxu0 %v11317_v38  ;;  %v11333_v38 = vpack.c.bf16 %v3277_v14, %v3266_v23  ;;  %v2289_v6 = vld [vmem:[#allocation13 + $0x1e0] sm:$0xff]  ;;  %v2280_v14 = vld [vmem:[#allocation13 + $0x198] sm:$0xff] }
 0x70d   :  { %11124 = vmatpush1.bf16.msra.mxu1 %v11123_v5  ;;  %v11139_v5 = vpack.c.bf16 %v3274_v10, %v3263_v19  ;;  %v2277_v19 = vld [vmem:[#allocation13 + $0x180] sm:$0xff]  ;;  %v2288_v10 = vld [vmem:[#allocation13 + $0x1d8] sm:$0xff] }
 0x70e   :  { %11320 = vmatpush1.bf16.msra.mxu0 %v11319_v24  ;;  %11126 = vmatprep.subr.bf16.mxu1 %v11125_v11  ;;  %v11335_v24 = vpack.c.bf16 %v3276_v51, %v3265_v27  ;;  %v11141_v11 = vpack.c.bf16 %v3297_v0, %v3286_v25  ;;  %v2279_v27 = vld [vmem:[#allocation13 + $0x190] sm:$0xff]  ;;  %v2290_v51 = vld [vmem:[#allocation13 + $0x1e8] sm:$0xff]  ;;  %v2300_v25 = vld [vmem:[#allocation13 + $0x238] sm:$0xff] }
 0x70f   :  { %11322 = vmatprep.subr.bf16.mxu0 %v11321_v26  ;;  %v3287_v26 = vld [vmem:[#allocation13 + $0x2110] sm:$0xff] }
 0x710   :  { %v2311_v0 = vld [vmem:[#allocation13 + $0x290] sm:$0xff] }
 0x711   :  { %11128 = vmatpush1.bf16.msra.mxu1 %v11127_v17  ;;  %v2247_v17 = vld [vmem:[#allocation13 + $0x90] sm:$0xff] }
 0x712   :  { %11324 = vmatpush1.bf16.msra.mxu0 %v11323_v3  ;;  %11130 = vmatprep.subr.bf16.mxu1 %v11129_v36  ;;  %v15004_v3 = vmax.f32 %v14983_v29, 0.0  ;;  %v11339_v36 = vpack.c.bf16 %v3298_v12, %v3287_v26  ;;  %v11537_v4 = vpack.c.bf16 %v2247_v17, %v2236_v48  ;;  %v2235_v29 = vld [vmem:[#allocation13 + $0x30] sm:$0xff]  ;;  %v11549_v26 = vpack.c.bf16 %v2313_v45, %v2302_v15  ;;  %v2312_v12 = vld [vmem:[#allocation13 + $0x298] sm:$0xff]  ;;  %v2390_v15 = vld [vmem:[#allocation13 + $0x508] sm:$0xff] }
 0x713   :  { %11326 = vmatprep.subr.bf16.mxu0 %v11325_v2  ;;  %v2244_v2 = vld [vmem:[#allocation13 + $0x78] sm:$0xff]  ;;  %v2335_v48 = vld [vmem:[#allocation13 + $0x350] sm:$0xff]  ;;  %v11355_v17 = vpack.c.bf16 %v2310_v33, %v2299_v58  ;;  %v2401_v45 = vld [vmem:[#allocation13 + $0x560] sm:$0xff] }
 0x714   :  { %v11343_v21 = vpack.c.bf16 %v2244_v2, %v2233_v62  ;;  %v2332_v62 = vld [vmem:[#allocation13 + $0x338] sm:$0xff]  ;;  %v2323_v2 = vld [vmem:[#allocation13 + $0x2f0] sm:$0xff]  ;;  %v2398_v33 = vld [vmem:[#allocation13 + $0x548] sm:$0xff] }
 0x715   :  { %11132 = vmatpush1.bf16.msra.mxu1 %v11131_v31  ;;  %v2269_v31 = vld [vmem:[#allocation13 + $0x140] sm:$0xff]  ;;  %v2387_v58 = vld [vmem:[#allocation13 + $0x4f0] sm:$0xff] }
 0x716   :  { %11328 = vmatpush1.bf16.msra.mxu0 %v11327_v57  ;;  %11134 = vmatprep.subr.bf16.mxu1 %v11133_v40  ;;  %v15011_v57 = vmax.f32 %v14991_v37, 0.0  ;;  %v11539_v40 = vpack.c.bf16 %v2246_v60, %v2235_v29  ;;  %v11541_v23 = vpack.c.bf16 %v2269_v31, %v2258_v35  ;;  %v11347_v37 = vpack.c.bf16 %v2266_v52, %v2255_v44  ;;  %v2334_v60 = vld [vmem:[#allocation13 + $0x348] sm:$0xff]  ;;  %v2357_v35 = vld [vmem:[#allocation13 + $0x400] sm:$0xff]  ;;  %v2343_v52 = vld [vmem:[#allocation13 + $0x390] sm:$0xff] }
 0x717   :  { %11330 = vmatprep.subr.bf16.mxu0 %v11329_v41  ;;  %v11345_v41 = vpack.c.bf16 %v2267_v61, %v2256_v42  ;;  %v2344_v42 = vld [vmem:[#allocation13 + $0x398] sm:$0xff]  ;;  %v2355_v61 = vld [vmem:[#allocation13 + $0x3f0] sm:$0xff] }
 0x718   :  { %v11361_v44 = vpack.c.bf16 %v2355_v61, %v2344_v42  ;;  %v2432_v42 = vld [vmem:[#allocation13 + $0x658] sm:$0xff]  ;;  %v2443_v61 = vld [vmem:[#allocation13 + $0x6b0] sm:$0xff] }
 0x719   :  { %11136 = vmatpush1.bf16.msra.mxu1 %v11135_v63  ;;  %v2291_v63 = vld [vmem:[#allocation13 + $0x1f0] sm:$0xff] }
 0x71a   :  { %11332 = vmatpush1.bf16.msra.mxu0 %v11331_v1  ;;  %11138 = vmatprep.subr.bf16.mxu1 %v11137_v18  ;;  %v11543_v1 = vpack.c.bf16 %v2268_v22, %v2257_v49  ;;  %v11349_v18 = vpack.c.bf16 %v2289_v6, %v2278_v16  ;;  %v2354_v49 = vld [vmem:[#allocation13 + $0x3e8] sm:$0xff]  ;;  %v2356_v16 = vld [vmem:[#allocation13 + $0x3f8] sm:$0xff] }
 0x71b   :  { %11334 = vmatprep.subr.bf16.mxu0 %v11333_v38  ;;  %v11545_v38 = vpack.c.bf16 %v2291_v63, %v2280_v14  ;;  %v2366_v6 = vld [vmem:[#allocation13 + $0x448] sm:$0xff]  ;;  %v2368_v14 = vld [vmem:[#allocation13 + $0x458] sm:$0xff]  ;;  %v2379_v63 = vld [vmem:[#allocation13 + $0x4b0] sm:$0xff] }
 0x71d   :  { %11140 = vmatpush1.bf16.msra.mxu1 %v11139_v5  ;;  %v11351_v5 = vpack.c.bf16 %v2288_v10, %v2277_v19  ;;  %v2365_v19 = vld [vmem:[#allocation13 + $0x440] sm:$0xff]  ;;  %v2376_v10 = vld [vmem:[#allocation13 + $0x498] sm:$0xff] }
 0x71e   :  { %11336 = vmatpush1.bf16.msra.mxu0 %v11335_v24  ;;  %11142 = vmatprep.subr.bf16.mxu1 %v11141_v11  ;;  %v11547_v24 = vpack.c.bf16 %v2290_v51, %v2279_v27  ;;  %v11353_v11 = vpack.c.bf16 %v2311_v0, %v2300_v25  ;;  %v2367_v27 = vld [vmem:[#allocation13 + $0x450] sm:$0xff]  ;;  %v2378_v51 = vld [vmem:[#allocation13 + $0x4a8] sm:$0xff]  ;;  %v2388_v25 = vld [vmem:[#allocation13 + $0x4f8] sm:$0xff] }
 0x71f   :  { %11338 = vmatprep.subr.bf16.mxu0 %v11337_v46  ;;  %v2301_v46 = vld [vmem:[#allocation13 + $0x240] sm:$0xff]  ;;  %v2399_v0 = vld [vmem:[#allocation13 + $0x550] sm:$0xff] }
 0x720   :  { %3576 = vmatmul.mubr.f32.vlgmr.msra.gmra.mrb[24].mxu1 %v15004_v3 }
 0x721   :  { %3860 = vmatmul.mubr.f32.vlgmr.msra.gmra.mrb[18].mxu0 %v15004_v3  ;;  %11144 = vmatpush1.bf16.msra.mxu1 %v11143_v28  ;;  %v2324_v28 = vld [vmem:[#allocation13 + $0x2f8] sm:$0xff] }
 0x722   :  { %11340 = vmatpush1.bf16.msra.mxu0 %v11339_v36  ;;  %3646 = vmatprep.mubr.f32.mxu1 %v16431_v55  ;;  %v11551_v36 = vpack.c.bf16 %v2312_v12, %v2301_v46  ;;  %v11553_v29 = vpack.c.bf16 %v2335_v48, %v2324_v28  ;;  %v2389_v46 = vld [vmem:[#allocation13 + $0x500] sm:$0xff]  ;;  %v2400_v12 = vld [vmem:[#allocation13 + $0x558] sm:$0xff]  ;;  %v2423_v48 = vld [vmem:[#allocation13 + $0x610] sm:$0xff] }
 0x723   :  { %3930 = vmatprep.mubr.f32.mxu0 %v16431_v55  ;;  %11342 = vmatprep.subr.bf16.mxu1 %v11341_v59  ;;  %v11357_v59 = vpack.c.bf16 %v2333_v13, %v2322_v50  ;;  %v2410_v50 = vld [vmem:[#allocation13 + $0x5a8] sm:$0xff]  ;;  %v2421_v13 = vld [vmem:[#allocation13 + $0x600] sm:$0xff]  ;;  %v2412_v28 = vld [vmem:[#allocation13 + $0x5b8] sm:$0xff] }
 0x724   :  { %11538 = vmatprep.subr.bf16.mxu0 %v11537_v4  ;;  %v2321_v4 = vld [vmem:[#allocation13 + $0x2e0] sm:$0xff] }
 0x725   :  { %v11359_v31 = vpack.c.bf16 %v2332_v62, %v2321_v4  ;;  %v2409_v4 = vld [vmem:[#allocation13 + $0x5a0] sm:$0xff]  ;;  %v2420_v62 = vld [vmem:[#allocation13 + $0x5f8] sm:$0xff] }
 0x728   :  { %9522 = vmatmul.mubr.msk.f32.vlgmr.msra.gmra.mrb[24].mxu1 %vm909_vm5, %v15011_v57 }
 0x729   :  { %9523 = vmatmul.mubr.msk.f32.vlgmr.msra.gmra.mrb[18].mxu0 %vm909_vm5, %v15011_v57  ;;  %11344 = vmatpush1.bf16.msra.mxu1 %v11343_v21  ;;  %v2346_v21 = vld [vmem:[#allocation13 + $0x3a8] sm:$0xff] }
 0x72a   :  { %11540 = vmatpush1.bf16.msra.mxu0 %v11539_v40  ;;  %4001 = vmatprep.mubr.f32.mxu1 %v14960_v34  ;;  %v11555_v40 = vpack.c.bf16 %v2334_v60, %v2323_v2  ;;  %v11557_v22 = vpack.c.bf16 %v2357_v35, %v2346_v21  ;;  %v2411_v2 = vld [vmem:[#allocation13 + $0x5b0] sm:$0xff]  ;;  %v2422_v60 = vld [vmem:[#allocation13 + $0x608] sm:$0xff]  ;;  %v2445_v35 = vld [vmem:[#allocation13 + $0x6c0] sm:$0xff] }
 0x72b   :  { %4285 = vmatprep.mubr.f32.mxu0 %v14960_v34  ;;  %11346 = vmatprep.subr.bf16.mxu1 %v11345_v41  ;;  %v2345_v41 = vld [vmem:[#allocation13 + $0x3a0] sm:$0xff]  ;;  %v2434_v21 = vld [vmem:[#allocation13 + $0x668] sm:$0xff] }
 0x72c   :  { %11542 = vmatprep.subr.bf16.mxu0 %v11541_v23  ;;  %v2377_v23 = vld [vmem:[#allocation13 + $0x4a0] sm:$0xff] }
 0x72d   :  { %11348 = vmatpush1.bf16.msra.mxu1 %v11347_v37  ;;  %v11363_v37 = vpack.c.bf16 %v2354_v49, %v2343_v52  ;;  %v2431_v52 = vld [vmem:[#allocation13 + $0x650] sm:$0xff]  ;;  %v2442_v49 = vld [vmem:[#allocation13 + $0x6a8] sm:$0xff] }
 0x72e   :  { %11544 = vmatpush1.bf16.msra.mxu0 %v11543_v1  ;;  %11350 = vmatprep.subr.bf16.mxu1 %v11349_v18  ;;  %v11559_v1 = vpack.c.bf16 %v2356_v16, %v2345_v41  ;;  %v11365_v18 = vpack.c.bf16 %v2377_v23, %v2366_v6  ;;  %v2433_v41 = vld [vmem:[#allocation13 + $0x660] sm:$0xff]  ;;  %v2444_v16 = vld [vmem:[#allocation13 + $0x6b8] sm:$0xff]  ;;  %v2454_v6 = vld [vmem:[#allocation13 + $0x708] sm:$0xff] }
 0x72f   :  { %11546 = vmatprep.subr.bf16.mxu0 %v11545_v38  ;;  %v11561_v38 = vpack.c.bf16 %v2379_v63, %v2368_v14  ;;  %v2465_v23 = vld [vmem:[#allocation13 + $0x760] sm:$0xff]  ;;  %v2456_v14 = vld [vmem:[#allocation13 + $0x718] sm:$0xff]  ;;  %v2467_v63 = vld [vmem:[#allocation13 + $0x770] sm:$0xff] }
 0x731   :  { %11352 = vmatpush1.bf16.msra.mxu1 %v11351_v5  ;;  %v11367_v5 = vpack.c.bf16 %v2376_v10, %v2365_v19  ;;  %v2453_v19 = vld [vmem:[#allocation13 + $0x700] sm:$0xff]  ;;  %v2464_v10 = vld [vmem:[#allocation13 + $0x758] sm:$0xff] }
 0x732   :  { %11548 = vmatpush1.bf16.msra.mxu0 %v11547_v24  ;;  %11354 = vmatprep.subr.bf16.mxu1 %v11353_v11  ;;  %v11563_v24 = vpack.c.bf16 %v2378_v51, %v2367_v27  ;;  %v11369_v11 = vpack.c.bf16 %v2399_v0, %v2388_v25  ;;  %v2455_v27 = vld [vmem:[#allocation13 + $0x710] sm:$0xff]  ;;  %v2466_v51 = vld [vmem:[#allocation13 + $0x768] sm:$0xff]  ;;  %v2476_v25 = vld [vmem:[#allocation13 + $0x7b8] sm:$0xff] }
 0x733   :  { %11550 = vmatprep.subr.bf16.mxu0 %v11549_v26  ;;  %v11565_v26 = vpack.c.bf16 %v2401_v45, %v2390_v15  ;;  %v2487_v0 = vld [vmem:[#allocation13 + $0x810] sm:$0xff]  ;;  %v2478_v15 = vld [vmem:[#allocation13 + $0x7c8] sm:$0xff]  ;;  %v2489_v45 = vld [vmem:[#allocation13 + $0x820] sm:$0xff] }
 0x735   :  { %11356 = vmatpush1.bf16.msra.mxu1 %v11355_v17  ;;  %v11371_v17 = vpack.c.bf16 %v2398_v33, %v2387_v58  ;;  %v2475_v58 = vld [vmem:[#allocation13 + $0x7b0] sm:$0xff]  ;;  %v2486_v33 = vld [vmem:[#allocation13 + $0x808] sm:$0xff] }
 0x736   :  { %11552 = vmatpush1.bf16.msra.mxu0 %v11551_v36  ;;  %11358 = vmatprep.subr.bf16.mxu1 %v11357_v59  ;;  %v11567_v36 = vpack.c.bf16 %v2400_v12, %v2389_v46  ;;  %v11373_v59 = vpack.c.bf16 %v2421_v13, %v2410_v50  ;;  %v2477_v46 = vld [vmem:[#allocation13 + $0x7c0] sm:$0xff]  ;;  %v2488_v12 = vld [vmem:[#allocation13 + $0x818] sm:$0xff]  ;;  %v2498_v50 = vld [vmem:[#allocation13 + $0x868] sm:$0xff] }
 0x737   :  { %11554 = vmatprep.subr.bf16.mxu0 %v11553_v29  ;;  %v11569_v29 = vpack.c.bf16 %v2423_v48, %v2412_v28  ;;  %v2509_v13 = vld [vmem:[#allocation13 + $0x8c0] sm:$0xff]  ;;  %v2500_v28 = vld [vmem:[#allocation13 + $0x878] sm:$0xff]  ;;  %v2511_v48 = vld [vmem:[#allocation13 + $0x8d0] sm:$0xff] }
 0x739   :  { %11360 = vmatpush1.bf16.msra.mxu1 %v11359_v31  ;;  %v11375_v31 = vpack.c.bf16 %v2420_v62, %v2409_v4  ;;  %v2497_v4 = vld [vmem:[#allocation13 + $0x860] sm:$0xff]  ;;  %v2508_v62 = vld [vmem:[#allocation13 + $0x8b8] sm:$0xff] }
 0x73a   :  { %11556 = vmatpush1.bf16.msra.mxu0 %v11555_v40  ;;  %11362 = vmatprep.subr.bf16.mxu1 %v11361_v44  ;;  %v11571_v40 = vpack.c.bf16 %v2422_v60, %v2411_v2  ;;  %v11377_v44 = vpack.c.bf16 %v2443_v61, %v2432_v42  ;;  %v2499_v2 = vld [vmem:[#allocation13 + $0x870] sm:$0xff]  ;;  %v2510_v60 = vld [vmem:[#allocation13 + $0x8c8] sm:$0xff]  ;;  %v2520_v42 = vld [vmem:[#allocation13 + $0x918] sm:$0xff] }
 0x73b   :  { %11558 = vmatprep.subr.bf16.mxu0 %v11557_v22  ;;  %v11573_v22 = vpack.c.bf16 %v2445_v35, %v2434_v21  ;;  %v2531_v61 = vld [vmem:[#allocation13 + $0x970] sm:$0xff]  ;;  %v2522_v21 = vld [vmem:[#allocation13 + $0x928] sm:$0xff]  ;;  %v2533_v35 = vld [vmem:[#allocation13 + $0x980] sm:$0xff] }
 0x73d   :  { %11364 = vmatpush1.bf16.msra.mxu1 %v11363_v37  ;;  %v11379_v37 = vpack.c.bf16 %v2442_v49, %v2431_v52  ;;  %v2519_v52 = vld [vmem:[#allocation13 + $0x910] sm:$0xff]  ;;  %v2530_v49 = vld [vmem:[#allocation13 + $0x968] sm:$0xff] }
 0x73e   :  { %11560 = vmatpush1.bf16.msra.mxu0 %v11559_v1  ;;  %11366 = vmatprep.subr.bf16.mxu1 %v11365_v18  ;;  %v11575_v1 = vpack.c.bf16 %v2444_v16, %v2433_v41  ;;  %v11381_v18 = vpack.c.bf16 %v2465_v23, %v2454_v6  ;;  %v2521_v41 = vld [vmem:[#allocation13 + $0x920] sm:$0xff]  ;;  %v2532_v16 = vld [vmem:[#allocation13 + $0x978] sm:$0xff]  ;;  %v2542_v6 = vld [vmem:[#allocation13 + $0x9c8] sm:$0xff] }
 0x73f   :  { %11562 = vmatprep.subr.bf16.mxu0 %v11561_v38  ;;  %v11577_v38 = vpack.c.bf16 %v2467_v63, %v2456_v14  ;;  %v2553_v23 = vld [vmem:[#allocation13 + $0xa20] sm:$0xff]  ;;  %v2544_v14 = vld [vmem:[#allocation13 + $0x9d8] sm:$0xff]  ;;  %v2555_v63 = vld [vmem:[#allocation13 + $0xa30] sm:$0xff] }
 0x741   :  { %11368 = vmatpush1.bf16.msra.mxu1 %v11367_v5  ;;  %v11383_v5 = vpack.c.bf16 %v2464_v10, %v2453_v19  ;;  %v2541_v19 = vld [vmem:[#allocation13 + $0x9c0] sm:$0xff]  ;;  %v2552_v10 = vld [vmem:[#allocation13 + $0xa18] sm:$0xff] }
 0x742   :  { %11564 = vmatpush1.bf16.msra.mxu0 %v11563_v24  ;;  %11370 = vmatprep.subr.bf16.mxu1 %v11369_v11  ;;  %v11579_v24 = vpack.c.bf16 %v2466_v51, %v2455_v27  ;;  %v11385_v11 = vpack.c.bf16 %v2487_v0, %v2476_v25  ;;  %v2543_v27 = vld [vmem:[#allocation13 + $0x9d0] sm:$0xff]  ;;  %v2554_v51 = vld [vmem:[#allocation13 + $0xa28] sm:$0xff]  ;;  %v2564_v25 = vld [vmem:[#allocation13 + $0xa78] sm:$0xff] }
 0x743   :  { %11566 = vmatprep.subr.bf16.mxu0 %v11565_v26  ;;  %v11581_v26 = vpack.c.bf16 %v2489_v45, %v2478_v15  ;;  %v2575_v0 = vld [vmem:[#allocation13 + $0xad0] sm:$0xff]  ;;  %v2566_v15 = vld [vmem:[#allocation13 + $0xa88] sm:$0xff]  ;;  %v2577_v45 = vld [vmem:[#allocation13 + $0xae0] sm:$0xff] }
 0x745   :  { %11372 = vmatpush1.bf16.msra.mxu1 %v11371_v17  ;;  %v11387_v17 = vpack.c.bf16 %v2486_v33, %v2475_v58  ;;  %v2563_v58 = vld [vmem:[#allocation13 + $0xa70] sm:$0xff]  ;;  %v2574_v33 = vld [vmem:[#allocation13 + $0xac8] sm:$0xff] }
 0x746   :  { %11568 = vmatpush1.bf16.msra.mxu0 %v11567_v36  ;;  %11374 = vmatprep.subr.bf16.mxu1 %v11373_v59  ;;  %v11583_v36 = vpack.c.bf16 %v2488_v12, %v2477_v46  ;;  %v11389_v59 = vpack.c.bf16 %v2509_v13, %v2498_v50  ;;  %v2565_v46 = vld [vmem:[#allocation13 + $0xa80] sm:$0xff]  ;;  %v2576_v12 = vld [vmem:[#allocation13 + $0xad8] sm:$0xff]  ;;  %v2586_v50 = vld [vmem:[#allocation13 + $0xb28] sm:$0xff] }
 0x747   :  { %11570 = vmatprep.subr.bf16.mxu0 %v11569_v29  ;;  %v11585_v29 = vpack.c.bf16 %v2511_v48, %v2500_v28  ;;  %v2597_v13 = vld [vmem:[#allocation13 + $0xb80] sm:$0xff]  ;;  %v2588_v28 = vld [vmem:[#allocation13 + $0xb38] sm:$0xff]  ;;  %v2599_v48 = vld [vmem:[#allocation13 + $0xb90] sm:$0xff] }
 0x749   :  { %11376 = vmatpush1.bf16.msra.mxu1 %v11375_v31  ;;  %v11391_v31 = vpack.c.bf16 %v2508_v62, %v2497_v4  ;;  %v2585_v4 = vld [vmem:[#allocation13 + $0xb20] sm:$0xff]  ;;  %v2596_v62 = vld [vmem:[#allocation13 + $0xb78] sm:$0xff] }
 0x74a   :  { %11572 = vmatpush1.bf16.msra.mxu0 %v11571_v40  ;;  %11378 = vmatprep.subr.bf16.mxu1 %v11377_v44  ;;  %v11587_v40 = vpack.c.bf16 %v2510_v60, %v2499_v2  ;;  %v11393_v44 = vpack.c.bf16 %v2531_v61, %v2520_v42  ;;  %v11601_v2 = vpack.c.bf16 %v2599_v48, %v2588_v28  ;;  %v2598_v60 = vld [vmem:[#allocation13 + $0xb88] sm:$0xff]  ;;  %v2608_v42 = vld [vmem:[#allocation13 + $0xbd8] sm:$0xff]  ;;  %v2619_v61 = vld [vmem:[#allocation13 + $0xc30] sm:$0xff] }
 0x74b   :  { %11574 = vmatprep.subr.bf16.mxu0 %v11573_v22  ;;  %v11589_v22 = vpack.c.bf16 %v2533_v35, %v2522_v21  ;;  %v11407_v21 = vpack.c.bf16 %v2596_v62, %v2585_v4  ;;  %v2610_v35 = vld [vmem:[#allocation13 + $0xbe8] sm:$0xff]  ;;  %v2676_v28 = vld [vmem:[#allocation13 + $0xdf8] sm:$0xff]  ;;  %v2687_v48 = vld [vmem:[#allocation13 + $0xe50] sm:$0xff] }
 0x74c   :  { %v2673_v4 = vld [vmem:[#allocation13 + $0xde0] sm:$0xff]  ;;  %v2684_v62 = vld [vmem:[#allocation13 + $0xe38] sm:$0xff] }
 0x74d   :  { %11380 = vmatpush1.bf16.msra.mxu1 %v11379_v37  ;;  %v11395_v37 = vpack.c.bf16 %v2530_v49, %v2519_v52  ;;  %v2618_v52 = vld [vmem:[#allocation13 + $0xc28] sm:$0xff]  ;;  %v2609_v49 = vld [vmem:[#allocation13 + $0xbe0] sm:$0xff] }
 0x74e   :  { %11576 = vmatpush1.bf16.msra.mxu0 %v11575_v1  ;;  %11382 = vmatprep.subr.bf16.mxu1 %v11381_v18  ;;  %v11591_v1 = vpack.c.bf16 %v2532_v16, %v2521_v41  ;;  %v11397_v18 = vpack.c.bf16 %v2553_v23, %v2542_v6  ;;  %v11409_v41 = vpack.c.bf16 %v2619_v61, %v2608_v42  ;;  %v2630_v16 = vld [vmem:[#allocation13 + $0xc88] sm:$0xff]  ;;  %v2641_v6 = vld [vmem:[#allocation13 + $0xce0] sm:$0xff]  ;;  %v2696_v42 = vld [vmem:[#allocation13 + $0xe98] sm:$0xff] }
 0x74f   :  { %11578 = vmatprep.subr.bf16.mxu0 %v11577_v38  ;;  %v11593_v38 = vpack.c.bf16 %v2555_v63, %v2544_v14  ;;  %v2632_v14 = vld [vmem:[#allocation13 + $0xc98] sm:$0xff]  ;;  %v2643_v63 = vld [vmem:[#allocation13 + $0xcf0] sm:$0xff] }
 0x750   :  { %v2707_v61 = vld [vmem:[#allocation13 + $0xef0] sm:$0xff] }
 0x751   :  { %11384 = vmatpush1.bf16.msra.mxu1 %v11383_v5  ;;  %v11399_v5 = vpack.c.bf16 %v2552_v10, %v2541_v19  ;;  %v2629_v19 = vld [vmem:[#allocation13 + $0xc80] sm:$0xff]  ;;  %v2640_v10 = vld [vmem:[#allocation13 + $0xcd8] sm:$0xff] }
 0x752   :  { %11580 = vmatpush1.bf16.msra.mxu0 %v11579_v24  ;;  %11386 = vmatprep.subr.bf16.mxu1 %v11385_v11  ;;  %v11595_v24 = vpack.c.bf16 %v2554_v51, %v2543_v27  ;;  %v11401_v11 = vpack.c.bf16 %v2575_v0, %v2564_v25  ;;  %v2631_v27 = vld [vmem:[#allocation13 + $0xc90] sm:$0xff]  ;;  %v2642_v51 = vld [vmem:[#allocation13 + $0xce8] sm:$0xff]  ;;  %v2652_v25 = vld [vmem:[#allocation13 + $0xd38] sm:$0xff] }
 0x753   :  { %11582 = vmatprep.subr.bf16.mxu0 %v11581_v26  ;;  %v11597_v26 = vpack.c.bf16 %v2577_v45, %v2566_v15  ;;  %v2663_v0 = vld [vmem:[#allocation13 + $0xd90] sm:$0xff]  ;;  %v2654_v15 = vld [vmem:[#allocation13 + $0xd48] sm:$0xff]  ;;  %v2665_v45 = vld [vmem:[#allocation13 + $0xda0] sm:$0xff] }
 0x755   :  { %11388 = vmatpush1.bf16.msra.mxu1 %v11387_v17  ;;  %v11403_v17 = vpack.c.bf16 %v2574_v33, %v2563_v58  ;;  %v2651_v58 = vld [vmem:[#allocation13 + $0xd30] sm:$0xff]  ;;  %v2662_v33 = vld [vmem:[#allocation13 + $0xd88] sm:$0xff] }
 0x756   :  { %11584 = vmatpush1.bf16.msra.mxu0 %v11583_v36  ;;  %11390 = vmatprep.subr.bf16.mxu1 %v11389_v59  ;;  %v11599_v36 = vpack.c.bf16 %v2576_v12, %v2565_v46  ;;  %v11405_v59 = vpack.c.bf16 %v2597_v13, %v2586_v50  ;;  %v2653_v46 = vld [vmem:[#allocation13 + $0xd40] sm:$0xff]  ;;  %v2664_v12 = vld [vmem:[#allocation13 + $0xd98] sm:$0xff]  ;;  %v2674_v50 = vld [vmem:[#allocation13 + $0xde8] sm:$0xff] }
 0x757   :  { %11586 = vmatprep.subr.bf16.mxu0 %v11585_v29  ;;  %v2587_v29 = vld [vmem:[#allocation13 + $0xb30] sm:$0xff]  ;;  %v2685_v13 = vld [vmem:[#allocation13 + $0xe40] sm:$0xff] }
 0x759   :  { %11392 = vmatpush1.bf16.msra.mxu1 %v11391_v31  ;;  %v2621_v31 = vld [vmem:[#allocation13 + $0xc40] sm:$0xff] }
 0x75a   :  { %11588 = vmatpush1.bf16.msra.mxu0 %v11587_v40  ;;  %11394 = vmatprep.subr.bf16.mxu1 %v11393_v44  ;;  %v11603_v40 = vpack.c.bf16 %v2598_v60, %v2587_v29  ;;  %v2607_v44 = vld [vmem:[#allocation13 + $0xbd0] sm:$0xff]  ;;  %v11605_v23 = vpack.c.bf16 %v2621_v31, %v2610_v35  ;;  %v11617_v29 = vpack.c.bf16 %v2687_v48, %v2676_v28  ;;  %v2686_v60 = vld [vmem:[#allocation13 + $0xe48] sm:$0xff]  ;;  %v2709_v35 = vld [vmem:[#allocation13 + $0xf00] sm:$0xff] }
 0x75b   :  { %11590 = vmatprep.subr.bf16.mxu0 %v11589_v22  ;;  %v2620_v22 = vld [vmem:[#allocation13 + $0xc38] sm:$0xff]  ;;  %v11423_v31 = vpack.c.bf16 %v2684_v62, %v2673_v4  ;;  %v2775_v48 = vld [vmem:[#allocation13 + $0x1110] sm:$0xff]  ;;  %v2761_v4 = vld [vmem:[#allocation13 + $0x10a0] sm:$0xff] }
 0x75c   :  { %v2764_v28 = vld [vmem:[#allocation13 + $0x10b8] sm:$0xff] }
 0x75d   :  { %11396 = vmatpush1.bf16.msra.mxu1 %v11395_v37  ;;  %v11411_v37 = vpack.c.bf16 %v2618_v52, %v2607_v44  ;;  %v11425_v44 = vpack.c.bf16 %v2707_v61, %v2696_v42  ;;  %v2695_v52 = vld [vmem:[#allocation13 + $0xe90] sm:$0xff]  ;;  %v2772_v62 = vld [vmem:[#allocation13 + $0x10f8] sm:$0xff] }
 0x75e   :  { %11592 = vmatpush1.bf16.msra.mxu0 %v11591_v1  ;;  %11398 = vmatprep.subr.bf16.mxu1 %v11397_v18  ;;  %v11607_v1 = vpack.c.bf16 %v2620_v22, %v2609_v49  ;;  %v11413_v18 = vpack.c.bf16 %v2641_v6, %v2630_v16  ;;  %v2706_v49 = vld [vmem:[#allocation13 + $0xee8] sm:$0xff]  ;;  %v2708_v16 = vld [vmem:[#allocation13 + $0xef8] sm:$0xff]  ;;  %v2795_v61 = vld [vmem:[#allocation13 + $0x11b0] sm:$0xff] }
 0x75f   :  { %11594 = vmatprep.subr.bf16.mxu0 %v11593_v38  ;;  %v11609_v38 = vpack.c.bf16 %v2643_v63, %v2632_v14  ;;  %v2718_v6 = vld [vmem:[#allocation13 + $0xf48] sm:$0xff]  ;;  %v2720_v14 = vld [vmem:[#allocation13 + $0xf58] sm:$0xff]  ;;  %v2731_v63 = vld [vmem:[#allocation13 + $0xfb0] sm:$0xff] }
 0x760   :  { %v2784_v42 = vld [vmem:[#allocation13 + $0x1158] sm:$0xff] }
 0x761   :  { %11400 = vmatpush1.bf16.msra.mxu1 %v11399_v5  ;;  %v11415_v5 = vpack.c.bf16 %v2640_v10, %v2629_v19  ;;  %v2717_v19 = vld [vmem:[#allocation13 + $0xf40] sm:$0xff]  ;;  %v2728_v10 = vld [vmem:[#allocation13 + $0xf98] sm:$0xff] }
 0x762   :  { %11596 = vmatpush1.bf16.msra.mxu0 %v11595_v24  ;;  %11402 = vmatprep.subr.bf16.mxu1 %v11401_v11  ;;  %v11611_v24 = vpack.c.bf16 %v2642_v51, %v2631_v27  ;;  %v11417_v11 = vpack.c.bf16 %v2663_v0, %v2652_v25  ;;  %v2719_v27 = vld [vmem:[#allocation13 + $0xf50] sm:$0xff]  ;;  %v2730_v51 = vld [vmem:[#allocation13 + $0xfa8] sm:$0xff]  ;;  %v2740_v25 = vld [vmem:[#allocation13 + $0xff8] sm:$0xff] }
 0x763   :  { %11598 = vmatprep.subr.bf16.mxu0 %v11597_v26  ;;  %v11613_v26 = vpack.c.bf16 %v2665_v45, %v2654_v15  ;;  %v2751_v0 = vld [vmem:[#allocation13 + $0x1050] sm:$0xff]  ;;  %v2742_v15 = vld [vmem:[#allocation13 + $0x1008] sm:$0xff]  ;;  %v2753_v45 = vld [vmem:[#allocation13 + $0x1060] sm:$0xff] }
 0x765   :  { %11404 = vmatpush1.bf16.msra.mxu1 %v11403_v17  ;;  %v11419_v17 = vpack.c.bf16 %v2662_v33, %v2651_v58  ;;  %v2739_v58 = vld [vmem:[#allocation13 + $0xff0] sm:$0xff]  ;;  %v2750_v33 = vld [vmem:[#allocation13 + $0x1048] sm:$0xff] }
 0x766   :  { %11600 = vmatpush1.bf16.msra.mxu0 %v11599_v36  ;;  %11406 = vmatprep.subr.bf16.mxu1 %v11405_v59  ;;  %v11615_v36 = vpack.c.bf16 %v2664_v12, %v2653_v46  ;;  %v11421_v59 = vpack.c.bf16 %v2685_v13, %v2674_v50  ;;  %v2741_v46 = vld [vmem:[#allocation13 + $0x1000] sm:$0xff]  ;;  %v2752_v12 = vld [vmem:[#allocation13 + $0x1058] sm:$0xff]  ;;  %v2762_v50 = vld [vmem:[#allocation13 + $0x10a8] sm:$0xff] }
 0x767   :  { %11602 = vmatprep.subr.bf16.mxu0 %v11601_v2  ;;  %v2675_v2 = vld [vmem:[#allocation13 + $0xdf0] sm:$0xff]  ;;  %v2773_v13 = vld [vmem:[#allocation13 + $0x1100] sm:$0xff] }
 0x768   :  { %4002 = vmatmul.mubr.f32.vlgmr.msra.gmra.mrb[26].mxu1 %v14965_v9 }
 0x769   :  { %4286 = vmatmul.mubr.f32.vlgmr.msra.gmra.mrb[20].mxu0 %v14965_v9  ;;  %11408 = vmatpush1.bf16.msra.mxu1 %v11407_v21  ;;  %v2698_v21 = vld [vmem:[#allocation13 + $0xea8] sm:$0xff] }
 0x76a   :  { %4072 = vmatprep.mubr.f32.mxu1 %v14978_v56  ;;  %11604 = vmatpush1.bf16.msra.mxu0 %v11603_v40  ;;  %v11619_v40 = vpack.c.bf16 %v2686_v60, %v2675_v2  ;;  %v11621_v22 = vpack.c.bf16 %v2709_v35, %v2698_v21  ;;  %v2763_v2 = vld [vmem:[#allocation13 + $0x10b0] sm:$0xff]  ;;  %v2774_v60 = vld [vmem:[#allocation13 + $0x1108] sm:$0xff]  ;;  %v2797_v35 = vld [vmem:[#allocation13 + $0x11c0] sm:$0xff] }
 0x76b   :  { %4356 = vmatprep.mubr.f32.mxu0 %v14978_v56  ;;  %11410 = vmatprep.subr.bf16.mxu1 %v11409_v41  ;;  %v2697_v41 = vld [vmem:[#allocation13 + $0xea0] sm:$0xff]  ;;  %v2786_v21 = vld [vmem:[#allocation13 + $0x1168] sm:$0xff] }
 0x76c   :  { %11606 = vmatprep.subr.bf16.mxu0 %v11605_v23  ;;  %v2729_v23 = vld [vmem:[#allocation13 + $0xfa0] sm:$0xff] }
 0x76d   :  { %11412 = vmatpush1.bf16.msra.mxu1 %v11411_v37  ;;  %v11427_v37 = vpack.c.bf16 %v2706_v49, %v2695_v52  ;;  %v2783_v52 = vld [vmem:[#allocation13 + $0x1150] sm:$0xff]  ;;  %v2794_v49 = vld [vmem:[#allocation13 + $0x11a8] sm:$0xff] }
 0x76e   :  { %11608 = vmatpush1.bf16.msra.mxu0 %v11607_v1  ;;  %11414 = vmatprep.subr.bf16.mxu1 %v11413_v18  ;;  %v11623_v1 = vpack.c.bf16 %v2708_v16, %v2697_v41  ;;  %v11429_v18 = vpack.c.bf16 %v2729_v23, %v2718_v6  ;;  %v2785_v41 = vld [vmem:[#allocation13 + $0x1160] sm:$0xff]  ;;  %v2796_v16 = vld [vmem:[#allocation13 + $0x11b8] sm:$0xff]  ;;  %v2806_v6 = vld [vmem:[#allocation13 + $0x1208] sm:$0xff] }
 0x76f   :  { %11610 = vmatprep.subr.bf16.mxu0 %v11609_v38  ;;  %v11625_v38 = vpack.c.bf16 %v2731_v63, %v2720_v14  ;;  %v2817_v23 = vld [vmem:[#allocation13 + $0x1260] sm:$0xff]  ;;  %v2808_v14 = vld [vmem:[#allocation13 + $0x1218] sm:$0xff]  ;;  %v2819_v63 = vld [vmem:[#allocation13 + $0x1270] sm:$0xff] }
 0x771   :  { %11416 = vmatpush1.bf16.msra.mxu1 %v11415_v5  ;;  %v11431_v5 = vpack.c.bf16 %v2728_v10, %v2717_v19  ;;  %v2805_v19 = vld [vmem:[#allocation13 + $0x1200] sm:$0xff]  ;;  %v2816_v10 = vld [vmem:[#allocation13 + $0x1258] sm:$0xff] }
 0x772   :  { %11612 = vmatpush1.bf16.msra.mxu0 %v11611_v24  ;;  %11418 = vmatprep.subr.bf16.mxu1 %v11417_v11  ;;  %v11627_v24 = vpack.c.bf16 %v2730_v51, %v2719_v27  ;;  %v11433_v11 = vpack.c.bf16 %v2751_v0, %v2740_v25  ;;  %v2807_v27 = vld [vmem:[#allocation13 + $0x1210] sm:$0xff]  ;;  %v2818_v51 = vld [vmem:[#allocation13 + $0x1268] sm:$0xff]  ;;  %v2828_v25 = vld [vmem:[#allocation13 + $0x12b8] sm:$0xff] }
 0x773   :  { %11614 = vmatprep.subr.bf16.mxu0 %v11613_v26  ;;  %v11629_v26 = vpack.c.bf16 %v2753_v45, %v2742_v15  ;;  %v2839_v0 = vld [vmem:[#allocation13 + $0x1310] sm:$0xff]  ;;  %v2830_v15 = vld [vmem:[#allocation13 + $0x12c8] sm:$0xff]  ;;  %v2841_v45 = vld [vmem:[#allocation13 + $0x1320] sm:$0xff] }
 0x775   :  { %11420 = vmatpush1.bf16.msra.mxu1 %v11419_v17  ;;  %v11435_v17 = vpack.c.bf16 %v2750_v33, %v2739_v58  ;;  %v2827_v58 = vld [vmem:[#allocation13 + $0x12b0] sm:$0xff]  ;;  %v2838_v33 = vld [vmem:[#allocation13 + $0x1308] sm:$0xff] }
 0x776   :  { %11616 = vmatpush1.bf16.msra.mxu0 %v11615_v36  ;;  %11422 = vmatprep.subr.bf16.mxu1 %v11421_v59  ;;  %v11631_v36 = vpack.c.bf16 %v2752_v12, %v2741_v46  ;;  %v11437_v59 = vpack.c.bf16 %v2773_v13, %v2762_v50  ;;  %v2829_v46 = vld [vmem:[#allocation13 + $0x12c0] sm:$0xff]  ;;  %v2840_v12 = vld [vmem:[#allocation13 + $0x1318] sm:$0xff]  ;;  %v2850_v50 = vld [vmem:[#allocation13 + $0x1368] sm:$0xff] }
 0x777   :  { %11618 = vmatprep.subr.bf16.mxu0 %v11617_v29  ;;  %v11633_v29 = vpack.c.bf16 %v2775_v48, %v2764_v28  ;;  %v2861_v13 = vld [vmem:[#allocation13 + $0x13c0] sm:$0xff]  ;;  %v2852_v28 = vld [vmem:[#allocation13 + $0x1378] sm:$0xff]  ;;  %v2863_v48 = vld [vmem:[#allocation13 + $0x13d0] sm:$0xff] }
 0x779   :  { %11424 = vmatpush1.bf16.msra.mxu1 %v11423_v31  ;;  %v11439_v31 = vpack.c.bf16 %v2772_v62, %v2761_v4  ;;  %v2849_v4 = vld [vmem:[#allocation13 + $0x1360] sm:$0xff]  ;;  %v2860_v62 = vld [vmem:[#allocation13 + $0x13b8] sm:$0xff] }
 0x77a   :  { %11620 = vmatpush1.bf16.msra.mxu0 %v11619_v40  ;;  %11426 = vmatprep.subr.bf16.mxu1 %v11425_v44  ;;  %v11635_v40 = vpack.c.bf16 %v2774_v60, %v2763_v2  ;;  %v11441_v44 = vpack.c.bf16 %v2795_v61, %v2784_v42  ;;  %v2851_v2 = vld [vmem:[#allocation13 + $0x1370] sm:$0xff]  ;;  %v2862_v60 = vld [vmem:[#allocation13 + $0x13c8] sm:$0xff]  ;;  %v2872_v42 = vld [vmem:[#allocation13 + $0x1418] sm:$0xff] }
 0x77b   :  { %11622 = vmatprep.subr.bf16.mxu0 %v11621_v22  ;;  %v11637_v22 = vpack.c.bf16 %v2797_v35, %v2786_v21  ;;  %v2883_v61 = vld [vmem:[#allocation13 + $0x1470] sm:$0xff]  ;;  %v2874_v21 = vld [vmem:[#allocation13 + $0x1428] sm:$0xff]  ;;  %v2885_v35 = vld [vmem:[#allocation13 + $0x1480] sm:$0xff] }
 0x77d   :  { %11428 = vmatpush1.bf16.msra.mxu1 %v11427_v37  ;;  %v11443_v37 = vpack.c.bf16 %v2794_v49, %v2783_v52  ;;  %v2871_v52 = vld [vmem:[#allocation13 + $0x1410] sm:$0xff]  ;;  %v2882_v49 = vld [vmem:[#allocation13 + $0x1468] sm:$0xff] }
 0x77e   :  { %11624 = vmatpush1.bf16.msra.mxu0 %v11623_v1  ;;  %11430 = vmatprep.subr.bf16.mxu1 %v11429_v18  ;;  %v11639_v1 = vpack.c.bf16 %v2796_v16, %v2785_v41  ;;  %v11445_v18 = vpack.c.bf16 %v2817_v23, %v2806_v6  ;;  %v2873_v41 = vld [vmem:[#allocation13 + $0x1420] sm:$0xff]  ;;  %v2884_v16 = vld [vmem:[#allocation13 + $0x1478] sm:$0xff]  ;;  %v2894_v6 = vld [vmem:[#allocation13 + $0x14c8] sm:$0xff] }
 0x77f   :  { %11626 = vmatprep.subr.bf16.mxu0 %v11625_v38  ;;  %v11641_v38 = vpack.c.bf16 %v2819_v63, %v2808_v14  ;;  %v2905_v23 = vld [vmem:[#allocation13 + $0x1520] sm:$0xff]  ;;  %v2896_v14 = vld [vmem:[#allocation13 + $0x14d8] sm:$0xff]  ;;  %v2907_v63 = vld [vmem:[#allocation13 + $0x1530] sm:$0xff] }
 0x781   :  { %11432 = vmatpush1.bf16.msra.mxu1 %v11431_v5  ;;  %v11447_v5 = vpack.c.bf16 %v2816_v10, %v2805_v19  ;;  %v2893_v19 = vld [vmem:[#allocation13 + $0x14c0] sm:$0xff]  ;;  %v2904_v10 = vld [vmem:[#allocation13 + $0x1518] sm:$0xff] }
 0x782   :  { %11628 = vmatpush1.bf16.msra.mxu0 %v11627_v24  ;;  %11434 = vmatprep.subr.bf16.mxu1 %v11433_v11  ;;  %v11643_v24 = vpack.c.bf16 %v2818_v51, %v2807_v27  ;;  %v11449_v11 = vpack.c.bf16 %v2839_v0, %v2828_v25  ;;  %v2895_v27 = vld [vmem:[#allocation13 + $0x14d0] sm:$0xff]  ;;  %v2906_v51 = vld [vmem:[#allocation13 + $0x1528] sm:$0xff]  ;;  %v2916_v25 = vld [vmem:[#allocation13 + $0x1578] sm:$0xff] }
 0x783   :  { %11630 = vmatprep.subr.bf16.mxu0 %v11629_v26  ;;  %v11645_v26 = vpack.c.bf16 %v2841_v45, %v2830_v15  ;;  %v2927_v0 = vld [vmem:[#allocation13 + $0x15d0] sm:$0xff]  ;;  %v2918_v15 = vld [vmem:[#allocation13 + $0x1588] sm:$0xff]  ;;  %v2929_v45 = vld [vmem:[#allocation13 + $0x15e0] sm:$0xff] }
 0x785   :  { %11436 = vmatpush1.bf16.msra.mxu1 %v11435_v17  ;;  %v11451_v17 = vpack.c.bf16 %v2838_v33, %v2827_v58  ;;  %v2915_v58 = vld [vmem:[#allocation13 + $0x1570] sm:$0xff]  ;;  %v2926_v33 = vld [vmem:[#allocation13 + $0x15c8] sm:$0xff] }
 0x786   :  { %11632 = vmatpush1.bf16.msra.mxu0 %v11631_v36  ;;  %11438 = vmatprep.subr.bf16.mxu1 %v11437_v59  ;;  %v11647_v36 = vpack.c.bf16 %v2840_v12, %v2829_v46  ;;  %v11453_v59 = vpack.c.bf16 %v2861_v13, %v2850_v50  ;;  %v2917_v46 = vld [vmem:[#allocation13 + $0x1580] sm:$0xff]  ;;  %v2928_v12 = vld [vmem:[#allocation13 + $0x15d8] sm:$0xff]  ;;  %v2938_v50 = vld [vmem:[#allocation13 + $0x1628] sm:$0xff] }
 0x787   :  { %11634 = vmatprep.subr.bf16.mxu0 %v11633_v29  ;;  %v11649_v29 = vpack.c.bf16 %v2863_v48, %v2852_v28  ;;  %v2949_v13 = vld [vmem:[#allocation13 + $0x1680] sm:$0xff]  ;;  %v2940_v28 = vld [vmem:[#allocation13 + $0x1638] sm:$0xff]  ;;  %v2951_v48 = vld [vmem:[#allocation13 + $0x1690] sm:$0xff] }
 0x789   :  { %11440 = vmatpush1.bf16.msra.mxu1 %v11439_v31  ;;  %v11455_v31 = vpack.c.bf16 %v2860_v62, %v2849_v4  ;;  %v2937_v4 = vld [vmem:[#allocation13 + $0x1620] sm:$0xff]  ;;  %v2948_v62 = vld [vmem:[#allocation13 + $0x1678] sm:$0xff] }
 0x78a   :  { %11636 = vmatpush1.bf16.msra.mxu0 %v11635_v40  ;;  %11442 = vmatprep.subr.bf16.mxu1 %v11441_v44  ;;  %v11651_v40 = vpack.c.bf16 %v2862_v60, %v2851_v2  ;;  %v11457_v44 = vpack.c.bf16 %v2883_v61, %v2872_v42  ;;  %v11665_v2 = vpack.c.bf16 %v2951_v48, %v2940_v28  ;;  %v2950_v60 = vld [vmem:[#allocation13 + $0x1688] sm:$0xff]  ;;  %v2960_v42 = vld [vmem:[#allocation13 + $0x16d8] sm:$0xff]  ;;  %v2971_v61 = vld [vmem:[#allocation13 + $0x1730] sm:$0xff] }
 0x78b   :  { %11638 = vmatprep.subr.bf16.mxu0 %v11637_v22  ;;  %v11653_v22 = vpack.c.bf16 %v2885_v35, %v2874_v21  ;;  %v11471_v21 = vpack.c.bf16 %v2948_v62, %v2937_v4  ;;  %v2962_v35 = vld [vmem:[#allocation13 + $0x16e8] sm:$0xff]  ;;  %v3028_v28 = vld [vmem:[#allocation13 + $0x18f8] sm:$0xff]  ;;  %v3039_v48 = vld [vmem:[#allocation13 + $0x1950] sm:$0xff] }
 0x78c   :  { %v3025_v4 = vld [vmem:[#allocation13 + $0x18e0] sm:$0xff]  ;;  %v3036_v62 = vld [vmem:[#allocation13 + $0x1938] sm:$0xff] }
 0x78d   :  { %11444 = vmatpush1.bf16.msra.mxu1 %v11443_v37  ;;  %v11459_v37 = vpack.c.bf16 %v2882_v49, %v2871_v52  ;;  %v2970_v52 = vld [vmem:[#allocation13 + $0x1728] sm:$0xff]  ;;  %v2961_v49 = vld [vmem:[#allocation13 + $0x16e0] sm:$0xff] }
 0x78e   :  { %11640 = vmatpush1.bf16.msra.mxu0 %v11639_v1  ;;  %11446 = vmatprep.subr.bf16.mxu1 %v11445_v18  ;;  %v11655_v1 = vpack.c.bf16 %v2884_v16, %v2873_v41  ;;  %v11461_v18 = vpack.c.bf16 %v2905_v23, %v2894_v6  ;;  %v11473_v41 = vpack.c.bf16 %v2971_v61, %v2960_v42  ;;  %v2982_v16 = vld [vmem:[#allocation13 + $0x1788] sm:$0xff]  ;;  %v2993_v6 = vld [vmem:[#allocation13 + $0x17e0] sm:$0xff]  ;;  %v3048_v42 = vld [vmem:[#allocation13 + $0x1998] sm:$0xff] }
 0x78f   :  { %11642 = vmatprep.subr.bf16.mxu0 %v11641_v38  ;;  %v11657_v38 = vpack.c.bf16 %v2907_v63, %v2896_v14  ;;  %v2984_v14 = vld [vmem:[#allocation13 + $0x1798] sm:$0xff]  ;;  %v2995_v63 = vld [vmem:[#allocation13 + $0x17f0] sm:$0xff] }
 0x790   :  { %v3059_v61 = vld [vmem:[#allocation13 + $0x19f0] sm:$0xff] }
 0x791   :  { %11448 = vmatpush1.bf16.msra.mxu1 %v11447_v5  ;;  %v11463_v5 = vpack.c.bf16 %v2904_v10, %v2893_v19  ;;  %v2981_v19 = vld [vmem:[#allocation13 + $0x1780] sm:$0xff]  ;;  %v2992_v10 = vld [vmem:[#allocation13 + $0x17d8] sm:$0xff] }
 0x792   :  { %11644 = vmatpush1.bf16.msra.mxu0 %v11643_v24  ;;  %11450 = vmatprep.subr.bf16.mxu1 %v11449_v11  ;;  %v11659_v24 = vpack.c.bf16 %v2906_v51, %v2895_v27  ;;  %v11465_v11 = vpack.c.bf16 %v2927_v0, %v2916_v25  ;;  %v2983_v27 = vld [vmem:[#allocation13 + $0x1790] sm:$0xff]  ;;  %v2994_v51 = vld [vmem:[#allocation13 + $0x17e8] sm:$0xff]  ;;  %v3004_v25 = vld [vmem:[#allocation13 + $0x1838] sm:$0xff] }
 0x793   :  { %11646 = vmatprep.subr.bf16.mxu0 %v11645_v26  ;;  %v11661_v26 = vpack.c.bf16 %v2929_v45, %v2918_v15  ;;  %v3015_v0 = vld [vmem:[#allocation13 + $0x1890] sm:$0xff]  ;;  %v3006_v15 = vld [vmem:[#allocation13 + $0x1848] sm:$0xff]  ;;  %v3017_v45 = vld [vmem:[#allocation13 + $0x18a0] sm:$0xff] }
 0x795   :  { %11452 = vmatpush1.bf16.msra.mxu1 %v11451_v17  ;;  %v11467_v17 = vpack.c.bf16 %v2926_v33, %v2915_v58  ;;  %v3003_v58 = vld [vmem:[#allocation13 + $0x1830] sm:$0xff]  ;;  %v3014_v33 = vld [vmem:[#allocation13 + $0x1888] sm:$0xff] }
 0x796   :  { %11648 = vmatpush1.bf16.msra.mxu0 %v11647_v36  ;;  %11454 = vmatprep.subr.bf16.mxu1 %v11453_v59  ;;  %v11663_v36 = vpack.c.bf16 %v2928_v12, %v2917_v46  ;;  %v11469_v59 = vpack.c.bf16 %v2949_v13, %v2938_v50  ;;  %v3005_v46 = vld [vmem:[#allocation13 + $0x1840] sm:$0xff]  ;;  %v3016_v12 = vld [vmem:[#allocation13 + $0x1898] sm:$0xff]  ;;  %v3026_v50 = vld [vmem:[#allocation13 + $0x18e8] sm:$0xff] }
 0x797   :  { %11650 = vmatprep.subr.bf16.mxu0 %v11649_v29  ;;  %v2939_v29 = vld [vmem:[#allocation13 + $0x1630] sm:$0xff]  ;;  %v3037_v13 = vld [vmem:[#allocation13 + $0x1940] sm:$0xff] }
 0x799   :  { %11456 = vmatpush1.bf16.msra.mxu1 %v11455_v31  ;;  %v2973_v31 = vld [vmem:[#allocation13 + $0x1740] sm:$0xff] }
 0x79a   :  { %11652 = vmatpush1.bf16.msra.mxu0 %v11651_v40  ;;  %11458 = vmatprep.subr.bf16.mxu1 %v11457_v44  ;;  %v11667_v40 = vpack.c.bf16 %v2950_v60, %v2939_v29  ;;  %v2959_v44 = vld [vmem:[#allocation13 + $0x16d0] sm:$0xff]  ;;  %v11669_v23 = vpack.c.bf16 %v2973_v31, %v2962_v35  ;;  %v11681_v29 = vpack.c.bf16 %v3039_v48, %v3028_v28  ;;  %v3038_v60 = vld [vmem:[#allocation13 + $0x1948] sm:$0xff]  ;;  %v3061_v35 = vld [vmem:[#allocation13 + $0x1a00] sm:$0xff] }
 0x79b   :  { %11654 = vmatprep.subr.bf16.mxu0 %v11653_v22  ;;  %v2972_v22 = vld [vmem:[#allocation13 + $0x1738] sm:$0xff]  ;;  %v11487_v31 = vpack.c.bf16 %v3036_v62, %v3025_v4  ;;  %v3127_v48 = vld [vmem:[#allocation13 + $0x1c10] sm:$0xff]  ;;  %v3113_v4 = vld [vmem:[#allocation13 + $0x1ba0] sm:$0xff] }
 0x79c   :  { %v3116_v28 = vld [vmem:[#allocation13 + $0x1bb8] sm:$0xff] }
 0x79d   :  { %11460 = vmatpush1.bf16.msra.mxu1 %v11459_v37  ;;  %v11475_v37 = vpack.c.bf16 %v2970_v52, %v2959_v44  ;;  %v11489_v44 = vpack.c.bf16 %v3059_v61, %v3048_v42  ;;  %v3047_v52 = vld [vmem:[#allocation13 + $0x1990] sm:$0xff]  ;;  %v3124_v62 = vld [vmem:[#allocation13 + $0x1bf8] sm:$0xff] }
 0x79e   :  { %11656 = vmatpush1.bf16.msra.mxu0 %v11655_v1  ;;  %11462 = vmatprep.subr.bf16.mxu1 %v11461_v18  ;;  %v11671_v1 = vpack.c.bf16 %v2972_v22, %v2961_v49  ;;  %v11477_v18 = vpack.c.bf16 %v2993_v6, %v2982_v16  ;;  %v3058_v49 = vld [vmem:[#allocation13 + $0x19e8] sm:$0xff]  ;;  %v3060_v16 = vld [vmem:[#allocation13 + $0x19f8] sm:$0xff]  ;;  %v3147_v61 = vld [vmem:[#allocation13 + $0x1cb0] sm:$0xff] }
 0x79f   :  { %11658 = vmatprep.subr.bf16.mxu0 %v11657_v38  ;;  %v11673_v38 = vpack.c.bf16 %v2995_v63, %v2984_v14  ;;  %v3070_v6 = vld [vmem:[#allocation13 + $0x1a48] sm:$0xff]  ;;  %v3072_v14 = vld [vmem:[#allocation13 + $0x1a58] sm:$0xff]  ;;  %v3083_v63 = vld [vmem:[#allocation13 + $0x1ab0] sm:$0xff] }
 0x7a0   :  { %v3136_v42 = vld [vmem:[#allocation13 + $0x1c58] sm:$0xff] }
 0x7a1   :  { %11464 = vmatpush1.bf16.msra.mxu1 %v11463_v5  ;;  %v11479_v5 = vpack.c.bf16 %v2992_v10, %v2981_v19  ;;  %v3069_v19 = vld [vmem:[#allocation13 + $0x1a40] sm:$0xff]  ;;  %v3080_v10 = vld [vmem:[#allocation13 + $0x1a98] sm:$0xff] }
 0x7a2   :  { %11660 = vmatpush1.bf16.msra.mxu0 %v11659_v24  ;;  %11466 = vmatprep.subr.bf16.mxu1 %v11465_v11  ;;  %v11675_v24 = vpack.c.bf16 %v2994_v51, %v2983_v27  ;;  %v11481_v11 = vpack.c.bf16 %v3015_v0, %v3004_v25  ;;  %v3071_v27 = vld [vmem:[#allocation13 + $0x1a50] sm:$0xff]  ;;  %v3082_v51 = vld [vmem:[#allocation13 + $0x1aa8] sm:$0xff]  ;;  %v3092_v25 = vld [vmem:[#allocation13 + $0x1af8] sm:$0xff] }
 0x7a3   :  { %11662 = vmatprep.subr.bf16.mxu0 %v11661_v26  ;;  %v11677_v26 = vpack.c.bf16 %v3017_v45, %v3006_v15  ;;  %v3103_v0 = vld [vmem:[#allocation13 + $0x1b50] sm:$0xff]  ;;  %v3094_v15 = vld [vmem:[#allocation13 + $0x1b08] sm:$0xff]  ;;  %v3105_v45 = vld [vmem:[#allocation13 + $0x1b60] sm:$0xff] }
 0x7a5   :  { %11468 = vmatpush1.bf16.msra.mxu1 %v11467_v17  ;;  %v11483_v17 = vpack.c.bf16 %v3014_v33, %v3003_v58  ;;  %v3091_v58 = vld [vmem:[#allocation13 + $0x1af0] sm:$0xff]  ;;  %v3102_v33 = vld [vmem:[#allocation13 + $0x1b48] sm:$0xff] }
 0x7a6   :  { %11664 = vmatpush1.bf16.msra.mxu0 %v11663_v36  ;;  %11470 = vmatprep.subr.bf16.mxu1 %v11469_v59  ;;  %v11679_v36 = vpack.c.bf16 %v3016_v12, %v3005_v46  ;;  %v11485_v59 = vpack.c.bf16 %v3037_v13, %v3026_v50  ;;  %v3093_v46 = vld [vmem:[#allocation13 + $0x1b00] sm:$0xff]  ;;  %v3104_v12 = vld [vmem:[#allocation13 + $0x1b58] sm:$0xff]  ;;  %v3114_v50 = vld [vmem:[#allocation13 + $0x1ba8] sm:$0xff] }
 0x7a7   :  { %11666 = vmatprep.subr.bf16.mxu0 %v11665_v2  ;;  %v3027_v2 = vld [vmem:[#allocation13 + $0x18f0] sm:$0xff]  ;;  %v3125_v13 = vld [vmem:[#allocation13 + $0x1c00] sm:$0xff] }
 0x7a8   :  { %4073 = vmatmul.mubr.f32.vlgmr.msra.gmra.mrb[26].mxu1 %v14994_v43 }
 0x7a9   :  { %4357 = vmatmul.mubr.f32.vlgmr.msra.gmra.mrb[20].mxu0 %v14994_v43  ;;  %11472 = vmatpush1.bf16.msra.mxu1 %v11471_v21  ;;  %v3050_v21 = vld [vmem:[#allocation13 + $0x19a8] sm:$0xff] }
 0x7aa   :  { %4143 = vmatprep.mubr.f32.mxu1 %v14997_v8  ;;  %11668 = vmatpush1.bf16.msra.mxu0 %v11667_v40  ;;  %v11683_v40 = vpack.c.bf16 %v3038_v60, %v3027_v2  ;;  %v11685_v22 = vpack.c.bf16 %v3061_v35, %v3050_v21  ;;  %v3115_v2 = vld [vmem:[#allocation13 + $0x1bb0] sm:$0xff]  ;;  %v3126_v60 = vld [vmem:[#allocation13 + $0x1c08] sm:$0xff]  ;;  %v3149_v35 = vld [vmem:[#allocation13 + $0x1cc0] sm:$0xff] }
 0x7ab   :  { %4427 = vmatprep.mubr.f32.mxu0 %v14997_v8  ;;  %11474 = vmatprep.subr.bf16.mxu1 %v11473_v41  ;;  %v3049_v41 = vld [vmem:[#allocation13 + $0x19a0] sm:$0xff]  ;;  %v3138_v21 = vld [vmem:[#allocation13 + $0x1c68] sm:$0xff] }
 0x7ac   :  { %11670 = vmatprep.subr.bf16.mxu0 %v11669_v23  ;;  %v3081_v23 = vld [vmem:[#allocation13 + $0x1aa0] sm:$0xff] }
 0x7ad   :  { %11476 = vmatpush1.bf16.msra.mxu1 %v11475_v37  ;;  %v11491_v37 = vpack.c.bf16 %v3058_v49, %v3047_v52  ;;  %v3135_v52 = vld [vmem:[#allocation13 + $0x1c50] sm:$0xff]  ;;  %v3146_v49 = vld [vmem:[#allocation13 + $0x1ca8] sm:$0xff] }
 0x7ae   :  { %11672 = vmatpush1.bf16.msra.mxu0 %v11671_v1  ;;  %11478 = vmatprep.subr.bf16.mxu1 %v11477_v18  ;;  %v11687_v1 = vpack.c.bf16 %v3060_v16, %v3049_v41  ;;  %v11493_v18 = vpack.c.bf16 %v3081_v23, %v3070_v6  ;;  %v3137_v41 = vld [vmem:[#allocation13 + $0x1c60] sm:$0xff]  ;;  %v3148_v16 = vld [vmem:[#allocation13 + $0x1cb8] sm:$0xff]  ;;  %v3158_v6 = vld [vmem:[#allocation13 + $0x1d08] sm:$0xff] }
 0x7af   :  { %11674 = vmatprep.subr.bf16.mxu0 %v11673_v38  ;;  %v11689_v38 = vpack.c.bf16 %v3083_v63, %v3072_v14  ;;  %v3169_v23 = vld [vmem:[#allocation13 + $0x1d60] sm:$0xff]  ;;  %v3160_v14 = vld [vmem:[#allocation13 + $0x1d18] sm:$0xff]  ;;  %v3171_v63 = vld [vmem:[#allocation13 + $0x1d70] sm:$0xff] }
 0x7b1   :  { %11480 = vmatpush1.bf16.msra.mxu1 %v11479_v5  ;;  %v11495_v5 = vpack.c.bf16 %v3080_v10, %v3069_v19  ;;  %v3157_v19 = vld [vmem:[#allocation13 + $0x1d00] sm:$0xff]  ;;  %v3168_v10 = vld [vmem:[#allocation13 + $0x1d58] sm:$0xff] }
 0x7b2   :  { %11676 = vmatpush1.bf16.msra.mxu0 %v11675_v24  ;;  %11482 = vmatprep.subr.bf16.mxu1 %v11481_v11  ;;  %v11691_v24 = vpack.c.bf16 %v3082_v51, %v3071_v27  ;;  %v11497_v11 = vpack.c.bf16 %v3103_v0, %v3092_v25  ;;  %v3159_v27 = vld [vmem:[#allocation13 + $0x1d10] sm:$0xff]  ;;  %v3170_v51 = vld [vmem:[#allocation13 + $0x1d68] sm:$0xff]  ;;  %v3180_v25 = vld [vmem:[#allocation13 + $0x1db8] sm:$0xff] }
 0x7b3   :  { %11678 = vmatprep.subr.bf16.mxu0 %v11677_v26  ;;  %v11693_v26 = vpack.c.bf16 %v3105_v45, %v3094_v15  ;;  %v3191_v0 = vld [vmem:[#allocation13 + $0x1e10] sm:$0xff]  ;;  %v3182_v15 = vld [vmem:[#allocation13 + $0x1dc8] sm:$0xff]  ;;  %v3193_v45 = vld [vmem:[#allocation13 + $0x1e20] sm:$0xff] }
 0x7b5   :  { %11484 = vmatpush1.bf16.msra.mxu1 %v11483_v17  ;;  %v11499_v17 = vpack.c.bf16 %v3102_v33, %v3091_v58  ;;  %v3179_v58 = vld [vmem:[#allocation13 + $0x1db0] sm:$0xff]  ;;  %v3190_v33 = vld [vmem:[#allocation13 + $0x1e08] sm:$0xff] }
 0x7b6   :  { %11680 = vmatpush1.bf16.msra.mxu0 %v11679_v36  ;;  %11486 = vmatprep.subr.bf16.mxu1 %v11485_v59  ;;  %v11695_v36 = vpack.c.bf16 %v3104_v12, %v3093_v46  ;;  %v11501_v59 = vpack.c.bf16 %v3125_v13, %v3114_v50  ;;  %v3181_v46 = vld [vmem:[#allocation13 + $0x1dc0] sm:$0xff]  ;;  %v3192_v12 = vld [vmem:[#allocation13 + $0x1e18] sm:$0xff]  ;;  %v3202_v50 = vld [vmem:[#allocation13 + $0x1e68] sm:$0xff] }
 0x7b7   :  { %11682 = vmatprep.subr.bf16.mxu0 %v11681_v29  ;;  %v11697_v29 = vpack.c.bf16 %v3127_v48, %v3116_v28  ;;  %v3213_v13 = vld [vmem:[#allocation13 + $0x1ec0] sm:$0xff]  ;;  %v3204_v28 = vld [vmem:[#allocation13 + $0x1e78] sm:$0xff]  ;;  %v3215_v48 = vld [vmem:[#allocation13 + $0x1ed0] sm:$0xff] }
 0x7b9   :  { %11488 = vmatpush1.bf16.msra.mxu1 %v11487_v31  ;;  %v11503_v31 = vpack.c.bf16 %v3124_v62, %v3113_v4  ;;  %v3201_v4 = vld [vmem:[#allocation13 + $0x1e60] sm:$0xff]  ;;  %v3212_v62 = vld [vmem:[#allocation13 + $0x1eb8] sm:$0xff] }
 0x7ba   :  { %11684 = vmatpush1.bf16.msra.mxu0 %v11683_v40  ;;  %11490 = vmatprep.subr.bf16.mxu1 %v11489_v44  ;;  %v11699_v40 = vpack.c.bf16 %v3126_v60, %v3115_v2  ;;  %v11505_v44 = vpack.c.bf16 %v3147_v61, %v3136_v42  ;;  %v3203_v2 = vld [vmem:[#allocation13 + $0x1e70] sm:$0xff]  ;;  %v3214_v60 = vld [vmem:[#allocation13 + $0x1ec8] sm:$0xff]  ;;  %v3224_v42 = vld [vmem:[#allocation13 + $0x1f18] sm:$0xff] }
 0x7bb   :  { %11686 = vmatprep.subr.bf16.mxu0 %v11685_v22  ;;  %v11701_v22 = vpack.c.bf16 %v3149_v35, %v3138_v21  ;;  %v3235_v61 = vld [vmem:[#allocation13 + $0x1f70] sm:$0xff]  ;;  %v3226_v21 = vld [vmem:[#allocation13 + $0x1f28] sm:$0xff]  ;;  %v3237_v35 = vld [vmem:[#allocation13 + $0x1f80] sm:$0xff] }
 0x7bd   :  { %11492 = vmatpush1.bf16.msra.mxu1 %v11491_v37  ;;  %v11507_v37 = vpack.c.bf16 %v3146_v49, %v3135_v52  ;;  %v3223_v52 = vld [vmem:[#allocation13 + $0x1f10] sm:$0xff]  ;;  %v3234_v49 = vld [vmem:[#allocation13 + $0x1f68] sm:$0xff] }
 0x7be   :  { %11688 = vmatpush1.bf16.msra.mxu0 %v11687_v1  ;;  %11494 = vmatprep.subr.bf16.mxu1 %v11493_v18  ;;  %v11703_v1 = vpack.c.bf16 %v3148_v16, %v3137_v41  ;;  %v11509_v18 = vpack.c.bf16 %v3169_v23, %v3158_v6  ;;  %v3225_v41 = vld [vmem:[#allocation13 + $0x1f20] sm:$0xff]  ;;  %v3236_v16 = vld [vmem:[#allocation13 + $0x1f78] sm:$0xff]  ;;  %v3246_v6 = vld [vmem:[#allocation13 + $0x1fc8] sm:$0xff] }
 0x7bf   :  { %11690 = vmatprep.subr.bf16.mxu0 %v11689_v38  ;;  %v11705_v38 = vpack.c.bf16 %v3171_v63, %v3160_v14  ;;  %v3257_v23 = vld [vmem:[#allocation13 + $0x2020] sm:$0xff]  ;;  %v3248_v14 = vld [vmem:[#allocation13 + $0x1fd8] sm:$0xff]  ;;  %v3259_v63 = vld [vmem:[#allocation13 + $0x2030] sm:$0xff] }
 0x7c1   :  { %11496 = vmatpush1.bf16.msra.mxu1 %v11495_v5  ;;  %v11511_v5 = vpack.c.bf16 %v3168_v10, %v3157_v19  ;;  %v3245_v19 = vld [vmem:[#allocation13 + $0x1fc0] sm:$0xff]  ;;  %v3256_v10 = vld [vmem:[#allocation13 + $0x2018] sm:$0xff] }
 0x7c2   :  { %11692 = vmatpush1.bf16.msra.mxu0 %v11691_v24  ;;  %11498 = vmatprep.subr.bf16.mxu1 %v11497_v11  ;;  %v11707_v24 = vpack.c.bf16 %v3170_v51, %v3159_v27  ;;  %v11513_v11 = vpack.c.bf16 %v3191_v0, %v3180_v25  ;;  %v3247_v27 = vld [vmem:[#allocation13 + $0x1fd0] sm:$0xff]  ;;  %v3258_v51 = vld [vmem:[#allocation13 + $0x2028] sm:$0xff]  ;;  %v3268_v25 = vld [vmem:[#allocation13 + $0x2078] sm:$0xff] }
 0x7c3   :  { %11694 = vmatprep.subr.bf16.mxu0 %v11693_v26  ;;  %v11709_v26 = vpack.c.bf16 %v3193_v45, %v3182_v15  ;;  %v3279_v0 = vld [vmem:[#allocation13 + $0x20d0] sm:$0xff]  ;;  %v3270_v15 = vld [vmem:[#allocation13 + $0x2088] sm:$0xff]  ;;  %v3281_v45 = vld [vmem:[#allocation13 + $0x20e0] sm:$0xff] }
 0x7c5   :  { %11500 = vmatpush1.bf16.msra.mxu1 %v11499_v17  ;;  %v11515_v17 = vpack.c.bf16 %v3190_v33, %v3179_v58  ;;  %v3267_v58 = vld [vmem:[#allocation13 + $0x2070] sm:$0xff]  ;;  %v3278_v33 = vld [vmem:[#allocation13 + $0x20c8] sm:$0xff] }
 0x7c6   :  { %11696 = vmatpush1.bf16.msra.mxu0 %v11695_v36  ;;  %11502 = vmatprep.subr.bf16.mxu1 %v11501_v59  ;;  %v11711_v36 = vpack.c.bf16 %v3192_v12, %v3181_v46  ;;  %v11517_v59 = vpack.c.bf16 %v3213_v13, %v3202_v50  ;;  %v3269_v46 = vld [vmem:[#allocation13 + $0x2080] sm:$0xff]  ;;  %v3280_v12 = vld [vmem:[#allocation13 + $0x20d8] sm:$0xff]  ;;  %v3290_v50 = vld [vmem:[#allocation13 + $0x2128] sm:$0xff] }
 0x7c7   :  { %11698 = vmatprep.subr.bf16.mxu0 %v11697_v29  ;;  %v11713_v29 = vpack.c.bf16 %v3215_v48, %v3204_v28  ;;  %v3301_v13 = vld [vmem:[#allocation13 + $0x2180] sm:$0xff]  ;;  %v3292_v28 = vld [vmem:[#allocation13 + $0x2138] sm:$0xff]  ;;  %v3303_v48 = vld [vmem:[#allocation13 + $0x2190] sm:$0xff] }
 0x7c9   :  { %11504 = vmatpush1.bf16.msra.mxu1 %v11503_v31  ;;  %v11519_v31 = vpack.c.bf16 %v3212_v62, %v3201_v4  ;;  %v3289_v4 = vld [vmem:[#allocation13 + $0x2120] sm:$0xff]  ;;  %v3300_v62 = vld [vmem:[#allocation13 + $0x2178] sm:$0xff] }
 0x7ca   :  { %11700 = vmatpush1.bf16.msra.mxu0 %v11699_v40  ;;  %11506 = vmatprep.subr.bf16.mxu1 %v11505_v44  ;;  %v11715_v40 = vpack.c.bf16 %v3214_v60, %v3203_v2  ;;  %v11521_v44 = vpack.c.bf16 %v3235_v61, %v3224_v42  ;;  %v11729_v2 = vpack.c.bf16 %v3303_v48, %v3292_v28  ;;  %v3302_v60 = vld [vmem:[#allocation13 + $0x2188] sm:$0xff]  ;;  %v2249_v61 = vld [vmem:[#allocation13 + $0xa0] sm:$0xff]  ;;  %v2492_v48 = vld [vmem:[#allocation13 + $0x838] sm:$0xff] }
 0x7cb   :  { %11702 = vmatprep.subr.bf16.mxu0 %v11701_v22  ;;  %v11717_v22 = vpack.c.bf16 %v3237_v35, %v3226_v21  ;;  %v2238_v42 = vld [vmem:[#allocation13 + $0x48] sm:$0xff]  ;;  %v11535_v21 = vpack.c.bf16 %v3300_v62, %v3289_v4  ;;  %v2415_v35 = vld [vmem:[#allocation13 + $0x5d0] sm:$0xff]  ;;  %v2481_v28 = vld [vmem:[#allocation13 + $0x7e0] sm:$0xff] }
 0x7cc   :  { %v2303_v4 = vld [vmem:[#allocation13 + $0x250] sm:$0xff]  ;;  %v2314_v62 = vld [vmem:[#allocation13 + $0x2a8] sm:$0xff] }
 0x7cd   :  { %11508 = vmatpush1.bf16.msra.mxu1 %v11507_v37  ;;  %v11523_v37 = vpack.c.bf16 %v3234_v49, %v3223_v52  ;;  %v2237_v49 = vld [vmem:[#allocation13 + $0x40] sm:$0xff] }
 0x7ce   :  { %11704 = vmatpush1.bf16.msra.mxu0 %v11703_v1  ;;  %11510 = vmatprep.subr.bf16.mxu1 %v11509_v18  ;;  %v11719_v1 = vpack.c.bf16 %v3236_v16, %v3225_v41  ;;  %v11525_v18 = vpack.c.bf16 %v3257_v23, %v3246_v6  ;;  %v2248_v41 = vld [vmem:[#allocation13 + $0x98] sm:$0xff]  ;;  %v2250_v16 = vld [vmem:[#allocation13 + $0xa8] sm:$0xff]  ;;  %v2271_v23 = vld [vmem:[#allocation13 + $0x150] sm:$0xff] }
 0x7cf   :  { %11706 = vmatprep.subr.bf16.mxu0 %v11705_v38  ;;  %v11721_v38 = vpack.c.bf16 %v3259_v63, %v3248_v14  ;;  %v2260_v6 = vld [vmem:[#allocation13 + $0xf8] sm:$0xff]  ;;  %v11735_v14 = vpack.c.bf16 %v2248_v41, %v2237_v49  ;;  %v2437_v63 = vld [vmem:[#allocation13 + $0x680] sm:$0xff]  ;;  %v2327_v49 = vld [vmem:[#allocation13 + $0x310] sm:$0xff] }
 0x7d1   :  { %11512 = vmatpush1.bf16.msra.mxu1 %v11511_v5  ;;  %v11527_v5 = vpack.c.bf16 %v3256_v10, %v3245_v19  ;;  %v2270_v19 = vld [vmem:[#allocation13 + $0x148] sm:$0xff]  ;;  %v2261_v10 = vld [vmem:[#allocation13 + $0x100] sm:$0xff] }
 0x7d2   :  { %11708 = vmatpush1.bf16.msra.mxu0 %v11707_v24  ;;  %11514 = vmatprep.subr.bf16.mxu1 %v11513_v11  ;;  %v11723_v24 = vpack.c.bf16 %v3258_v51, %v3247_v27  ;;  %v11529_v11 = vpack.c.bf16 %v3279_v0, %v3268_v25  ;;  %v11737_v27 = vpack.c.bf16 %v2271_v23, %v2260_v6  ;;  %v2282_v51 = vld [vmem:[#allocation13 + $0x1a8] sm:$0xff]  ;;  %v2293_v25 = vld [vmem:[#allocation13 + $0x200] sm:$0xff]  ;;  %v2348_v6 = vld [vmem:[#allocation13 + $0x3b8] sm:$0xff] }
 0x7d3   :  { %11710 = vmatprep.subr.bf16.mxu0 %v11709_v26  ;;  %v11725_v26 = vpack.c.bf16 %v3281_v45, %v3270_v15  ;;  %v2459_v15 = vld [vmem:[#allocation13 + $0x730] sm:$0xff]  ;;  %v2470_v45 = vld [vmem:[#allocation13 + $0x788] sm:$0xff] }
 0x7d4   :  { %v2359_v23 = vld [vmem:[#allocation13 + $0x410] sm:$0xff] }
 0x7d5   :  { %11516 = vmatpush1.bf16.msra.mxu1 %v11515_v17  ;;  %v11531_v17 = vpack.c.bf16 %v3278_v33, %v3267_v58  ;;  %v2281_v58 = vld [vmem:[#allocation13 + $0x1a0] sm:$0xff]  ;;  %v2292_v33 = vld [vmem:[#allocation13 + $0x1f8] sm:$0xff] }
 0x7d6   :  { %11712 = vmatpush1.bf16.msra.mxu0 %v11711_v36  ;;  %11518 = vmatprep.subr.bf16.mxu1 %v11517_v59  ;;  %v11727_v36 = vpack.c.bf16 %v3280_v12, %v3269_v46  ;;  %v11533_v59 = vpack.c.bf16 %v3301_v13, %v3290_v50  ;;  %v2283_v46 = vld [vmem:[#allocation13 + $0x1b0] sm:$0xff]  ;;  %v2294_v12 = vld [vmem:[#allocation13 + $0x208] sm:$0xff]  ;;  %v2304_v50 = vld [vmem:[#allocation13 + $0x258] sm:$0xff] }
 0x7d7   :  { %11714 = vmatprep.subr.bf16.mxu0 %v11713_v29  ;;  %v3291_v29 = vld [vmem:[#allocation13 + $0x2130] sm:$0xff] }
 0x7d8   :  { %v2315_v13 = vld [vmem:[#allocation13 + $0x2b0] sm:$0xff] }
 0x7d9   :  { %11520 = vmatpush1.bf16.msra.mxu1 %v11519_v31  ;;  %v2426_v31 = vld [vmem:[#allocation13 + $0x628] sm:$0xff] }
 0x7da   :  { %11716 = vmatpush1.bf16.msra.mxu0 %v11715_v40  ;;  %11522 = vmatprep.subr.bf16.mxu1 %v11521_v44  ;;  %v11731_v40 = vpack.c.bf16 %v3302_v60, %v3291_v29  ;;  %v11733_v44 = vpack.c.bf16 %v2249_v61, %v2238_v42  ;;  %v11929_v52 = vpack.c.bf16 %v2426_v31, %v2415_v35  ;;  %v2326_v60 = vld [vmem:[#allocation13 + $0x308] sm:$0xff]  ;;  %v2337_v42 = vld [vmem:[#allocation13 + $0x360] sm:$0xff]  ;;  %v2503_v61 = vld [vmem:[#allocation13 + $0x890] sm:$0xff] }
 0x7db   :  { %11718 = vmatprep.subr.bf16.mxu0 %v11717_v22  ;;  %v2239_v22 = vld [vmem:[#allocation13 + $0x50] sm:$0xff]  ;;  %v11941_v29 = vpack.c.bf16 %v2492_v48, %v2481_v28  ;;  %v11747_v35 = vpack.c.bf16 %v2314_v62, %v2303_v4  ;;  %v2382_v28 = vld [vmem:[#allocation13 + $0x4c8] sm:$0xff]  ;;  %v2392_v48 = vld [vmem:[#allocation13 + $0x518] sm:$0xff] }
 0x7dd   :  { %11524 = vmatpush1.bf16.msra.mxu1 %v11523_v37  ;;  %v2448_v37 = vld [vmem:[#allocation13 + $0x6d8] sm:$0xff] }
 0x7de   :  { %11720 = vmatpush1.bf16.msra.mxu0 %v11719_v1  ;;  %11526 = vmatprep.subr.bf16.mxu1 %v11525_v18  ;;  %v11931_v1 = vpack.c.bf16 %v2250_v16, %v2239_v22  ;;  %v2259_v18 = vld [vmem:[#allocation13 + $0xf0] sm:$0xff]  ;;  %v11933_v0 = vpack.c.bf16 %v2448_v37, %v2437_v63  ;;  %v2338_v16 = vld [vmem:[#allocation13 + $0x368] sm:$0xff]  ;;  %v2525_v37 = vld [vmem:[#allocation13 + $0x940] sm:$0xff] }
 0x7df   :  { %11722 = vmatprep.subr.bf16.mxu0 %v11721_v38  ;;  %v2272_v38 = vld [vmem:[#allocation13 + $0x158] sm:$0xff] }
 0x7e1   :  { %11528 = vmatpush1.bf16.msra.mxu1 %v11527_v5  ;;  %v11739_v5 = vpack.c.bf16 %v2270_v19, %v2259_v18 }
 0x7e2   :  { %11724 = vmatpush1.bf16.msra.mxu0 %v11723_v24  ;;  %11530 = vmatprep.subr.bf16.mxu1 %v11529_v11  ;;  %v11935_v24 = vpack.c.bf16 %v2272_v38, %v2261_v10  ;;  %v11741_v11 = vpack.c.bf16 %v2293_v25, %v2282_v51  ;;  %v11947_v10 = vpack.c.bf16 %v2338_v16, %v2327_v49  ;;  %v2347_v38 = vld [vmem:[#allocation13 + $0x3b0] sm:$0xff]  ;;  %v2358_v51 = vld [vmem:[#allocation13 + $0x408] sm:$0xff]  ;;  %v2349_v25 = vld [vmem:[#allocation13 + $0x3c0] sm:$0xff] }
 0x7e3   :  { %11726 = vmatprep.subr.bf16.mxu0 %v11725_v26  ;;  %v11937_v26 = vpack.c.bf16 %v2470_v45, %v2459_v15  ;;  %v2360_v15 = vld [vmem:[#allocation13 + $0x418] sm:$0xff]  ;;  %v2370_v45 = vld [vmem:[#allocation13 + $0x468] sm:$0xff] }
 0x7e4   :  { %v2424_v16 = vld [vmem:[#allocation13 + $0x618] sm:$0xff] }
 0x7e5   :  { %11532 = vmatpush1.bf16.msra.mxu1 %v11531_v17  ;;  %v11743_v17 = vpack.c.bf16 %v2292_v33, %v2281_v58  ;;  %v11755_v58 = vpack.c.bf16 %v2358_v51, %v2347_v38  ;;  %v11951_v33 = vpack.c.bf16 %v2360_v15, %v2349_v25  ;;  %v2435_v25 = vld [vmem:[#allocation13 + $0x670] sm:$0xff]  ;;  %v2613_v15 = vld [vmem:[#allocation13 + $0xc00] sm:$0xff] }
 0x7e6   :  { %11728 = vmatpush1.bf16.msra.mxu0 %v11727_v36  ;;  %11534 = vmatprep.subr.bf16.mxu1 %v11533_v59  ;;  %v11939_v36 = vpack.c.bf16 %v2294_v12, %v2283_v46  ;;  %v11745_v59 = vpack.c.bf16 %v2315_v13, %v2304_v50  ;;  %v2380_v12 = vld [vmem:[#allocation13 + $0x4b8] sm:$0xff]  ;;  %v2371_v50 = vld [vmem:[#allocation13 + $0x470] sm:$0xff] }
 0x7e7   :  { %11730 = vmatprep.subr.bf16.mxu0 %v11729_v2  ;;  %v2305_v2 = vld [vmem:[#allocation13 + $0x260] sm:$0xff]  ;;  %v11955_v62 = vpack.c.bf16 %v2382_v28, %v2371_v50  ;;  %v2468_v28 = vld [vmem:[#allocation13 + $0x778] sm:$0xff] }
 0x7e8   :  { %4144 = vmatmul.mubr.f32.vlgmr.msra.gmra.mrb[26].mxu1 %v15004_v3 }
 0x7e9   :  { %4428 = vmatmul.mubr.f32.vlgmr.msra.gmra.mrb[20].mxu0 %v15004_v3  ;;  %11536 = vmatpush1.bf16.msra.mxu1 %v11535_v21  ;;  %v2514_v21 = vld [vmem:[#allocation13 + $0x8e8] sm:$0xff] }
 0x7ea   :  { %11732 = vmatpush1.bf16.msra.mxu0 %v11731_v40  ;;  %4214 = vmatprep.mubr.f32.mxu1 %v16431_v55  ;;  %v11749_v40 = vpack.c.bf16 %v2337_v42, %v2326_v60  ;;  %v11945_v22 = vpack.c.bf16 %v2514_v21, %v2503_v61  ;;  %v2393_v60 = vld [vmem:[#allocation13 + $0x520] sm:$0xff]  ;;  %v2404_v61 = vld [vmem:[#allocation13 + $0x578] sm:$0xff]  ;;  %v2414_v21 = vld [vmem:[#allocation13 + $0x5c8] sm:$0xff] }
 0x7eb   :  { %4498 = vmatprep.mubr.f32.mxu0 %v16431_v55  ;;  %11734 = vmatprep.subr.bf16.mxu1 %v11733_v44  ;;  %v2325_v44 = vld [vmem:[#allocation13 + $0x300] sm:$0xff] }
 0x7ec   :  { %11930 = vmatprep.subr.bf16.mxu0 %v11929_v52  ;;  %v2336_v52 = vld [vmem:[#allocation13 + $0x358] sm:$0xff] }
 0x7ed   :  { %v11751_v19 = vpack.c.bf16 %v2336_v52, %v2325_v44  ;;  %v11959_v52 = vpack.c.bf16 %v2404_v61, %v2393_v60  ;;  %v2490_v61 = vld [vmem:[#allocation13 + $0x828] sm:$0xff] }
 0x7f0   :  { %9524 = vmatmul.mubr.msk.f32.vlgmr.msra.gmra.mrb[26].mxu1 %vm909_vm5, %v15011_v57 }
 0x7f1   :  { %9525 = vmatmul.mubr.msk.f32.vlgmr.msra.gmra.mrb[20].mxu0 %vm909_vm5, %v15011_v57  ;;  %11736 = vmatpush1.bf16.msra.mxu1 %v11735_v14 }
 0x7f2   :  { %11932 = vmatpush3.bf16.msra.mxu0 %v11931_v1  ;;  %4569 = vmatprep.mubr.f32.mxu1 %v14960_v34  ;;  %v2536_v1 = vld [vmem:[#allocation13 + $0x998] sm:$0xff] }
 0x7f3   :  { %4853 = vmatprep.mubr.f32.mxu0 %v14960_v34  ;;  %11738 = vmatprep.subr.bf16.mxu1 %v11737_v27  ;;  %v2316_v34 = vld [vmem:[#allocation13 + $0x2b8] sm:$0xff]  ;;  %v11753_v27 = vpack.c.bf16 %v2359_v23, %v2348_v6  ;;  %v2591_v23 = vld [vmem:[#allocation13 + $0xb50] sm:$0xff] }
 0x7f4   :  { %11934 = vmatprep.subr.bf16.mxu0 %v11933_v0  ;;  %v11943_v31 = vpack.c.bf16 %v2316_v34, %v2305_v2  ;;  %v11949_v0 = vpack.c.bf16 %v2536_v1, %v2525_v37  ;;  %v2402_v34 = vld [vmem:[#allocation13 + $0x568] sm:$0xff]  ;;  %v2436_v1 = vld [vmem:[#allocation13 + $0x678] sm:$0xff] }
 0x7f5   :  { %11740 = vmatpush1.bf16.msra.mxu1 %v11739_v5  ;;  %v2381_v5 = vld [vmem:[#allocation13 + $0x4c0] sm:$0xff]  ;;  %v2602_v37 = vld [vmem:[#allocation13 + $0xba8] sm:$0xff] }
 0x7f6   :  { %11936 = vmatpush3.bf16.msra.mxu0 %v11935_v24  ;;  %11742 = vmatprep.subr.bf16.mxu1 %v11741_v11  ;;  %v2547_v24 = vld [vmem:[#allocation13 + $0x9f0] sm:$0xff]  ;;  %v2558_v11 = vld [vmem:[#allocation13 + $0xa48] sm:$0xff]  ;;  %v11757_v46 = vpack.c.bf16 %v2381_v5, %v2370_v45  ;;  %v11963_v51 = vpack.c.bf16 %v2602_v37, %v2591_v23  ;;  %v2501_v23 = vld [vmem:[#allocation13 + $0x880] sm:$0xff] }
 0x7f7   :  { %11938 = vmatprep.subr.bf16.mxu0 %v11937_v26  ;;  %v2369_v26 = vld [vmem:[#allocation13 + $0x460] sm:$0xff]  ;;  %v11953_v13 = vpack.c.bf16 %v2558_v11, %v2547_v24  ;;  %v2624_v24 = vld [vmem:[#allocation13 + $0xc58] sm:$0xff]  ;;  %v2458_v11 = vld [vmem:[#allocation13 + $0x728] sm:$0xff] }
 0x7f8   :  { %v11759_v4 = vpack.c.bf16 %v2380_v12, %v2369_v26  ;;  %v11967_v12 = vpack.c.bf16 %v2624_v24, %v2613_v15  ;;  %v2512_v37 = vld [vmem:[#allocation13 + $0x8d8] sm:$0xff]  ;;  %v2534_v24 = vld [vmem:[#allocation13 + $0x988] sm:$0xff] }
 0x7f9   :  { %11744 = vmatpush1.bf16.msra.mxu1 %v11743_v17  ;;  %v2403_v17 = vld [vmem:[#allocation13 + $0x570] sm:$0xff] }
 0x7fa   :  { %11940 = vmatpush3.bf16.msra.mxu0 %v11939_v36  ;;  %11746 = vmatprep.subr.bf16.mxu1 %v11745_v59  ;;  %v2569_v36 = vld [vmem:[#allocation13 + $0xaa0] sm:$0xff]  ;;  %v2580_v59 = vld [vmem:[#allocation13 + $0xaf8] sm:$0xff]  ;;  %v11761_v2 = vpack.c.bf16 %v2403_v17, %v2392_v48  ;;  %v2635_v48 = vld [vmem:[#allocation13 + $0xcb0] sm:$0xff] }
 0x7fb   :  { %11942 = vmatprep.subr.bf16.mxu0 %v11941_v29  ;;  %v15037_v41 = vpop.f32.mrb[24].mxu1  ;;  %v2391_v29 = vld [vmem:[#allocation13 + $0x510] sm:$0xff]  ;;  %v11957_v42 = vpack.c.bf16 %v2580_v59, %v2569_v36  ;;  %v2646_v36 = vld [vmem:[#allocation13 + $0xd08] sm:$0xff]  ;;  %v2480_v59 = vld [vmem:[#allocation13 + $0x7d8] sm:$0xff] }
 0x7fc   :  { %v15039_v14 = vpop.f32.mrb[18].mxu0  ;;  %v15041_v63 = vpop.f32.mrb[25].mxu1  ;;  %v11763_v44 = vpack.c.bf16 %v2402_v34, %v2391_v29  ;;  %v11971_v34 = vpack.c.bf16 %v2646_v36, %v2635_v48  ;;  %v2556_v36 = vld [vmem:[#allocation13 + $0xa38] sm:$0xff] }
 0x7fd   :  { %11748 = vmatpush1.bf16.msra.mxu1 %v11747_v35  ;;  %v15043_v18 = vpop.f32.mrb[19].mxu0  ;;  %v2425_v35 = vld [vmem:[#allocation13 + $0x620] sm:$0xff] }
 0x7fe   :  { %11944 = vmatpush3.bf16.msra.mxu0 %v11943_v31  ;;  %11750 = vmatprep.subr.bf16.mxu1 %v11749_v40  ;;  %v2767_v31 = vld [vmem:[#allocation13 + $0x10d0] sm:$0xff]  ;;  %v2778_v40 = vld [vmem:[#allocation13 + $0x1128] sm:$0xff]  ;;  %v11765_v49 = vpack.c.bf16 %v2425_v35, %v2414_v21  ;;  %v2657_v21 = vld [vmem:[#allocation13 + $0xd60] sm:$0xff] }
 0x7ff   :  { %11946 = vmatprep.subr.bf16.mxu0 %v11945_v22  ;;  %v2413_v22 = vld [vmem:[#allocation13 + $0x5c0] sm:$0xff]  ;;  %v11961_v6 = vpack.c.bf16 %v2778_v40, %v2767_v31  ;;  %v2668_v31 = vld [vmem:[#allocation13 + $0xdb8] sm:$0xff]  ;;  %v2502_v40 = vld [vmem:[#allocation13 + $0x888] sm:$0xff] }
 0x800   :  { %v11767_v38 = vpack.c.bf16 %v2424_v16, %v2413_v22  ;;  %v11975_v16 = vpack.c.bf16 %v2668_v31, %v2657_v21  ;;  %v2578_v31 = vld [vmem:[#allocation13 + $0xae8] sm:$0xff] }
 0x801   :  { %11752 = vmatpush1.bf16.msra.mxu1 %v11751_v19  ;;  %v2447_v19 = vld [vmem:[#allocation13 + $0x6d0] sm:$0xff] }
 0x802   :  { %11948 = vmatpush3.bf16.msra.mxu0 %v11947_v10  ;;  %11754 = vmatprep.subr.bf16.mxu1 %v11753_v27  ;;  %v2789_v10 = vld [vmem:[#allocation13 + $0x1180] sm:$0xff]  ;;  %v2800_v27 = vld [vmem:[#allocation13 + $0x11d8] sm:$0xff]  ;;  %v11769_v45 = vpack.c.bf16 %v2447_v19, %v2436_v1  ;;  %v2679_v1 = vld [vmem:[#allocation13 + $0xe10] sm:$0xff] }
 0x803   :  { %11950 = vmatprep.subr.bf16.mxu0 %v11949_v0  ;;  %v2446_v0 = vld [vmem:[#allocation13 + $0x6c8] sm:$0xff]  ;;  %v11965_v5 = vpack.c.bf16 %v2800_v27, %v2789_v10  ;;  %v2524_v27 = vld [vmem:[#allocation13 + $0x938] sm:$0xff] }
 0x804   :  { %v11771_v26 = vpack.c.bf16 %v2446_v0, %v2435_v25  ;;  %v2690_v10 = vld [vmem:[#allocation13 + $0xe68] sm:$0xff]  ;;  %v2888_v25 = vld [vmem:[#allocation13 + $0x1498] sm:$0xff]  ;;  %v11783_v0 = vpack.c.bf16 %v2512_v37, %v2501_v23 }
 0x805   :  { %11756 = vmatpush1.bf16.msra.mxu1 %v11755_v58  ;;  %v2469_v58 = vld [vmem:[#allocation13 + $0x780] sm:$0xff]  ;;  %v11979_v15 = vpack.c.bf16 %v2690_v10, %v2679_v1  ;;  %v2600_v10 = vld [vmem:[#allocation13 + $0xb98] sm:$0xff] }
 0x806   :  { %11952 = vmatpush3.bf16.msra.mxu0 %v11951_v33  ;;  %11758 = vmatprep.subr.bf16.mxu1 %v11757_v46  ;;  %v2811_v33 = vld [vmem:[#allocation13 + $0x1230] sm:$0xff]  ;;  %v2822_v46 = vld [vmem:[#allocation13 + $0x1288] sm:$0xff]  ;;  %v11773_v50 = vpack.c.bf16 %v2469_v58, %v2458_v11  ;;  %v2701_v11 = vld [vmem:[#allocation13 + $0xec0] sm:$0xff] }
 0x807   :  { %11954 = vmatprep.subr.bf16.mxu0 %v11953_v13  ;;  %v2457_v13 = vld [vmem:[#allocation13 + $0x720] sm:$0xff]  ;;  %v11969_v17 = vpack.c.bf16 %v2822_v46, %v2811_v33  ;;  %v2712_v33 = vld [vmem:[#allocation13 + $0xf18] sm:$0xff]  ;;  %v2546_v46 = vld [vmem:[#allocation13 + $0x9e8] sm:$0xff] }
 0x808   :  { %v11775_v29 = vpack.c.bf16 %v2468_v28, %v2457_v13  ;;  %v11983_v28 = vpack.c.bf16 %v2712_v33, %v2701_v11  ;;  %v2611_v11 = vld [vmem:[#allocation13 + $0xbf0] sm:$0xff]  ;;  %v2965_v33 = vld [vmem:[#allocation13 + $0x1700] sm:$0xff] }
 0x809   :  { %11760 = vmatpush1.bf16.msra.mxu1 %v11759_v4  ;;  %v2491_v4 = vld [vmem:[#allocation13 + $0x830] sm:$0xff] }
 0x80a   :  { %11956 = vmatpush3.bf16.msra.mxu0 %v11955_v62  ;;  %11762 = vmatprep.subr.bf16.mxu1 %v11761_v2  ;;  %v2833_v62 = vld [vmem:[#allocation13 + $0x12e0] sm:$0xff]  ;;  %v2844_v2 = vld [vmem:[#allocation13 + $0x1338] sm:$0xff]  ;;  %v11777_v60 = vpack.c.bf16 %v2491_v4, %v2480_v59  ;;  %v2723_v59 = vld [vmem:[#allocation13 + $0xf70] sm:$0xff] }
 0x80b   :  { %11958 = vmatprep.subr.bf16.mxu0 %v11957_v42  ;;  %v2479_v42 = vld [vmem:[#allocation13 + $0x7d0] sm:$0xff]  ;;  %v11973_v35 = vpack.c.bf16 %v2844_v2, %v2833_v62  ;;  %v2734_v62 = vld [vmem:[#allocation13 + $0xfc8] sm:$0xff]  ;;  %v2568_v2 = vld [vmem:[#allocation13 + $0xa98] sm:$0xff] }
 0x80c   :  { %v11779_v22 = vpack.c.bf16 %v2490_v61, %v2479_v42  ;;  %v11987_v61 = vpack.c.bf16 %v2734_v62, %v2723_v59  ;;  %v2633_v62 = vld [vmem:[#allocation13 + $0xca0] sm:$0xff] }
 0x80d   :  { %11764 = vmatpush1.bf16.msra.mxu1 %v11763_v44  ;;  %v2513_v44 = vld [vmem:[#allocation13 + $0x8e0] sm:$0xff] }
 0x80e   :  { %11960 = vmatpush3.bf16.msra.mxu0 %v11959_v52  ;;  %11766 = vmatprep.subr.bf16.mxu1 %v11765_v49  ;;  %v2855_v52 = vld [vmem:[#allocation13 + $0x1390] sm:$0xff]  ;;  %v2866_v49 = vld [vmem:[#allocation13 + $0x13e8] sm:$0xff] }
 0x80f   :  { %11962 = vmatprep.subr.bf16.mxu0 %v11961_v6  ;;  %v11781_v6 = vpack.c.bf16 %v2513_v44, %v2502_v40  ;;  %v11977_v19 = vpack.c.bf16 %v2866_v49, %v2855_v52  ;;  %v2745_v40 = vld [vmem:[#allocation13 + $0x1020] sm:$0xff]  ;;  %v2756_v52 = vld [vmem:[#allocation13 + $0x1078] sm:$0xff]  ;;  %v2590_v49 = vld [vmem:[#allocation13 + $0xb48] sm:$0xff] }
 0x810   :  { %v11991_v37 = vpack.c.bf16 %v2756_v52, %v2745_v40  ;;  %v2666_v52 = vld [vmem:[#allocation13 + $0xda8] sm:$0xff] }
 0x811   :  { %4854 = vmatmul.mubr.f32.vlgmr.msra.gmra.mrb[22].mxu0 %v14965_v9  ;;  %11768 = vmatpush1.bf16.msra.mxu1 %v11767_v38  ;;  %v2535_v38 = vld [vmem:[#allocation13 + $0x990] sm:$0xff] }
 0x812   :  { %11964 = vmatpush3.bf16.msra.mxu0 %v11963_v51  ;;  %4923 = vmatprep.mubr.f32.mxu0 %v14978_v56  ;;  %v2877_v51 = vld [vmem:[#allocation13 + $0x1440] sm:$0xff] }
 0x813   :  { %11770 = vmatprep.subr.bf16.mxu1 %v11769_v45  ;;  %11966 = vmatprep.subr.bf16.mxu0 %v11965_v5  ;;  %v11785_v45 = vpack.c.bf16 %v2535_v38, %v2524_v27  ;;  %v2523_v5 = vld [vmem:[#allocation13 + $0x930] sm:$0xff]  ;;  %v11981_v58 = vpack.c.bf16 %v2888_v25, %v2877_v51  ;;  %v2954_v51 = vld [vmem:[#allocation13 + $0x16a8] sm:$0xff]  ;;  %v2612_v25 = vld [vmem:[#allocation13 + $0xbf8] sm:$0xff] }
 0x814   :  { %v11787_v13 = vpack.c.bf16 %v2534_v24, %v2523_v5  ;;  %v2943_v38 = vld [vmem:[#allocation13 + $0x1650] sm:$0xff]  ;;  %v3152_v5 = vld [vmem:[#allocation13 + $0x1cd8] sm:$0xff] }
 0x815   :  { %11772 = vmatpush1.bf16.msra.mxu1 %v11771_v26  ;;  %v2557_v26 = vld [vmem:[#allocation13 + $0xa40] sm:$0xff]  ;;  %v11995_v24 = vpack.c.bf16 %v2954_v51, %v2943_v38 }
 0x816   :  { %11968 = vmatpush3.bf16.msra.mxu0 %v11967_v12  ;;  %11774 = vmatprep.subr.bf16.mxu1 %v11773_v50  ;;  %v2899_v12 = vld [vmem:[#allocation13 + $0x14f0] sm:$0xff]  ;;  %v2910_v50 = vld [vmem:[#allocation13 + $0x1548] sm:$0xff]  ;;  %v11789_v48 = vpack.c.bf16 %v2557_v26, %v2546_v46  ;;  %v2976_v26 = vld [vmem:[#allocation13 + $0x1758] sm:$0xff] }
 0x817   :  { %11970 = vmatprep.subr.bf16.mxu0 %v11969_v17  ;;  %v2545_v17 = vld [vmem:[#allocation13 + $0x9e0] sm:$0xff]  ;;  %v11985_v4 = vpack.c.bf16 %v2910_v50, %v2899_v12  ;;  %v2634_v12 = vld [vmem:[#allocation13 + $0xca8] sm:$0xff]  ;;  %v11999_v59 = vpack.c.bf16 %v2976_v26, %v2965_v33 }
 0x818   :  { %v11791_v42 = vpack.c.bf16 %v2556_v36, %v2545_v17  ;;  %v2645_v50 = vld [vmem:[#allocation13 + $0xd00] sm:$0xff]  ;;  %v15048_v17 = vld [vmem:[#allocation15] sm:$0xff] }
 0x819   :  { %11776 = vmatpush1.bf16.msra.mxu1 %v11775_v29  ;;  %v2579_v29 = vld [vmem:[#allocation13 + $0xaf0] sm:$0xff]  ;;  %v2677_v51 = vld [vmem:[#allocation13 + $0xe00] sm:$0xff] }
 0x81a   :  { %11972 = vmatpush3.bf16.msra.mxu0 %v11971_v34  ;;  %11778 = vmatprep.subr.bf16.mxu1 %v11777_v60  ;;  %v2921_v34 = vld [vmem:[#allocation13 + $0x15a0] sm:$0xff]  ;;  %v2932_v60 = vld [vmem:[#allocation13 + $0x15f8] sm:$0xff]  ;;  %v11793_v21 = vpack.c.bf16 %v2579_v29, %v2568_v2  ;;  %v2987_v29 = vld [vmem:[#allocation13 + $0x17b0] sm:$0xff] }
 0x81b   :  { %11974 = vmatprep.subr.bf16.mxu0 %v11973_v35  ;;  %v2567_v35 = vld [vmem:[#allocation13 + $0xa90] sm:$0xff]  ;;  %v11989_v44 = vpack.c.bf16 %v2932_v60, %v2921_v34  ;;  %v2644_v2 = vld [vmem:[#allocation13 + $0xcf8] sm:$0xff]  ;;  %v2998_v34 = vld [vmem:[#allocation13 + $0x1808] sm:$0xff] }
 0x81c   :  { %v11795_v23 = vpack.c.bf16 %v2578_v31, %v2567_v35  ;;  %v2656_v60 = vld [vmem:[#allocation13 + $0xd58] sm:$0xff]  ;;  %v3318_v35 = vrot.slane %v15048_v17, %v16451_v30  ;;  %v12003_v31 = vpack.c.bf16 %v2998_v34, %v2987_v29 }
 0x81d   :  { %11780 = vmatpush1.bf16.msra.mxu1 %v11779_v22  ;;  %v2601_v22 = vld [vmem:[#allocation13 + $0xba0] sm:$0xff] }
 0x81e   :  { %11976 = vmatpush3.bf16.msra.mxu0 %v11975_v16  ;;  %11782 = vmatprep.subr.bf16.mxu1 %v11781_v6  ;;  %v3119_v16 = vld [vmem:[#allocation13 + $0x1bd0] sm:$0xff]  ;;  %v3130_v6 = vld [vmem:[#allocation13 + $0x1c28] sm:$0xff]  ;;  %v11797_v1 = vpack.c.bf16 %v2601_v22, %v2590_v49  ;;  %v3009_v49 = vld [vmem:[#allocation13 + $0x1860] sm:$0xff] }
 0x81f   :  { %11978 = vmatprep.subr.bf16.mxu0 %v11977_v19  ;;  %v2589_v19 = vld [vmem:[#allocation13 + $0xb40] sm:$0xff]  ;;  %v11993_v27 = vpack.c.bf16 %v3130_v6, %v3119_v16  ;;  %v3020_v16 = vld [vmem:[#allocation13 + $0x18b8] sm:$0xff]  ;;  %v2678_v6 = vld [vmem:[#allocation13 + $0xe08] sm:$0xff] }
 0x821   :  { %11784 = vmatpush1.bf16.msra.mxu1 %v11783_v0  ;;  %v2623_v0 = vld [vmem:[#allocation13 + $0xc50] sm:$0xff] }
 0x822   :  { %11980 = vmatpush3.bf16.msra.mxu0 %v11979_v15  ;;  %11786 = vmatprep.subr.bf16.mxu1 %v11785_v45  ;;  %v11799_v15 = vpack.c.bf16 %v2600_v10, %v2589_v19  ;;  %v3141_v45 = vld [vmem:[#allocation13 + $0x1c80] sm:$0xff]  ;;  %v11801_v46 = vpack.c.bf16 %v2623_v0, %v2612_v25  ;;  %v15056_v19 = vadd.f32 %v15041_v63, %v3318_v35  ;;  %v2688_v25 = vld [vmem:[#allocation13 + $0xe58] sm:$0xff]  ;;  %v3031_v0 = vld [vmem:[#allocation13 + $0x1910] sm:$0xff] }
 0x823   :  { %11982 = vmatprep.subr.bf16.mxu0 %v11981_v58  ;;  %v2622_v58 = vld [vmem:[#allocation13 + $0xc48] sm:$0xff]  ;;  %v11815_v33 = vpack.c.bf16 %v2688_v25, %v2677_v51 }
 0x824   :  { %v11803_v36 = vpack.c.bf16 %v2622_v58, %v2611_v11  ;;  %16457 = vst [vmem:[#allocation36_spill] sm:$0xff] %v15056_v19  ;;  %v3229_v11 = vld [vmem:[#allocation13 + $0x1f40] sm:$0xff]  ;;  %v3240_v58 = vld [vmem:[#allocation13 + $0x1f98] sm:$0xff]  ;;  %v5259_v63 = vsel %vm858_vm3, %v15056_v19, 0.0  ;;  %v3086_v35 = vld [vmem:[#allocation13 + $0x1ac8] sm:$0xff] }
 0x825   :  { %11788 = vmatpush1.bf16.msra.mxu1 %v11787_v13  ;;  %v11997_v13 = vpack.c.bf16 %v3152_v5, %v3141_v45  ;;  %v3042_v45 = vld [vmem:[#allocation13 + $0x1968] sm:$0xff]  ;;  %v2700_v5 = vld [vmem:[#allocation13 + $0xeb8] sm:$0xff]  ;;  %v3195_v19 = vld [vmem:[#allocation13 + $0x1e30] sm:$0xff] }
 0x826   :  { %11984 = vmatpush3.bf16.msra.mxu0 %v11983_v28  ;;  %11790 = vmatprep.subr.bf16.mxu1 %v11789_v48  ;;  %v3163_v28 = vld [vmem:[#allocation13 + $0x1d30] sm:$0xff]  ;;  %v3174_v48 = vld [vmem:[#allocation13 + $0x1d88] sm:$0xff] }
 0x827   :  { %11986 = vmatprep.subr.bf16.mxu0 %v11985_v4  ;;  %v11805_v4 = vpack.c.bf16 %v2645_v50, %v2634_v12  ;;  %v2699_v12 = vld [vmem:[#allocation13 + $0xeb0] sm:$0xff]  ;;  %v2710_v50 = vld [vmem:[#allocation13 + $0xf08] sm:$0xff] }
 0x828   :  { %v11819_v29 = vpack.c.bf16 %v2710_v50, %v2699_v12 }
 0x829   :  { %11792 = vmatpush1.bf16.msra.mxu1 %v11791_v42  ;;  %v2667_v42 = vld [vmem:[#allocation13 + $0xdb0] sm:$0xff] }
 0x82a   :  { %11988 = vmatpush3.bf16.msra.mxu0 %v11987_v61  ;;  %11794 = vmatprep.subr.bf16.mxu1 %v11793_v21  ;;  %v3185_v61 = vld [vmem:[#allocation13 + $0x1de0] sm:$0xff]  ;;  %v3196_v21 = vld [vmem:[#allocation13 + $0x1e38] sm:$0xff]  ;;  %v11809_v40 = vpack.c.bf16 %v2667_v42, %v2656_v60 }
 0x82b   :  { %11990 = vmatprep.subr.bf16.mxu0 %v11989_v44  ;;  %v2655_v44 = vld [vmem:[#allocation13 + $0xd50] sm:$0xff]  ;;  %v12005_v22 = vpack.c.bf16 %v3196_v21, %v3185_v61  ;;  %v2721_v60 = vld [vmem:[#allocation13 + $0xf60] sm:$0xff]  ;;  %v2732_v42 = vld [vmem:[#allocation13 + $0xfb8] sm:$0xff] }
 0x82c   :  { %v11811_v10 = vpack.c.bf16 %v2666_v52, %v2655_v44  ;;  %v3075_v61 = vld [vmem:[#allocation13 + $0x1a70] sm:$0xff]  ;;  %v3273_v44 = vld [vmem:[#allocation13 + $0x20a0] sm:$0xff]  ;;  %v3284_v52 = vld [vmem:[#allocation13 + $0x20f8] sm:$0xff] }
 0x82d   :  { %11796 = vmatpush1.bf16.msra.mxu1 %v11795_v23  ;;  %v2689_v23 = vld [vmem:[#allocation13 + $0xe60] sm:$0xff] }
 0x82e   :  { %11992 = vmatpush3.bf16.msra.mxu0 %v11991_v37  ;;  %11798 = vmatprep.subr.bf16.mxu1 %v11797_v1  ;;  %v3207_v37 = vld [vmem:[#allocation13 + $0x1e90] sm:$0xff]  ;;  %v3218_v1 = vld [vmem:[#allocation13 + $0x1ee8] sm:$0xff]  ;;  %v11813_v38 = vpack.c.bf16 %v2689_v23, %v2678_v6 }
 0x82f   :  { %11994 = vmatprep.subr.bf16.mxu0 %v11993_v27  ;;  %v12007_v27 = vpack.c.bf16 %v3020_v16, %v3009_v49  ;;  %v11823_v49 = vpack.c.bf16 %v2732_v42, %v2721_v60  ;;  %v2743_v6 = vld [vmem:[#allocation13 + $0x1010] sm:$0xff]  ;;  %v2754_v23 = vld [vmem:[#allocation13 + $0x1068] sm:$0xff] }
 0x830   :  { %4570 = vmatmul.mubr.f32.vlgmr.msra.gmra.mrb[28].mxu1 %v14965_v9  ;;  %v12001_v9 = vpack.c.bf16 %v3174_v48, %v3163_v28  ;;  %v12013_v28 = vpack.c.bf16 %v3240_v58, %v3229_v11  ;;  %v3064_v48 = vld [vmem:[#allocation13 + $0x1a18] sm:$0xff]  ;;  %v11827_v25 = vpack.c.bf16 %v2754_v23, %v2743_v6  ;;  %v3306_v11 = vld [vmem:[#allocation13 + $0x21a8] sm:$0xff]  ;;  %v3326_v23 = vrot.slane %v15048_v17, %v16453_v53  ;;  %v3173_v53 = vld [vmem:[#allocation13 + $0x1d80] sm:$0xff] }
 0x831   :  { %4924 = vmatmul.mubr.f32.vlgmr.msra.gmra.mrb[24].mxu0 %v14994_v43  ;;  %11800 = vmatpush1.bf16.msra.mxu1 %v11799_v15  ;;  %v12009_v15 = vpack.c.bf16 %v3218_v1, %v3207_v37  ;;  %v3097_v37 = vld [vmem:[#allocation13 + $0x1b20] sm:$0xff]  ;;  %v12021_v1 = vpack.c.bf16 %v3284_v52, %v3273_v44  ;;  %v2788_v58 = vld [vmem:[#allocation13 + $0x1178] sm:$0xff]  ;;  %v2843_v52 = vld [vmem:[#allocation13 + $0x1330] sm:$0xff] }
 0x832   :  { %4640 = vmatprep.mubr.f32.mxu1 %v14978_v56  ;;  %11996 = vmatpush3.bf16.msra.mxu0 %v11995_v24  ;;  %v11807_v56 = vpack.c.bf16 %v2644_v2, %v2633_v62  ;;  %v2711_v24 = vld [vmem:[#allocation13 + $0xf10] sm:$0xff]  ;;  %v3262_v2 = vld [vmem:[#allocation13 + $0x2048] sm:$0xff]  ;;  %v2832_v44 = vld [vmem:[#allocation13 + $0x12d8] sm:$0xff] }
 0x833   :  { %4993 = vmatprep.mubr.f32.mxu0 %v14997_v8  ;;  %11802 = vmatprep.subr.bf16.mxu1 %v11801_v46  ;;  %v12011_v46 = vpack.c.bf16 %v3042_v45, %v3031_v0  ;;  %v11817_v26 = vpack.c.bf16 %v2711_v24, %v2700_v5  ;;  %v3251_v62 = vld [vmem:[#allocation13 + $0x1ff0] sm:$0xff]  ;;  %v2765_v45 = vld [vmem:[#allocation13 + $0x10c0] sm:$0xff]  ;;  %v2776_v5 = vld [vmem:[#allocation13 + $0x1118] sm:$0xff] }
 0x834   :  { %11998 = vmatprep.subr.bf16.mxu0 %v11997_v13  ;;  %v3053_v13 = vld [vmem:[#allocation13 + $0x19c0] sm:$0xff]  ;;  %v12017_v21 = vpack.c.bf16 %v3262_v2, %v3251_v62  ;;  %v3295_v24 = vld [vmem:[#allocation13 + $0x2150] sm:$0xff]  ;;  %v11831_v12 = vpack.c.bf16 %v2776_v5, %v2765_v45  ;;  %v2810_v62 = vld [vmem:[#allocation13 + $0x1228] sm:$0xff] }
 0x835   :  { %11804 = vmatpush1.bf16.msra.mxu1 %v11803_v36  ;;  %v2722_v36 = vld [vmem:[#allocation13 + $0xf68] sm:$0xff]  ;;  %v12026_v50 = vpack.c.bf16 %v3306_v11, %v3295_v24  ;;  %v5090_v6 = vld [vmem:[%s16323_s11 + $0xa8] sm:$0xff] }
 0x836   :  { %12000 = vmatpush3.bf16.msra.mxu0 %v11999_v59  ;;  %11806 = vmatprep.subr.bf16.mxu1 %v11805_v4  ;;  %v2733_v59 = vld [vmem:[#allocation13 + $0xfc0] sm:$0xff]  ;;  %v5260_v4 = vrot.slane %v5259_v63, 4  ;;  %v5092_v11 = vld [vmem:[%s16323_s11 + $0xb8] sm:$0xff] }
 0x837   :  { %12002 = vmatprep.subr.bf16.mxu0 %v12001_v9  ;;  %v12015_v9 = vpack.c.bf16 %v3064_v48, %v3053_v13  ;;  %v11821_v34 = vpack.c.bf16 %v2733_v59, %v2722_v36  ;;  %v2787_v13 = vld [vmem:[#allocation13 + $0x1170] sm:$0xff]  ;;  %v2865_v45 = vld [vmem:[#allocation13 + $0x13e0] sm:$0xff] }
 0x838   :  { %v5069_v59 = vld [vmem:[%s16323_s11] sm:$0xff]  ;;  %v5091_v24 = vld [vmem:[%s16323_s11 + $0xb0] sm:$0xff] }
 0x839   :  { %11808 = vmatpush1.bf16.msra.mxu1 %v11807_v56  ;;  %v2744_v56 = vld [vmem:[#allocation13 + $0x1018] sm:$0xff] }
 0x83a   :  { %12004 = vmatpush3.bf16.msra.mxu0 %v12003_v31  ;;  %11810 = vmatprep.subr.bf16.mxu1 %v11809_v40  ;;  %v2755_v31 = vld [vmem:[#allocation13 + $0x1070] sm:$0xff]  ;;  %v5261_v40 = vadd.f32 %v5260_v4, %v5259_v63  ;;  %v5070_v4 = vld [vmem:[%s16323_s11 + $0x8] sm:$0xff] }
 0x83b   :  { %12006 = vmatprep.subr.bf16.mxu0 %v12005_v22  ;;  %v12019_v22 = vpack.c.bf16 %v3086_v35, %v3075_v61  ;;  %v11825_v16 = vpack.c.bf16 %v2755_v31, %v2744_v56  ;;  %v15084_v42 = vpack.c.bf16 %v5070_v4, %v5069_v59  ;;  %v2809_v61 = vld [vmem:[#allocation13 + $0x1220] sm:$0xff]  ;;  %v5093_v59 = vld [vmem:[%s16323_s11 + $0xc0] sm:$0xff] }
 0x83c   :  { %v5262_v51 = vrot.slane %v5261_v40, 2  ;;  %v5071_v35 = vld [vmem:[%s16323_s11 + $0x10] sm:$0xff]  ;;  %v5094_v4 = vld [vmem:[%s16323_s11 + $0xc8] sm:$0xff] }
 0x83d   :  { %11812 = vmatpush1.bf16.msra.mxu1 %v11811_v10  ;;  %v3108_v10 = vld [vmem:[#allocation13 + $0x1b78] sm:$0xff] }
 0x83e   :  { %12008 = vmatpush3.bf16.msra.mxu0 %v12007_v27  ;;  %11814 = vmatprep.subr.bf16.mxu1 %v11813_v38  ;;  %v2766_v27 = vld [vmem:[#allocation13 + $0x10c8] sm:$0xff]  ;;  %v2777_v38 = vld [vmem:[#allocation13 + $0x1120] sm:$0xff]  ;;  %v12023_v0 = vpack.c.bf16 %v3108_v10, %v3097_v37  ;;  %v5263_v63 = vadd.f32 %v5262_v51, %v5261_v40  ;;  %v11841_v10 = vpack.c.bf16 %v2843_v52, %v2832_v44  ;;  %v5073_v51 = vld [vmem:[%s16323_s11 + $0x20] sm:$0xff] }
 0x83f   :  { %12010 = vmatprep.subr.bf16.mxu0 %v12009_v15  ;;  %v11829_v15 = vpack.c.bf16 %v2777_v38, %v2766_v27  ;;  %v5072_v40 = vld [vmem:[%s16323_s11 + $0x18] sm:$0xff]  ;;  %v2909_v44 = vld [vmem:[#allocation13 + $0x1540] sm:$0xff] }
 0x840   :  { %v5264_v2 = vrot.slane %v5263_v63, 1  ;;  %v2831_v27 = vld [vmem:[#allocation13 + $0x12d0] sm:$0xff]  ;;  %v2842_v38 = vld [vmem:[#allocation13 + $0x1328] sm:$0xff] }
 0x841   :  { %11816 = vmatpush1.bf16.msra.mxu1 %v11815_v33  ;;  %v2799_v33 = vld [vmem:[#allocation13 + $0x11d0] sm:$0xff] }
 0x842   :  { %12012 = vmatpush3.bf16.msra.mxu0 %v12011_v46  ;;  %11818 = vmatprep.subr.bf16.mxu1 %v11817_v26  ;;  %v5085_v46 = vld [vmem:[%s16323_s11 + $0x80] sm:$0xff]  ;;  %v5086_v26 = vld [vmem:[%s16323_s11 + $0x88] sm:$0xff]  ;;  %v11833_v48 = vpack.c.bf16 %v2799_v33, %v2788_v58  ;;  %v15129_v58 = vadd.f32 %v15043_v18, %v3326_v23  ;;  %v5076_v18 = vld [vmem:[%s16323_s11 + $0x38] sm:$0xff] }
 0x843   :  { %12014 = vmatprep.subr.bf16.mxu0 %v12013_v28  ;;  %v2798_v28 = vld [vmem:[#allocation13 + $0x11c8] sm:$0xff]  ;;  %v15067_v36 = vpack.c.bf16 %v5086_v26, %v5085_v46  ;;  %v2853_v46 = vld [vmem:[#allocation13 + $0x1380] sm:$0xff]  ;;  %v2864_v26 = vld [vmem:[#allocation13 + $0x13d8] sm:$0xff] }
 0x844   :  { %v11835_v60 = vpack.c.bf16 %v2798_v28, %v2787_v13  ;;  %16459 = vst [vmem:[#allocation38_spill] sm:$0xff] %v15129_v58  ;;  %v2876_v13 = vld [vmem:[#allocation13 + $0x1438] sm:$0xff]  ;;  %v2887_v28 = vld [vmem:[#allocation13 + $0x1490] sm:$0xff] }
 0x845   :  { %11820 = vmatpush1.bf16.msra.mxu1 %v11819_v29  ;;  %v2821_v29 = vld [vmem:[#allocation13 + $0x1280] sm:$0xff] }
 0x846   :  { %12016 = vmatpush3.bf16.msra.mxu0 %v12015_v9  ;;  %11822 = vmatprep.subr.bf16.mxu1 %v11821_v34  ;;  %v5087_v9 = vld [vmem:[%s16323_s11 + $0x90] sm:$0xff]  ;;  %v5088_v34 = vld [vmem:[%s16323_s11 + $0x98] sm:$0xff]  ;;  %v11837_v56 = vpack.c.bf16 %v2821_v29, %v2810_v62  ;;  %v5273_v62 = vsel %vm858_vm3, %v15129_v58, 0.0 }
 0x847   :  { %12018 = vmatprep.subr.bf16.mxu0 %v12017_v21  ;;  %v2820_v21 = vld [vmem:[#allocation13 + $0x1278] sm:$0xff]  ;;  %v15090_v31 = vpack.c.bf16 %v5088_v34, %v5087_v9  ;;  %v11849_v9 = vpack.c.bf16 %v2887_v28, %v2876_v13  ;;  %v2875_v34 = vld [vmem:[#allocation13 + $0x1430] sm:$0xff]  ;;  %v5274_v52 = vrot.slane %v5273_v62, 4 }
 0x848   :  { %v11839_v37 = vpack.c.bf16 %v2820_v21, %v2809_v61  ;;  %v5077_v61 = vld [vmem:[%s16323_s11 + $0x40] sm:$0xff] }
 0x849   :  { %11824 = vmatpush1.bf16.msra.mxu1 %v11823_v49  ;;  %v3314_v49 = vrot.slane %v15048_v17, %v14581_v47  ;;  %v5081_v13 = vld [vmem:[%s16323_s11 + $0x60] sm:$0xff] }
 0x84a   :  { %12020 = vmatpush3.bf16.msra.mxu0 %v12019_v22  ;;  %11826 = vmatprep.subr.bf16.mxu1 %v11825_v16  ;;  %v5265_v22 = vadd.f32 %v5264_v2, %v5263_v63  ;;  %v5089_v16 = vld [vmem:[%s16323_s11 + $0xa0] sm:$0xff]  ;;  %v11843_v63 = vpack.c.bf16 %v2842_v38, %v2831_v27  ;;  %v11847_v2 = vpack.c.bf16 %v2864_v26, %v2853_v46  ;;  %v5079_v27 = vld [vmem:[%s16323_s11 + $0x50] sm:$0xff] }
 0x84b   :  { %12022 = vmatprep.subr.bf16.mxu0 %v12021_v1  ;;  %v15108_v1 = vpack.c.bf16 %v5072_v40, %v5071_v35  ;;  %v15120_v5 = vadd.f32 %v15037_v41, %v3314_v49  ;;  %v15160_v35 = vpack.c.bf16 %v5094_v4, %v5093_v59  ;;  %v2898_v40 = vld [vmem:[#allocation13 + $0x14e8] sm:$0xff]  ;;  %v5082_v59 = vld [vmem:[%s16323_s11 + $0x68] sm:$0xff] }
 0x84c   :  { %v5095_v49 = vld [vmem:[%s16323_s11 + $0xd0] sm:$0xff]  ;;  %v11853_v23 = vpack.c.bf16 %v2909_v44, %v2898_v40  ;;  %v2952_v40 = vld [vmem:[#allocation13 + $0x1698] sm:$0xff] }
 0x84d   :  { %11828 = vmatpush1.bf16.msra.mxu1 %v11827_v25  ;;  %v15114_v25 = vpack.c.bf16 %v5090_v6, %v5089_v16  ;;  %16458 = vst [vmem:[#allocation37_spill] sm:$0xff] %v15120_v5  ;;  %v2942_v4 = vld [vmem:[#allocation13 + $0x1648] sm:$0xff] }
 0x84e   :  { %12024 = vmatpush3.bf16.msra.mxu0 %v12023_v0  ;;  %11830 = vmatprep.subr.bf16.mxu1 %v11829_v15  ;;  %v5074_v0 = vld [vmem:[%s16323_s11 + $0x28] sm:$0xff]  ;;  %v2854_v15 = vld [vmem:[#allocation13 + $0x1388] sm:$0xff] }
 0x84f   :  { %12025 = vmatprep.subr.bf16.mxu0 %v16442_v54  ;;  %v15132_v33 = vpack.c.bf16 %v5074_v0, %v5073_v51  ;;  %v11845_v41 = vpack.c.bf16 %v2865_v45, %v2854_v15  ;;  %v5080_v0 = vld [vmem:[%s16323_s11 + $0x58] sm:$0xff]  ;;  %v2920_v15 = vld [vmem:[#allocation13 + $0x1598] sm:$0xff]  ;;  %v5083_v44 = vld [vmem:[%s16323_s11 + $0x70] sm:$0xff] }
 0x850   :  { %v2931_v45 = vld [vmem:[#allocation13 + $0x15f0] sm:$0xff]  ;;  %v15190_v46 = vpack.c.bf16 %v5080_v0, %v5079_v27  ;;  %v5118_v27 = vld [vmem:[%s16323_s11 + $0x188] sm:$0xff] }
 0x851   :  { %4994 = vmatmul.mubr.f32.vlgmr.msra.gmra.mrb[26].mxu0 %v15004_v3  ;;  %11832 = vmatpush1.bf16.msra.mxu1 %v11831_v12  ;;  %v5075_v12 = vld [vmem:[%s16323_s11 + $0x30] sm:$0xff]  ;;  %v11857_v26 = vpack.c.bf16 %v2931_v45, %v2920_v15  ;;  %v2963_v45 = vld [vmem:[#allocation13 + $0x16f0] sm:$0xff] }
 0x852   :  { %12027 = vmatpush3.bf16.msra.mxu0 %v12026_v50  ;;  %10525 = vmatprep.mubr.msk.f32.mxu0 %vm13655_vm0, %v16431_v55  ;;  %v15138_v50 = vpack.c.bf16 %v5092_v11, %v5091_v24  ;;  %v15154_v29 = vpack.c.bf16 %v5076_v18, %v5075_v12  ;;  %v5275_v24 = vadd.f32 %v5274_v52, %v5273_v62  ;;  %v5097_v11 = vld [vmem:[%s16323_s11 + $0xe0] sm:$0xff]  ;;  %v2930_v18 = vld [vmem:[#allocation13 + $0x15e8] sm:$0xff]  ;;  %v2953_v62 = vld [vmem:[#allocation13 + $0x16a0] sm:$0xff] }
 0x853   :  { %11834 = vmatprep.subr.bf16.mxu1 %v11833_v48  ;;  %12029 = vmatprep.subr.bf16.mxu0 %v15067_v36  ;;  %v5252_v48 = vsel %vm858_vm3, %v15120_v5, 0.0  ;;  %v2919_v12 = vld [vmem:[#allocation13 + $0x1590] sm:$0xff] }
 0x854   :  { %v5253_v21 = vrot.slane %v5252_v48, 4 }
 0x855   :  { %10526 = vmatmul.mubr.msk.f32.vlgmr.msra.gmra.mrb[28].mxu0 %vm909_vm5, %v15011_v57  ;;  %11836 = vmatpush1.bf16.msra.mxu1 %v11835_v60  ;;  %v2886_v60 = vld [vmem:[#allocation13 + $0x1488] sm:$0xff] }
 0x856   :  { %12031 = vmatpush3.bf16.msra.mxu0 %v15084_v42  ;;  %5398 = vmatprep.mubr.f32.mxu0 %v5265_v22  ;;  %v5096_v22 = vld [vmem:[%s16323_s11 + $0xd8] sm:$0xff]  ;;  %v11851_v16 = vpack.c.bf16 %v2886_v60, %v2875_v34  ;;  %v5254_v38 = vadd.f32 %v5253_v21, %v5252_v48  ;;  %v11859_v60 = vpack.c.bf16 %v2930_v18, %v2919_v12 }
 0x857   :  { %11838 = vmatprep.subr.bf16.mxu1 %v11837_v56  ;;  %12033 = vmatprep.subr.bf16.mxu0 %v15090_v31  ;;  %v5078_v56 = vld [vmem:[%s16323_s11 + $0x48] sm:$0xff]  ;;  %v15178_v51 = vpack.c.bf16 %v5096_v22, %v5095_v49  ;;  %v5100_v34 = vld [vmem:[%s16323_s11 + $0xf8] sm:$0xff]  ;;  %v11861_v21 = vpack.c.bf16 %v2953_v62, %v2942_v4 }
 0x858   :  { %v15172_v6 = vpack.c.bf16 %v5078_v56, %v5077_v61  ;;  %v5255_v28 = vrot.slane %v5254_v38, 2  ;;  %v15208_v61 = vpack.c.bf16 %v5082_v59, %v5081_v13  ;;  %v2941_v56 = vld [vmem:[#allocation13 + $0x1640] sm:$0xff]  ;;  %v5084_v22 = vld [vmem:[%s16323_s11 + $0x78] sm:$0xff] }
 0x859   :  { %11840 = vmatpush1.bf16.msra.mxu1 %v11839_v37  ;;  %v2897_v37 = vld [vmem:[#allocation13 + $0x14e0] sm:$0xff]  ;;  %v15226_v0 = vpack.c.bf16 %v5084_v22, %v5083_v44  ;;  %v2986_v12 = vld [vmem:[#allocation13 + $0x17a8] sm:$0xff]  ;;  %v3322_v44 = vrot.slane %v15048_v17, %v16452_v7 }
 0x85a   :  { %12035 = vmatpush3.bf16.msra.mxu0 %v15108_v1  ;;  %11842 = vmatprep.subr.bf16.mxu1 %v11841_v10  ;;  %v2908_v10 = vld [vmem:[#allocation13 + $0x1538] sm:$0xff]  ;;  %v5256_v52 = vadd.f32 %v5255_v28, %v5254_v38  ;;  %v11863_v38 = vpack.c.bf16 %v2952_v40, %v2941_v56  ;;  %v2997_v13 = vld [vmem:[#allocation13 + $0x1800] sm:$0xff]  ;;  %v5120_v59 = vld [vmem:[%s16323_s11 + $0x198] sm:$0xff] }
 0x85b   :  { %12037 = vmatprep.subr.bf16.mxu0 %v15114_v25  ;;  %v5119_v28 = vld [vmem:[%s16323_s11 + $0x190] sm:$0xff]  ;;  %v3008_v56 = vld [vmem:[#allocation13 + $0x1858] sm:$0xff]  ;;  %v3019_v40 = vld [vmem:[#allocation13 + $0x18b0] sm:$0xff] }
 0x85c   :  { %v3018_v17 = vld [vmem:[#allocation13 + $0x18a8] sm:$0xff] }
 0x85d   :  { %11844 = vmatpush1.bf16.msra.mxu1 %v11843_v63  ;;  %v5098_v63 = vld [vmem:[%s16323_s11 + $0xe8] sm:$0xff] }
 0x85e   :  { %12039 = vmatpush3.bf16.msra.mxu0 %v15132_v33  ;;  %11846 = vmatprep.subr.bf16.mxu1 %v11845_v41  ;;  %v11855_v41 = vpack.c.bf16 %v2908_v10, %v2897_v37  ;;  %v15196_v48 = vpack.c.bf16 %v5098_v63, %v5097_v11  ;;  %v5117_v10 = vld [vmem:[%s16323_s11 + $0x180] sm:$0xff]  ;;  %v2974_v11 = vld [vmem:[#allocation13 + $0x1748] sm:$0xff]  ;;  %v5257_v63 = vrot.slane %v5256_v52, 1 }
 0x85f   :  { %12041 = vmatprep.subr.bf16.mxu0 %v15138_v50  ;;  %v11867_v4 = vpack.c.bf16 %v2974_v11, %v2963_v45  ;;  %v5106_v45 = vld [vmem:[%s16323_s11 + $0x128] sm:$0xff]  ;;  %v3030_v11 = vld [vmem:[#allocation13 + $0x1908] sm:$0xff] }
 0x861   :  { %11848 = vmatpush1.bf16.msra.mxu1 %v11847_v2  ;;  %v5276_v2 = vrot.slane %v5275_v24, 2 }
 0x862   :  { %12043 = vmatpush3.bf16.msra.mxu0 %v15154_v29  ;;  %11850 = vmatprep.subr.bf16.mxu1 %v11849_v9  ;;  %v5099_v9 = vld [vmem:[%s16323_s11 + $0xf0] sm:$0xff] }
 0x863   :  { %12045 = vmatprep.subr.bf16.mxu0 %v15160_v35  ;;  %v15214_v49 = vpack.c.bf16 %v5100_v34, %v5099_v9  ;;  %v5277_v37 = vadd.f32 %v5276_v2, %v5275_v24  ;;  %v15229_v24 = vpack.c.bf16 %v5118_v27, %v5117_v10  ;;  %v2996_v2 = vld [vmem:[#allocation13 + $0x17f8] sm:$0xff]  ;;  %v5103_v9 = vld [vmem:[%s16323_s11 + $0x110] sm:$0xff]  ;;  %v5258_v34 = vadd.f32 %v5257_v63, %v5256_v52 }
 0x864   :  { %v5122_v52 = vld [vmem:[%s16323_s11 + $0x1a8] sm:$0xff]  ;;  %v11873_v27 = vpack.c.bf16 %v3019_v40, %v3008_v56 }
 0x865   :  { %11852 = vmatpush1.bf16.msra.mxu1 %v11851_v16  ;;  %v2964_v16 = vld [vmem:[#allocation13 + $0x16f8] sm:$0xff]  ;;  %v5278_v18 = vrot.slane %v5277_v37, 1  ;;  %v3041_v63 = vld [vmem:[#allocation13 + $0x1960] sm:$0xff] }
 0x866   :  { %12047 = vmatpush3.bf16.msra.mxu0 %v15172_v6  ;;  %11854 = vmatprep.subr.bf16.mxu1 %v11853_v23  ;;  %v2975_v23 = vld [vmem:[#allocation13 + $0x1750] sm:$0xff]  ;;  %v5126_v56 = vld [vmem:[%s16323_s11 + $0x1c8] sm:$0xff] }
 0x867   :  { %12049 = vmatprep.subr.bf16.mxu0 %v15178_v51  ;;  %v11865_v15 = vpack.c.bf16 %v2975_v23, %v2964_v16  ;;  %v5279_v22 = vadd.f32 %v5278_v18, %v5277_v37  ;;  %v5121_v16 = vld [vmem:[%s16323_s11 + $0x1a0] sm:$0xff] }
 0x868   :  { %v5105_v37 = vld [vmem:[%s16323_s11 + $0x120] sm:$0xff] }
 0x869   :  { %11856 = vmatpush1.bf16.msra.mxu1 %v11855_v41  ;;  %v5101_v41 = vld [vmem:[%s16323_s11 + $0x100] sm:$0xff] }
 0x86a   :  { %12051 = vmatpush3.bf16.msra.mxu0 %v15190_v46  ;;  %11858 = vmatprep.subr.bf16.mxu1 %v11857_v26  ;;  %v5102_v26 = vld [vmem:[%s16323_s11 + $0x108] sm:$0xff] }
 0x86b   :  { %12053 = vmatprep.subr.bf16.mxu0 %v15196_v48  ;;  %v15246_v62 = vpack.c.bf16 %v5102_v26, %v5101_v41  ;;  %v15278_v41 = vadd.f32 %v15039_v14, %v3322_v44  ;;  %v5123_v26 = vld [vmem:[%s16323_s11 + $0x1b0] sm:$0xff] }
 0x86c   :  { %v5107_v14 = vld [vmem:[%s16323_s11 + $0x130] sm:$0xff] }
 0x86d   :  { %11860 = vmatpush1.bf16.msra.mxu1 %v11859_v60  ;;  %v11869_v60 = vpack.c.bf16 %v2997_v13, %v2986_v12  ;;  %16460 = vst [vmem:[#allocation39_spill] sm:$0xff] %v15278_v41  ;;  %v5124_v12 = vld [vmem:[%s16323_s11 + $0x1b8] sm:$0xff]  ;;  %v15287_v13 = vpack.c.bf16 %v5106_v45, %v5105_v37  ;;  %v3085_v45 = vld [vmem:[#allocation13 + $0x1ac0] sm:$0xff] }
 0x86e   :  { %12055 = vmatpush3.bf16.msra.mxu0 %v15208_v61  ;;  %11862 = vmatprep.subr.bf16.mxu1 %v11861_v21  ;;  %v15252_v21 = vpack.c.bf16 %v5120_v59, %v5119_v28  ;;  %v11877_v28 = vpack.c.bf16 %v3041_v63, %v3030_v11  ;;  %v3029_v59 = vld [vmem:[#allocation13 + $0x1900] sm:$0xff]  ;;  %v3074_v37 = vld [vmem:[#allocation13 + $0x1a68] sm:$0xff] }
 0x86f   :  { %12057 = vmatprep.subr.bf16.mxu0 %v15214_v49  ;;  %v5127_v11 = vld [vmem:[%s16323_s11 + $0x1d0] sm:$0xff]  ;;  %v5128_v63 = vld [vmem:[%s16323_s11 + $0x1d8] sm:$0xff] }
 0x870   :  { %4641 = vmatmul.mubr.f32.vlgmr.msra.gmra.mrb[28].mxu1 %v14994_v43  ;;  %v2985_v43 = vld [vmem:[#allocation13 + $0x17a0] sm:$0xff] }
 0x871   :  { %11864 = vmatpush1.bf16.msra.mxu1 %v11863_v38  ;;  %4711 = vmatprep.mubr.f32.mxu1 %v14997_v8  ;;  %v5104_v8 = vld [vmem:[%s16323_s11 + $0x118] sm:$0xff]  ;;  %v11871_v23 = vpack.c.bf16 %v2996_v2, %v2985_v43  ;;  %v15293_v43 = vpack.c.bf16 %v5124_v12, %v5123_v26 }
 0x872   :  { %12059 = vmatpush3.bf16.msra.mxu0 %v15226_v0  ;;  %11866 = vmatprep.subr.bf16.mxu1 %v11865_v15  ;;  %v15266_v10 = vpack.c.bf16 %v5104_v8, %v5103_v9  ;;  %v3007_v38 = vld [vmem:[#allocation13 + $0x1850] sm:$0xff]  ;;  %v15272_v15 = vpack.c.bf16 %v5122_v52, %v5121_v16  ;;  %v3052_v9 = vld [vmem:[#allocation13 + $0x19b8] sm:$0xff]  ;;  %v3062_v52 = vld [vmem:[#allocation13 + $0x1a08] sm:$0xff] }
 0x873   :  { %12061 = vmatprep.subr.bf16.mxu0 %v15229_v24  ;;  %v11875_v18 = vpack.c.bf16 %v3018_v17, %v3007_v38  ;;  %v5108_v2 = vld [vmem:[%s16323_s11 + $0x138] sm:$0xff]  ;;  %v5125_v8 = vld [vmem:[%s16323_s11 + $0x1c0] sm:$0xff]  ;;  %v5110_v17 = vld [vmem:[%s16323_s11 + $0x148] sm:$0xff] }
 0x874   :  { %v15307_v44 = vpack.c.bf16 %v5108_v2, %v5107_v14  ;;  %v3051_v16 = vld [vmem:[#allocation13 + $0x19b0] sm:$0xff]  ;;  %v15313_v38 = vpack.c.bf16 %v5126_v56, %v5125_v8  ;;  %v15331_v2 = vpack.c.bf16 %v5128_v63, %v5127_v11  ;;  %v3118_v11 = vld [vmem:[#allocation13 + $0x1bc8] sm:$0xff]  ;;  %v3129_v63 = vld [vmem:[#allocation13 + $0x1c20] sm:$0xff] }
 0x875   :  { %5399 = vmatmul.mubr.f32.vlgmr.msra.gmra.mrb[30].mxu0 %v5258_v34  ;;  %11868 = vmatpush1.bf16.msra.mxu1 %v11867_v4  ;;  %v3040_v4 = vld [vmem:[#allocation13 + $0x1958] sm:$0xff]  ;;  %v3063_v34 = vld [vmem:[#allocation13 + $0x1a10] sm:$0xff]  ;;  %v11883_v26 = vpack.c.bf16 %v3062_v52, %v3051_v16 }
 0x876   :  { %12063 = vmatpush3.bf16.msra.mxu0 %v15246_v62  ;;  %5468 = vmatprep.mubr.f32.mxu0 %v5279_v22  ;;  %v11879_v40 = vpack.c.bf16 %v3040_v4, %v3029_v59  ;;  %v11881_v22 = vpack.c.bf16 %v3063_v34, %v3052_v9  ;;  %v3084_v59 = vld [vmem:[#allocation13 + $0x1ab8] sm:$0xff]  ;;  %v5111_v4 = vld [vmem:[%s16323_s11 + $0x150] sm:$0xff]  ;;  %v5112_v9 = vld [vmem:[%s16323_s11 + $0x158] sm:$0xff] }
 0x877   :  { %11870 = vmatprep.subr.bf16.mxu1 %v11869_v60  ;;  %12065 = vmatprep.subr.bf16.mxu0 %v15252_v21  ;;  %v5266_v60 = vsel %vm858_vm3, %v15278_v41, 0.0  ;;  %v3096_v34 = vld [vmem:[#allocation13 + $0x1b18] sm:$0xff]  ;;  %v3107_v8 = vld [vmem:[#allocation13 + $0x1b70] sm:$0xff] }
 0x878   :  { %v5129_v56 = vld [vmem:[%s16323_s11 + $0x1e0] sm:$0xff]  ;;  %v11889_v16 = vpack.c.bf16 %v3107_v8, %v3096_v34  ;;  %v5115_v8 = vld [vmem:[%s16323_s11 + $0x170] sm:$0xff] }
 0x879   :  { %11872 = vmatpush1.bf16.msra.mxu1 %v11871_v23  ;;  %v5109_v23 = vld [vmem:[%s16323_s11 + $0x140] sm:$0xff] }
 0x87a   :  { %12067 = vmatpush3.bf16.msra.mxu0 %v15266_v10  ;;  %11874 = vmatprep.subr.bf16.mxu1 %v11873_v27  ;;  %v5267_v27 = vrot.slane %v5266_v60, 4  ;;  %v15325_v12 = vpack.c.bf16 %v5110_v17, %v5109_v23  ;;  %v3095_v52 = vld [vmem:[#allocation13 + $0x1b10] sm:$0xff]  ;;  %v3106_v23 = vld [vmem:[#allocation13 + $0x1b68] sm:$0xff]  ;;  %v3128_v34 = vld [vmem:[#allocation13 + $0x1c18] sm:$0xff] }
 0x87b   :  { %12069 = vmatprep.subr.bf16.mxu0 %v15272_v15 }
 0x87c   :  { %v5268_v14 = vadd.f32 %v5267_v27, %v5266_v60  ;;  %v5113_v27 = vld [vmem:[%s16323_s11 + $0x160] sm:$0xff] }
 0x87d   :  { %11876 = vmatpush1.bf16.msra.mxu1 %v11875_v18  ;;  %v11885_v18 = vpack.c.bf16 %v3085_v45, %v3074_v37  ;;  %v5114_v45 = vld [vmem:[%s16323_s11 + $0x168] sm:$0xff] }
 0x87e   :  { %12071 = vmatpush3.bf16.msra.mxu0 %v15287_v13  ;;  %11878 = vmatprep.subr.bf16.mxu1 %v11877_v28  ;;  %v3073_v28 = vld [vmem:[#allocation13 + $0x1a60] sm:$0xff]  ;;  %v5269_v17 = vrot.slane %v5268_v14, 2 }
 0x87f   :  { %12073 = vmatprep.subr.bf16.mxu0 %v15293_v43  ;;  %v11887_v60 = vpack.c.bf16 %v3084_v59, %v3073_v28  ;;  %v11891_v28 = vpack.c.bf16 %v3106_v23, %v3095_v52  ;;  %v15361_v59 = vpack.c.bf16 %v5114_v45, %v5113_v27  ;;  %v3140_v52 = vld [vmem:[#allocation13 + $0x1c78] sm:$0xff] }
 0x880   :  { %v5149_v23 = vld [vmem:[%s16323_s11 + $0x280] sm:$0xff]  ;;  %v5150_v27 = vld [vmem:[%s16323_s11 + $0x288] sm:$0xff] }
 0x881   :  { %11880 = vmatpush1.bf16.msra.mxu1 %v11879_v40  ;;  %v5130_v40 = vld [vmem:[%s16323_s11 + $0x1e8] sm:$0xff]  ;;  %v15382_v58 = vpack.c.bf16 %v5150_v27, %v5149_v23 }
 0x882   :  { %12075 = vmatpush3.bf16.msra.mxu0 %v15307_v44  ;;  %11882 = vmatprep.subr.bf16.mxu1 %v11881_v22  ;;  %v15343_v22 = vpack.c.bf16 %v5112_v9, %v5111_v4  ;;  %v15349_v37 = vpack.c.bf16 %v5130_v40, %v5129_v56  ;;  %v11893_v4 = vpack.c.bf16 %v3129_v63, %v3118_v11  ;;  %v3117_v9 = vld [vmem:[#allocation13 + $0x1bc0] sm:$0xff]  ;;  %v3139_v11 = vld [vmem:[#allocation13 + $0x1c70] sm:$0xff]  ;;  %v3150_v63 = vld [vmem:[#allocation13 + $0x1cc8] sm:$0xff] }
 0x883   :  { %12077 = vmatprep.subr.bf16.mxu0 %v15313_v38  ;;  %v5270_v56 = vadd.f32 %v5269_v17, %v5268_v14  ;;  %v11895_v14 = vpack.c.bf16 %v3128_v34, %v3117_v9  ;;  %v5151_v9 = vld [vmem:[%s16323_s11 + $0x290] sm:$0xff]  ;;  %v5152_v34 = vld [vmem:[%s16323_s11 + $0x298] sm:$0xff]  ;;  %v3184_v23 = vld [vmem:[#allocation13 + $0x1dd8] sm:$0xff] }
 0x884   :  { %v15400_v5 = vpack.c.bf16 %v5152_v34, %v5151_v9  ;;  %v3217_v9 = vld [vmem:[#allocation13 + $0x1ee0] sm:$0xff] }
 0x885   :  { %11884 = vmatpush1.bf16.msra.mxu1 %v11883_v26  ;;  %v5131_v26 = vld [vmem:[%s16323_s11 + $0x1f0] sm:$0xff] }
 0x886   :  { %12079 = vmatpush3.bf16.msra.mxu0 %v15325_v12  ;;  %11886 = vmatprep.subr.bf16.mxu1 %v11885_v18  ;;  %v5132_v18 = vld [vmem:[%s16323_s11 + $0x1f8] sm:$0xff]  ;;  %16462 = vst [vmem:[#allocation44_spill] sm:$0xff] %v15400_v5 }
 0x887   :  { %12081 = vmatprep.subr.bf16.mxu0 %v15331_v2  ;;  %v15367_v40 = vpack.c.bf16 %v5132_v18, %v5131_v26  ;;  %v3162_v26 = vld [vmem:[#allocation13 + $0x1d28] sm:$0xff]  ;;  %v5271_v18 = vrot.slane %v5270_v56, 1 }
 0x889   :  { %11888 = vmatpush1.bf16.msra.mxu1 %v11887_v60  ;;  %v5116_v60 = vld [vmem:[%s16323_s11 + $0x178] sm:$0xff]  ;;  %v5272_v41 = vadd.f32 %v5271_v18, %v5270_v56  ;;  %v5154_v56 = vld [vmem:[%s16323_s11 + $0x2a8] sm:$0xff] }
 0x88a   :  { %12083 = vmatpush3.bf16.msra.mxu0 %v15343_v22  ;;  %11890 = vmatprep.subr.bf16.mxu1 %v11889_v16  ;;  %v3151_v16 = vld [vmem:[#allocation13 + $0x1cd0] sm:$0xff]  ;;  %v15379_v17 = vpack.c.bf16 %v5116_v60, %v5115_v8  ;;  %v11899_v8 = vpack.c.bf16 %v3150_v63, %v3139_v11  ;;  %v11901_v60 = vpack.c.bf16 %v3173_v53, %v3162_v26  ;;  %v3194_v18 = vld [vmem:[#allocation13 + $0x1e28] sm:$0xff] }
 0x88b   :  { %12085 = vmatprep.subr.bf16.mxu0 %v15349_v37  ;;  %v11897_v45 = vpack.c.bf16 %v3151_v16, %v3140_v52  ;;  %v3161_v52 = vld [vmem:[#allocation13 + $0x1d20] sm:$0xff]  ;;  %v3172_v16 = vld [vmem:[#allocation13 + $0x1d78] sm:$0xff]  ;;  %v11905_v63 = vpack.c.bf16 %v3195_v19, %v3184_v23  ;;  %v3183_v26 = vld [vmem:[#allocation13 + $0x1dd0] sm:$0xff] }
 0x88c   :  { %v5153_v53 = vld [vmem:[%s16323_s11 + $0x2a0] sm:$0xff]  ;;  %v11903_v11 = vpack.c.bf16 %v3172_v16, %v3161_v52  ;;  %v5138_v19 = vld [vmem:[%s16323_s11 + $0x228] sm:$0xff]  ;;  %v11907_v52 = vpack.c.bf16 %v3194_v18, %v3183_v26 }
 0x88d   :  { %11892 = vmatpush1.bf16.msra.mxu1 %v11891_v28  ;;  %v5133_v28 = vld [vmem:[%s16323_s11 + $0x200] sm:$0xff]  ;;  %v15418_v34 = vpack.c.bf16 %v5154_v56, %v5153_v53  ;;  %v3205_v23 = vld [vmem:[#allocation13 + $0x1e80] sm:$0xff] }
 0x88e   :  { %12087 = vmatpush3.bf16.msra.mxu0 %v15361_v59  ;;  %11894 = vmatprep.subr.bf16.mxu1 %v11893_v4  ;;  %v5134_v4 = vld [vmem:[%s16323_s11 + $0x208] sm:$0xff]  ;;  %v3239_v56 = vld [vmem:[#allocation13 + $0x1f90] sm:$0xff] }
 0x88f   :  { %12089 = vmatprep.subr.bf16.mxu0 %v15367_v40  ;;  %v15397_v27 = vpack.c.bf16 %v5134_v4, %v5133_v28  ;;  %v3206_v28 = vld [vmem:[#allocation13 + $0x1e88] sm:$0xff]  ;;  %16464 = vst [vmem:[#allocation46_spill] sm:$0xff] %v15418_v34  ;;  %v5158_v26 = vld [vmem:[%s16323_s11 + $0x2c8] sm:$0xff] }
 0x890   :  { %v11909_v16 = vpack.c.bf16 %v3217_v9, %v3206_v28  ;;  %v3227_v9 = vld [vmem:[#allocation13 + $0x1f30] sm:$0xff] }
 0x891   :  { %11896 = vmatpush1.bf16.msra.mxu1 %v11895_v14  ;;  %16461 = vst [vmem:[#allocation43_spill] sm:$0xff] %v15397_v27  ;;  %v5135_v14 = vld [vmem:[%s16323_s11 + $0x210] sm:$0xff] }
 0x892   :  { %12091 = vmatpush3.bf16.msra.mxu0 %v15379_v17  ;;  %11898 = vmatprep.subr.bf16.mxu1 %v11897_v45  ;;  %v5136_v45 = vld [vmem:[%s16323_s11 + $0x218] sm:$0xff] }
 0x893   :  { %12093 = vmatprep.subr.bf16.mxu0 %v15382_v58  ;;  %v15415_v4 = vpack.c.bf16 %v5136_v45, %v5135_v14  ;;  %v3216_v14 = vld [vmem:[#allocation13 + $0x1ed8] sm:$0xff] }
 0x894   :  { %v3228_v45 = vld [vmem:[#allocation13 + $0x1f38] sm:$0xff]  ;;  %v11911_v18 = vpack.c.bf16 %v3216_v14, %v3205_v23 }
 0x895   :  { %5469 = vmatmul.mubr.f32.vlgmr.msra.gmra.mrb[32].mxu0 %v5272_v41  ;;  %11900 = vmatpush1.bf16.msra.mxu1 %v11899_v8  ;;  %16463 = vst [vmem:[#allocation45_spill] sm:$0xff] %v15415_v4  ;;  %v5137_v41 = vld [vmem:[%s16323_s11 + $0x220] sm:$0xff]  ;;  %v5155_v8 = vld [vmem:[%s16323_s11 + $0x2b0] sm:$0xff]  ;;  %v11913_v28 = vpack.c.bf16 %v3239_v56, %v3228_v45 }
 0x896   :  { %11902 = vmatprep.subr.bf16.mxu1 %v11901_v60  ;;  %12095 = vmatpush3.bf16.msra.mxu0 %v15397_v27  ;;  %v5156_v60 = vld [vmem:[%s16323_s11 + $0x2b8] sm:$0xff]  ;;  %v15433_v53 = vpack.c.bf16 %v5138_v19, %v5137_v41  ;;  %v5139_v27 = vld [vmem:[%s16323_s11 + $0x230] sm:$0xff]  ;;  %v3260_v56 = vld [vmem:[#allocation13 + $0x2038] sm:$0xff] }
 0x897   :  { %12097 = vmatprep.subr.bf16.mxu0 %v15400_v5  ;;  %v15436_v5 = vpack.c.bf16 %v5156_v60, %v5155_v8  ;;  %v3238_v41 = vld [vmem:[#allocation13 + $0x1f88] sm:$0xff]  ;;  %v3261_v60 = vld [vmem:[#allocation13 + $0x2040] sm:$0xff] }
 0x898   :  { %16465 = vst [vmem:[#allocation47_spill] sm:$0xff] %v15433_v53  ;;  %v3250_v19 = vld [vmem:[#allocation13 + $0x1fe8] sm:$0xff]  ;;  %v11915_v23 = vpack.c.bf16 %v3238_v41, %v3227_v9  ;;  %v3249_v45 = vld [vmem:[#allocation13 + $0x1fe0] sm:$0xff] }
 0x899   :  { %11904 = vmatpush1.bf16.msra.mxu1 %v11903_v11  ;;  %16466 = vst [vmem:[#allocation48_spill] sm:$0xff] %v15436_v5  ;;  %v5140_v11 = vld [vmem:[%s16323_s11 + $0x238] sm:$0xff]  ;;  %v11917_v14 = vpack.c.bf16 %v3261_v60, %v3250_v19  ;;  %v11919_v9 = vpack.c.bf16 %v3260_v56, %v3249_v45 }
 0x89a   :  { %11906 = vmatprep.subr.bf16.mxu1 %v11905_v63  ;;  %12099 = vmatpush3.bf16.msra.mxu0 %v15415_v4  ;;  %v5157_v63 = vld [vmem:[%s16323_s11 + $0x2c0] sm:$0xff]  ;;  %v15451_v8 = vpack.c.bf16 %v5140_v11, %v5139_v27  ;;  %v5160_v27 = vld [vmem:[%s16323_s11 + $0x2d8] sm:$0xff] }
 0x89b   :  { %12101 = vmatprep.subr.bf16.mxu0 %v15418_v34  ;;  %v15454_v34 = vpack.c.bf16 %v5158_v26, %v5157_v63  ;;  %v5141_v4 = vld [vmem:[%s16323_s11 + $0x240] sm:$0xff]  ;;  %v3282_v60 = vld [vmem:[#allocation13 + $0x20e8] sm:$0xff] }
 0x89c   :  { %16467 = vst [vmem:[#allocation49_spill] sm:$0xff] %v15451_v8  ;;  %v3272_v11 = vld [vmem:[#allocation13 + $0x2098] sm:$0xff]  ;;  %v3283_v26 = vld [vmem:[#allocation13 + $0x20f0] sm:$0xff] }
 0x89d   :  { %11908 = vmatpush1.bf16.msra.mxu1 %v11907_v52  ;;  %16468 = vst [vmem:[#allocation50_spill] sm:$0xff] %v15454_v34  ;;  %v5142_v52 = vld [vmem:[%s16323_s11 + $0x248] sm:$0xff]  ;;  %v11921_v41 = vpack.c.bf16 %v3283_v26, %v3272_v11  ;;  %v3271_v19 = vld [vmem:[#allocation13 + $0x2090] sm:$0xff] }
 0x89e   :  { %11910 = vmatprep.subr.bf16.mxu1 %v11909_v16  ;;  %12103 = vmatpush3.bf16.msra.mxu0 %v15433_v53  ;;  %v5159_v16 = vld [vmem:[%s16323_s11 + $0x2d0] sm:$0xff]  ;;  %v15469_v63 = vpack.c.bf16 %v5142_v52, %v5141_v4  ;;  %v5162_v4 = vld [vmem:[%s16323_s11 + $0x2e8] sm:$0xff]  ;;  %v11923_v45 = vpack.c.bf16 %v3282_v60, %v3271_v19  ;;  %v5148_v19 = vld [vmem:[%s16323_s11 + $0x278] sm:$0xff] }
 0x89f   :  { %12105 = vmatprep.subr.bf16.mxu0 %v15436_v5  ;;  %v15472_v5 = vpack.c.bf16 %v5160_v27, %v5159_v16  ;;  %v5143_v53 = vld [vmem:[%s16323_s11 + $0x250] sm:$0xff]  ;;  %v3304_v26 = vld [vmem:[#allocation13 + $0x2198] sm:$0xff] }
 0x8a0   :  { %16469 = vst [vmem:[#allocation51_spill] sm:$0xff] %v15469_v63  ;;  %v3294_v52 = vld [vmem:[#allocation13 + $0x2148] sm:$0xff]  ;;  %v3305_v27 = vld [vmem:[#allocation13 + $0x21a0] sm:$0xff] }
 0x8a1   :  { %11912 = vmatpush1.bf16.msra.mxu1 %v11911_v18  ;;  %16470 = vst [vmem:[#allocation52_spill] sm:$0xff] %v15472_v5  ;;  %v5144_v18 = vld [vmem:[%s16323_s11 + $0x258] sm:$0xff]  ;;  %v11925_v56 = vpack.c.bf16 %v3305_v27, %v3294_v52  ;;  %v3293_v11 = vld [vmem:[#allocation13 + $0x2140] sm:$0xff]  ;;  %v5165_v27 = vld [vmem:[%s16323_s11 + $0x300] sm:$0xff] }
 0x8a2   :  { %11914 = vmatprep.subr.bf16.mxu1 %v11913_v28  ;;  %12107 = vmatpush3.bf16.msra.mxu0 %v15451_v8  ;;  %v5161_v28 = vld [vmem:[%s16323_s11 + $0x2e0] sm:$0xff]  ;;  %v15487_v16 = vpack.c.bf16 %v5144_v18, %v5143_v53  ;;  %v5164_v53 = vld [vmem:[%s16323_s11 + $0x2f8] sm:$0xff]  ;;  %v11927_v60 = vpack.c.bf16 %v3304_v26, %v3293_v11 }
 0x8a3   :  { %12109 = vmatprep.subr.bf16.mxu0 %v15454_v34  ;;  %v15490_v34 = vpack.c.bf16 %v5162_v4, %v5161_v28  ;;  %v5145_v8 = vld [vmem:[%s16323_s11 + $0x260] sm:$0xff]  ;;  %v5182_v4 = vld [vmem:[%s16323_s11 + $0x388] sm:$0xff]  ;;  %v5168_v11 = vld [vmem:[%s16323_s11 + $0x318] sm:$0xff] }
 0x8a4   :  { %16471 = vst [vmem:[#allocation53_spill] sm:$0xff] %v15487_v16  ;;  %v5181_v18 = vld [vmem:[%s16323_s11 + $0x380] sm:$0xff] }
 0x8a5   :  { %11916 = vmatpush1.bf16.msra.mxu1 %v11915_v23  ;;  %16472 = vst [vmem:[#allocation54_spill] sm:$0xff] %v15490_v34  ;;  %v5146_v23 = vld [vmem:[%s16323_s11 + $0x268] sm:$0xff]  ;;  %v5185_v26 = vld [vmem:[%s16323_s11 + $0x3a0] sm:$0xff] }
 0x8a6   :  { %11918 = vmatprep.subr.bf16.mxu1 %v11917_v14  ;;  %12111 = vmatpush3.bf16.msra.mxu0 %v15469_v63  ;;  %v5163_v14 = vld [vmem:[%s16323_s11 + $0x2f0] sm:$0xff]  ;;  %v15508_v28 = vpack.c.bf16 %v5146_v23, %v5145_v8  ;;  %v15522_v8 = vpack.c.bf16 %v5182_v4, %v5181_v18  ;;  %v5166_v23 = vld [vmem:[%s16323_s11 + $0x308] sm:$0xff] }
 0x8a7   :  { %12113 = vmatprep.subr.bf16.mxu0 %v15472_v5  ;;  %v5186_v18 = vld [vmem:[%s16323_s11 + $0x3a8] sm:$0xff] }
 0x8a8   :  { %16473 = vst [vmem:[#allocation55_spill] sm:$0xff] %v15508_v28 }
 0x8a9   :  { %11920 = vmatpush1.bf16.msra.mxu1 %v11919_v9  ;;  %v15514_v9 = vpack.c.bf16 %v5164_v53, %v5163_v14  ;;  %v5183_v14 = vld [vmem:[%s16323_s11 + $0x390] sm:$0xff]  ;;  %v15544_v53 = vpack.c.bf16 %v5166_v23, %v5165_v27  ;;  %v5188_v27 = vld [vmem:[%s16323_s11 + $0x3b8] sm:$0xff] }
 0x8aa   :  { %11922 = vmatprep.subr.bf16.mxu1 %v11921_v41  ;;  %12115 = vmatpush3.bf16.msra.mxu0 %v15487_v16  ;;  %v5147_v41 = vld [vmem:[%s16323_s11 + $0x270] sm:$0xff]  ;;  %v5173_v16 = vld [vmem:[%s16323_s11 + $0x340] sm:$0xff] }
 0x8ab   :  { %12117 = vmatprep.subr.bf16.mxu0 %v15490_v34  ;;  %16474 = vst [vmem:[#allocation56_spill] sm:$0xff] %v15514_v9  ;;  %v15525_v52 = vpack.c.bf16 %v5148_v19, %v5147_v41  ;;  %16476 = vst [vmem:[#allocation58_spill] sm:$0xff] %v15544_v53  ;;  %v15566_v41 = vpack.c.bf16 %v5186_v18, %v5185_v26  ;;  %v5169_v19 = vld [vmem:[%s16323_s11 + $0x320] sm:$0xff] }
 0x8ac   :  { %v5189_v18 = vld [vmem:[%s16323_s11 + $0x3c0] sm:$0xff] }
 0x8ad   :  { %11924 = vmatpush1.bf16.msra.mxu1 %v11923_v45  ;;  %16475 = vst [vmem:[#allocation57_spill] sm:$0xff] %v15525_v52  ;;  %16479 = vst [vmem:[#allocation61_spill] sm:$0xff] %v15566_v41 }
 0x8ae   :  { %11926 = vmatprep.subr.bf16.mxu1 %v11925_v56  ;;  %12119 = vmatpush3.bf16.msra.mxu0 %v15508_v28  ;;  %v5167_v56 = vld [vmem:[%s16323_s11 + $0x310] sm:$0xff] }
 0x8af   :  { %12121 = vmatprep.subr.bf16.mxu0 %v15514_v9  ;;  %v15563_v4 = vpack.c.bf16 %v5168_v11, %v5167_v56  ;;  %v5172_v56 = vld [vmem:[%s16323_s11 + $0x338] sm:$0xff] }
 0x8b0   :  { %4712 = vmatmul.mubr.f32.vlgmr.msra.gmra.mrb[28].mxu1 %v15004_v3  ;;  %v5184_v3 = vld [vmem:[%s16323_s11 + $0x398] sm:$0xff] }
 0x8b1   :  { %11928 = vmatpush1.bf16.msra.mxu1 %v11927_v60  ;;  %4782 = vmatprep.mubr.f32.mxu1 %v16431_v55  ;;  %v15546_v45 = vpack.c.bf16 %v5184_v3, %v5183_v14  ;;  %16478 = vst [vmem:[#allocation60_spill] sm:$0xff] %v15563_v4  ;;  %v5170_v60 = vld [vmem:[%s16323_s11 + $0x328] sm:$0xff]  ;;  %v5171_v3 = vld [vmem:[%s16323_s11 + $0x330] sm:$0xff]  ;;  %v16482_v11 = vld [vmem:[#allocation32_spill] sm:$0xff] }
 0x8b2   :  { %12125 = vmatprep.subr.bf16.mxu1 %v15522_v8  ;;  %12123 = vmatpush3.bf16.msra.mxu0 %v15525_v52  ;;  %v15581_v23 = vpack.c.bf16 %v5170_v60, %v5169_v19  ;;  %v16378_v26 = vsub.s32 7, %v16482_v11  ;;  %v5190_v19 = vld [vmem:[%s16323_s11 + $0x3c8] sm:$0xff]  ;;  %v13308_v60 = vld [vmem:[#allocation15] sm:$0xff]  ;;  %v15602_v52 = vpack.c.bf16 %v5172_v56, %v5171_v3  ;;  %v5191_v3 = vld [vmem:[%s16323_s11 + $0x3d0] sm:$0xff] }
 0x8b3   :  { %16477 = vst [vmem:[#allocation59_spill] sm:$0xff] %v15546_v45  ;;  %v3334_v9 = vrot.slane %v13308_v60, %v16455_v32  ;;  %v15608_v34 = vpack.c.bf16 %v5190_v19, %v5189_v18  ;;  %v5192_v56 = vld [vmem:[%s16323_s11 + $0x3d8] sm:$0xff] }
 0x8b4   :  { %16480 = vst [vmem:[#allocation62_spill] sm:$0xff] %v15581_v23  ;;  %16483 = vst [vmem:[#allocation64_spill] sm:$0xff] %v15602_v52  ;;  %v3342_v28 = vrot.slane %v13308_v60, %v16378_v26 }
 0x8b5   :  { %16484 = vst [vmem:[#allocation65_spill] sm:$0xff] %v15608_v34 }
 0x8b8   :  { %9526 = vmatmul.mubr.msk.f32.vlgmr.msra.gmra.mrb[28].mxu1 %vm909_vm5, %v15011_v57  ;;  %v5187_v57 = vld [vmem:[%s16323_s11 + $0x3b0] sm:$0xff] }
 0x8b9   :  { %12127 = vmatpush3.bf16.msra.mxu1 %v15544_v53  ;;  %v15584_v14 = vpack.c.bf16 %v5188_v27, %v5187_v57  ;;  %v3330_v57 = vrot.slane %v13308_v60, %v16454_v39  ;;  %v3338_v27 = vrot.slane %v13308_v60, %v16456_v20  ;;  %v5174_v39 = vld [vmem:[%s16323_s11 + $0x348] sm:$0xff] }
 0x8ba   :  { %12129 = vmatprep.subr.bf16.mxu1 %v15546_v45  ;;  %v15629_v5 = vpack.c.bf16 %v5174_v39, %v5173_v16  ;;  %v5193_v16 = vld [vmem:[%s16323_s11 + $0x3e0] sm:$0xff]  ;;  %v5178_v53 = vld [vmem:[%s16323_s11 + $0x368] sm:$0xff] }
 0x8bb   :  { %16481 = vst [vmem:[#allocation63_spill] sm:$0xff] %v15584_v14  ;;  %v5177_v45 = vld [vmem:[%s16323_s11 + $0x360] sm:$0xff] }
 0x8bc   :  { %16486 = vst [vmem:[#allocation67_spill] sm:$0xff] %v15629_v5 }
 0x8bd   :  { %12131 = vmatpush3.bf16.msra.mxu1 %v15563_v4 }
 0x8be   :  { %12133 = vmatprep.subr.bf16.mxu1 %v15566_v41 }
 0x8c1   :  { %12135 = vmatpush3.bf16.msra.mxu1 %v15581_v23 }
 0x8c2   :  { %12137 = vmatprep.subr.bf16.mxu1 %v15584_v14 }
 0x8c3   :  { %v4216_v20 = vpop.f32.mrb[26].mxu1 }
 0x8c4   :  { %v15622_v60 = vadd.f32 %v4216_v20, %v3330_v57  ;;  %v4500_v18 = vpop.f32.mrb[20].mxu0  ;;  %v4218_v19 = vpop.f32.mrb[27].mxu1  ;;  %v15636_v20 = vpack.c.bf16 %v5192_v56, %v5191_v3  ;;  %v5175_v57 = vld [vmem:[%s16323_s11 + $0x350] sm:$0xff] }
 0x8c5   :  { %v15624_v26 = vadd.f32 %v4500_v18, %v3338_v27  ;;  %12139 = vmatpush3.bf16.msra.mxu1 %v15602_v52  ;;  %v15627_v11 = vadd.f32 %v4218_v19, %v3334_v9  ;;  %v4502_v32 = vpop.f32.mrb[21].mxu0  ;;  %v5176_v9 = vld [vmem:[%s16323_s11 + $0x358] sm:$0xff] }
 0x8c6   :  { %v5280_v63 = vsel %vm858_vm3, %v15622_v60, 0.0  ;;  %v15633_v14 = vadd.f32 %v4502_v32, %v3342_v28  ;;  %12141 = vmatprep.subr.bf16.mxu1 %v15608_v34  ;;  %16487 = vst [vmem:[#allocation68_spill] sm:$0xff] %v15636_v20  ;;  %v5194_v28 = vld [vmem:[%s16323_s11 + $0x3e8] sm:$0xff]  ;;  %v15657_v52 = vpack.c.bf16 %v5176_v9, %v5175_v57  ;;  %v5195_v57 = vld [vmem:[%s16323_s11 + $0x3f0] sm:$0xff]  ;;  %v5196_v9 = vld [vmem:[%s16323_s11 + $0x3f8] sm:$0xff] }
 0x8c7   :  { %16485 = vst [vmem:[#allocation66_spill] sm:$0xff] %v15624_v26  ;;  %v5281_v27 = vrot.slane %v5280_v63, 4  ;;  %v5294_v39 = vsel %vm858_vm3, %v15624_v26, 0.0  ;;  %v5287_v32 = vsel %vm858_vm3, %v15627_v11, 0.0  ;;  %v15660_v4 = vpack.c.bf16 %v5194_v28, %v5193_v16 }
 0x8c8   :  { %v5295_v3 = vrot.slane %v5294_v39, 4  ;;  %v5288_v56 = vrot.slane %v5287_v32, 4  ;;  %v5301_v18 = vsel %vm858_vm3, %v15633_v14, 0.0 }
 0x8c9   :  { %v5282_v19 = vadd.f32 %v5281_v27, %v5280_v63  ;;  %v5302_v34 = vrot.slane %v5301_v18, 4  ;;  %12143 = vmatpush3.bf16.msra.mxu1 %v15629_v5  ;;  %v5180_v5 = vld [vmem:[%s16323_s11 + $0x378] sm:$0xff] }
 0x8ca   :  { %v5296_v23 = vadd.f32 %v5295_v3, %v5294_v39  ;;  %v5289_v41 = vadd.f32 %v5288_v56, %v5287_v32  ;;  %12145 = vmatprep.subr.bf16.mxu1 %v15636_v20  ;;  %v15675_v3 = vpack.c.bf16 %v5178_v53, %v5177_v45 }
 0x8cb   :  { %v5283_v63 = vrot.slane %v5282_v19, 2  ;;  %v5303_v27 = vadd.f32 %v5302_v34, %v5301_v18  ;;  %v15678_v34 = vpack.c.bf16 %v5196_v9, %v5195_v57  ;;  %v5179_v18 = vld [vmem:[%s16323_s11 + $0x370] sm:$0xff]  ;;  %v5229_v57 = vld [vmem:[%s16323_s11 + $0x500] sm:$0xff]  ;;  %v5230_v9 = vld [vmem:[%s16323_s11 + $0x508] sm:$0xff] }
 0x8cc   :  { %v5297_v39 = vrot.slane %v5296_v23, 2  ;;  %v5290_v32 = vrot.slane %v5289_v41, 2  ;;  %16488 = vst [vmem:[#allocation69_spill] sm:$0xff] %v15675_v3  ;;  %v15687_v53 = vpack.c.bf16 %v5180_v5, %v5179_v18  ;;  %v15697_v5 = vpack.c.bf16 %v5230_v9, %v5229_v57  ;;  %v15737_v9 = vld [vmem:[%s16323_s11 + $0x540] sm:$0xff] }
 0x8cd   :  { %v5284_v16 = vadd.f32 %v5283_v63, %v5282_v19  ;;  %v5304_v28 = vrot.slane %v5303_v27, 2  ;;  %12147 = vmatpush3.bf16.msra.mxu1 %v15657_v52  ;;  %16489 = vst [vmem:[#allocation70_spill] sm:$0xff] %v15678_v34  ;;  %16495 = vst [vmem:[#allocation76_spill] sm:$0xff] %v15737_v9 }
 0x8ce   :  { %v5298_v56 = vadd.f32 %v5297_v39, %v5296_v23  ;;  %v5291_v20 = vadd.f32 %v5290_v32, %v5289_v41  ;;  %12149 = vmatprep.subr.bf16.mxu1 %v15660_v4  ;;  %16490 = vst [vmem:[#allocation71_spill] sm:$0xff] %v15687_v53  ;;  %16491 = vst [vmem:[#allocation72_spill] sm:$0xff] %v15697_v5 }
 0x8cf   :  { %v5305_v19 = vadd.f32 %v5304_v28, %v5303_v27  ;;  %v5285_v63 = vrot.slane %v5284_v16, 1  ;;  %v5233_v28 = vld [vmem:[%s16323_s11 + $0x520] sm:$0xff] }
 0x8d0   :  { %v5292_v26 = vrot.slane %v5291_v20, 1  ;;  %v5299_v41 = vrot.slane %v5298_v56, 1 }
 0x8d1   :  { %12151 = vmatpush3.bf16.msra.mxu1 %v15675_v3  ;;  %v5306_v45 = vrot.slane %v5305_v19, 1  ;;  %v5286_v39 = vadd.f32 %v5285_v63, %v5284_v16  ;;  %v5236_v63 = vld [vmem:[%s16323_s11 + $0x538] sm:$0xff] }
 0x8d2   :  { %12153 = vmatprep.subr.bf16.mxu1 %v15678_v34  ;;  %v5293_v23 = vadd.f32 %v5292_v26, %v5291_v20  ;;  %v5300_v32 = vadd.f32 %v5299_v41, %v5298_v56  ;;  %v5231_v26 = vld [vmem:[%s16323_s11 + $0x510] sm:$0xff]  ;;  %v5232_v20 = vld [vmem:[%s16323_s11 + $0x518] sm:$0xff]  ;;  %v5234_v56 = vld [vmem:[%s16323_s11 + $0x528] sm:$0xff] }
 0x8d3   :  { %v5307_v27 = vadd.f32 %v5306_v45, %v5305_v19  ;;  %v15707_v16 = vpack.c.bf16 %v5232_v20, %v5231_v26  ;;  %v15719_v18 = vpack.c.bf16 %v5234_v56, %v5233_v28  ;;  %v5235_v19 = vld [vmem:[%s16323_s11 + $0x530] sm:$0xff]  ;;  %v5198_v20 = vld [vmem:[%s16323_s11 + $0x408] sm:$0xff]  ;;  %v5216_v56 = vld [vmem:[%s16323_s11 + $0x498] sm:$0xff] }
 0x8d4   :  { %5538 = vmatprep.mubr.f32.mxu0 %v5293_v23  ;;  %v15729_v45 = vpack.c.bf16 %v5236_v63, %v5235_v19  ;;  %v5215_v28 = vld [vmem:[%s16323_s11 + $0x490] sm:$0xff] }
 0x8d5   :  { %12155 = vmatpush3.bf16.msra.mxu1 %v15687_v53  ;;  %5608 = vmatprep.mubr.f32.mxu1 %v5307_v27  ;;  %16492 = vst [vmem:[#allocation73_spill] sm:$0xff] %v15707_v16  ;;  %16493 = vst [vmem:[#allocation74_spill] sm:$0xff] %v15719_v18  ;;  %v5213_v27 = vld [vmem:[%s16323_s11 + $0x480] sm:$0xff]  ;;  %v15763_v63 = vpack.c.bf16 %v5216_v56, %v5215_v28  ;;  %v5202_v56 = vld [vmem:[%s16323_s11 + $0x428] sm:$0xff] }
 0x8d6   :  { %5539 = vmatmul.mubr.f32.vlgmr.msra.gmra.mrb[34].mxu0 %v5286_v39  ;;  %12188 = vmatprep.subr.bf16.mxu1 %v16442_v54  ;;  %16494 = vst [vmem:[#allocation75_spill] sm:$0xff] %v15729_v45  ;;  %v5214_v39 = vld [vmem:[%s16323_s11 + $0x488] sm:$0xff]  ;;  %v5201_v28 = vld [vmem:[%s16323_s11 + $0x420] sm:$0xff] }
 0x8d7   :  { %v15750_v26 = vpack.c.bf16 %v5214_v39, %v5213_v27  ;;  %16498 = vst [vmem:[#allocation79_spill] sm:$0xff] %v15763_v63  ;;  %v5217_v27 = vld [vmem:[%s16323_s11 + $0x4a0] sm:$0xff]  ;;  %v5218_v39 = vld [vmem:[%s16323_s11 + $0x4a8] sm:$0xff] }
 0x8d8   :  { %5609 = vmatmul.mubr.f32.vlgmr.msra.gmra.mrb[30].mxu1 %v5300_v32  ;;  %v5197_v32 = vld [vmem:[%s16323_s11 + $0x400] sm:$0xff] }
 0x8d9   :  { %12190 = vmatpush3.bf16.msra.mxu1 %v15697_v5  ;;  %10546 = vmatprep.mubr.msk.f32.mxu1 %vm13655_vm0, %v16431_v55  ;;  %16496 = vst [vmem:[#allocation77_spill] sm:$0xff] %v15750_v26  ;;  %v15761_v19 = vpack.c.bf16 %v5198_v20, %v5197_v32  ;;  %v15782_v20 = vpack.c.bf16 %v5218_v39, %v5217_v27  ;;  %v5203_v39 = vld [vmem:[%s16323_s11 + $0x430] sm:$0xff] }
 0x8da   :  { %12191 = vmatprep.subr.bf16.mxu1 %v16442_v54  ;;  %12157 = vmatprep.subr.bf16.mxu0 %v15750_v26 }
 0x8db   :  { %16497 = vst [vmem:[#allocation78_spill] sm:$0xff] %v15761_v19  ;;  %12159 = vmatpush3.bf16.msra.mxu0 %v15761_v19  ;;  %16500 = vst [vmem:[#allocation81_spill] sm:$0xff] %v15782_v20 }
 0x8dc   :  { %12161 = vmatprep.subr.bf16.mxu0 %v15763_v63 }
 0x8dd   :  { %12193 = vmatpush3.bf16.msra.mxu1 %v15707_v16 }
 0x8de   :  { %12194 = vmatprep.subr.bf16.mxu1 %v16442_v54 }
 0x8e1   :  { %12196 = vmatpush3.bf16.msra.mxu1 %v15719_v18 }
 0x8e2   :  { %12197 = vmatprep.subr.bf16.mxu1 %v16442_v54 }
 0x8e4   :  { %v9818_v41 = vpop.f32.mrb[22].mxu0 }
 0x8e5   :  { %v9819_v23 = vpop.f32.mrb[23].mxu0  ;;  %12199 = vmatpush3.bf16.msra.mxu1 %v15729_v45  ;;  %v5204_v45 = vld [vmem:[%s16323_s11 + $0x438] sm:$0xff] }
 0x8e6   :  { %v9820_v57 = vadd.f32 %v9819_v23, %v9818_v41  ;;  %10544 = vmatprep.subr.mxu1 %v16431_v55  ;;  %v5199_v41 = vld [vmem:[%s16323_s11 + $0x410] sm:$0xff]  ;;  %v5200_v23 = vld [vmem:[%s16323_s11 + $0x418] sm:$0xff]  ;;  %v15809_v18 = vpack.c.bf16 %v5204_v45, %v5203_v39  ;;  %v5222_v45 = vld [vmem:[%s16323_s11 + $0x4c8] sm:$0xff] }
 0x8e7   :  { %v15779_v32 = vpack.c.bf16 %v5200_v23, %v5199_v41  ;;  %v5220_v41 = vld [vmem:[%s16323_s11 + $0x4b8] sm:$0xff]  ;;  %v15797_v23 = vpack.c.bf16 %v5202_v56, %v5201_v28  ;;  %v15813_v28 = vld [vmem:[#allocation15 + $0x8] sm:$0x7] }
 0x8e8   :  { %16503 = vst [vmem:[#allocation84_spill] sm:$0xff] %v15809_v18 }
 0x8e9   :  { %10545 = vmatpush3.msra.mxu1 %v15737_v9  ;;  %16499 = vst [vmem:[#allocation80_spill] sm:$0xff] %v15779_v32  ;;  %v5219_v9 = vld [vmem:[%s16323_s11 + $0x4b0] sm:$0xff]  ;;  %12163 = vmatpush3.bf16.msra.mxu0 %v15779_v32  ;;  %16501 = vst [vmem:[#allocation82_spill] sm:$0xff] %v15797_v23 }
 0x8ea   :  { %10549 = vmatprep.subr.mxu1 %v16431_v55  ;;  %12165 = vmatprep.subr.bf16.mxu0 %v15782_v20  ;;  %v15800_v27 = vpack.c.bf16 %v5220_v41, %v5219_v9  ;;  %v3354_v9 = vrot.slane %v15813_v28, %v16452_v7  ;;  %v5227_v7 = vld [vmem:[%s16323_s11 + $0x4f0] sm:$0xff] }
 0x8ec   :  { %16502 = vst [vmem:[#allocation83_spill] sm:$0xff] %v15800_v27  ;;  %v4856_v16 = vadd.f32 %v9820_v57, %v3354_v9  ;;  %v5206_v57 = vld [vmem:[%s16323_s11 + $0x448] sm:$0xff] }
 0x8ed   :  { %12167 = vmatpush3.bf16.msra.mxu0 %v15797_v23  ;;  %v5221_v23 = vld [vmem:[%s16323_s11 + $0x4c0] sm:$0xff] }
 0x8ee   :  { %12169 = vmatprep.subr.bf16.mxu0 %v15800_v27  ;;  %v15823_v39 = vpack.c.bf16 %v5222_v45, %v5221_v23  ;;  %v5225_v45 = vld [vmem:[%s16323_s11 + $0x4e0] sm:$0xff] }
 0x8f0   :  { %16504 = vst [vmem:[#allocation85_spill] sm:$0xff] %v15823_v39 }
 0x8f1   :  { %12171 = vmatpush3.bf16.msra.mxu0 %v15809_v18  ;;  %v5205_v18 = vld [vmem:[%s16323_s11 + $0x440] sm:$0xff] }
 0x8f2   :  { %v15831_v9 = vpack.c.bf16 %v5206_v57, %v5205_v18  ;;  %12173 = vmatprep.subr.bf16.mxu0 %v15823_v39  ;;  %v5208_v18 = vld [vmem:[%s16323_s11 + $0x458] sm:$0xff]  ;;  %v5226_v57 = vld [vmem:[%s16323_s11 + $0x4e8] sm:$0xff] }
 0x8f4   :  { %16505 = vst [vmem:[#allocation86_spill] sm:$0xff] %v15831_v9 }
 0x8f5   :  { %12175 = vmatpush3.bf16.msra.mxu0 %v15831_v9 }
 0x904   :  { %v9853_v56 = vpop.f32.mrb[24].mxu0 }
 0x905   :  { %v9854_v41 = vpop.f32.mrb[25].mxu0 }
 0x906   :  { %v9855_v20 = vadd.f32 %v9854_v41, %v9853_v56  ;;  %v5207_v56 = vld [vmem:[%s16323_s11 + $0x450] sm:$0xff] }
 0x907   :  { %v15849_v41 = vpack.c.bf16 %v5208_v18, %v5207_v56  ;;  %v5210_v56 = vld [vmem:[%s16323_s11 + $0x468] sm:$0xff] }
 0x908   :  { %v4926_v32 = vadd.f32 %v9855_v20, %v4856_v16  ;;  %v5223_v16 = vld [vmem:[%s16323_s11 + $0x4d0] sm:$0xff]  ;;  %v5224_v20 = vld [vmem:[%s16323_s11 + $0x4d8] sm:$0xff] }
 0x909   :  { %v15841_v23 = vpack.c.bf16 %v5224_v20, %v5223_v16  ;;  %16507 = vst [vmem:[#allocation88_spill] sm:$0xff] %v15849_v41  ;;  %v15859_v16 = vpack.c.bf16 %v5226_v57, %v5225_v45  ;;  %v5209_v20 = vld [vmem:[%s16323_s11 + $0x460] sm:$0xff]  ;;  %v5228_v45 = vld [vmem:[%s16323_s11 + $0x4f8] sm:$0xff]  ;;  %v5211_v57 = vld [vmem:[%s16323_s11 + $0x470] sm:$0xff] }
 0x90a   :  { %v15867_v18 = vpack.c.bf16 %v5210_v56, %v5209_v20  ;;  %v5212_v20 = vld [vmem:[%s16323_s11 + $0x478] sm:$0xff] }
 0x90b   :  { %16506 = vst [vmem:[#allocation87_spill] sm:$0xff] %v15841_v23  ;;  %12177 = vmatprep.subr.bf16.mxu0 %v15841_v23  ;;  %16508 = vst [vmem:[#allocation89_spill] sm:$0xff] %v15859_v16  ;;  %v15885_v56 = vpack.c.bf16 %v5212_v20, %v5211_v57 }
 0x90c   :  { %12179 = vmatpush3.bf16.msra.mxu0 %v15849_v41  ;;  %16509 = vst [vmem:[#allocation90_spill] sm:$0xff] %v15867_v18  ;;  %v15880_v41 = vpack.c.bf16 %v5228_v45, %v5227_v7 }
 0x90d   :  { %12181 = vmatprep.subr.bf16.mxu0 %v15859_v16  ;;  %16511 = vst [vmem:[#allocation92_spill] sm:$0xff] %v15885_v56 }
 0x90e   :  { %16510 = vst [vmem:[#allocation91_spill] sm:$0xff] %v15880_v41 }
 0x910   :  { %12183 = vmatpush3.bf16.msra.mxu0 %v15867_v18 }
 0x911   :  { %12185 = vmatprep.subr.bf16.mxu0 %v15880_v41 }
 0x914   :  { %12187 = vmatpush3.bf16.msra.mxu0 %v15885_v56 }
 0x924   :  { %v9888_v16 = vpop.f32.mrb[26].mxu0 }
 0x925   :  { %v9889_v23 = vpop.f32.mrb[27].mxu0 }
 0x926   :  { %v9890_v9 = vadd.f32 %v9889_v23, %v9888_v16 }
 0x928   :  { %v4996_v39 = vadd.f32 %v9890_v9, %v4926_v32  ;;  %v5065_v27 = vpop.f32.mrb[28].mxu0 }
 0x929   :  { %v10527_v5 = vpop.f32.mrb[29].mxu0 }
 0x92a   :  { %v15889_v18 = vadd.f32 %v5065_v27, %v4996_v39 }
 0x92c   :  { %v5323_v7 = vsel %vm5322_vm6, %v15889_v18, 0.0 }
 0x92d   :  { %v5324_v45 = vrot.slane %v5323_v7, 4 }
 0x92f   :  { %v5325_v54 = vadd.f32 %v5324_v45, %v5323_v7  ;;  %v3346_v7 = vrot.slane %v15813_v28, %v14581_v47 }
 0x931   :  { %v5326_v57 = vrot.slane %v5325_v54, 2 }
 0x933   :  { %v5327_v20 = vadd.f32 %v5326_v57, %v5325_v54  ;;  %v3350_v54 = vrot.slane %v15813_v28, %v16451_v30 }
 0x935   :  { %v5328_v63 = vrot.slane %v5327_v20, 1 }
 0x937   :  { %v5329_v41 = vadd.f32 %v5328_v63, %v5327_v20 }
 0x939   :  { %10547 = vmatmul.mubr.msk.f32.vlgmr.msra.gmra.mrb[32].mxu1 %vm5330_vm7, %v5329_v41 }
 0x93a   :  { %10551 = vmatprep.mubr.msk.f32.mxu1 %vm13655_vm0, %v16431_v55 }
 0x948   :  { %v9926_v32 = vpop.f32.mrb[30].mxu0 }
 0x949   :  { %v9927_v9 = vpop.f32.mrb[31].mxu0 }
 0x94a   :  { %v9928_v5 = vadd.f32 %v9927_v9, %v9926_v32 }
 0x968   :  { %v9961_v27 = vpop.f32.mrb[32].mxu0 }
 0x969   :  { %v9962_v39 = vpop.f32.mrb[33].mxu0 }
 0x96a   :  { %v9963_v23 = vadd.f32 %v9962_v39, %v9961_v27 }
 0x96c   :  { %v5471_v16 = vadd.f32 %v9963_v23, %v9928_v5 }
 0x98b   :  { %v4784_v45 = vpop.f32.mrb[28].mxu1 }
 0x98c   :  { %v15900_v63 = vadd.f32 %v4784_v45, %v3346_v7  ;;  %v4786_v41 = vpop.f32.mrb[29].mxu1 }
 0x98d   :  { %v15902_v57 = vadd.f32 %v4786_v41, %v3350_v54 }
 0x98e   :  { %16512 = vst [vmem:[#allocation93_spill] sm:$0xff] %v15900_v63  ;;  %v5308_v20 = vsel %vm858_vm3, %v15900_v63, 0.0 }
 0x98f   :  { %v5309_v32 = vrot.slane %v5308_v20, 4  ;;  %v5315_v9 = vsel %vm858_vm3, %v15902_v57, 0.0 }
 0x990   :  { %v5316_v5 = vrot.slane %v5315_v9, 4 }
 0x991   :  { %v5310_v27 = vadd.f32 %v5309_v32, %v5308_v20 }
 0x992   :  { %v5317_v39 = vadd.f32 %v5316_v5, %v5315_v9  ;;  %v15909_v9 = vld [vmem:[#allocation16 + $0x8] sm:$0xff]  ;;  %v15911_v5 = vld [vmem:[#allocation16] sm:$0xff] }
 0x993   :  { %v5311_v23 = vrot.slane %v5310_v27, 2  ;;  %5759 = vmatprep.subr.mxu0 %v15909_v9 }
 0x994   :  { %v5318_v56 = vrot.slane %v5317_v39, 2 }
 0x995   :  { %v5312_v19 = vadd.f32 %v5311_v23, %v5310_v27  ;;  %v15924_v23 = vld [vmem:[#allocation16 + $0x28] sm:$0xff] }
 0x996   :  { %v5319_v28 = vadd.f32 %v5318_v56, %v5317_v39  ;;  %v15913_v56 = vld [vmem:[#allocation16 + $0x50] sm:$0xff] }
 0x997   :  { %v5313_v30 = vrot.slane %v5312_v19, 1  ;;  %10550 = vmatpush3.msra.mxu1 %v15913_v56  ;;  %v15922_v39 = vld [vmem:[#allocation16 + $0x10] sm:$0xff] }
 0x998   :  { %v5320_v7 = vrot.slane %v5319_v28, 1  ;;  %12233 = vmatprep.subr.bf16.mxu1 %v15229_v24  ;;  %v15931_v24 = vld [vmem:[#allocation16 + $0x20] sm:$0xff] }
 0x999   :  { %v5314_v53 = vadd.f32 %v5313_v30, %v5312_v19  ;;  %v15918_v30 = vld [vmem:[#allocation16 + $0x18] sm:$0xff] }
 0x99a   :  { %v5321_v45 = vadd.f32 %v5320_v7, %v5319_v28  ;;  %v15934_v28 = vld [vmem:[#allocation16 + $0x38] sm:$0xff]  ;;  %v15941_v7 = vld [vmem:[#allocation16 + $0x30] sm:$0xff] }
 0x99c   :  { %5678 = vmatprep.mubr.f32.mxu0 %v5321_v45  ;;  %v15944_v45 = vld [vmem:[#allocation16 + $0x48] sm:$0xff] }
 0x99d   :  { %5679 = vmatmul.mubr.f32.vlgmr.msra.gmra.mrb[36].mxu0 %v5314_v53 }
 0x99e   :  { %5823 = vmatprep.mubr.f32.mxu0 %v16431_v55  ;;  %5760 = vmatpush1.msra.mxu0 %v15911_v5 }
 0x99f   :  { %5830 = vmatprep.subr.mxu0 %v15918_v30 }
 0x9a9   :  { %v9996_v54 = vpop.f32.mrb[34].mxu0 }
 0x9aa   :  { %v9997_v41 = vpop.f32.mrb[35].mxu0 }
 0x9ab   :  { %v9998_v63 = vadd.f32 %v9997_v41, %v9996_v54  ;;  %v10031_v26 = vpop.f32.mrb[30].mxu1 }
 0x9ac   :  { %v10032_v34 = vpop.f32.mrb[31].mxu1 }
 0x9ad   :  { %v5541_v3 = vadd.f32 %v9998_v63, %v5471_v16  ;;  %v10033_v20 = vadd.f32 %v10032_v34, %v10031_v26 }
 0x9af   :  { %v5611_v32 = vadd.f32 %v10033_v20, %v5541_v3 }
 0xa0c   :  { %v5750_v34 = vpop.f32.mrb[32].mxu1 }
 0xa0d   :  { %v10548_v3 = vpop.f32.mrb[33].mxu1 }
 0xa70   :  { %v10066_v53 = vpop.f32.mrb[36].mxu0 }
 0xa71   :  { %v10067_v26 = vpop.f32.mrb[37].mxu0 }
 0xa72   :  { %v10068_v19 = vadd.f32 %v10067_v26, %v10066_v53 }
 0xa74   :  { %v5681_v16 = vadd.f32 %v10068_v19, %v5611_v32 }
 0xa76   :  { %v5751_v63 = vadd.f32 %v5750_v34, %v5681_v16 }
 0xa78   :  { %v5754_v27 = vmul.f32 0.00295858, %v5751_v63 }
 0xa7a   :  { %9529 = vmatmul.mubr.msk.f32.vlgmr.msra.gmra.mrb[38].mxu0 %vm5755_vm8, %v5754_v27  ;;  %10552 = vmatmul.mubr.msk.f32.vlgmr.msra.gmra.mrb[34].mxu1 %vm5755_vm8, %v5754_v27 }
 0xa7b   :  { %5831 = vmatpush1.msra.mxu0 %v15922_v39  ;;  %5894 = vmatprep.mubr.f32.mxu0 %v16431_v55 }
 0xa7c   :  { %5901 = vmatprep.subr.mxu0 %v15924_v23  ;;  %12235 = vmatpush3.bf16.msra.mxu1 %v15246_v62  ;;  %v15951_v62 = vld [vmem:[#allocation16 + $0x40] sm:$0xff] }
 0xa7d   :  { %12237 = vmatprep.subr.bf16.mxu1 %v15252_v21  ;;  %v16515_v21 = vld [vmem:[#allocation39_spill] sm:$0xff] }
 0xa7e   :  { %9530 = vmatmul.mubr.msk.f32.vlgmr.msra.gmra.mrb[40].mxu0 %vm5755_vm8, %v5754_v27 }
 0xa7f   :  { %5902 = vmatpush1.msra.mxu0 %v15931_v24  ;;  %5965 = vmatprep.mubr.f32.mxu0 %v16431_v55 }
 0xa80   :  { %5972 = vmatprep.subr.mxu0 %v15934_v28  ;;  %12239 = vmatpush3.bf16.msra.mxu1 %v15266_v10 }
 0xa81   :  { %12241 = vmatprep.subr.bf16.mxu1 %v15272_v15 }
 0xa82   :  { %9531 = vmatmul.mubr.msk.f32.vlgmr.msra.gmra.mrb[42].mxu0 %vm5755_vm8, %v5754_v27 }
 0xa83   :  { %5973 = vmatpush1.msra.mxu0 %v15941_v7  ;;  %6036 = vmatprep.mubr.f32.mxu0 %v16431_v55 }
 0xa84   :  { %6043 = vmatprep.subr.mxu0 %v15944_v45  ;;  %12243 = vmatpush3.bf16.msra.mxu1 %v15287_v13  ;;  %v16516_v13 = vld [vmem:[#allocation38_spill] sm:$0xff] }
 0xa85   :  { %12245 = vmatprep.subr.bf16.mxu1 %v15293_v43 }
 0xa86   :  { %9532 = vmatmul.mubr.msk.f32.vlgmr.msra.gmra.mrb[44].mxu0 %vm5755_vm8, %v5754_v27 }
 0xa87   :  { %6044 = vmatpush1.msra.mxu0 %v15951_v62  ;;  %6107 = vmatprep.mubr.f32.mxu0 %v16431_v55 }
 0xa88   :  { %12201 = vmatprep.subr.bf16.mxu0 %v15067_v36  ;;  %12247 = vmatpush3.bf16.msra.mxu1 %v15307_v44 }
 0xa89   :  { %12249 = vmatprep.subr.bf16.mxu1 %v15313_v38 }
 0xa8a   :  { %9533 = vmatmul.mubr.msk.f32.vlgmr.msra.gmra.mrb[46].mxu0 %vm5755_vm8, %v5754_v27 }
 0xa8b   :  { %12203 = vmatpush3.bf16.msra.mxu0 %v15084_v42 }
 0xa8c   :  { %12205 = vmatprep.subr.bf16.mxu0 %v15090_v31  ;;  %12251 = vmatpush3.bf16.msra.mxu1 %v15325_v12 }
 0xa8d   :  { %12253 = vmatprep.subr.bf16.mxu1 %v15331_v2 }
 0xa8f   :  { %12207 = vmatpush3.bf16.msra.mxu0 %v15108_v1 }
 0xa90   :  { %12209 = vmatprep.subr.bf16.mxu0 %v15114_v25  ;;  %12255 = vmatpush3.bf16.msra.mxu1 %v15343_v22 }
 0xa91   :  { %12257 = vmatprep.subr.bf16.mxu1 %v15349_v37 }
 0xa93   :  { %12211 = vmatpush3.bf16.msra.mxu0 %v15132_v33 }
 0xa94   :  { %12213 = vmatprep.subr.bf16.mxu0 %v15138_v50  ;;  %12259 = vmatpush3.bf16.msra.mxu1 %v15361_v59  ;;  %v16513_v50 = vld [vmem:[#allocation37_spill] sm:$0xff] }
 0xa95   :  { %12261 = vmatprep.subr.bf16.mxu1 %v15367_v40 }
 0xa97   :  { %12215 = vmatpush3.bf16.msra.mxu0 %v15154_v29 }
 0xa98   :  { %12217 = vmatprep.subr.bf16.mxu0 %v15160_v35  ;;  %12263 = vmatpush3.bf16.msra.mxu1 %v15379_v17  ;;  %v16514_v35 = vld [vmem:[#allocation36_spill] sm:$0xff] }
 0xa99   :  { %12297 = vmatprep.subr.bf16.mxu1 %v15522_v8 }
 0xa9b   :  { %12219 = vmatpush3.bf16.msra.mxu0 %v15172_v6 }
 0xa9c   :  { %12221 = vmatprep.subr.bf16.mxu0 %v15178_v51 }
 0xa9f   :  { %12223 = vmatpush3.bf16.msra.mxu0 %v15190_v46 }
 0xaa0   :  { %12225 = vmatprep.subr.bf16.mxu0 %v15196_v48 }
 0xaa3   :  { %12227 = vmatpush3.bf16.msra.mxu0 %v15208_v61 }
 0xaa4   :  { %12229 = vmatprep.subr.bf16.mxu0 %v15214_v49 }
 0xaa7   :  { %12231 = vmatpush3.bf16.msra.mxu0 %v15226_v0 }
 0xaa8   :  { %12265 = vmatprep.subr.bf16.mxu0 %v15382_v58 }
 0xb4d   :  { %v5825_v36 = vpop.f32.mrb[38].mxu0  ;;  %v15986_v42 = vpop.f32.mrb[34].mxu1 }
 0xb4e   :  { %v6187_v31 = vrot.slane %v5825_v36, %v14581_v47  ;;  %v5827_v1 = vpop.f32.mrb[39].mxu0  ;;  %v10553_v25 = vpop.f32.mrb[35].mxu1 }
 0xb4f   :  { %v6191_v33 = vrot.slane %v5827_v1, %v14581_v47 }
 0xb50   :  { %v15991_v29 = vsub.f32 %v16513_v50, %v6187_v31 }
 0xb51   :  { %v15994_v6 = vsub.f32 %v16514_v35, %v6191_v33  ;;  %v5896_v51 = vpop.f32.mrb[40].mxu0 }
 0xb52   :  { %v6239_v46 = vmul.f32 %v15991_v29, %v15991_v29  ;;  %v6195_v58 = vrot.slane %v5896_v51, %v14581_v47  ;;  %v5898_v48 = vpop.f32.mrb[41].mxu0 }
 0xb53   :  { %v6240_v61 = vmul.f32 %v15994_v6, %v15994_v6  ;;  %v6199_v49 = vrot.slane %v5898_v48, %v14581_v47 }
 0xb54   :  { %v6250_v0 = vsel %vm858_vm3, %v6239_v46, 0.0  ;;  %v16004_v10 = vsub.f32 %v16515_v21, %v6195_v58 }
 0xb55   :  { %v6257_v15 = vsel %vm858_vm3, %v6240_v61, 0.0  ;;  %v16008_v43 = vsub.f32 %v16516_v13, %v6199_v49  ;;  %v5967_v44 = vpop.f32.mrb[42].mxu0  ;;  %v6251_v38 = vrot.slane %v6250_v0, 4 }
 0xb56   :  { %v6258_v12 = vrot.slane %v6257_v15, 4  ;;  %v6241_v2 = vmul.f32 %v16004_v10, %v16004_v10  ;;  %v5969_v22 = vpop.f32.mrb[43].mxu0  ;;  %v6203_v21 = vrot.slane %v5967_v44, %v14581_v47 }
 0xb57   :  { %v6242_v37 = vmul.f32 %v16008_v43, %v16008_v43  ;;  %v6207_v59 = vrot.slane %v5969_v22, %v14581_v47  ;;  %v6252_v20 = vadd.f32 %v6251_v38, %v6250_v0 }
 0xb58   :  { %v6259_v40 = vadd.f32 %v6258_v12, %v6257_v15  ;;  %v6264_v17 = vsel %vm858_vm3, %v6241_v2, 0.0 }
 0xb59   :  { %v6265_v8 = vrot.slane %v6264_v17, 4  ;;  %v6271_v54 = vsel %vm858_vm3, %v6242_v37, 0.0  ;;  %v6038_v41 = vpop.f32.mrb[44].mxu0  ;;  %v16018_v32 = vsub.f32 %v15627_v11, %v6207_v59  ;;  %v6253_v36 = vrot.slane %v6252_v20, 2 }
 0xb5a   :  { %v6040_v34 = vpop.f32.mrb[45].mxu0  ;;  %v6272_v53 = vrot.slane %v6271_v54, 4  ;;  %v6260_v19 = vrot.slane %v6259_v40, 2 }
 0xb5b   :  { %v6266_v3 = vadd.f32 %v6265_v8, %v6264_v17  ;;  %v6215_v26 = vrot.slane %v6040_v34, %v14581_v47  ;;  %v6244_v16 = vmul.f32 %v16018_v32, %v16018_v32  ;;  %v6254_v61 = vadd.f32 %v6253_v36, %v6252_v20  ;;  %v16518_v36 = vld [vmem:[#allocation66_spill] sm:$0xff] }
 0xb5c   :  { %v6261_v11 = vadd.f32 %v6260_v19, %v6259_v40  ;;  %v6273_v33 = vadd.f32 %v6272_v53, %v6271_v54  ;;  %v6211_v40 = vrot.slane %v6038_v41, %v14581_v47  ;;  %v16036_v54 = vsub.f32 %v15622_v60, %v6203_v21  ;;  %v16517_v53 = vld [vmem:[#allocation43_spill] sm:$0xff]  ;;  %v16519_v41 = vld [vmem:[#allocation44_spill] sm:$0xff] }
 0xb5d   :  { %v16024_v63 = vsub.f32 %v15633_v14, %v6215_v26  ;;  %v16026_v27 = vpop.f32.mrb[46].mxu0  ;;  %v6285_v31 = vsel %vm858_vm3, %v6244_v16, 0.0  ;;  %v6267_v25 = vrot.slane %v6266_v3, 2  ;;  %v6255_v12 = vrot.slane %v6254_v61, 1 }
 0xb5e   :  { %v6111_v1 = vpop.f32.mrb[47].mxu0  ;;  %v6286_v50 = vrot.slane %v6285_v31, 4  ;;  %v6262_v51 = vrot.slane %v6261_v11, 1  ;;  %v6274_v49 = vrot.slane %v6273_v33, 2  ;;  %v6243_v60 = vmul.f32 %v16036_v54, %v16036_v54 }
 0xb5f   :  { %v6246_v35 = vmul.f32 %v16024_v63, %v16024_v63  ;;  %v6268_v0 = vadd.f32 %v6267_v25, %v6266_v3  ;;  %v6223_v38 = vrot.slane %v6111_v1, %v14581_v47  ;;  %v6256_v17 = vadd.f32 %v6255_v12, %v6254_v61  ;;  %v16521_v25 = vld [vmem:[#allocation45_spill] sm:$0xff]  ;;  %v16530_v12 = vld [vmem:[#allocation63_spill] sm:$0xff] }
 0xb60   :  { %v6287_v46 = vadd.f32 %v6286_v50, %v6285_v31  ;;  %v6263_v14 = vadd.f32 %v6262_v51, %v6261_v11  ;;  %v6275_v2 = vadd.f32 %v6274_v49, %v6273_v33  ;;  %v16043_v31 = vsub.f32 %v16518_v36, %v6211_v40  ;;  %v16520_v11 = vld [vmem:[#allocation58_spill] sm:$0xff]  ;;  %v16522_v33 = vld [vmem:[#allocation59_spill] sm:$0xff]  ;;  %v16532_v40 = vld [vmem:[#allocation64_spill] sm:$0xff] }
 0xb61   :  { %v6299_v58 = vsel %vm858_vm3, %v6246_v35, 0.0  ;;  %v6269_v22 = vrot.slane %v6268_v0, 1  ;;  %v16039_v44 = vsub.f32 %v15902_v57, %v6223_v38  ;;  %v16523_v35 = vld [vmem:[#allocation46_spill] sm:$0xff]  ;;  %v6278_v51 = vsel %vm858_vm3, %v6243_v60, 0.0  ;;  %v16529_v38 = vld [vmem:[#allocation49_spill] sm:$0xff] }
 0xb62   :  { %v6300_v48 = vrot.slane %v6299_v58, 4  ;;  %6394 = vmatprep.mubr.f32.mxu0 %v6263_v14  ;;  %v6288_v13 = vrot.slane %v6287_v46, 2  ;;  %v6276_v8 = vrot.slane %v6275_v2, 1  ;;  %v6245_v50 = vmul.f32 %v16043_v31, %v16043_v31  ;;  %v16526_v14 = vld [vmem:[#allocation61_spill] sm:$0xff] }
 0xb63   :  { %6395 = vmatmul.mubr.f32.vlgmr.msra.gmra.mrb[48].mxu0 %v6256_v17  ;;  %v6270_v26 = vadd.f32 %v6269_v22, %v6268_v0  ;;  %v6248_v1 = vmul.f32 %v16039_v44, %v16039_v44  ;;  %v6279_v61 = vrot.slane %v6278_v51, 4  ;;  %v16527_v0 = vld [vmem:[#allocation48_spill] sm:$0xff]  ;;  %v16531_v22 = vld [vmem:[#allocation50_spill] sm:$0xff]  ;;  %v16537_v36 = vld [vmem:[#allocation53_spill] sm:$0xff] }
 0xb64   :  { %v6301_v15 = vadd.f32 %v6300_v48, %v6299_v58  ;;  %v6289_v37 = vadd.f32 %v6288_v13, %v6287_v46  ;;  %v6277_v3 = vadd.f32 %v6276_v8, %v6275_v2  ;;  %12267 = vmatpush3.bf16.msra.mxu0 %v16517_v53  ;;  %v16524_v58 = vld [vmem:[#allocation60_spill] sm:$0xff]  ;;  %v16525_v48 = vld [vmem:[#allocation47_spill] sm:$0xff]  ;;  %v6292_v49 = vsel %vm858_vm3, %v6245_v50, 0.0 }
 0xb65   :  { %12269 = vmatprep.subr.bf16.mxu0 %v16519_v41  ;;  %v6313_v46 = vsel %vm858_vm3, %v6248_v1, 0.0  ;;  %v6293_v13 = vrot.slane %v6292_v49, 4  ;;  %v6280_v2 = vadd.f32 %v6279_v61, %v6278_v51  ;;  %v16533_v8 = vld [vmem:[#allocation51_spill] sm:$0xff]  ;;  %v16539_v41 = vld [vmem:[#allocation54_spill] sm:$0xff]  ;;  %v6219_v50 = vrot.slane %v16026_v27, %v14581_v47  ;;  %v16545_v61 = vld [vmem:[#allocation77_spill] sm:$0xff] }
 0xb66   :  { %v6302_v59 = vrot.slane %v6301_v15, 2  ;;  %v6290_v20 = vrot.slane %v6289_v37, 1  ;;  %6464 = vmatprep.mubr.f32.mxu1 %v6277_v3  ;;  %v6314_v21 = vrot.slane %v6313_v46, 4  ;;  %v16535_v3 = vld [vmem:[#allocation52_spill] sm:$0xff]  ;;  %v16547_v27 = vld [vmem:[#allocation71_spill] sm:$0xff] }
 0xb67   :  { %6465 = vmatmul.mubr.f32.vlgmr.msra.gmra.mrb[36].mxu1 %v6270_v26  ;;  %v6294_v17 = vadd.f32 %v6293_v13, %v6292_v49  ;;  %v16546_v49 = vld [vmem:[#allocation93_spill] sm:$0xff] }
 0xb68   :  { %v6303_v34 = vadd.f32 %v6302_v59, %v6301_v15  ;;  %v6291_v19 = vadd.f32 %v6290_v20, %v6289_v37  ;;  %12299 = vmatpush3.bf16.msra.mxu1 %v16520_v11  ;;  %12271 = vmatpush3.bf16.msra.mxu0 %v16521_v25  ;;  %v16528_v15 = vld [vmem:[#allocation62_spill] sm:$0xff]  ;;  %v6315_v37 = vadd.f32 %v6314_v21, %v6313_v46  ;;  %v16534_v20 = vld [vmem:[#allocation65_spill] sm:$0xff]  ;;  %v16540_v11 = vld [vmem:[#allocation55_spill] sm:$0xff] }
 0xb69   :  { %12301 = vmatprep.subr.bf16.mxu1 %v16522_v33  ;;  %12273 = vmatprep.subr.bf16.mxu0 %v16523_v35  ;;  %v6227_v59 = vrot.slane %v15986_v42, %v14581_v47  ;;  %v16538_v42 = vld [vmem:[#allocation68_spill] sm:$0xff]  ;;  %v16542_v46 = vld [vmem:[#allocation69_spill] sm:$0xff] }
 0xb6a   :  { %v6304_v16 = vrot.slane %v6303_v34, 1  ;;  %6534 = vmatprep.mubr.f32.mxu0 %v6291_v19  ;;  %v6316_v53 = vrot.slane %v6315_v37, 2  ;;  %v16536_v19 = vld [vmem:[#allocation67_spill] sm:$0xff]  ;;  %v16541_v25 = vld [vmem:[#allocation56_spill] sm:$0xff] }
 0xb6b   :  { %v16074_v26 = vsub.f32 %v15889_v18, %v6227_v59  ;;  %v16552_v59 = vld [vmem:[#allocation80_spill] sm:$0xff] }
 0xb6c   :  { %v6305_v57 = vadd.f32 %v6304_v16, %v6303_v34  ;;  %12303 = vmatpush3.bf16.msra.mxu1 %v16524_v58  ;;  %12275 = vmatpush3.bf16.msra.mxu0 %v16525_v48  ;;  %v6281_v34 = vrot.slane %v6280_v2, 2  ;;  %v6295_v16 = vrot.slane %v6294_v17, 2  ;;  %v16543_v58 = vld [vmem:[#allocation57_spill] sm:$0xff]  ;;  %v16544_v48 = vld [vmem:[#allocation70_spill] sm:$0xff] }
 0xb6d   :  { %12305 = vmatprep.subr.bf16.mxu1 %v16526_v14  ;;  %12277 = vmatprep.subr.bf16.mxu0 %v16527_v0  ;;  %v6249_v1 = vmul.f32 %v16074_v26, %v16074_v26  ;;  %v16094_v0 = vsub.f32 %v16546_v49, %v6219_v50  ;;  %v16564_v50 = vld [vmem:[#allocation88_spill] sm:$0xff] }
 0xb6e   :  { %6604 = vmatprep.mubr.f32.mxu1 %v6305_v57  ;;  %v6282_v60 = vadd.f32 %v6281_v34, %v6280_v2  ;;  %v6317_v57 = vadd.f32 %v6316_v53, %v6315_v37  ;;  %v6296_v18 = vadd.f32 %v6295_v16, %v6294_v17  ;;  %v16551_v37 = vld [vmem:[#allocation72_spill] sm:$0xff]  ;;  %v16555_v34 = vld [vmem:[#allocation82_spill] sm:$0xff]  ;;  %v16556_v53 = vld [vmem:[#allocation83_spill] sm:$0xff] }
 0xb6f   :  { %v6320_v51 = vsel %vm5322_vm6, %v6249_v1, 0.0  ;;  %v16557_v16 = vld [vmem:[#allocation74_spill] sm:$0xff] }
 0xb70   :  { %12307 = vmatpush3.bf16.msra.mxu1 %v16528_v15  ;;  %12279 = vmatpush3.bf16.msra.mxu0 %v16529_v38  ;;  %v6283_v33 = vrot.slane %v6282_v60, 1  ;;  %v6318_v35 = vrot.slane %v6317_v57, 1  ;;  %v16548_v15 = vld [vmem:[#allocation78_spill] sm:$0xff]  ;;  %v16549_v38 = vld [vmem:[#allocation79_spill] sm:$0xff] }
 0xb71   :  { %12309 = vmatprep.subr.bf16.mxu1 %v16530_v12  ;;  %12281 = vmatprep.subr.bf16.mxu0 %v16531_v22  ;;  %v16550_v12 = vmov 0.0|0.0   ;;  %v6247_v22 = vmul.f32 %v16094_v0, %v16094_v0  ;;  %v16561_v1 = vld [vmem:[#allocation86_spill] sm:$0xff] }
 0xb72   :  { %v6284_v14 = vadd.f32 %v6283_v33, %v6282_v60  ;;  %v6319_v21 = vadd.f32 %v6318_v35, %v6317_v57  ;;  %v16560_v57 = vld [vmem:[#allocation75_spill] sm:$0xff]  ;;  %v16563_v33 = vld [vmem:[#allocation76_spill] sm:$0xff]  ;;  %v16565_v35 = vld [vmem:[#allocation89_spill] sm:$0xff] }
 0xb74   :  { %12311 = vmatpush3.bf16.msra.mxu1 %v16532_v40  ;;  %12283 = vmatpush3.bf16.msra.mxu0 %v16533_v8  ;;  %v16553_v40 = vld [vmem:[#allocation81_spill] sm:$0xff]  ;;  %v6306_v8 = vsel %vm858_vm3, %v6247_v22, 0.0 }
 0xb75   :  { %12313 = vmatprep.subr.bf16.mxu1 %v16534_v20  ;;  %12285 = vmatprep.subr.bf16.mxu0 %v16535_v3  ;;  %v16554_v20 = vld [vmem:[#allocation73_spill] sm:$0xff]  ;;  %v6307_v3 = vrot.slane %v6306_v8, 4 }
 0xb78   :  { %12315 = vmatpush3.bf16.msra.mxu1 %v16536_v19  ;;  %12287 = vmatpush3.bf16.msra.mxu0 %v16537_v36  ;;  %v16558_v36 = vld [vmem:[#allocation84_spill] sm:$0xff] }
 0xb79   :  { %12317 = vmatprep.subr.bf16.mxu1 %v16538_v42  ;;  %12289 = vmatprep.subr.bf16.mxu0 %v16539_v41  ;;  %v6308_v42 = vadd.f32 %v6307_v3, %v6306_v8  ;;  %v16559_v41 = vld [vmem:[#allocation85_spill] sm:$0xff] }
 0xb7c   :  { %12319 = vmatpush3.bf16.msra.mxu1 %v15657_v52  ;;  %12291 = vmatpush3.bf16.msra.mxu0 %v16540_v11  ;;  %v6297_v52 = vrot.slane %v6296_v18, 1  ;;  %v6309_v11 = vrot.slane %v6308_v42, 2 }
 0xb7d   :  { %12321 = vmatprep.subr.bf16.mxu1 %v15660_v4  ;;  %12293 = vmatprep.subr.bf16.mxu0 %v16541_v25  ;;  %v6321_v4 = vrot.slane %v6320_v51, 4 }
 0xb7e   :  { %v6298_v13 = vadd.f32 %v6297_v52, %v6296_v18  ;;  %v16562_v18 = vld [vmem:[#allocation87_spill] sm:$0xff]  ;;  %v16568_v52 = vld [vmem:[#allocation92_spill] sm:$0xff] }
 0xb7f   :  { %v6322_v2 = vadd.f32 %v6321_v4, %v6320_v51  ;;  %v6310_v51 = vadd.f32 %v6309_v11, %v6308_v42  ;;  %v5249_v42 = vld [vmem:[#allocation18] sm:$0x1] }
 0xb80   :  { %12323 = vmatpush3.bf16.msra.mxu1 %v16542_v46  ;;  %12295 = vmatpush3.bf16.msra.mxu0 %v16543_v58  ;;  %v16566_v46 = vld [vmem:[#allocation90_spill] sm:$0xff]  ;;  %v16567_v58 = vld [vmem:[#allocation91_spill] sm:$0xff] }
 0xb81   :  { %12325 = vmatprep.subr.bf16.mxu1 %v16544_v48  ;;  %12329 = vmatprep.subr.bf16.mxu0 %v16545_v61  ;;  %v6323_v17 = vrot.slane %v6322_v2, 2  ;;  %v6311_v48 = vrot.slane %v6310_v51, 1 }
 0xb83   :  { %6535 = vmatmul.mubr.f32.vlgmr.msra.gmra.mrb[50].mxu0 %v6284_v14  ;;  %v6324_v19 = vadd.f32 %v6323_v17, %v6322_v2  ;;  %v6312_v14 = vadd.f32 %v6311_v48, %v6310_v51  ;;  %v7337_v51 = vld [vmem:[#allocation21 + $0xa8] sm:$0xff] }
 0xb84   :  { %12327 = vmatpush3.bf16.msra.mxu1 %v16547_v27  ;;  %12331 = vmatpush3.bf16.msra.mxu0 %v16548_v15 }
 0xb85   :  { %6674 = vmatprep.mubr.f32.mxu0 %v6319_v21  ;;  %12333 = vmatprep.subr.bf16.mxu0 %v16549_v38  ;;  %v6325_v60 = vrot.slane %v6324_v19, 1 }
 0xb86   :  { %12360 = vmatprep.subr.bf16.mxu1 %v16550_v12 }
 0xb87   :  { %6605 = vmatmul.mubr.f32.vlgmr.msra.gmra.mrb[38].mxu1 %v6298_v13  ;;  %v6326_v25 = vadd.f32 %v6325_v60, %v6324_v19  ;;  %v7321_v60 = vld [vmem:[#allocation21 + $0x28] sm:$0xff] }
 0xb88   :  { %12362 = vmatpush3.bf16.msra.mxu1 %v16551_v37  ;;  %10572 = vmatprep.mubr.msk.f32.mxu1 %vm13655_vm0, %v16431_v55 }
 0xb89   :  { %12335 = vmatpush3.bf16.msra.mxu0 %v16552_v59  ;;  %12363 = vmatprep.subr.bf16.mxu1 %v16550_v12 }
 0xb8a   :  { %12337 = vmatprep.subr.bf16.mxu0 %v16553_v40 }
 0xb8c   :  { %12365 = vmatpush3.bf16.msra.mxu1 %v16554_v20 }
 0xb8d   :  { %12339 = vmatpush3.bf16.msra.mxu0 %v16555_v34  ;;  %12366 = vmatprep.subr.bf16.mxu1 %v16550_v12 }
 0xb8e   :  { %12341 = vmatprep.subr.bf16.mxu0 %v16556_v53 }
 0xb90   :  { %12368 = vmatpush3.bf16.msra.mxu1 %v16557_v16 }
 0xb91   :  { %12343 = vmatpush3.bf16.msra.mxu0 %v16558_v36  ;;  %12369 = vmatprep.subr.bf16.mxu1 %v16550_v12 }
 0xb92   :  { %12345 = vmatprep.subr.bf16.mxu0 %v16559_v41  ;;  %v7316_v41 = vld [vmem:[#allocation21] sm:$0xff] }
 0xb94   :  { %12371 = vmatpush3.bf16.msra.mxu1 %v16560_v57  ;;  %v7327_v57 = vld [vmem:[#allocation21 + $0x58] sm:$0xff] }
 0xb95   :  { %12347 = vmatpush3.bf16.msra.mxu0 %v16561_v1  ;;  %10570 = vmatprep.subr.mxu1 %v16431_v55  ;;  %v7332_v1 = vld [vmem:[#allocation21 + $0x80] sm:$0xff] }
 0xb96   :  { %12349 = vmatprep.subr.bf16.mxu0 %v16562_v18 }
 0xb98   :  { %10571 = vmatpush3.msra.mxu1 %v16563_v33  ;;  %v12376_v33 = vpack.c.bf16 %v7332_v1, %v7327_v57  ;;  %v7343_v57 = vld [vmem:[#allocation21 + $0xd8] sm:$0xff]  ;;  %v7349_v1 = vld [vmem:[#allocation21 + $0x108] sm:$0xff] }
 0xb99   :  { %12351 = vmatpush3.bf16.msra.mxu0 %v16564_v50  ;;  %10573 = vmatmul.mubr.msk.f32.vlgmr.msra.gmra.mrb[40].mxu1 %vm5330_vm7, %v6326_v25  ;;  %v12374_v25 = vpack.c.bf16 %v7321_v60, %v7316_v41  ;;  %v7326_v50 = vld [vmem:[#allocation21 + $0x50] sm:$0xff] }
 0xb9a   :  { %12353 = vmatprep.subr.bf16.mxu0 %v16565_v35  ;;  %6757 = vmatprep.subr.mxu1 %v15909_v9  ;;  %v7317_v9 = vld [vmem:[#allocation21 + $0x8] sm:$0xff]  ;;  %v7331_v35 = vld [vmem:[#allocation21 + $0x78] sm:$0xff]  ;;  %v7338_v60 = vld [vmem:[#allocation21 + $0xb0] sm:$0xff] }
 0xb9b   :  { %6758 = vmatpush1.msra.mxu1 %v15911_v5  ;;  %6821 = vmatprep.mubr.f32.mxu1 %v16431_v55  ;;  %v7322_v5 = vld [vmem:[#allocation21 + $0x30] sm:$0xff] }
 0xb9c   :  { %6828 = vmatprep.subr.mxu1 %v15918_v30  ;;  %v12372_v61 = vpack.c.bf16 %v7322_v5, %v7317_v9  ;;  %v7347_v9 = vld [vmem:[#allocation21 + $0xf8] sm:$0xff]  ;;  %v7352_v5 = vld [vmem:[#allocation21 + $0x120] sm:$0xff] }
 0xb9d   :  { %12355 = vmatpush3.bf16.msra.mxu0 %v16566_v46  ;;  %v7342_v46 = vld [vmem:[#allocation21 + $0xd0] sm:$0xff] }
 0xb9e   :  { %12357 = vmatprep.subr.bf16.mxu0 %v16567_v58  ;;  %v12378_v58 = vpack.c.bf16 %v7331_v35, %v7326_v50  ;;  %v12380_v48 = vpack.c.bf16 %v7342_v46, %v7337_v51  ;;  %v7376_v50 = vld [vmem:[#allocation21 + $0x1e0] sm:$0xff]  ;;  %v7381_v35 = vld [vmem:[#allocation21 + $0x208] sm:$0xff]  ;;  %v7387_v51 = vld [vmem:[#allocation21 + $0x238] sm:$0xff] }
 0xb9f   :  { %v7392_v46 = vld [vmem:[#allocation21 + $0x260] sm:$0xff] }
 0xba1   :  { %12359 = vmatpush3.bf16.msra.mxu0 %v16568_v52  ;;  %v7336_v52 = vld [vmem:[#allocation21 + $0xa0] sm:$0xff] }
 0xba2   :  { %7041 = vmatprep.subr.mxu0 %v15944_v45 }
 0xba4   :  { %6675 = vmatmul.mubr.f32.vlgmr.msra.gmra.mrb[52].mxu0 %v6312_v14  ;;  %v7341_v14 = vld [vmem:[#allocation21 + $0xc8] sm:$0xff] }
 0xba5   :  { %7042 = vmatpush1.msra.mxu0 %v15951_v62  ;;  %7105 = vmatprep.mubr.f32.mxu0 %v16431_v55 }
 0xba6   :  { %12373 = vmatprep.subr.bf16.mxu0 %v12372_v61  ;;  %v7324_v61 = vld [vmem:[#allocation21 + $0x40] sm:$0xff] }
 0xc36   :  { %v10113_v30 = vpop.f32.mrb[48].mxu0 }
 0xc37   :  { %v10114_v4 = vpop.f32.mrb[49].mxu0 }
 0xc38   :  { %v10115_v49 = vadd.f32 %v10114_v4, %v10113_v30  ;;  %v12384_v30 = vpack.c.bf16 %v7352_v5, %v7347_v9  ;;  %v7346_v4 = vld [vmem:[#allocation21 + $0xf0] sm:$0xff]  ;;  %v12398_v9 = vpack.c.bf16 %v7381_v35, %v7376_v50  ;;  %v7364_v5 = vld [vmem:[#allocation21 + $0x180] sm:$0xff]  ;;  %v7427_v50 = vld [vmem:[#allocation21 + $0x378] sm:$0xff] }
 0xc39   :  { %v7432_v35 = vld [vmem:[#allocation21 + $0x3a0] sm:$0xff] }
 0xc3a   :  { %v10148_v21 = vpop.f32.mrb[36].mxu1 }
 0xc3b   :  { %v10149_v27 = vpop.f32.mrb[37].mxu1 }
 0xc3c   :  { %v10150_v15 = vadd.f32 %v10149_v27, %v10148_v21  ;;  %v7357_v21 = vld [vmem:[#allocation21 + $0x148] sm:$0xff]  ;;  %v7362_v27 = vld [vmem:[#allocation21 + $0x170] sm:$0xff] }
 0xc3e   :  { %v6467_v13 = vadd.f32 %v10150_v15, %v10115_v49  ;;  %v7351_v49 = vld [vmem:[#allocation21 + $0x118] sm:$0xff] }
 0xc3f   :  { %v7323_v15 = vld [vmem:[#allocation21 + $0x38] sm:$0xff] }
 0xc56   :  { %v10183_v38 = vpop.f32.mrb[50].mxu0 }
 0xc57   :  { %v10184_v2 = vpop.f32.mrb[51].mxu0 }
 0xc58   :  { %v10185_v22 = vadd.f32 %v10184_v2, %v10183_v38  ;;  %v12386_v38 = vpack.c.bf16 %v7351_v49, %v7346_v4  ;;  %v7334_v2 = vld [vmem:[#allocation21 + $0x90] sm:$0xff] }
 0xc59   :  { %v7402_v4 = vld [vmem:[#allocation21 + $0x2b0] sm:$0xff] }
 0xc5a   :  { %v10218_v45 = vpop.f32.mrb[38].mxu1  ;;  %v6537_v37 = vadd.f32 %v10185_v22, %v6467_v13  ;;  %v7329_v13 = vld [vmem:[#allocation21 + $0x68] sm:$0xff]  ;;  %v12388_v22 = vpack.c.bf16 %v7362_v27, %v7357_v21  ;;  %v7358_v27 = vld [vmem:[#allocation21 + $0x150] sm:$0xff] }
 0xc5b   :  { %v10219_v59 = vpop.f32.mrb[39].mxu1 }
 0xc5c   :  { %v10220_v62 = vadd.f32 %v10219_v59, %v10218_v45  ;;  %v7356_v45 = vld [vmem:[#allocation21 + $0x140] sm:$0xff]  ;;  %v7367_v59 = vld [vmem:[#allocation21 + $0x198] sm:$0xff] }
 0xc5e   :  { %v6607_v40 = vadd.f32 %v10220_v62, %v6537_v37  ;;  %v7361_v37 = vld [vmem:[#allocation21 + $0x168] sm:$0xff] }
 0xc6c   :  { %v6746_v17 = vpop.f32.mrb[40].mxu1 }
 0xc6d   :  { %v10574_v8 = vpop.f32.mrb[41].mxu1 }
 0xc6e   :  { %v7333_v8 = vld [vmem:[#allocation21 + $0x88] sm:$0xff] }
 0xc77   :  { %v10253_v20 = vpop.f32.mrb[52].mxu0 }
 0xc78   :  { %v10254_v34 = vpop.f32.mrb[53].mxu0 }
 0xc79   :  { %v10255_v3 = vadd.f32 %v10254_v34, %v10253_v20  ;;  %v7339_v20 = vld [vmem:[#allocation21 + $0xb8] sm:$0xff]  ;;  %v12390_v34 = vpack.c.bf16 %v7361_v37, %v7356_v45  ;;  %v7412_v37 = vld [vmem:[#allocation21 + $0x300] sm:$0xff] }
 0xc7a   :  { %v7407_v45 = vld [vmem:[#allocation21 + $0x2d8] sm:$0xff] }
 0xc7b   :  { %v6677_v53 = vadd.f32 %v10255_v3, %v6607_v40  ;;  %v12712_v40 = vpack.c.bf16 %v7334_v2, %v7329_v13  ;;  %v7344_v3 = vld [vmem:[#allocation21 + $0xe0] sm:$0xff]  ;;  %v7374_v13 = vld [vmem:[#allocation21 + $0x1d0] sm:$0xff] }
 0xc7c   :  { %v12716_v41 = vpack.c.bf16 %v7344_v3, %v7339_v20  ;;  %v7396_v2 = vld [vmem:[#allocation21 + $0x280] sm:$0xff]  ;;  %v7406_v3 = vld [vmem:[#allocation21 + $0x2d0] sm:$0xff] }
 0xc7d   :  { %v6747_v19 = vadd.f32 %v6746_v17, %v6677_v53  ;;  %v7328_v17 = vld [vmem:[#allocation21 + $0x60] sm:$0xff] }
 0xc7e   :  { %v7384_v20 = vld [vmem:[#allocation21 + $0x220] sm:$0xff] }
 0xc7f   :  { %v6750_v16 = vmul.f32 0.00295858, %v6747_v19  ;;  %v7366_v19 = vld [vmem:[#allocation21 + $0x190] sm:$0xff] }
 0xc81   :  { %v6751_v36 = vadd.f32 1e-05, %v6750_v16  ;;  %v7371_v16 = vld [vmem:[#allocation21 + $0x1b8] sm:$0xff] }
 0xc83   :  { %13306 = vrsqrt.f32 %v6751_v36  ;;  %v7382_v36 = vld [vmem:[#allocation21 + $0x210] sm:$0xff] }
 0xc8d   :  { %v13307_v11 = vpop.eup %13306 }
 0xc8e   :  { %v16135_v18 = vmul.f32 %v13307_v11, %v5249_v42  ;;  %v12714_v42 = vpack.c.bf16 %v7333_v8, %v7328_v17  ;;  %v12394_v11 = vpack.c.bf16 %v7371_v16, %v7366_v19  ;;  %v7379_v17 = vld [vmem:[#allocation21 + $0x1f8] sm:$0xff]  ;;  %v7417_v19 = vld [vmem:[#allocation21 + $0x328] sm:$0xff]  ;;  %v7422_v16 = vld [vmem:[#allocation21 + $0x350] sm:$0xff] }
 0xc90   :  { %9536 = vmatmul.mubr.msk.f32.vlgmr.msra.gmra.mrb[42].mxu1 %vm5755_vm8, %v16135_v18  ;;  %9540 = vmatmul.mubr.msk.f32.vlgmr.msra.gmra.mrb[54].mxu0 %vm5755_vm8, %v16135_v18 }
 0xc91   :  { %6829 = vmatpush1.msra.mxu1 %v15922_v39  ;;  %6892 = vmatprep.mubr.f32.mxu1 %v16431_v55  ;;  %v7319_v39 = vld [vmem:[#allocation21 + $0x18] sm:$0xff] }
 0xc92   :  { %6899 = vmatprep.subr.mxu1 %v15924_v23  ;;  %12375 = vmatpush1.bf16.msra.mxu0 %v12374_v25  ;;  %v12382_v23 = vpack.c.bf16 %v7341_v14, %v7336_v52  ;;  %v7354_v25 = vld [vmem:[#allocation21 + $0x130] sm:$0xff]  ;;  %v7353_v52 = vld [vmem:[#allocation21 + $0x128] sm:$0xff]  ;;  %v7359_v14 = vld [vmem:[#allocation21 + $0x158] sm:$0xff] }
 0xc93   :  { %12377 = vmatprep.subr.bf16.mxu0 %v12376_v33  ;;  %v12724_v21 = vpack.c.bf16 %v7364_v5, %v7359_v14  ;;  %v7404_v14 = vld [vmem:[#allocation21 + $0x2c0] sm:$0xff]  ;;  %v7426_v5 = vld [vmem:[#allocation21 + $0x370] sm:$0xff] }
 0xc94   :  { %9537 = vmatmul.mubr.msk.f32.vlgmr.msra.gmra.mrb[44].mxu1 %vm5755_vm8, %v16135_v18 }
 0xc95   :  { %6900 = vmatpush1.msra.mxu1 %v15931_v24  ;;  %6963 = vmatprep.mubr.f32.mxu1 %v16431_v55  ;;  %v12708_v24 = vpack.c.bf16 %v7324_v61, %v7319_v39  ;;  %v12400_v39 = vpack.c.bf16 %v7392_v46, %v7387_v51  ;;  %v7391_v61 = vld [vmem:[#allocation21 + $0x258] sm:$0xff] }
 0xc96   :  { %6970 = vmatprep.subr.mxu1 %v15934_v28  ;;  %12379 = vmatpush1.bf16.msra.mxu0 %v12378_v58  ;;  %v7318_v28 = vld [vmem:[#allocation21 + $0x10] sm:$0xff]  ;;  %v12720_v58 = vpack.c.bf16 %v7354_v25, %v7349_v1  ;;  %v7416_v25 = vld [vmem:[#allocation21 + $0x320] sm:$0xff] }
 0xc97   :  { %12381 = vmatprep.subr.bf16.mxu0 %v12380_v48  ;;  %v12710_v62 = vpack.c.bf16 %v7323_v15, %v7318_v28  ;;  %v7348_v48 = vld [vmem:[#allocation21 + $0x100] sm:$0xff]  ;;  %v7369_v28 = vld [vmem:[#allocation21 + $0x1a8] sm:$0xff]  ;;  %v7394_v1 = vld [vmem:[#allocation21 + $0x270] sm:$0xff] }
 0xc98   :  { %9538 = vmatmul.mubr.msk.f32.vlgmr.msra.gmra.mrb[46].mxu1 %vm5755_vm8, %v16135_v18  ;;  %v12722_v49 = vpack.c.bf16 %v7353_v52, %v7348_v48  ;;  %v7399_v48 = vld [vmem:[#allocation21 + $0x298] sm:$0xff] }
 0xc99   :  { %6971 = vmatpush1.msra.mxu1 %v15941_v7  ;;  %7034 = vmatprep.mubr.f32.mxu1 %v16431_v55  ;;  %v7372_v7 = vld [vmem:[#allocation21 + $0x1c0] sm:$0xff] }
 0xc9a   :  { %10575 = vmatprep.subr.mxu1 %v16431_v55  ;;  %12383 = vmatpush1.bf16.msra.mxu0 %v12382_v23  ;;  %v12392_v53 = vpack.c.bf16 %v7372_v7, %v7367_v59  ;;  %v7386_v23 = vld [vmem:[#allocation21 + $0x230] sm:$0xff]  ;;  %v12728_v7 = vpack.c.bf16 %v7374_v13, %v7369_v28  ;;  %v7436_v13 = vld [vmem:[#allocation21 + $0x3c0] sm:$0xff] }
 0xc9b   :  { %12385 = vmatprep.subr.bf16.mxu0 %v12384_v30  ;;  %v7397_v30 = vld [vmem:[#allocation21 + $0x288] sm:$0xff]  ;;  %v12402_v15 = vpack.c.bf16 %v7391_v61, %v7386_v23  ;;  %v7442_v61 = vld [vmem:[#allocation21 + $0x3f0] sm:$0xff] }
 0xc9c   :  { %9539 = vmatmul.mubr.msk.f32.vlgmr.msra.gmra.mrb[48].mxu1 %vm5755_vm8, %v16135_v18  ;;  %v7437_v23 = vld [vmem:[#allocation21 + $0x3c8] sm:$0xff]  ;;  %v7414_v28 = vld [vmem:[#allocation21 + $0x310] sm:$0xff] }
 0xc9d   :  { %10576 = vmatpush3.msra.mxu1 %v15913_v56  ;;  %10577 = vmatprep.mubr.msk.f32.mxu1 %vm13655_vm0, %v16431_v55  ;;  %v7377_v56 = vld [vmem:[#allocation21 + $0x1e8] sm:$0xff] }
 0xc9e   :  { %12709 = vmatprep.subr.bf16.mxu1 %v12708_v24  ;;  %12387 = vmatpush1.bf16.msra.mxu0 %v12386_v38  ;;  %v12396_v33 = vpack.c.bf16 %v7382_v36, %v7377_v56  ;;  %v7363_v24 = vld [vmem:[#allocation21 + $0x178] sm:$0xff]  ;;  %v12404_v38 = vpack.c.bf16 %v7402_v4, %v7397_v30  ;;  %v12732_v36 = vpack.c.bf16 %v7384_v20, %v7379_v17  ;;  %v7424_v17 = vld [vmem:[#allocation21 + $0x360] sm:$0xff]  ;;  %v7446_v20 = vld [vmem:[#allocation21 + $0x410] sm:$0xff] }
 0xc9f   :  { %12389 = vmatprep.subr.bf16.mxu0 %v12388_v22  ;;  %v7401_v22 = vld [vmem:[#allocation21 + $0x2a8] sm:$0xff]  ;;  %v12726_v59 = vpack.c.bf16 %v7363_v24, %v7358_v27  ;;  %v12740_v4 = vpack.c.bf16 %v7404_v14, %v7399_v48 }
 0xca0   :  { %10578 = vmatmul.mubr.msk.f32.vlgmr.msra.gmra.mrb[50].mxu1 %vm5755_vm8, %v16135_v18  ;;  %v12718_v18 = vpack.c.bf16 %v7343_v57, %v7338_v60  ;;  %v12406_v8 = vpack.c.bf16 %v7401_v22, %v7396_v2  ;;  %v7389_v60 = vld [vmem:[#allocation21 + $0x248] sm:$0xff]  ;;  %v7447_v2 = vld [vmem:[#allocation21 + $0x418] sm:$0xff]  ;;  %v7452_v22 = vld [vmem:[#allocation21 + $0x440] sm:$0xff] }
 0xca1   :  { %12711 = vmatpush1.bf16.msra.mxu1 %v12710_v62  ;;  %v7368_v62 = vld [vmem:[#allocation21 + $0x1a0] sm:$0xff]  ;;  %v12736_v46 = vpack.c.bf16 %v7394_v1, %v7389_v60  ;;  %v7409_v27 = vld [vmem:[#allocation21 + $0x2e8] sm:$0xff] }
 0xca2   :  { %12713 = vmatprep.subr.bf16.mxu1 %v12712_v40  ;;  %12391 = vmatpush1.bf16.msra.mxu0 %v12390_v34  ;;  %v7373_v40 = vld [vmem:[#allocation21 + $0x1c8] sm:$0xff]  ;;  %v12408_v34 = vpack.c.bf16 %v7412_v37, %v7407_v45  ;;  %v12744_v37 = vpack.c.bf16 %v7414_v28, %v7409_v27  ;;  %v7463_v28 = vld [vmem:[#allocation21 + $0x498] sm:$0xff] }
 0xca3   :  { %12393 = vmatprep.subr.bf16.mxu0 %v12392_v53  ;;  %v7411_v53 = vld [vmem:[#allocation21 + $0x2f8] sm:$0xff]  ;;  %v12730_v56 = vpack.c.bf16 %v7373_v40, %v7368_v62  ;;  %v7433_v1 = vld [vmem:[#allocation21 + $0x3a8] sm:$0xff] }
 0xca4   :  { %v12410_v57 = vpack.c.bf16 %v7411_v53, %v7406_v3  ;;  %v7419_v62 = vld [vmem:[#allocation21 + $0x338] sm:$0xff]  ;;  %v7453_v14 = vld [vmem:[#allocation21 + $0x448] sm:$0xff] }
 0xca5   :  { %12715 = vmatpush1.bf16.msra.mxu1 %v12714_v42  ;;  %v7378_v42 = vld [vmem:[#allocation21 + $0x1f0] sm:$0xff]  ;;  %v12748_v53 = vpack.c.bf16 %v7424_v17, %v7419_v62  ;;  %v7473_v17 = vld [vmem:[#allocation21 + $0x4e8] sm:$0xff] }
 0xca6   :  { %12717 = vmatprep.subr.bf16.mxu1 %v12716_v41  ;;  %12395 = vmatpush1.bf16.msra.mxu0 %v12394_v11  ;;  %v7383_v41 = vld [vmem:[#allocation21 + $0x218] sm:$0xff]  ;;  %v12412_v11 = vpack.c.bf16 %v7422_v16, %v7417_v19  ;;  %v7418_v19 = vld [vmem:[#allocation21 + $0x330] sm:$0xff] }
 0xca7   :  { %12397 = vmatprep.subr.bf16.mxu0 %v12396_v33  ;;  %v7421_v33 = vld [vmem:[#allocation21 + $0x348] sm:$0xff]  ;;  %v12734_v51 = vpack.c.bf16 %v7383_v41, %v7378_v42  ;;  %v7423_v16 = vld [vmem:[#allocation21 + $0x358] sm:$0xff]  ;;  %v7434_v42 = vld [vmem:[#allocation21 + $0x3b0] sm:$0xff] }
 0xca8   :  { %v12414_v52 = vpack.c.bf16 %v7421_v33, %v7416_v25  ;;  %v12750_v41 = vpack.c.bf16 %v7423_v16, %v7418_v19  ;;  %v7444_v25 = vld [vmem:[#allocation21 + $0x400] sm:$0xff] }
 0xca9   :  { %12719 = vmatpush1.bf16.msra.mxu1 %v12718_v18  ;;  %v7388_v18 = vld [vmem:[#allocation21 + $0x240] sm:$0xff] }
 0xcaa   :  { %12721 = vmatprep.subr.bf16.mxu1 %v12720_v58  ;;  %12399 = vmatpush1.bf16.msra.mxu0 %v12398_v9  ;;  %v7393_v58 = vld [vmem:[#allocation21 + $0x268] sm:$0xff]  ;;  %v12416_v9 = vpack.c.bf16 %v7432_v35, %v7427_v50  ;;  %v7438_v35 = vld [vmem:[#allocation21 + $0x3d0] sm:$0xff]  ;;  %v7484_v19 = vld [vmem:[#allocation21 + $0x540] sm:$0xff] }
 0xcab   :  { %12401 = vmatprep.subr.bf16.mxu0 %v12400_v39  ;;  %v7431_v39 = vld [vmem:[#allocation21 + $0x398] sm:$0xff]  ;;  %v12738_v30 = vpack.c.bf16 %v7393_v58, %v7388_v18  ;;  %v7454_v18 = vld [vmem:[#allocation21 + $0x450] sm:$0xff] }
 0xcac   :  { %v12418_v24 = vpack.c.bf16 %v7431_v39, %v7426_v5  ;;  %v7457_v5 = vld [vmem:[#allocation21 + $0x468] sm:$0xff]  ;;  %v7462_v39 = vld [vmem:[#allocation21 + $0x490] sm:$0xff] }
 0xcad   :  { %12723 = vmatpush1.bf16.msra.mxu1 %v12722_v49  ;;  %v7398_v49 = vld [vmem:[#allocation21 + $0x290] sm:$0xff] }
 0xcae   :  { %12725 = vmatprep.subr.bf16.mxu1 %v12724_v21  ;;  %12403 = vmatpush1.bf16.msra.mxu0 %v12402_v15  ;;  %v7403_v21 = vld [vmem:[#allocation21 + $0x2b8] sm:$0xff]  ;;  %v12420_v15 = vpack.c.bf16 %v7442_v61, %v7437_v23  ;;  %v12428_v61 = vpack.c.bf16 %v7462_v39, %v7457_v5 }
 0xcaf   :  { %12405 = vmatprep.subr.bf16.mxu0 %v12404_v38  ;;  %v7441_v38 = vld [vmem:[#allocation21 + $0x3e8] sm:$0xff]  ;;  %v12742_v45 = vpack.c.bf16 %v7403_v21, %v7398_v49  ;;  %v7459_v23 = vld [vmem:[#allocation21 + $0x478] sm:$0xff] }
 0xcb0   :  { %v12422_v40 = vpack.c.bf16 %v7441_v38, %v7436_v13  ;;  %v7461_v49 = vld [vmem:[#allocation21 + $0x488] sm:$0xff]  ;;  %v7467_v13 = vld [vmem:[#allocation21 + $0x4b8] sm:$0xff]  ;;  %v7472_v38 = vld [vmem:[#allocation21 + $0x4e0] sm:$0xff] }
 0xcb1   :  { %12727 = vmatpush1.bf16.msra.mxu1 %v12726_v59  ;;  %v7408_v59 = vld [vmem:[#allocation21 + $0x2e0] sm:$0xff]  ;;  %v7483_v39 = vld [vmem:[#allocation21 + $0x538] sm:$0xff] }
 0xcb2   :  { %12729 = vmatprep.subr.bf16.mxu1 %v12728_v7  ;;  %12407 = vmatpush1.bf16.msra.mxu0 %v12406_v8  ;;  %v7413_v7 = vld [vmem:[#allocation21 + $0x308] sm:$0xff]  ;;  %v12424_v8 = vpack.c.bf16 %v7452_v22, %v7447_v2  ;;  %v12432_v22 = vpack.c.bf16 %v7472_v38, %v7467_v13 }
 0xcb3   :  { %12409 = vmatprep.subr.bf16.mxu0 %v12408_v34  ;;  %v7451_v34 = vld [vmem:[#allocation21 + $0x438] sm:$0xff]  ;;  %v12746_v3 = vpack.c.bf16 %v7413_v7, %v7408_v59  ;;  %v7469_v2 = vld [vmem:[#allocation21 + $0x4c8] sm:$0xff] }
 0xcb4   :  { %v7471_v59 = vld [vmem:[#allocation21 + $0x4d8] sm:$0xff] }
 0xcb5   :  { %12731 = vmatpush1.bf16.msra.mxu1 %v12730_v56  ;;  %v12426_v56 = vpack.c.bf16 %v7451_v34, %v7446_v20  ;;  %v7477_v20 = vld [vmem:[#allocation21 + $0x508] sm:$0xff]  ;;  %v7482_v34 = vld [vmem:[#allocation21 + $0x530] sm:$0xff] }
 0xcb6   :  { %12733 = vmatprep.subr.bf16.mxu1 %v12732_v36  ;;  %12411 = vmatpush1.bf16.msra.mxu0 %v12410_v57  ;;  %v7429_v36 = vld [vmem:[#allocation21 + $0x388] sm:$0xff]  ;;  %v7428_v57 = vld [vmem:[#allocation21 + $0x380] sm:$0xff] }
 0xcb7   :  { %12413 = vmatprep.subr.bf16.mxu0 %v12412_v11  ;;  %v12752_v60 = vpack.c.bf16 %v7434_v42, %v7429_v36  ;;  %v7439_v11 = vld [vmem:[#allocation21 + $0x3d8] sm:$0xff]  ;;  %v12754_v33 = vpack.c.bf16 %v7433_v1, %v7428_v57 }
 0xcb8   :  { %v12756_v50 = vpack.c.bf16 %v7444_v25, %v7439_v11  ;;  %v16569_v25 = vld [vmem:[#allocation34_spill] sm:$0xff] }
 0xcb9   :  { %12735 = vmatpush1.bf16.msra.mxu1 %v12734_v51  ;;  %v7443_v51 = vld [vmem:[#allocation21 + $0x3f8] sm:$0xff] }
 0xcba   :  { %12737 = vmatprep.subr.bf16.mxu1 %v12736_v46  ;;  %12415 = vmatpush1.bf16.msra.mxu0 %v12414_v52  ;;  %v7449_v46 = vld [vmem:[#allocation21 + $0x428] sm:$0xff]  ;;  %v12758_v58 = vpack.c.bf16 %v7443_v51, %v7438_v35  ;;  %v7448_v52 = vld [vmem:[#allocation21 + $0x420] sm:$0xff] }
 0xcbb   :  { %12417 = vmatprep.subr.bf16.mxu0 %v12416_v9  ;;  %v12760_v48 = vpack.c.bf16 %v7454_v18, %v7449_v46  ;;  %v12762_v9 = vpack.c.bf16 %v7453_v14, %v7448_v52  ;;  %v7476_v46 = vld [vmem:[#allocation21 + $0x500] sm:$0xff]  ;;  %v7481_v18 = vld [vmem:[#allocation21 + $0x528] sm:$0xff]  ;;  %v16570_v14 = vld [vmem:[#allocation33_spill] sm:$0xff] }
 0xcbd   :  { %12739 = vmatpush1.bf16.msra.mxu1 %v12738_v30  ;;  %v7464_v30 = vld [vmem:[#allocation21 + $0x4a0] sm:$0xff] }
 0xcbe   :  { %12741 = vmatprep.subr.bf16.mxu1 %v12740_v4  ;;  %12419 = vmatpush1.bf16.msra.mxu0 %v12418_v24  ;;  %v7456_v4 = vld [vmem:[#allocation21 + $0x460] sm:$0xff]  ;;  %v12764_v21 = vpack.c.bf16 %v7464_v30, %v7459_v23  ;;  %v7458_v24 = vld [vmem:[#allocation21 + $0x470] sm:$0xff]  ;;  %v7487_v23 = vld [vmem:[#allocation21 + $0x558] sm:$0xff] }
 0xcbf   :  { %12421 = vmatprep.subr.bf16.mxu0 %v12420_v15  ;;  %v12430_v27 = vpack.c.bf16 %v7461_v49, %v7456_v4  ;;  %v12766_v15 = vpack.c.bf16 %v7463_v28, %v7458_v24  ;;  %v7489_v49 = vld [vmem:[#allocation21 + $0x568] sm:$0xff] }
 0xcc0   :  { %v16572_v24 = vld [vmem:[#allocation40_spill] sm:$0xff] }
 0xcc1   :  { %12743 = vmatpush1.bf16.msra.mxu1 %v12742_v45  ;;  %v7474_v45 = vld [vmem:[#allocation21 + $0x4f0] sm:$0xff] }
 0xcc2   :  { %12745 = vmatprep.subr.bf16.mxu1 %v12744_v37  ;;  %12423 = vmatpush1.bf16.msra.mxu0 %v12422_v40  ;;  %v7466_v37 = vld [vmem:[#allocation21 + $0x4b0] sm:$0xff]  ;;  %v12768_v7 = vpack.c.bf16 %v7474_v45, %v7469_v2  ;;  %v7468_v40 = vld [vmem:[#allocation21 + $0x4c0] sm:$0xff] }
 0xcc3   :  { %12425 = vmatprep.subr.bf16.mxu0 %v12424_v8  ;;  %v12434_v62 = vpack.c.bf16 %v7471_v59, %v7466_v37  ;;  %v12770_v8 = vpack.c.bf16 %v7473_v17, %v7468_v40  ;;  %v7486_v37 = vld [vmem:[#allocation21 + $0x550] sm:$0xff]  ;;  %v7491_v59 = vld [vmem:[#allocation21 + $0x578] sm:$0xff] }
 0xcc5   :  { %12747 = vmatpush1.bf16.msra.mxu1 %v12746_v3  ;;  %v7479_v3 = vld [vmem:[#allocation21 + $0x518] sm:$0xff] }
 0xcc6   :  { %12749 = vmatprep.subr.bf16.mxu1 %v12748_v53  ;;  %12427 = vmatpush1.bf16.msra.mxu0 %v12426_v56  ;;  %v12436_v53 = vpack.c.bf16 %v7482_v34, %v7477_v20  ;;  %v12772_v16 = vpack.c.bf16 %v7484_v19, %v7479_v3  ;;  %v16161_v56 = vld [vmem:[#allocation19] sm:$0xff]  ;;  %v7493_v20 = vld [vmem:[#allocation21 + $0x588] sm:$0xff] }
 0xcc7   :  { %12429 = vmatprep.subr.bf16.mxu0 %v12428_v61  ;;  %v7492_v61 = vld [vmem:[#allocation21 + $0x580] sm:$0xff]  ;;  %v7258_v28 = vrot.slane %v16161_v56, %v16572_v24  ;;  %v7497_v34 = vld [vmem:[#allocation21 + $0x5a8] sm:$0xff]  ;;  %v7502_v3 = vld [vmem:[#allocation21 + $0x5d0] sm:$0xff] }
 0xcc8   :  { %v12440_v45 = vpack.c.bf16 %v7492_v61, %v7487_v23  ;;  %v7499_v19 = vld [vmem:[#allocation21 + $0x5b8] sm:$0xff]  ;;  %v7512_v61 = vld [vmem:[#allocation21 + $0x620] sm:$0xff] }
 0xcc9   :  { %12751 = vmatpush1.bf16.msra.mxu1 %v12750_v41  ;;  %v7503_v23 = vld [vmem:[#allocation21 + $0x5d8] sm:$0xff] }
 0xcca   :  { %12753 = vmatprep.subr.bf16.mxu1 %v12752_v60  ;;  %12431 = vmatpush1.bf16.msra.mxu0 %v12430_v27  ;;  %v7242_v60 = vrot.slane %v16161_v56, %v14581_v47 }
 0xccb   :  { %12433 = vmatprep.subr.bf16.mxu0 %v12432_v22 }
 0xccd   :  { %12755 = vmatpush1.bf16.msra.mxu1 %v12754_v33  ;;  %v7246_v33 = vrot.slane %v16161_v56, %v16569_v25 }
 0xcce   :  { %12757 = vmatprep.subr.bf16.mxu1 %v12756_v50  ;;  %12435 = vmatpush1.bf16.msra.mxu0 %v12434_v62 }
 0xccf   :  { %12437 = vmatprep.subr.bf16.mxu0 %v12436_v53 }
 0xcd1   :  { %12759 = vmatpush1.bf16.msra.mxu1 %v12758_v58  ;;  %v7478_v58 = vld [vmem:[#allocation21 + $0x510] sm:$0xff] }
 0xcd2   :  { %12761 = vmatprep.subr.bf16.mxu1 %v12760_v48  ;;  %v12774_v22 = vpack.c.bf16 %v7483_v39, %v7478_v58  ;;  %v7496_v58 = vld [vmem:[#allocation21 + $0x5a0] sm:$0xff] }
 0xcd5   :  { %12763 = vmatpush1.bf16.msra.mxu1 %v12762_v9  ;;  %v7250_v9 = vrot.slane %v16161_v56, %v16570_v14 }
 0xcd6   :  { %12765 = vmatprep.subr.bf16.mxu1 %v12764_v21  ;;  %v7494_v21 = vld [vmem:[#allocation21 + $0x590] sm:$0xff] }
 0xcd9   :  { %12767 = vmatpush1.bf16.msra.mxu1 %v12766_v15  ;;  %v12438_v15 = vpack.c.bf16 %v7481_v18, %v7476_v46  ;;  %v12444_v18 = vpack.c.bf16 %v7502_v3, %v7497_v34  ;;  %v7513_v3 = vld [vmem:[#allocation21 + $0x628] sm:$0xff] }
 0xcda   :  { %12769 = vmatprep.subr.bf16.mxu1 %v12768_v7  ;;  %v7488_v7 = vld [vmem:[#allocation21 + $0x560] sm:$0xff] }
 0xcdb   :  { %v12778_v46 = vpack.c.bf16 %v7493_v20, %v7488_v7 }
 0xcdd   :  { %12771 = vmatpush1.bf16.msra.mxu1 %v12770_v8  ;;  %v12776_v8 = vpack.c.bf16 %v7494_v21, %v7489_v49  ;;  %v7514_v49 = vld [vmem:[#allocation21 + $0x630] sm:$0xff] }
 0xcde   :  { %12773 = vmatprep.subr.bf16.mxu1 %v12772_v16  ;;  %v7504_v16 = vld [vmem:[#allocation21 + $0x5e0] sm:$0xff] }
 0xcdf   :  { %v12780_v39 = vpack.c.bf16 %v7504_v16, %v7499_v19  ;;  %v7524_v19 = vld [vmem:[#allocation21 + $0x680] sm:$0xff] }
 0xd63   :  { %v6823_v36 = vpop.f32.mrb[42].mxu1  ;;  %v16163_v42 = vpop.f32.mrb[54].mxu0 }
 0xd64   :  { %v7185_v41 = vrot.slane %v6823_v36, %v14581_v47  ;;  %v6825_v57 = vpop.f32.mrb[43].mxu1  ;;  %v16168_v1 = vpop.f32.mrb[55].mxu0  ;;  %v16573_v36 = vld [vmem:[#allocation42_spill] sm:$0xff] }
 0xd65   :  { %v7189_v11 = vrot.slane %v6825_v57, %v14581_v47  ;;  %v16574_v57 = vld [vmem:[#allocation41_spill] sm:$0xff] }
 0xd66   :  { %v7226_v50 = vmul.f32 %v7185_v41, %v15991_v29  ;;  %v16571_v29 = vld [vmem:[#allocation35_spill] sm:$0xff]  ;;  %v7262_v41 = vrot.slane %v16161_v56, %v16573_v36 }
 0xd67   :  { %v7227_v35 = vmul.f32 %v7189_v11, %v15994_v6  ;;  %v6894_v51 = vpop.f32.mrb[44].mxu1  ;;  %v7254_v6 = vrot.slane %v16161_v56, %v16571_v29  ;;  %v7266_v11 = vrot.slane %v16161_v56, %v16574_v57  ;;  %v7516_v57 = vld [vmem:[#allocation21 + $0x640] sm:$0xff] }
 0xd68   :  { %v7294_v48 = vadd.f32 %v7242_v60, %v7226_v50  ;;  %v7193_v52 = vrot.slane %v6894_v51, %v14581_v47  ;;  %v6896_v5 = vpop.f32.mrb[45].mxu1 }
 0xd69   :  { %v7197_v30 = vrot.slane %v6896_v5, %v14581_v47  ;;  %v7295_v4 = vadd.f32 %v7246_v33, %v7227_v35  ;;  %v12442_v33 = vpack.c.bf16 %v7491_v59, %v7486_v37 }
 0xd6a   :  { %v7228_v27 = vmul.f32 %v7193_v52, %v16004_v10  ;;  %v16187_v62 = vmax.f32 %v7294_v48, 0.0  ;;  %v7501_v48 = vld [vmem:[#allocation21 + $0x5c8] sm:$0xff] }
 0xd6b   :  { %v7229_v13 = vmul.f32 %v7197_v30, %v16008_v43  ;;  %v6965_v38 = vpop.f32.mrb[46].mxu1  ;;  %v16185_v2 = vmax.f32 %v7295_v4, 0.0  ;;  %v5251_v30 = vld [vmem:[#allocation19 + $0x8] sm:$0x7] }
 0xd6c   :  { %v16189_v40 = vadd.f32 %v7250_v9, %v7228_v27  ;;  %v7201_v10 = vrot.slane %v6965_v38, %v14581_v47  ;;  %v6967_v17 = vpop.f32.mrb[47].mxu1  ;;  %v16575_v27 = vld [vmem:[#allocation32_spill] sm:$0xff]  ;;  %v7282_v38 = vrot.slane %v5251_v30, %v16570_v14  ;;  %v7528_v30 = vld [vmem:[#allocation21 + $0x6a0] sm:$0xff] }
 0xd6d   :  { %v7205_v43 = vrot.slane %v6967_v17, %v14581_v47  ;;  %8255 = vmatprep.mubr.f32.mxu0 %v16185_v2  ;;  %8681 = vmatprep.mubr.f32.mxu1 %v16185_v2  ;;  %v7297_v53 = vadd.f32 %v7254_v6, %v7229_v13  ;;  %v7509_v6 = vld [vmem:[#allocation21 + $0x608] sm:$0xff]  ;;  %v7511_v17 = vld [vmem:[#allocation21 + $0x618] sm:$0xff] }
 0xd6e   :  { %v7230_v60 = vmul.f32 %v7201_v10, %v16036_v54  ;;  %8256 = vmatmul.mubr.f32.vlgmr.msra.gmra.mrb[56].mxu0 %v16187_v62  ;;  %8682 = vmatmul.mubr.f32.vlgmr.msra.gmra.mrb[52].mxu1 %v16187_v62  ;;  %v7498_v54 = vld [vmem:[#allocation21 + $0x5b0] sm:$0xff] }
 0xd6f   :  { %v7231_v50 = vmul.f32 %v7205_v43, %v16018_v32  ;;  %12439 = vmatpush1.bf16.msra.mxu0 %v12438_v15  ;;  %12775 = vmatpush1.bf16.msra.mxu1 %v12774_v22  ;;  %v7036_v35 = vpop.f32.mrb[48].mxu1  ;;  %v16203_v51 = vmax.f32 %v7297_v53, 0.0  ;;  %v7507_v32 = vld [vmem:[#allocation21 + $0x5f8] sm:$0xff]  ;;  %v12446_v22 = vpack.c.bf16 %v7501_v48, %v7496_v58  ;;  %v12782_v59 = vpack.c.bf16 %v7503_v23, %v7498_v54  ;;  %v7506_v10 = vld [vmem:[#allocation21 + $0x5f0] sm:$0xff]  ;;  %v7517_v43 = vld [vmem:[#allocation21 + $0x648] sm:$0xff] }
 0xd70   :  { %v16205_v52 = vadd.f32 %v7258_v28, %v7230_v60  ;;  %v7209_v9 = vrot.slane %v7036_v35, %v14581_v47  ;;  %v7038_v5 = vpop.f32.mrb[49].mxu1  ;;  %12441 = vmatprep.subr.bf16.mxu0 %v12440_v45  ;;  %12777 = vmatprep.subr.bf16.mxu1 %v12776_v8  ;;  %v16576_v28 = vsub.s32 7, %v16575_v27  ;;  %v12448_v7 = vpack.c.bf16 %v7512_v61, %v7507_v32  ;;  %v7522_v53 = vld [vmem:[#allocation21 + $0x670] sm:$0xff]  ;;  %v7527_v58 = vld [vmem:[#allocation21 + $0x698] sm:$0xff]  ;;  %v7532_v48 = vld [vmem:[#allocation21 + $0x6c0] sm:$0xff] }
 0xd71   :  { %v7213_v4 = vrot.slane %v7038_v5, %v14581_v47  ;;  %8326 = vmatprep.mubr.f32.mxu0 %v16203_v51  ;;  %8752 = vmatprep.mubr.f32.mxu1 %v16203_v51  ;;  %v16211_v21 = vadd.f32 %v7262_v41, %v7231_v50  ;;  %v12450_v41 = vpack.c.bf16 %v7511_v17, %v7506_v10  ;;  %v7529_v54 = vld [vmem:[#allocation21 + $0x6a8] sm:$0xff]  ;;  %v7531_v23 = vld [vmem:[#allocation21 + $0x6b8] sm:$0xff] }
 0xd72   :  { %v7270_v15 = vrot.slane %v16161_v56, %v16576_v28  ;;  %v7232_v13 = vmul.f32 %v7209_v9, %v16043_v31  ;;  %v12784_v31 = vpack.c.bf16 %v7514_v49, %v7509_v6  ;;  %v7508_v56 = vld [vmem:[#allocation21 + $0x600] sm:$0xff]  ;;  %v12452_v50 = vpack.c.bf16 %v7522_v53, %v7517_v43  ;;  %v7534_v9 = vld [vmem:[#allocation21 + $0x6d0] sm:$0xff]  ;;  %v7537_v6 = vld [vmem:[#allocation21 + $0x6e8] sm:$0xff] }
 0xd73   :  { %v7233_v45 = vmul.f32 %v7213_v4, %v16024_v63  ;;  %12443 = vmatpush1.bf16.msra.mxu0 %v12442_v33  ;;  %12779 = vmatpush1.bf16.msra.mxu1 %v12778_v46  ;;  %v7178_v37 = vpop.f32.mrb[50].mxu1  ;;  %v7519_v63 = vld [vmem:[#allocation21 + $0x658] sm:$0xff]  ;;  %v12786_v60 = vpack.c.bf16 %v7513_v3, %v7508_v56  ;;  %v7518_v46 = vld [vmem:[#allocation21 + $0x650] sm:$0xff]  ;;  %v12456_v32 = vpack.c.bf16 %v7532_v48, %v7527_v58  ;;  %v7533_v4 = vld [vmem:[#allocation21 + $0x6c8] sm:$0xff] }
 0xd74   :  { %v16219_v8 = vadd.f32 %v7266_v11, %v7232_v13  ;;  %v7225_v20 = vrot.slane %v7178_v37, %v14581_v47  ;;  %v10579_v34 = vpop.f32.mrb[51].mxu1  ;;  %12445 = vmatprep.subr.bf16.mxu0 %v12444_v18  ;;  %12781 = vmatprep.subr.bf16.mxu1 %v12780_v39  ;;  %v7521_v11 = vld [vmem:[#allocation21 + $0x668] sm:$0xff]  ;;  %v12788_v35 = vpack.c.bf16 %v7524_v19, %v7519_v63  ;;  %v7523_v18 = vld [vmem:[#allocation21 + $0x678] sm:$0xff]  ;;  %v7526_v39 = vld [vmem:[#allocation21 + $0x690] sm:$0xff] }
 0xd75   :  { %v16222_v16 = vadd.f32 %v7270_v15, %v7233_v45  ;;  %v12790_v5 = vpack.c.bf16 %v7523_v18, %v7518_v46  ;;  %v12792_v61 = vpack.c.bf16 %v7534_v9, %v7529_v54  ;;  %v7542_v49 = vld [vmem:[#allocation21 + $0x710] sm:$0xff]  ;;  %v7539_v28 = vld [vmem:[#allocation21 + $0x6f8] sm:$0xff]  ;;  %v7544_v15 = vld [vmem:[#allocation21 + $0x720] sm:$0xff]  ;;  %v12458_v13 = vpack.c.bf16 %v7531_v23, %v7526_v39 }
 0xd76   :  { %v7236_v36 = vmul.f32 %v7225_v20, %v16074_v26  ;;  %v12454_v26 = vpack.c.bf16 %v7521_v11, %v7516_v57  ;;  %v7541_v45 = vld [vmem:[#allocation21 + $0x708] sm:$0xff]  ;;  %v12460_v37 = vpack.c.bf16 %v7542_v49, %v7537_v6  ;;  %v7543_v10 = vld [vmem:[#allocation21 + $0x718] sm:$0xff]  ;;  %v7552_v20 = vld [vmem:[#allocation21 + $0x760] sm:$0xff] }
 0xd77   :  { %12447 = vmatpush1.bf16.msra.mxu0 %v12446_v22  ;;  %12783 = vmatpush1.bf16.msra.mxu1 %v12782_v59  ;;  %v7536_v22 = vld [vmem:[#allocation21 + $0x6e0] sm:$0xff]  ;;  %v12796_v59 = vpack.c.bf16 %v7544_v15, %v7539_v28  ;;  %v7547_v17 = vld [vmem:[#allocation21 + $0x738] sm:$0xff]  ;;  %v7549_v34 = vld [vmem:[#allocation21 + $0x748] sm:$0xff] }
 0xd78   :  { %v16225_v33 = vadd.f32 %v7282_v38, %v7236_v36  ;;  %12449 = vmatprep.subr.bf16.mxu0 %v12448_v7  ;;  %12785 = vmatprep.subr.bf16.mxu1 %v12784_v31  ;;  %v12794_v38 = vpack.c.bf16 %v7533_v4, %v7528_v30  ;;  %v7538_v7 = vld [vmem:[#allocation21 + $0x6f0] sm:$0xff]  ;;  %v12462_v56 = vpack.c.bf16 %v7541_v45, %v7536_v22  ;;  %v7551_v53 = vld [vmem:[#allocation21 + $0x758] sm:$0xff]  ;;  %v7548_v36 = vld [vmem:[#allocation21 + $0x740] sm:$0xff] }
 0xd79   :  { %v7554_v31 = vld [vmem:[#allocation21 + $0x770] sm:$0xff]  ;;  %v12798_v3 = vpack.c.bf16 %v7543_v10, %v7538_v7  ;;  %v12464_v63 = vpack.c.bf16 %v7552_v20, %v7547_v17  ;;  %v7559_v11 = vld [vmem:[#allocation21 + $0x798] sm:$0xff]  ;;  %v7556_v18 = vld [vmem:[#allocation21 + $0x780] sm:$0xff] }
 0xd7a   :  { %v7546_v43 = vld [vmem:[#allocation21 + $0x730] sm:$0xff]  ;;  %v12800_v19 = vpack.c.bf16 %v7554_v31, %v7549_v34  ;;  %v7561_v58 = vld [vmem:[#allocation21 + $0x7a8] sm:$0xff]  ;;  %v7572_v39 = vld [vmem:[#allocation21 + $0x800] sm:$0xff] }
 0xd7b   :  { %12451 = vmatpush1.bf16.msra.mxu0 %v12450_v41  ;;  %12787 = vmatpush1.bf16.msra.mxu1 %v12786_v60  ;;  %v7553_v41 = vld [vmem:[#allocation21 + $0x768] sm:$0xff]  ;;  %v7562_v57 = vld [vmem:[#allocation21 + $0x7b0] sm:$0xff]  ;;  %v7571_v6 = vld [vmem:[#allocation21 + $0x7f8] sm:$0xff] }
 0xd7c   :  { %12453 = vmatprep.subr.bf16.mxu0 %v12452_v50  ;;  %12789 = vmatprep.subr.bf16.mxu1 %v12788_v35  ;;  %v7557_v60 = vld [vmem:[#allocation21 + $0x788] sm:$0xff]  ;;  %v7564_v50 = vld [vmem:[#allocation21 + $0x7c0] sm:$0xff]  ;;  %v12466_v35 = vpack.c.bf16 %v7551_v53, %v7546_v43  ;;  %v12802_v46 = vpack.c.bf16 %v7553_v41, %v7548_v36  ;;  %v7558_v9 = vld [vmem:[#allocation21 + $0x790] sm:$0xff] }
 0xd7d   :  { %v12468_v48 = vpack.c.bf16 %v7562_v57, %v7557_v60  ;;  %v12804_v54 = vpack.c.bf16 %v7564_v50, %v7559_v11  ;;  %v7569_v23 = vld [vmem:[#allocation21 + $0x7e8] sm:$0xff]  ;;  %v7566_v4 = vld [vmem:[#allocation21 + $0x7d0] sm:$0xff]  ;;  %v7568_v15 = vld [vmem:[#allocation21 + $0x7e0] sm:$0xff] }
 0xd7e   :  { %v7582_v22 = vld [vmem:[#allocation21 + $0x850] sm:$0xff]  ;;  %v7579_v45 = vld [vmem:[#allocation21 + $0x838] sm:$0xff]  ;;  %v7576_v10 = vld [vmem:[#allocation21 + $0x820] sm:$0xff] }
 0xd7f   :  { %12455 = vmatpush1.bf16.msra.mxu0 %v12454_v26  ;;  %12791 = vmatpush1.bf16.msra.mxu1 %v12790_v5  ;;  %v7563_v26 = vld [vmem:[#allocation21 + $0x7b8] sm:$0xff]  ;;  %v7581_v17 = vld [vmem:[#allocation21 + $0x848] sm:$0xff]  ;;  %v7578_v31 = vld [vmem:[#allocation21 + $0x830] sm:$0xff] }
 0xd80   :  { %12457 = vmatprep.subr.bf16.mxu0 %v12456_v32  ;;  %12793 = vmatprep.subr.bf16.mxu1 %v12792_v61  ;;  %v7567_v5 = vld [vmem:[#allocation21 + $0x7d8] sm:$0xff]  ;;  %v7574_v32 = vld [vmem:[#allocation21 + $0x810] sm:$0xff]  ;;  %v12470_v61 = vpack.c.bf16 %v7561_v58, %v7556_v18  ;;  %v12806_v30 = vpack.c.bf16 %v7563_v26, %v7558_v9  ;;  %v7592_v43 = vld [vmem:[#allocation21 + $0x8a0] sm:$0xff] }
 0xd81   :  { %v12472_v49 = vpack.c.bf16 %v7572_v39, %v7567_v5  ;;  %v12808_v28 = vpack.c.bf16 %v7574_v32, %v7569_v23  ;;  %v7589_v53 = vld [vmem:[#allocation21 + $0x888] sm:$0xff]  ;;  %v7586_v41 = vld [vmem:[#allocation21 + $0x870] sm:$0xff]  ;;  %v7591_v60 = vld [vmem:[#allocation21 + $0x898] sm:$0xff] }
 0xd82   :  { %v7588_v50 = vld [vmem:[#allocation21 + $0x880] sm:$0xff]  ;;  %v7602_v18 = vld [vmem:[#allocation21 + $0x8f0] sm:$0xff]  ;;  %v7599_v58 = vld [vmem:[#allocation21 + $0x8d8] sm:$0xff] }
 0xd83   :  { %12459 = vmatpush1.bf16.msra.mxu0 %v12458_v13  ;;  %12795 = vmatpush1.bf16.msra.mxu1 %v12794_v38  ;;  %v7573_v13 = vld [vmem:[#allocation21 + $0x808] sm:$0xff]  ;;  %v7596_v26 = vld [vmem:[#allocation21 + $0x8c0] sm:$0xff]  ;;  %v7598_v32 = vld [vmem:[#allocation21 + $0x8d0] sm:$0xff] }
 0xd84   :  { %12461 = vmatprep.subr.bf16.mxu0 %v12460_v37  ;;  %12797 = vmatprep.subr.bf16.mxu1 %v12796_v59  ;;  %v7577_v38 = vld [vmem:[#allocation21 + $0x828] sm:$0xff]  ;;  %v7584_v37 = vld [vmem:[#allocation21 + $0x860] sm:$0xff]  ;;  %v12474_v59 = vpack.c.bf16 %v7571_v6, %v7566_v4  ;;  %v12810_v7 = vpack.c.bf16 %v7573_v13, %v7568_v15  ;;  %v7606_v13 = vld [vmem:[#allocation21 + $0x910] sm:$0xff] }
 0xd85   :  { %v12476_v20 = vpack.c.bf16 %v7582_v22, %v7577_v38  ;;  %v12812_v34 = vpack.c.bf16 %v7584_v37, %v7579_v45  ;;  %v7601_v5 = vld [vmem:[#allocation21 + $0x8e8] sm:$0xff]  ;;  %v7612_v4 = vld [vmem:[#allocation21 + $0x940] sm:$0xff]  ;;  %v7611_v38 = vld [vmem:[#allocation21 + $0x938] sm:$0xff] }
 0xd86   :  { %v7609_v6 = vld [vmem:[#allocation21 + $0x928] sm:$0xff]  ;;  %v7608_v37 = vld [vmem:[#allocation21 + $0x920] sm:$0xff] }
 0xd87   :  { %12463 = vmatpush1.bf16.msra.mxu0 %v12462_v56  ;;  %12799 = vmatpush1.bf16.msra.mxu1 %v12798_v3  ;;  %v7583_v56 = vld [vmem:[#allocation21 + $0x858] sm:$0xff] }
 0xd88   :  { %12465 = vmatprep.subr.bf16.mxu0 %v12464_v63  ;;  %12801 = vmatprep.subr.bf16.mxu1 %v12800_v19  ;;  %v7587_v3 = vld [vmem:[#allocation21 + $0x878] sm:$0xff]  ;;  %v7594_v63 = vld [vmem:[#allocation21 + $0x8b0] sm:$0xff]  ;;  %v12478_v19 = vpack.c.bf16 %v7581_v17, %v7576_v10  ;;  %v12814_v36 = vpack.c.bf16 %v7583_v56, %v7578_v31  ;;  %v7616_v56 = vld [vmem:[#allocation21 + $0x960] sm:$0xff] }
 0xd89   :  { %v12480_v57 = vpack.c.bf16 %v7592_v43, %v7587_v3  ;;  %v12816_v11 = vpack.c.bf16 %v7594_v63, %v7589_v53  ;;  %v7622_v10 = vld [vmem:[#allocation21 + $0x990] sm:$0xff]  ;;  %v7619_v17 = vld [vmem:[#allocation21 + $0x978] sm:$0xff]  ;;  %v7621_v3 = vld [vmem:[#allocation21 + $0x988] sm:$0xff] }
 0xd8a   :  { %v7618_v63 = vld [vmem:[#allocation21 + $0x970] sm:$0xff] }
 0xd8b   :  { %12467 = vmatpush1.bf16.msra.mxu0 %v12466_v35  ;;  %12803 = vmatpush1.bf16.msra.mxu1 %v12802_v46  ;;  %v7593_v35 = vld [vmem:[#allocation21 + $0x8a8] sm:$0xff] }
 0xd8c   :  { %12469 = vmatprep.subr.bf16.mxu0 %v12468_v48  ;;  %12805 = vmatprep.subr.bf16.mxu1 %v12804_v54  ;;  %v7597_v46 = vld [vmem:[#allocation21 + $0x8c8] sm:$0xff]  ;;  %v7604_v48 = vld [vmem:[#allocation21 + $0x900] sm:$0xff]  ;;  %v12482_v54 = vpack.c.bf16 %v7591_v60, %v7586_v41  ;;  %v12818_v9 = vpack.c.bf16 %v7593_v35, %v7588_v50  ;;  %v7626_v35 = vld [vmem:[#allocation21 + $0x9b0] sm:$0xff] }
 0xd8d   :  { %v12484_v39 = vpack.c.bf16 %v7602_v18, %v7597_v46  ;;  %v12820_v23 = vpack.c.bf16 %v7604_v48, %v7599_v58  ;;  %v7632_v41 = vld [vmem:[#allocation21 + $0x9e0] sm:$0xff]  ;;  %v7629_v60 = vld [vmem:[#allocation21 + $0x9c8] sm:$0xff]  ;;  %v7631_v46 = vld [vmem:[#allocation21 + $0x9d8] sm:$0xff] }
 0xd8e   :  { %v7628_v48 = vld [vmem:[#allocation21 + $0x9c0] sm:$0xff] }
 0xd8f   :  { %12471 = vmatpush1.bf16.msra.mxu0 %v12470_v61  ;;  %12807 = vmatpush1.bf16.msra.mxu1 %v12806_v30  ;;  %v7603_v61 = vld [vmem:[#allocation21 + $0x8f8] sm:$0xff] }
 0xd90   :  { %12473 = vmatprep.subr.bf16.mxu0 %v12472_v49  ;;  %12809 = vmatprep.subr.bf16.mxu1 %v12808_v28  ;;  %v7607_v30 = vld [vmem:[#allocation21 + $0x918] sm:$0xff]  ;;  %v7614_v49 = vld [vmem:[#allocation21 + $0x950] sm:$0xff]  ;;  %v12486_v28 = vpack.c.bf16 %v7601_v5, %v7596_v26  ;;  %v12822_v15 = vpack.c.bf16 %v7603_v61, %v7598_v32 }
 0xd91   :  { %v12488_v22 = vpack.c.bf16 %v7612_v4, %v7607_v30  ;;  %v12824_v45 = vpack.c.bf16 %v7614_v49, %v7609_v6  ;;  %v7642_v26 = vld [vmem:[#allocation21 + $0xa30] sm:$0xff]  ;;  %v7639_v5 = vld [vmem:[#allocation21 + $0xa18] sm:$0xff]  ;;  %v7636_v4 = vld [vmem:[#allocation21 + $0xa00] sm:$0xff] }
 0xd92   :  { %v7641_v6 = vld [vmem:[#allocation21 + $0xa28] sm:$0xff]  ;;  %v7638_v49 = vld [vmem:[#allocation21 + $0xa10] sm:$0xff] }
 0xd93   :  { %12475 = vmatpush1.bf16.msra.mxu0 %v12474_v59  ;;  %12811 = vmatpush1.bf16.msra.mxu1 %v12810_v7  ;;  %v7613_v59 = vld [vmem:[#allocation21 + $0x948] sm:$0xff] }
 0xd94   :  { %12477 = vmatprep.subr.bf16.mxu0 %v12476_v20  ;;  %12813 = vmatprep.subr.bf16.mxu1 %v12812_v34  ;;  %v7617_v7 = vld [vmem:[#allocation21 + $0x968] sm:$0xff]  ;;  %v7624_v20 = vld [vmem:[#allocation21 + $0x9a0] sm:$0xff]  ;;  %v12490_v34 = vpack.c.bf16 %v7611_v38, %v7606_v13  ;;  %v12826_v31 = vpack.c.bf16 %v7613_v59, %v7608_v37  ;;  %v16228_v37 = vmax.f32 %v16189_v40, 0.0  ;;  %v7659_v40 = vld [vmem:[#allocation21 + $0xab8] sm:$0xff] }
 0xd95   :  { %v12492_v43 = vpack.c.bf16 %v7622_v10, %v7617_v7  ;;  %v12828_v53 = vpack.c.bf16 %v7624_v20, %v7619_v17  ;;  %v7652_v13 = vld [vmem:[#allocation21 + $0xa80] sm:$0xff]  ;;  %v7649_v38 = vld [vmem:[#allocation21 + $0xa68] sm:$0xff]  ;;  %v7646_v7 = vld [vmem:[#allocation21 + $0xa50] sm:$0xff]  ;;  %v16231_v20 = vmax.f32 %v16211_v21, 0.0 }
 0xd96   :  { %v7651_v10 = vld [vmem:[#allocation21 + $0xa78] sm:$0xff]  ;;  %v7648_v17 = vld [vmem:[#allocation21 + $0xa60] sm:$0xff] }
 0xd97   :  { %12479 = vmatpush1.bf16.msra.mxu0 %v12478_v19  ;;  %12815 = vmatpush1.bf16.msra.mxu1 %v12814_v36  ;;  %v7623_v19 = vld [vmem:[#allocation21 + $0x998] sm:$0xff] }
 0xd98   :  { %12481 = vmatprep.subr.bf16.mxu0 %v12480_v57  ;;  %12817 = vmatprep.subr.bf16.mxu1 %v12816_v11  ;;  %v7627_v36 = vld [vmem:[#allocation21 + $0x9b8] sm:$0xff]  ;;  %v7634_v57 = vld [vmem:[#allocation21 + $0x9f0] sm:$0xff]  ;;  %v12494_v11 = vpack.c.bf16 %v7621_v3, %v7616_v56  ;;  %v12830_v50 = vpack.c.bf16 %v7623_v19, %v7618_v63  ;;  %v7653_v56 = vld [vmem:[#allocation21 + $0xa88] sm:$0xff]  ;;  %v12506_v63 = vpack.c.bf16 %v7651_v10, %v7646_v7 }
 0xd99   :  { %v12496_v18 = vpack.c.bf16 %v7632_v41, %v7627_v36  ;;  %v12832_v58 = vpack.c.bf16 %v7634_v57, %v7629_v60  ;;  %v7657_v3 = vld [vmem:[#allocation21 + $0xaa8] sm:$0xff]  ;;  %v12842_v21 = vpack.c.bf16 %v7653_v56, %v7648_v17  ;;  %v7656_v36 = vld [vmem:[#allocation21 + $0xaa0] sm:$0xff]  ;;  %v7658_v60 = vld [vmem:[#allocation21 + $0xab0] sm:$0xff] }
 0xd9a   :  { %v7661_v41 = vld [vmem:[#allocation21 + $0xac8] sm:$0xff]  ;;  %v7692_v7 = vld [vmem:[#allocation21 + $0xbc0] sm:$0xff]  ;;  %v7694_v17 = vld [vmem:[#allocation21 + $0xbd0] sm:$0xff] }
 0xd9b   :  { %12483 = vmatpush1.bf16.msra.mxu0 %v12482_v54  ;;  %12819 = vmatpush1.bf16.msra.mxu1 %v12818_v9  ;;  %v7633_v54 = vld [vmem:[#allocation21 + $0x9e8] sm:$0xff] }
 0xd9c   :  { %12485 = vmatprep.subr.bf16.mxu0 %v12484_v39  ;;  %12821 = vmatprep.subr.bf16.mxu1 %v12820_v23  ;;  %v7637_v9 = vld [vmem:[#allocation21 + $0xa08] sm:$0xff]  ;;  %v7644_v39 = vld [vmem:[#allocation21 + $0xa40] sm:$0xff]  ;;  %v12498_v23 = vpack.c.bf16 %v7631_v46, %v7626_v35  ;;  %v12834_v32 = vpack.c.bf16 %v7633_v54, %v7628_v48 }
 0xd9d   :  { %v12500_v61 = vpack.c.bf16 %v7642_v26, %v7637_v9  ;;  %v12836_v30 = vpack.c.bf16 %v7644_v39, %v7639_v5  ;;  %v7672_v35 = vld [vmem:[#allocation21 + $0xb20] sm:$0xff]  ;;  %v7669_v46 = vld [vmem:[#allocation21 + $0xb08] sm:$0xff]  ;;  %v7666_v9 = vld [vmem:[#allocation21 + $0xaf0] sm:$0xff] }
 0xd9e   :  { %v7671_v26 = vld [vmem:[#allocation21 + $0xb18] sm:$0xff]  ;;  %v7668_v5 = vld [vmem:[#allocation21 + $0xb00] sm:$0xff]  ;;  %v7689_v10 = vld [vmem:[#allocation21 + $0xba8] sm:$0xff] }
 0xd9f   :  { %12487 = vmatpush1.bf16.msra.mxu0 %v12486_v28  ;;  %12823 = vmatpush1.bf16.msra.mxu1 %v12822_v15  ;;  %v7643_v28 = vld [vmem:[#allocation21 + $0xa38] sm:$0xff] }
 0xda0   :  { %12489 = vmatprep.subr.bf16.mxu0 %v12488_v22  ;;  %12825 = vmatprep.subr.bf16.mxu1 %v12824_v45  ;;  %v7647_v15 = vld [vmem:[#allocation21 + $0xa58] sm:$0xff]  ;;  %v7654_v22 = vld [vmem:[#allocation21 + $0xa90] sm:$0xff]  ;;  %v12502_v45 = vpack.c.bf16 %v7641_v6, %v7636_v4  ;;  %v12838_v59 = vpack.c.bf16 %v7643_v28, %v7638_v49  ;;  %v7684_v4 = vld [vmem:[#allocation21 + $0xb80] sm:$0xff]  ;;  %v12514_v6 = vpack.c.bf16 %v7671_v26, %v7666_v9 }
 0xda1   :  { %v7709_v9 = vld [vmem:[#allocation21 + $0xc48] sm:$0xff]  ;;  %v7714_v26 = vld [vmem:[#allocation21 + $0xc70] sm:$0xff] }
 0xda3   :  { %12491 = vmatpush1.bf16.msra.mxu0 %v12490_v34  ;;  %12827 = vmatpush1.bf16.msra.mxu1 %v12826_v31  ;;  %v12504_v34 = vpack.c.bf16 %v7652_v13, %v7647_v15  ;;  %v12840_v31 = vpack.c.bf16 %v7654_v22, %v7649_v38  ;;  %v7676_v15 = vld [vmem:[#allocation21 + $0xb40] sm:$0xff]  ;;  %v7681_v13 = vld [vmem:[#allocation21 + $0xb68] sm:$0xff]  ;;  %v7678_v38 = vld [vmem:[#allocation21 + $0xb50] sm:$0xff] }
 0xda4   :  { %12493 = vmatprep.subr.bf16.mxu0 %v12492_v43  ;;  %12829 = vmatprep.subr.bf16.mxu1 %v12828_v53  ;;  %v7662_v43 = vld [vmem:[#allocation21 + $0xad0] sm:$0xff]  ;;  %v7664_v53 = vld [vmem:[#allocation21 + $0xae0] sm:$0xff] }
 0xda5   :  { %v12508_v19 = vpack.c.bf16 %v7662_v43, %v7657_v3  ;;  %v12844_v57 = vpack.c.bf16 %v7664_v53, %v7659_v40  ;;  %v7686_v3 = vld [vmem:[#allocation21 + $0xb90] sm:$0xff]  ;;  %v7691_v43 = vld [vmem:[#allocation21 + $0xbb8] sm:$0xff]  ;;  %v7688_v40 = vld [vmem:[#allocation21 + $0xba0] sm:$0xff]  ;;  %v12856_v53 = vpack.c.bf16 %v7694_v17, %v7689_v10 }
 0xda6   :  { %v7718_v10 = vld [vmem:[#allocation21 + $0xc90] sm:$0xff] }
 0xda7   :  { %12495 = vmatpush1.bf16.msra.mxu0 %v12494_v11  ;;  %12831 = vmatpush1.bf16.msra.mxu1 %v12830_v50  ;;  %v7663_v11 = vld [vmem:[#allocation21 + $0xad8] sm:$0xff] }
 0xda8   :  { %12497 = vmatprep.subr.bf16.mxu0 %v12496_v18  ;;  %12833 = vmatprep.subr.bf16.mxu1 %v12832_v58  ;;  %v7667_v50 = vld [vmem:[#allocation21 + $0xaf8] sm:$0xff]  ;;  %v7674_v18 = vld [vmem:[#allocation21 + $0xb30] sm:$0xff]  ;;  %v12510_v58 = vpack.c.bf16 %v7661_v41, %v7656_v36  ;;  %v12846_v48 = vpack.c.bf16 %v7663_v11, %v7658_v60  ;;  %v7704_v41 = vld [vmem:[#allocation21 + $0xc20] sm:$0xff]  ;;  %v12522_v60 = vpack.c.bf16 %v7691_v43, %v7686_v3 }
 0xda9   :  { %v12512_v54 = vpack.c.bf16 %v7672_v35, %v7667_v50  ;;  %v12848_v39 = vpack.c.bf16 %v7674_v18, %v7669_v46  ;;  %v7699_v36 = vld [vmem:[#allocation21 + $0xbf8] sm:$0xff]  ;;  %v7696_v50 = vld [vmem:[#allocation21 + $0xbe0] sm:$0xff]  ;;  %v7701_v35 = vld [vmem:[#allocation21 + $0xc08] sm:$0xff] }
 0xdaa   :  { %v7698_v46 = vld [vmem:[#allocation21 + $0xbf0] sm:$0xff]  ;;  %v12860_v18 = vpack.c.bf16 %v7704_v41, %v7699_v36  ;;  %v7729_v3 = vld [vmem:[#allocation21 + $0xce8] sm:$0xff]  ;;  %v7728_v36 = vld [vmem:[#allocation21 + $0xce0] sm:$0xff] }
 0xdab   :  { %12499 = vmatpush1.bf16.msra.mxu0 %v12498_v23  ;;  %12835 = vmatpush1.bf16.msra.mxu1 %v12834_v32  ;;  %v7673_v23 = vld [vmem:[#allocation21 + $0xb28] sm:$0xff]  ;;  %v7734_v43 = vld [vmem:[#allocation21 + $0xd10] sm:$0xff] }
 0xdac   :  { %12501 = vmatprep.subr.bf16.mxu0 %v12500_v61  ;;  %12837 = vmatprep.subr.bf16.mxu1 %v12836_v30  ;;  %v7677_v32 = vld [vmem:[#allocation21 + $0xb48] sm:$0xff]  ;;  %v7682_v61 = vld [vmem:[#allocation21 + $0xb70] sm:$0xff]  ;;  %v7679_v30 = vld [vmem:[#allocation21 + $0xb58] sm:$0xff]  ;;  %v12850_v49 = vpack.c.bf16 %v7673_v23, %v7668_v5  ;;  %v12526_v5 = vpack.c.bf16 %v7701_v35, %v7696_v50  ;;  %v12872_v41 = vpack.c.bf16 %v7734_v43, %v7729_v3 }
 0xdad   :  { %v12516_v28 = vpack.c.bf16 %v7682_v61, %v7677_v32  ;;  %v12852_v22 = vpack.c.bf16 %v7684_v4, %v7679_v30  ;;  %v7706_v32 = vld [vmem:[#allocation21 + $0xc30] sm:$0xff]  ;;  %v7711_v61 = vld [vmem:[#allocation21 + $0xc58] sm:$0xff]  ;;  %v7708_v30 = vld [vmem:[#allocation21 + $0xc40] sm:$0xff]  ;;  %v12864_v4 = vpack.c.bf16 %v7714_v26, %v7709_v9 }
 0xdae   :  { %8327 = vmatmul.mubr.f32.vlgmr.msra.gmra.mrb[56].mxu0 %v16228_v37  ;;  %8753 = vmatmul.mubr.f32.vlgmr.msra.gmra.mrb[52].mxu1 %v16228_v37  ;;  %v7739_v50 = vld [vmem:[#allocation21 + $0xd38] sm:$0xff]  ;;  %v7744_v35 = vld [vmem:[#allocation21 + $0xd60] sm:$0xff]  ;;  %v7738_v9 = vld [vmem:[#allocation21 + $0xd30] sm:$0xff] }
 0xdaf   :  { %12503 = vmatpush1.bf16.msra.mxu0 %v12502_v45  ;;  %8397 = vmatprep.mubr.f32.mxu0 %v16231_v20  ;;  %v7683_v45 = vld [vmem:[#allocation21 + $0xb78] sm:$0xff]  ;;  %v12876_v26 = vpack.c.bf16 %v7744_v35, %v7739_v50  ;;  %v7758_v3 = vld [vmem:[#allocation21 + $0xdd0] sm:$0xff]  ;;  %v7768_v50 = vld [vmem:[#allocation21 + $0xe20] sm:$0xff] }
 0xdb0   :  { %12839 = vmatpush1.bf16.msra.mxu1 %v12838_v59  ;;  %8823 = vmatprep.mubr.f32.mxu1 %v16231_v20  ;;  %v7687_v59 = vld [vmem:[#allocation21 + $0xb98] sm:$0xff] }
 0xdb1   :  { %12505 = vmatprep.subr.bf16.mxu0 %v12504_v34  ;;  %12841 = vmatprep.subr.bf16.mxu1 %v12840_v31  ;;  %v12518_v34 = vpack.c.bf16 %v7681_v13, %v7676_v15  ;;  %v12854_v31 = vpack.c.bf16 %v7683_v45, %v7678_v38  ;;  %v12520_v56 = vpack.c.bf16 %v7692_v7, %v7687_v59  ;;  %v7719_v15 = vld [vmem:[#allocation21 + $0xc98] sm:$0xff]  ;;  %v7724_v13 = vld [vmem:[#allocation21 + $0xcc0] sm:$0xff]  ;;  %v7721_v7 = vld [vmem:[#allocation21 + $0xca8] sm:$0xff] }
 0xdb2   :  { %v12530_v38 = vpack.c.bf16 %v7711_v61, %v7706_v32  ;;  %v7716_v59 = vld [vmem:[#allocation21 + $0xc80] sm:$0xff]  ;;  %v12868_v17 = vpack.c.bf16 %v7724_v13, %v7719_v15  ;;  %v7749_v32 = vld [vmem:[#allocation21 + $0xd88] sm:$0xff]  ;;  %v7754_v61 = vld [vmem:[#allocation21 + $0xdb0] sm:$0xff] }
 0xdb3   :  { %12507 = vmatpush1.bf16.msra.mxu0 %v12506_v63  ;;  %v7693_v63 = vld [vmem:[#allocation21 + $0xbc8] sm:$0xff]  ;;  %v7748_v15 = vld [vmem:[#allocation21 + $0xd80] sm:$0xff]  ;;  %v12880_v13 = vpack.c.bf16 %v7754_v61, %v7749_v32  ;;  %v7778_v32 = vld [vmem:[#allocation21 + $0xe70] sm:$0xff] }
 0xdb4   :  { %12843 = vmatpush1.bf16.msra.mxu1 %v12842_v21  ;;  %12509 = vmatprep.subr.bf16.mxu0 %v12508_v19  ;;  %v7697_v21 = vld [vmem:[#allocation21 + $0xbe8] sm:$0xff]  ;;  %v7702_v19 = vld [vmem:[#allocation21 + $0xc10] sm:$0xff] }
 0xdb5   :  { %12845 = vmatprep.subr.bf16.mxu1 %v12844_v57  ;;  %v12858_v57 = vpack.c.bf16 %v7693_v63, %v7688_v40  ;;  %v12524_v11 = vpack.c.bf16 %v7702_v19, %v7697_v21  ;;  %v12534_v40 = vpack.c.bf16 %v7721_v7, %v7716_v59  ;;  %v7726_v21 = vld [vmem:[#allocation21 + $0xcd0] sm:$0xff]  ;;  %v7731_v19 = vld [vmem:[#allocation21 + $0xcf8] sm:$0xff]  ;;  %v7764_v7 = vld [vmem:[#allocation21 + $0xe00] sm:$0xff] }
 0xdb6   :  { %v7759_v59 = vld [vmem:[#allocation21 + $0xdd8] sm:$0xff] }
 0xdb7   :  { %12511 = vmatpush1.bf16.msra.mxu0 %v12510_v58  ;;  %v7703_v58 = vld [vmem:[#allocation21 + $0xc18] sm:$0xff]  ;;  %v12884_v43 = vpack.c.bf16 %v7764_v7, %v7759_v59  ;;  %v7788_v59 = vld [vmem:[#allocation21 + $0xec0] sm:$0xff] }
 0xdb8   :  { %12847 = vmatpush1.bf16.msra.mxu1 %v12846_v48  ;;  %12513 = vmatprep.subr.bf16.mxu0 %v12512_v54  ;;  %v7707_v48 = vld [vmem:[#allocation21 + $0xc38] sm:$0xff]  ;;  %v7712_v54 = vld [vmem:[#allocation21 + $0xc60] sm:$0xff] }
 0xdb9   :  { %12849 = vmatprep.subr.bf16.mxu1 %v12848_v39  ;;  %v12862_v39 = vpack.c.bf16 %v7703_v58, %v7698_v46  ;;  %v12528_v23 = vpack.c.bf16 %v7712_v54, %v7707_v48  ;;  %v12538_v46 = vpack.c.bf16 %v7731_v19, %v7726_v21  ;;  %v7736_v48 = vld [vmem:[#allocation21 + $0xd20] sm:$0xff]  ;;  %v7741_v54 = vld [vmem:[#allocation21 + $0xd48] sm:$0xff]  ;;  %v7774_v19 = vld [vmem:[#allocation21 + $0xe50] sm:$0xff] }
 0xdba   :  { %v7769_v21 = vld [vmem:[#allocation21 + $0xe28] sm:$0xff] }
 0xdbb   :  { %12515 = vmatpush1.bf16.msra.mxu0 %v12514_v6  ;;  %v7713_v6 = vld [vmem:[#allocation21 + $0xc68] sm:$0xff]  ;;  %v12888_v35 = vpack.c.bf16 %v7774_v19, %v7769_v21  ;;  %v7798_v19 = vld [vmem:[#allocation21 + $0xf10] sm:$0xff] }
 0xdbc   :  { %12851 = vmatpush1.bf16.msra.mxu1 %v12850_v49  ;;  %12517 = vmatprep.subr.bf16.mxu0 %v12516_v28  ;;  %v7717_v49 = vld [vmem:[#allocation21 + $0xc88] sm:$0xff]  ;;  %v7722_v28 = vld [vmem:[#allocation21 + $0xcb0] sm:$0xff] }
 0xdbd   :  { %12853 = vmatprep.subr.bf16.mxu1 %v12852_v22  ;;  %v12866_v22 = vpack.c.bf16 %v7713_v6, %v7708_v30  ;;  %v12532_v45 = vpack.c.bf16 %v7722_v28, %v7717_v49  ;;  %v12542_v30 = vpack.c.bf16 %v7741_v54, %v7736_v48  ;;  %v7746_v49 = vld [vmem:[#allocation21 + $0xd70] sm:$0xff]  ;;  %v7751_v28 = vld [vmem:[#allocation21 + $0xd98] sm:$0xff]  ;;  %v7784_v54 = vld [vmem:[#allocation21 + $0xea0] sm:$0xff] }
 0xdbe   :  { %v7779_v48 = vld [vmem:[#allocation21 + $0xe78] sm:$0xff] }
 0xdbf   :  { %12519 = vmatpush1.bf16.msra.mxu0 %v12518_v34  ;;  %v7723_v34 = vld [vmem:[#allocation21 + $0xcb8] sm:$0xff]  ;;  %v12892_v61 = vpack.c.bf16 %v7784_v54, %v7779_v48  ;;  %v7808_v48 = vld [vmem:[#allocation21 + $0xf60] sm:$0xff] }
 0xdc0   :  { %12855 = vmatpush1.bf16.msra.mxu1 %v12854_v31  ;;  %12521 = vmatprep.subr.bf16.mxu0 %v12520_v56  ;;  %v7727_v31 = vld [vmem:[#allocation21 + $0xcd8] sm:$0xff]  ;;  %v7732_v56 = vld [vmem:[#allocation21 + $0xd00] sm:$0xff] }
 0xdc1   :  { %12857 = vmatprep.subr.bf16.mxu1 %v12856_v53  ;;  %v12870_v53 = vpack.c.bf16 %v7723_v34, %v7718_v10  ;;  %v12536_v63 = vpack.c.bf16 %v7732_v56, %v7727_v31  ;;  %v12546_v10 = vpack.c.bf16 %v7751_v28, %v7746_v49  ;;  %v7756_v31 = vld [vmem:[#allocation21 + $0xdc0] sm:$0xff]  ;;  %v7761_v56 = vld [vmem:[#allocation21 + $0xde8] sm:$0xff]  ;;  %v7794_v28 = vld [vmem:[#allocation21 + $0xef0] sm:$0xff] }
 0xdc2   :  { %v7789_v49 = vld [vmem:[#allocation21 + $0xec8] sm:$0xff] }
 0xdc3   :  { %12523 = vmatpush1.bf16.msra.mxu0 %v12522_v60  ;;  %v7733_v60 = vld [vmem:[#allocation21 + $0xd08] sm:$0xff]  ;;  %v12896_v7 = vpack.c.bf16 %v7794_v28, %v7789_v49  ;;  %v7818_v28 = vld [vmem:[#allocation21 + $0xfb0] sm:$0xff] }
 0xdc4   :  { %12859 = vmatpush1.bf16.msra.mxu1 %v12858_v57  ;;  %12525 = vmatprep.subr.bf16.mxu0 %v12524_v11  ;;  %v7737_v57 = vld [vmem:[#allocation21 + $0xd28] sm:$0xff]  ;;  %v7742_v11 = vld [vmem:[#allocation21 + $0xd50] sm:$0xff] }
 0xdc5   :  { %12861 = vmatprep.subr.bf16.mxu1 %v12860_v18  ;;  %v12874_v18 = vpack.c.bf16 %v7733_v60, %v7728_v36  ;;  %v12540_v58 = vpack.c.bf16 %v7742_v11, %v7737_v57  ;;  %v12550_v36 = vpack.c.bf16 %v7761_v56, %v7756_v31  ;;  %v7766_v57 = vld [vmem:[#allocation21 + $0xe10] sm:$0xff]  ;;  %v7771_v11 = vld [vmem:[#allocation21 + $0xe38] sm:$0xff]  ;;  %v7804_v56 = vld [vmem:[#allocation21 + $0xf40] sm:$0xff] }
 0xdc6   :  { %v7799_v31 = vld [vmem:[#allocation21 + $0xf18] sm:$0xff]  ;;  %v7821_v49 = vld [vmem:[#allocation21 + $0xfc8] sm:$0xff] }
 0xdc7   :  { %12527 = vmatpush1.bf16.msra.mxu0 %v12526_v5  ;;  %v7743_v5 = vld [vmem:[#allocation21 + $0xd58] sm:$0xff]  ;;  %v12900_v21 = vpack.c.bf16 %v7804_v56, %v7799_v31  ;;  %v7828_v31 = vld [vmem:[#allocation21 + $0x1000] sm:$0xff] }
 0xdc8   :  { %12863 = vmatpush1.bf16.msra.mxu1 %v12862_v39  ;;  %12529 = vmatprep.subr.bf16.mxu0 %v12528_v23  ;;  %v7747_v39 = vld [vmem:[#allocation21 + $0xd78] sm:$0xff]  ;;  %v7752_v23 = vld [vmem:[#allocation21 + $0xda0] sm:$0xff] }
 0xdc9   :  { %12865 = vmatprep.subr.bf16.mxu1 %v12864_v4  ;;  %v12878_v4 = vpack.c.bf16 %v7743_v5, %v7738_v9  ;;  %v12544_v6 = vpack.c.bf16 %v7752_v23, %v7747_v39  ;;  %v12554_v9 = vpack.c.bf16 %v7771_v11, %v7766_v57  ;;  %v7776_v39 = vld [vmem:[#allocation21 + $0xe60] sm:$0xff]  ;;  %v7781_v23 = vld [vmem:[#allocation21 + $0xe88] sm:$0xff] }
 0xdca   :  { %v7809_v11 = vld [vmem:[#allocation21 + $0xf68] sm:$0xff] }
 0xdcb   :  { %12531 = vmatpush1.bf16.msra.mxu0 %v12530_v38  ;;  %v7753_v38 = vld [vmem:[#allocation21 + $0xda8] sm:$0xff] }
 0xdcc   :  { %12867 = vmatpush1.bf16.msra.mxu1 %v12866_v22  ;;  %12533 = vmatprep.subr.bf16.mxu0 %v12532_v45  ;;  %v7757_v22 = vld [vmem:[#allocation21 + $0xdc8] sm:$0xff]  ;;  %v7762_v45 = vld [vmem:[#allocation21 + $0xdf0] sm:$0xff] }
 0xdcd   :  { %12869 = vmatprep.subr.bf16.mxu1 %v12868_v17  ;;  %v12882_v17 = vpack.c.bf16 %v7753_v38, %v7748_v15  ;;  %v12548_v34 = vpack.c.bf16 %v7762_v45, %v7757_v22  ;;  %v12558_v15 = vpack.c.bf16 %v7781_v23, %v7776_v39  ;;  %v7786_v22 = vld [vmem:[#allocation21 + $0xeb0] sm:$0xff]  ;;  %v7791_v45 = vld [vmem:[#allocation21 + $0xed8] sm:$0xff]  ;;  %v16242_v39 = vmax.f32 %v16222_v16, 0.0 }
 0xdcf   :  { %12535 = vmatpush1.bf16.msra.mxu0 %v12534_v40  ;;  %v7763_v40 = vld [vmem:[#allocation21 + $0xdf8] sm:$0xff] }
 0xdd0   :  { %12871 = vmatpush1.bf16.msra.mxu1 %v12870_v53  ;;  %12537 = vmatprep.subr.bf16.mxu0 %v12536_v63  ;;  %v7767_v53 = vld [vmem:[#allocation21 + $0xe18] sm:$0xff]  ;;  %v7772_v63 = vld [vmem:[#allocation21 + $0xe40] sm:$0xff] }
 0xdd1   :  { %12873 = vmatprep.subr.bf16.mxu1 %v12872_v41  ;;  %v12886_v41 = vpack.c.bf16 %v7763_v40, %v7758_v3  ;;  %v12552_v60 = vpack.c.bf16 %v7772_v63, %v7767_v53  ;;  %v12562_v3 = vpack.c.bf16 %v7791_v45, %v7786_v22  ;;  %v7796_v53 = vld [vmem:[#allocation21 + $0xf00] sm:$0xff]  ;;  %v7801_v63 = vld [vmem:[#allocation21 + $0xf28] sm:$0xff]  ;;  %v7834_v45 = vld [vmem:[#allocation21 + $0x1030] sm:$0xff] }
 0xdd2   :  { %v12566_v57 = vpack.c.bf16 %v7801_v63, %v7796_v53  ;;  %v7829_v22 = vld [vmem:[#allocation21 + $0x1008] sm:$0xff]  ;;  %v7839_v53 = vld [vmem:[#allocation21 + $0x1058] sm:$0xff]  ;;  %v7844_v63 = vld [vmem:[#allocation21 + $0x1080] sm:$0xff] }
 0xdd3   :  { %12539 = vmatpush1.bf16.msra.mxu0 %v12538_v46  ;;  %v7773_v46 = vld [vmem:[#allocation21 + $0xe48] sm:$0xff]  ;;  %v12912_v56 = vpack.c.bf16 %v7834_v45, %v7829_v22  ;;  %v7858_v22 = vld [vmem:[#allocation21 + $0x10f0] sm:$0xff] }
 0xdd4   :  { %12875 = vmatpush1.bf16.msra.mxu1 %v12874_v18  ;;  %12541 = vmatprep.subr.bf16.mxu0 %v12540_v58  ;;  %v7777_v18 = vld [vmem:[#allocation21 + $0xe68] sm:$0xff]  ;;  %v7782_v58 = vld [vmem:[#allocation21 + $0xe90] sm:$0xff] }
 0xdd5   :  { %12877 = vmatprep.subr.bf16.mxu1 %v12876_v26  ;;  %v12890_v26 = vpack.c.bf16 %v7773_v46, %v7768_v50  ;;  %v12556_v5 = vpack.c.bf16 %v7782_v58, %v7777_v18  ;;  %v7814_v50 = vld [vmem:[#allocation21 + $0xf90] sm:$0xff]  ;;  %v7811_v58 = vld [vmem:[#allocation21 + $0xf78] sm:$0xff] }
 0xdd6   :  { %v7806_v18 = vld [vmem:[#allocation21 + $0xf50] sm:$0xff]  ;;  %v12904_v23 = vpack.c.bf16 %v7814_v50, %v7809_v11  ;;  %v12916_v11 = vpack.c.bf16 %v7844_v63, %v7839_v53  ;;  %v7843_v50 = vld [vmem:[#allocation21 + $0x1078] sm:$0xff]  ;;  %v7868_v53 = vld [vmem:[#allocation21 + $0x1140] sm:$0xff] }
 0xdd7   :  { %12543 = vmatpush1.bf16.msra.mxu0 %v12542_v30  ;;  %v7783_v30 = vld [vmem:[#allocation21 + $0xe98] sm:$0xff] }
 0xdd8   :  { %12879 = vmatpush1.bf16.msra.mxu1 %v12878_v4  ;;  %12545 = vmatprep.subr.bf16.mxu0 %v12544_v6  ;;  %v7787_v4 = vld [vmem:[#allocation21 + $0xeb8] sm:$0xff]  ;;  %v7792_v6 = vld [vmem:[#allocation21 + $0xee0] sm:$0xff] }
 0xdd9   :  { %12881 = vmatprep.subr.bf16.mxu1 %v12880_v13  ;;  %v12894_v13 = vpack.c.bf16 %v7783_v30, %v7778_v32  ;;  %v12560_v38 = vpack.c.bf16 %v7792_v6, %v7787_v4  ;;  %v7819_v32 = vld [vmem:[#allocation21 + $0xfb8] sm:$0xff]  ;;  %v7816_v6 = vld [vmem:[#allocation21 + $0xfa0] sm:$0xff] }
 0xddb   :  { %12547 = vmatpush1.bf16.msra.mxu0 %v12546_v10  ;;  %v7793_v10 = vld [vmem:[#allocation21 + $0xee8] sm:$0xff] }
 0xddc   :  { %12883 = vmatpush1.bf16.msra.mxu1 %v12882_v17  ;;  %12549 = vmatprep.subr.bf16.mxu0 %v12548_v34  ;;  %v7797_v17 = vld [vmem:[#allocation21 + $0xf08] sm:$0xff]  ;;  %v7802_v34 = vld [vmem:[#allocation21 + $0xf30] sm:$0xff] }
 0xddd   :  { %12885 = vmatprep.subr.bf16.mxu1 %v12884_v43  ;;  %v12898_v43 = vpack.c.bf16 %v7793_v10, %v7788_v59  ;;  %v12564_v40 = vpack.c.bf16 %v7802_v34, %v7797_v17  ;;  %v12574_v59 = vpack.c.bf16 %v7821_v49, %v7816_v6  ;;  %v7826_v17 = vld [vmem:[#allocation21 + $0xff0] sm:$0xff]  ;;  %v7831_v34 = vld [vmem:[#allocation21 + $0x1018] sm:$0xff]  ;;  %v7864_v49 = vld [vmem:[#allocation21 + $0x1120] sm:$0xff] }
 0xdde   :  { %v7859_v6 = vld [vmem:[#allocation21 + $0x10f8] sm:$0xff] }
 0xddf   :  { %12551 = vmatpush1.bf16.msra.mxu0 %v12550_v36  ;;  %v7803_v36 = vld [vmem:[#allocation21 + $0xf38] sm:$0xff]  ;;  %v12924_v45 = vpack.c.bf16 %v7864_v49, %v7859_v6  ;;  %v7888_v6 = vld [vmem:[#allocation21 + $0x11e0] sm:$0xff] }
 0xde0   :  { %12887 = vmatpush1.bf16.msra.mxu1 %v12886_v41  ;;  %12553 = vmatprep.subr.bf16.mxu0 %v12552_v60  ;;  %v7807_v41 = vld [vmem:[#allocation21 + $0xf58] sm:$0xff]  ;;  %v7812_v60 = vld [vmem:[#allocation21 + $0xf80] sm:$0xff]  ;;  %v12902_v46 = vpack.c.bf16 %v7803_v36, %v7798_v19 }
 0xde1   :  { %12889 = vmatprep.subr.bf16.mxu1 %v12888_v35  ;;  %v16238_v35 = vmax.f32 %v16205_v52, 0.0  ;;  %v12568_v54 = vpack.c.bf16 %v7812_v60, %v7807_v41  ;;  %v7824_v52 = vld [vmem:[#allocation21 + $0xfe0] sm:$0xff]  ;;  %v7841_v60 = vld [vmem:[#allocation21 + $0x1068] sm:$0xff] }
 0xde2   :  { %v12908_v16 = vpack.c.bf16 %v7824_v52, %v7819_v32  ;;  %v7836_v41 = vld [vmem:[#allocation21 + $0x1040] sm:$0xff] }
 0xde3   :  { %12555 = vmatpush1.bf16.msra.mxu0 %v12554_v9  ;;  %v7813_v9 = vld [vmem:[#allocation21 + $0xf88] sm:$0xff]  ;;  %v7848_v32 = vld [vmem:[#allocation21 + $0x10a0] sm:$0xff] }
 0xde4   :  { %12891 = vmatpush1.bf16.msra.mxu1 %v12890_v26  ;;  %12557 = vmatprep.subr.bf16.mxu0 %v12556_v5  ;;  %v7817_v26 = vld [vmem:[#allocation21 + $0xfa8] sm:$0xff]  ;;  %v7822_v5 = vld [vmem:[#allocation21 + $0xfd0] sm:$0xff]  ;;  %v12906_v30 = vpack.c.bf16 %v7813_v9, %v7808_v48 }
 0xde5   :  { %12893 = vmatprep.subr.bf16.mxu1 %v12892_v61  ;;  %v12570_v61 = vpack.c.bf16 %v7811_v58, %v7806_v18  ;;  %v12572_v4 = vpack.c.bf16 %v7822_v5, %v7817_v26  ;;  %v7852_v18 = vld [vmem:[#allocation21 + $0x10c0] sm:$0xff]  ;;  %v7849_v58 = vld [vmem:[#allocation21 + $0x10a8] sm:$0xff]  ;;  %v7854_v48 = vld [vmem:[#allocation21 + $0x10d0] sm:$0xff] }
 0xde6   :  { %v7846_v5 = vld [vmem:[#allocation21 + $0x1090] sm:$0xff]  ;;  %v12920_v52 = vpack.c.bf16 %v7854_v48, %v7849_v58 }
 0xde7   :  { %12559 = vmatpush1.bf16.msra.mxu0 %v12558_v15  ;;  %v7823_v15 = vld [vmem:[#allocation21 + $0xfd8] sm:$0xff]  ;;  %v7878_v58 = vld [vmem:[#allocation21 + $0x1190] sm:$0xff] }
 0xde8   :  { %12895 = vmatpush1.bf16.msra.mxu1 %v12894_v13  ;;  %12561 = vmatprep.subr.bf16.mxu0 %v12560_v38  ;;  %v7827_v13 = vld [vmem:[#allocation21 + $0xff8] sm:$0xff]  ;;  %v7832_v38 = vld [vmem:[#allocation21 + $0x1020] sm:$0xff] }
 0xde9   :  { %12897 = vmatprep.subr.bf16.mxu1 %v12896_v7  ;;  %v12910_v7 = vpack.c.bf16 %v7823_v15, %v7818_v28  ;;  %v12576_v10 = vpack.c.bf16 %v7832_v38, %v7827_v13  ;;  %v7856_v13 = vld [vmem:[#allocation21 + $0x10e0] sm:$0xff]  ;;  %v7861_v38 = vld [vmem:[#allocation21 + $0x1108] sm:$0xff] }
 0xdeb   :  { %12563 = vmatpush1.bf16.msra.mxu0 %v12562_v3  ;;  %v7833_v3 = vld [vmem:[#allocation21 + $0x1028] sm:$0xff] }
 0xdec   :  { %12899 = vmatpush1.bf16.msra.mxu1 %v12898_v43  ;;  %12565 = vmatprep.subr.bf16.mxu0 %v12564_v40  ;;  %v7837_v43 = vld [vmem:[#allocation21 + $0x1048] sm:$0xff]  ;;  %v7842_v40 = vld [vmem:[#allocation21 + $0x1070] sm:$0xff]  ;;  %v12914_v19 = vpack.c.bf16 %v7833_v3, %v7828_v31  ;;  %v12590_v31 = vpack.c.bf16 %v7861_v38, %v7856_v13  ;;  %v7899_v13 = vld [vmem:[#allocation21 + $0x1238] sm:$0xff] }
 0xded   :  { %12901 = vmatprep.subr.bf16.mxu1 %v12900_v21  ;;  %v12578_v21 = vpack.c.bf16 %v7831_v34, %v7826_v17  ;;  %v12580_v36 = vpack.c.bf16 %v7842_v40, %v7837_v43  ;;  %v7869_v17 = vld [vmem:[#allocation21 + $0x1148] sm:$0xff]  ;;  %v7874_v34 = vld [vmem:[#allocation21 + $0x1170] sm:$0xff]  ;;  %v7871_v40 = vld [vmem:[#allocation21 + $0x1158] sm:$0xff] }
 0xdee   :  { %8398 = vmatmul.mubr.f32.vlgmr.msra.gmra.mrb[56].mxu0 %v16238_v35  ;;  %v7866_v43 = vld [vmem:[#allocation21 + $0x1130] sm:$0xff]  ;;  %v12928_v63 = vpack.c.bf16 %v7874_v34, %v7869_v17  ;;  %v7904_v38 = vld [vmem:[#allocation21 + $0x1260] sm:$0xff] }
 0xdef   :  { %8824 = vmatmul.mubr.f32.vlgmr.msra.gmra.mrb[52].mxu1 %v16238_v35  ;;  %12567 = vmatpush1.bf16.msra.mxu0 %v12566_v57  ;;  %v7838_v57 = vld [vmem:[#allocation21 + $0x1050] sm:$0xff]  ;;  %v12940_v34 = vpack.c.bf16 %v7904_v38, %v7899_v13  ;;  %v7928_v13 = vld [vmem:[#allocation21 + $0x1320] sm:$0xff] }
 0xdf0   :  { %8468 = vmatprep.mubr.f32.mxu0 %v16242_v39  ;;  %12903 = vmatpush1.bf16.msra.mxu1 %v12902_v46  ;;  %v7847_v46 = vld [vmem:[#allocation21 + $0x1098] sm:$0xff]  ;;  %v12918_v9 = vpack.c.bf16 %v7843_v50, %v7838_v57  ;;  %v12594_v57 = vpack.c.bf16 %v7871_v40, %v7866_v43  ;;  %v7898_v17 = vld [vmem:[#allocation21 + $0x1230] sm:$0xff]  ;;  %v7909_v43 = vld [vmem:[#allocation21 + $0x1288] sm:$0xff] }
 0xdf1   :  { %8894 = vmatprep.mubr.f32.mxu1 %v16242_v39  ;;  %12569 = vmatprep.subr.bf16.mxu0 %v12568_v54  ;;  %v12582_v54 = vpack.c.bf16 %v7841_v60, %v7836_v41  ;;  %v12584_v26 = vpack.c.bf16 %v7852_v18, %v7847_v46  ;;  %v7879_v41 = vld [vmem:[#allocation21 + $0x1198] sm:$0xff]  ;;  %v7884_v60 = vld [vmem:[#allocation21 + $0x11c0] sm:$0xff]  ;;  %v7881_v18 = vld [vmem:[#allocation21 + $0x11a8] sm:$0xff] }
 0xdf2   :  { %12905 = vmatprep.subr.bf16.mxu1 %v12904_v23  ;;  %v7851_v23 = vld [vmem:[#allocation21 + $0x10b8] sm:$0xff]  ;;  %v7876_v46 = vld [vmem:[#allocation21 + $0x1180] sm:$0xff]  ;;  %v12932_v48 = vpack.c.bf16 %v7884_v60, %v7879_v41  ;;  %v7914_v40 = vld [vmem:[#allocation21 + $0x12b0] sm:$0xff] }
 0xdf3   :  { %12571 = vmatpush1.bf16.msra.mxu0 %v12570_v61  ;;  %v7853_v61 = vld [vmem:[#allocation21 + $0x10c8] sm:$0xff]  ;;  %v12586_v28 = vpack.c.bf16 %v7851_v23, %v7846_v5  ;;  %v7894_v23 = vld [vmem:[#allocation21 + $0x1210] sm:$0xff]  ;;  %v7908_v41 = vld [vmem:[#allocation21 + $0x1280] sm:$0xff]  ;;  %v12944_v60 = vpack.c.bf16 %v7914_v40, %v7909_v43 }
 0xdf4   :  { %12907 = vmatpush1.bf16.msra.mxu1 %v12906_v30  ;;  %12573 = vmatprep.subr.bf16.mxu0 %v12572_v4  ;;  %v7857_v30 = vld [vmem:[#allocation21 + $0x10e8] sm:$0xff]  ;;  %v7862_v4 = vld [vmem:[#allocation21 + $0x1110] sm:$0xff] }
 0xdf5   :  { %12909 = vmatprep.subr.bf16.mxu1 %v12908_v16  ;;  %v12922_v16 = vpack.c.bf16 %v7853_v61, %v7848_v32  ;;  %v12588_v15 = vpack.c.bf16 %v7862_v4, %v7857_v30  ;;  %v7889_v5 = vld [vmem:[#allocation21 + $0x11e8] sm:$0xff]  ;;  %v12598_v32 = vpack.c.bf16 %v7881_v18, %v7876_v46  ;;  %v7886_v30 = vld [vmem:[#allocation21 + $0x11d0] sm:$0xff]  ;;  %v7891_v4 = vld [vmem:[#allocation21 + $0x11f8] sm:$0xff] }
 0xdf6   :  { %v12936_v49 = vpack.c.bf16 %v7894_v23, %v7889_v5  ;;  %v7919_v46 = vld [vmem:[#allocation21 + $0x12d8] sm:$0xff]  ;;  %v7924_v18 = vld [vmem:[#allocation21 + $0x1300] sm:$0xff]  ;;  %v7918_v5 = vld [vmem:[#allocation21 + $0x12d0] sm:$0xff] }
 0xdf7   :  { %12575 = vmatpush1.bf16.msra.mxu0 %v12574_v59  ;;  %v7863_v59 = vld [vmem:[#allocation21 + $0x1118] sm:$0xff]  ;;  %v12948_v23 = vpack.c.bf16 %v7924_v18, %v7919_v46  ;;  %v7938_v43 = vld [vmem:[#allocation21 + $0x1370] sm:$0xff]  ;;  %v7948_v18 = vld [vmem:[#allocation21 + $0x13c0] sm:$0xff] }
 0xdf8   :  { %12911 = vmatpush1.bf16.msra.mxu1 %v12910_v7  ;;  %12577 = vmatprep.subr.bf16.mxu0 %v12576_v10  ;;  %v7867_v7 = vld [vmem:[#allocation21 + $0x1138] sm:$0xff]  ;;  %v7872_v10 = vld [vmem:[#allocation21 + $0x1160] sm:$0xff] }
 0xdf9   :  { %12913 = vmatprep.subr.bf16.mxu1 %v12912_v56  ;;  %v12926_v56 = vpack.c.bf16 %v7863_v59, %v7858_v22  ;;  %v12592_v3 = vpack.c.bf16 %v7872_v10, %v7867_v7  ;;  %v12602_v22 = vpack.c.bf16 %v7891_v4, %v7886_v30  ;;  %v7896_v7 = vld [vmem:[#allocation21 + $0x1220] sm:$0xff]  ;;  %v7901_v10 = vld [vmem:[#allocation21 + $0x1248] sm:$0xff]  ;;  %v7934_v4 = vld [vmem:[#allocation21 + $0x1350] sm:$0xff] }
 0xdfa   :  { %v7929_v30 = vld [vmem:[#allocation21 + $0x1328] sm:$0xff]  ;;  %v7951_v46 = vld [vmem:[#allocation21 + $0x13d8] sm:$0xff] }
 0xdfb   :  { %12579 = vmatpush1.bf16.msra.mxu0 %v12578_v21  ;;  %v7873_v21 = vld [vmem:[#allocation21 + $0x1168] sm:$0xff]  ;;  %v12952_v38 = vpack.c.bf16 %v7934_v4, %v7929_v30  ;;  %v7956_v4 = vld [vmem:[#allocation21 + $0x1400] sm:$0xff] }
 0xdfc   :  { %12915 = vmatpush1.bf16.msra.mxu1 %v12914_v19  ;;  %12581 = vmatprep.subr.bf16.mxu0 %v12580_v36  ;;  %v7877_v19 = vld [vmem:[#allocation21 + $0x1188] sm:$0xff]  ;;  %v7882_v36 = vld [vmem:[#allocation21 + $0x11b0] sm:$0xff] }
 0xdfd   :  { %12917 = vmatprep.subr.bf16.mxu1 %v12916_v11  ;;  %v12930_v11 = vpack.c.bf16 %v7873_v21, %v7868_v53  ;;  %v12596_v50 = vpack.c.bf16 %v7882_v36, %v7877_v19  ;;  %v12606_v53 = vpack.c.bf16 %v7901_v10, %v7896_v7  ;;  %v7906_v19 = vld [vmem:[#allocation21 + $0x1270] sm:$0xff]  ;;  %v7911_v36 = vld [vmem:[#allocation21 + $0x1298] sm:$0xff]  ;;  %v7944_v10 = vld [vmem:[#allocation21 + $0x13a0] sm:$0xff] }
 0xdfe   :  { %v7939_v7 = vld [vmem:[#allocation21 + $0x1378] sm:$0xff] }
 0xdff   :  { %12583 = vmatpush1.bf16.msra.mxu0 %v12582_v54  ;;  %v7883_v54 = vld [vmem:[#allocation21 + $0x11b8] sm:$0xff]  ;;  %v12956_v40 = vpack.c.bf16 %v7944_v10, %v7939_v7  ;;  %v7966_v10 = vld [vmem:[#allocation21 + $0x1450] sm:$0xff] }
 0xe00   :  { %12919 = vmatpush1.bf16.msra.mxu1 %v12918_v9  ;;  %12585 = vmatprep.subr.bf16.mxu0 %v12584_v26  ;;  %v7887_v9 = vld [vmem:[#allocation21 + $0x11d8] sm:$0xff]  ;;  %v7892_v26 = vld [vmem:[#allocation21 + $0x1200] sm:$0xff] }
 0xe01   :  { %12921 = vmatprep.subr.bf16.mxu1 %v12920_v52  ;;  %v12934_v52 = vpack.c.bf16 %v7883_v54, %v7878_v58  ;;  %v12600_v61 = vpack.c.bf16 %v7892_v26, %v7887_v9  ;;  %v12610_v58 = vpack.c.bf16 %v7911_v36, %v7906_v19  ;;  %v7916_v9 = vld [vmem:[#allocation21 + $0x12c0] sm:$0xff]  ;;  %v7921_v26 = vld [vmem:[#allocation21 + $0x12e8] sm:$0xff]  ;;  %v7221_v19 = vrot.slane %v16168_v1, %v14581_v47 }
 0xe02   :  { %v7949_v36 = vld [vmem:[#allocation21 + $0x13c8] sm:$0xff]  ;;  %v7964_v1 = vld [vmem:[#allocation21 + $0x1440] sm:$0xff] }
 0xe03   :  { %12587 = vmatpush1.bf16.msra.mxu0 %v12586_v28  ;;  %v7893_v28 = vld [vmem:[#allocation21 + $0x1208] sm:$0xff] }
 0xe04   :  { %12923 = vmatpush1.bf16.msra.mxu1 %v12922_v16  ;;  %12589 = vmatprep.subr.bf16.mxu0 %v12588_v15  ;;  %v7897_v16 = vld [vmem:[#allocation21 + $0x1228] sm:$0xff]  ;;  %v7902_v15 = vld [vmem:[#allocation21 + $0x1250] sm:$0xff] }
 0xe05   :  { %12925 = vmatprep.subr.bf16.mxu1 %v12924_v45  ;;  %v12938_v45 = vpack.c.bf16 %v7893_v28, %v7888_v6  ;;  %v12604_v59 = vpack.c.bf16 %v7902_v15, %v7897_v16  ;;  %v12614_v6 = vpack.c.bf16 %v7921_v26, %v7916_v9  ;;  %v7926_v16 = vld [vmem:[#allocation21 + $0x1310] sm:$0xff]  ;;  %v7931_v15 = vld [vmem:[#allocation21 + $0x1338] sm:$0xff]  ;;  %v7235_v26 = vmul.f32 %v7221_v19, %v16039_v44 }
 0xe06   :  { %v7962_v9 = vld [vmem:[#allocation21 + $0x1430] sm:$0xff] }
 0xe07   :  { %12591 = vmatpush1.bf16.msra.mxu0 %v12590_v31  ;;  %v7903_v31 = vld [vmem:[#allocation21 + $0x1258] sm:$0xff] }
 0xe08   :  { %12927 = vmatpush1.bf16.msra.mxu1 %v12926_v56  ;;  %12593 = vmatprep.subr.bf16.mxu0 %v12592_v3  ;;  %v7907_v56 = vld [vmem:[#allocation21 + $0x1278] sm:$0xff]  ;;  %v7912_v3 = vld [vmem:[#allocation21 + $0x12a0] sm:$0xff] }
 0xe09   :  { %12929 = vmatprep.subr.bf16.mxu1 %v12928_v63  ;;  %v12942_v63 = vpack.c.bf16 %v7903_v31, %v7898_v17  ;;  %v12608_v21 = vpack.c.bf16 %v7912_v3, %v7907_v56  ;;  %v12618_v17 = vpack.c.bf16 %v7931_v15, %v7926_v16  ;;  %v7936_v56 = vld [vmem:[#allocation21 + $0x1360] sm:$0xff]  ;;  %v7941_v3 = vld [vmem:[#allocation21 + $0x1388] sm:$0xff]  ;;  %v7963_v16 = vld [vmem:[#allocation21 + $0x1438] sm:$0xff] }
 0xe0a   :  { %v7967_v15 = vld [vmem:[#allocation21 + $0x1458] sm:$0xff] }
 0xe0b   :  { %12595 = vmatpush1.bf16.msra.mxu0 %v12594_v57  ;;  %v7913_v57 = vld [vmem:[#allocation21 + $0x12a8] sm:$0xff] }
 0xe0c   :  { %12931 = vmatpush1.bf16.msra.mxu1 %v12930_v11  ;;  %12597 = vmatprep.subr.bf16.mxu0 %v12596_v50  ;;  %v7917_v11 = vld [vmem:[#allocation21 + $0x12c8] sm:$0xff]  ;;  %v7922_v50 = vld [vmem:[#allocation21 + $0x12f0] sm:$0xff] }
 0xe0d   :  { %12933 = vmatprep.subr.bf16.mxu1 %v12932_v48  ;;  %v12946_v48 = vpack.c.bf16 %v7913_v57, %v7908_v41  ;;  %v12612_v54 = vpack.c.bf16 %v7922_v50, %v7917_v11  ;;  %v7954_v41 = vld [vmem:[#allocation21 + $0x13f0] sm:$0xff] }
 0xe0e   :  { %v7946_v50 = vld [vmem:[#allocation21 + $0x13b0] sm:$0xff] }
 0xe0f   :  { %12599 = vmatpush1.bf16.msra.mxu0 %v12598_v32  ;;  %v7923_v32 = vld [vmem:[#allocation21 + $0x12f8] sm:$0xff] }
 0xe10   :  { %12935 = vmatpush1.bf16.msra.mxu1 %v12934_v52  ;;  %12601 = vmatprep.subr.bf16.mxu0 %v12600_v61  ;;  %v7927_v52 = vld [vmem:[#allocation21 + $0x1318] sm:$0xff]  ;;  %v7932_v61 = vld [vmem:[#allocation21 + $0x1340] sm:$0xff] }
 0xe11   :  { %12937 = vmatprep.subr.bf16.mxu1 %v12936_v49  ;;  %v12950_v49 = vpack.c.bf16 %v7923_v32, %v7918_v5  ;;  %v12616_v28 = vpack.c.bf16 %v7932_v61, %v7927_v52  ;;  %v7959_v5 = vld [vmem:[#allocation21 + $0x1418] sm:$0xff]  ;;  %v12626_v52 = vpack.c.bf16 %v7951_v46, %v7946_v50 }
 0xe12   :  { %v7983_v50 = vld [vmem:[#allocation21 + $0x14d8] sm:$0xff] }
 0xe13   :  { %12603 = vmatpush1.bf16.msra.mxu0 %v12602_v22  ;;  %v7933_v22 = vld [vmem:[#allocation21 + $0x1348] sm:$0xff]  ;;  %v7987_v46 = vld [vmem:[#allocation21 + $0x14f8] sm:$0xff] }
 0xe14   :  { %12939 = vmatpush1.bf16.msra.mxu1 %v12938_v45  ;;  %12605 = vmatprep.subr.bf16.mxu0 %v12604_v59  ;;  %v7937_v45 = vld [vmem:[#allocation21 + $0x1368] sm:$0xff]  ;;  %v7942_v59 = vld [vmem:[#allocation21 + $0x1390] sm:$0xff] }
 0xe15   :  { %12941 = vmatprep.subr.bf16.mxu1 %v12940_v34  ;;  %v12954_v34 = vpack.c.bf16 %v7933_v22, %v7928_v13  ;;  %v12620_v31 = vpack.c.bf16 %v7942_v59, %v7937_v45  ;;  %v7972_v13 = vld [vmem:[#allocation21 + $0x1480] sm:$0xff]  ;;  %v7969_v22 = vld [vmem:[#allocation21 + $0x1468] sm:$0xff]  ;;  %v7974_v45 = vld [vmem:[#allocation21 + $0x1490] sm:$0xff]  ;;  %v16255_v59 = vmax.f32 %v16219_v8, 0.0 }
 0xe17   :  { %12607 = vmatpush1.bf16.msra.mxu0 %v12606_v53  ;;  %v7943_v53 = vld [vmem:[#allocation21 + $0x1398] sm:$0xff] }
 0xe18   :  { %12943 = vmatpush1.bf16.msra.mxu1 %v12942_v63  ;;  %12609 = vmatprep.subr.bf16.mxu0 %v12608_v21  ;;  %v7947_v63 = vld [vmem:[#allocation21 + $0x13b8] sm:$0xff]  ;;  %v7952_v21 = vld [vmem:[#allocation21 + $0x13e0] sm:$0xff]  ;;  %v12958_v57 = vpack.c.bf16 %v7943_v53, %v7938_v43  ;;  %v7982_v43 = vld [vmem:[#allocation21 + $0x14d0] sm:$0xff]  ;;  %v12968_v53 = vpack.c.bf16 %v7974_v45, %v7969_v22 }
 0xe19   :  { %12945 = vmatprep.subr.bf16.mxu1 %v12944_v60  ;;  %v12622_v60 = vpack.c.bf16 %v7941_v3, %v7936_v56  ;;  %v12624_v11 = vpack.c.bf16 %v7952_v21, %v7947_v63  ;;  %v7973_v56 = vld [vmem:[#allocation21 + $0x1488] sm:$0xff]  ;;  %v7979_v63 = vld [vmem:[#allocation21 + $0x14b8] sm:$0xff]  ;;  %v7984_v21 = vld [vmem:[#allocation21 + $0x14e0] sm:$0xff] }
 0xe1a   :  { %v7977_v3 = vld [vmem:[#allocation21 + $0x14a8] sm:$0xff]  ;;  %v8003_v45 = vld [vmem:[#allocation21 + $0x1578] sm:$0xff] }
 0xe1b   :  { %12611 = vmatpush1.bf16.msra.mxu0 %v12610_v58  ;;  %v12960_v58 = vpack.c.bf16 %v7954_v41, %v7949_v36  ;;  %v12636_v36 = vpack.c.bf16 %v7982_v43, %v7977_v3  ;;  %v7976_v41 = vld [vmem:[#allocation21 + $0x14a0] sm:$0xff]  ;;  %v8006_v43 = vld [vmem:[#allocation21 + $0x1590] sm:$0xff] }
 0xe1c   :  { %12947 = vmatpush1.bf16.msra.mxu1 %v12946_v48  ;;  %12613 = vmatprep.subr.bf16.mxu0 %v12612_v54  ;;  %v7953_v48 = vld [vmem:[#allocation21 + $0x13e8] sm:$0xff] }
 0xe1d   :  { %12949 = vmatprep.subr.bf16.mxu1 %v12948_v23  ;;  %v7957_v54 = vld [vmem:[#allocation21 + $0x1408] sm:$0xff]  ;;  %v16250_v23 = vld [vmem:[#allocation19 + $0x8] sm:$0x7]  ;;  %v12962_v61 = vpack.c.bf16 %v7953_v48, %v7948_v18  ;;  %v7992_v18 = vld [vmem:[#allocation21 + $0x1520] sm:$0xff] }
 0xe1e   :  { %v7278_v32 = vrot.slane %v16250_v23, %v16569_v25  ;;  %v12628_v30 = vpack.c.bf16 %v7962_v9, %v7957_v54  ;;  %v7994_v48 = vld [vmem:[#allocation21 + $0x1530] sm:$0xff] }
 0xe1f   :  { %12615 = vmatpush1.bf16.msra.mxu0 %v12614_v6  ;;  %v7961_v6 = vld [vmem:[#allocation21 + $0x1428] sm:$0xff] }
 0xe20   :  { %12951 = vmatpush1.bf16.msra.mxu1 %v12950_v49  ;;  %12617 = vmatprep.subr.bf16.mxu0 %v12616_v28  ;;  %v12964_v49 = vpack.c.bf16 %v7964_v1, %v7959_v5  ;;  %v7958_v28 = vld [vmem:[#allocation21 + $0x1410] sm:$0xff]  ;;  %v7303_v44 = vadd.f32 %v7278_v32, %v7235_v26  ;;  %v12640_v26 = vpack.c.bf16 %v7992_v18, %v7987_v46  ;;  %v7991_v1 = vld [vmem:[#allocation21 + $0x1518] sm:$0xff]  ;;  %v7988_v32 = vld [vmem:[#allocation21 + $0x1500] sm:$0xff] }
 0xe21   :  { %12953 = vmatprep.subr.bf16.mxu1 %v12952_v38  ;;  %v12630_v38 = vpack.c.bf16 %v7961_v6, %v7956_v4  ;;  %v12966_v7 = vpack.c.bf16 %v7963_v16, %v7958_v28  ;;  %v7986_v5 = vld [vmem:[#allocation21 + $0x14f0] sm:$0xff]  ;;  %v7999_v6 = vld [vmem:[#allocation21 + $0x1558] sm:$0xff]  ;;  %v8016_v46 = vld [vmem:[#allocation21 + $0x15e0] sm:$0xff] }
 0xe22   :  { %v8002_v4 = vld [vmem:[#allocation21 + $0x1570] sm:$0xff]  ;;  %v12642_v28 = vpack.c.bf16 %v7991_v1, %v7986_v5  ;;  %v8021_v18 = vld [vmem:[#allocation21 + $0x1608] sm:$0xff] }
 0xe23   :  { %12619 = vmatpush1.bf16.msra.mxu0 %v12618_v17  ;;  %v7971_v17 = vld [vmem:[#allocation21 + $0x1478] sm:$0xff]  ;;  %v8029_v5 = vld [vmem:[#allocation21 + $0x1648] sm:$0xff]  ;;  %v8034_v1 = vld [vmem:[#allocation21 + $0x1670] sm:$0xff] }
 0xe24   :  { %12955 = vmatpush1.bf16.msra.mxu1 %v12954_v34  ;;  %12621 = vmatprep.subr.bf16.mxu0 %v12620_v31  ;;  %v7968_v34 = vld [vmem:[#allocation21 + $0x1460] sm:$0xff]  ;;  %v12632_v31 = vpack.c.bf16 %v7972_v13, %v7967_v15  ;;  %v12634_v8 = vpack.c.bf16 %v7971_v17, %v7966_v10  ;;  %v8001_v13 = vld [vmem:[#allocation21 + $0x1568] sm:$0xff] }
 0xe25   :  { %12957 = vmatprep.subr.bf16.mxu1 %v12956_v40  ;;  %v16258_v40 = vmax.f32 %v7303_v44, 0.0  ;;  %v12970_v19 = vpack.c.bf16 %v7973_v56, %v7968_v34  ;;  %v7996_v15 = vld [vmem:[#allocation21 + $0x1540] sm:$0xff]  ;;  %v8009_v17 = vld [vmem:[#allocation21 + $0x15a8] sm:$0xff]  ;;  %v8014_v34 = vld [vmem:[#allocation21 + $0x15d0] sm:$0xff] }
 0xe26   :  { %v8012_v10 = vld [vmem:[#allocation21 + $0x15c0] sm:$0xff] }
 0xe27   :  { %12623 = vmatpush1.bf16.msra.mxu0 %v12622_v60  ;;  %v7981_v60 = vld [vmem:[#allocation21 + $0x14c8] sm:$0xff] }
 0xe28   :  { %12959 = vmatpush1.bf16.msra.mxu1 %v12958_v57  ;;  %12625 = vmatprep.subr.bf16.mxu0 %v12624_v11  ;;  %v7978_v57 = vld [vmem:[#allocation21 + $0x14b0] sm:$0xff]  ;;  %v12972_v11 = vpack.c.bf16 %v7984_v21, %v7979_v63  ;;  %v12638_v54 = vpack.c.bf16 %v7981_v60, %v7976_v41  ;;  %v8008_v63 = vld [vmem:[#allocation21 + $0x15a0] sm:$0xff]  ;;  %v12984_v21 = vpack.c.bf16 %v8014_v34, %v8009_v17  ;;  %v8019_v41 = vld [vmem:[#allocation21 + $0x15f8] sm:$0xff] }
 0xe29   :  { %12961 = vmatprep.subr.bf16.mxu1 %v12960_v58  ;;  %v7989_v58 = vld [vmem:[#allocation21 + $0x1508] sm:$0xff]  ;;  %v12974_v9 = vpack.c.bf16 %v7983_v50, %v7978_v57  ;;  %v8024_v60 = vld [vmem:[#allocation21 + $0x1620] sm:$0xff]  ;;  %v8038_v17 = vld [vmem:[#allocation21 + $0x1690] sm:$0xff] }
 0xe2b   :  { %12627 = vmatpush1.bf16.msra.mxu0 %v12626_v52  ;;  %v12976_v52 = vpack.c.bf16 %v7994_v48, %v7989_v58  ;;  %v8018_v58 = vld [vmem:[#allocation21 + $0x15f0] sm:$0xff]  ;;  %v12988_v48 = vpack.c.bf16 %v8024_v60, %v8019_v41  ;;  %v8048_v41 = vld [vmem:[#allocation21 + $0x16e0] sm:$0xff] }
 0xe2c   :  { %12963 = vmatpush1.bf16.msra.mxu1 %v12962_v61  ;;  %12629 = vmatprep.subr.bf16.mxu0 %v12628_v30  ;;  %v7993_v61 = vld [vmem:[#allocation21 + $0x1528] sm:$0xff] }
 0xe2d   :  { %12965 = vmatprep.subr.bf16.mxu1 %v12964_v49  ;;  %v7997_v30 = vld [vmem:[#allocation21 + $0x1548] sm:$0xff]  ;;  %v8004_v49 = vld [vmem:[#allocation21 + $0x1580] sm:$0xff]  ;;  %v12978_v16 = vpack.c.bf16 %v7993_v61, %v7988_v32  ;;  %v12654_v32 = vpack.c.bf16 %v8021_v18, %v8016_v46  ;;  %v8059_v46 = vld [vmem:[#allocation21 + $0x1738] sm:$0xff] }
 0xe2e   :  { %8469 = vmatmul.mubr.f32.vlgmr.msra.gmra.mrb[56].mxu0 %v16255_v59  ;;  %v12644_v44 = vpack.c.bf16 %v8002_v4, %v7997_v30  ;;  %v12980_v22 = vpack.c.bf16 %v8004_v49, %v7999_v6  ;;  %v8026_v30 = vld [vmem:[#allocation21 + $0x1630] sm:$0xff]  ;;  %v8031_v4 = vld [vmem:[#allocation21 + $0x1658] sm:$0xff]  ;;  %v8028_v6 = vld [vmem:[#allocation21 + $0x1640] sm:$0xff]  ;;  %v12992_v49 = vpack.c.bf16 %v8034_v1, %v8029_v5 }
 0xe2f   :  { %8895 = vmatmul.mubr.f32.vlgmr.msra.gmra.mrb[52].mxu1 %v16255_v59  ;;  %12631 = vmatpush1.bf16.msra.mxu0 %v12630_v38  ;;  %v7998_v38 = vld [vmem:[#allocation21 + $0x1550] sm:$0xff]  ;;  %v8064_v18 = vld [vmem:[#allocation21 + $0x1760] sm:$0xff] }
 0xe30   :  { %8539 = vmatprep.mubr.f32.mxu0 %v16258_v40  ;;  %12967 = vmatpush1.bf16.msra.mxu1 %v12966_v7  ;;  %v8007_v7 = vld [vmem:[#allocation21 + $0x1598] sm:$0xff]  ;;  %v12982_v56 = vpack.c.bf16 %v8003_v45, %v7998_v38  ;;  %v12658_v38 = vpack.c.bf16 %v8031_v4, %v8026_v30  ;;  %v8058_v5 = vld [vmem:[#allocation21 + $0x1730] sm:$0xff]  ;;  %v13004_v1 = vpack.c.bf16 %v8064_v18, %v8059_v46  ;;  %v8069_v30 = vld [vmem:[#allocation21 + $0x1788] sm:$0xff] }
 0xe31   :  { %8965 = vmatprep.mubr.f32.mxu1 %v16258_v40  ;;  %12633 = vmatprep.subr.bf16.mxu0 %v12632_v31  ;;  %v12646_v31 = vpack.c.bf16 %v8001_v13, %v7996_v15  ;;  %v12648_v3 = vpack.c.bf16 %v8012_v10, %v8007_v7  ;;  %v8039_v15 = vld [vmem:[#allocation21 + $0x1698] sm:$0xff]  ;;  %v8044_v13 = vld [vmem:[#allocation21 + $0x16c0] sm:$0xff]  ;;  %v8041_v10 = vld [vmem:[#allocation21 + $0x16a8] sm:$0xff] }
 0xe32   :  { %12969 = vmatprep.subr.bf16.mxu1 %v12968_v53  ;;  %v8011_v53 = vld [vmem:[#allocation21 + $0x15b8] sm:$0xff]  ;;  %v8036_v7 = vld [vmem:[#allocation21 + $0x1680] sm:$0xff]  ;;  %v12996_v34 = vpack.c.bf16 %v8044_v13, %v8039_v15  ;;  %v8074_v4 = vld [vmem:[#allocation21 + $0x17b0] sm:$0xff] }
 0xe33   :  { %12635 = vmatpush1.bf16.msra.mxu0 %v12634_v8  ;;  %v8013_v8 = vld [vmem:[#allocation21 + $0x15c8] sm:$0xff]  ;;  %v12650_v57 = vpack.c.bf16 %v8011_v53, %v8006_v43  ;;  %v8054_v53 = vld [vmem:[#allocation21 + $0x1710] sm:$0xff]  ;;  %v8068_v15 = vld [vmem:[#allocation21 + $0x1780] sm:$0xff]  ;;  %v13008_v13 = vpack.c.bf16 %v8074_v4, %v8069_v30 }
 0xe34   :  { %12971 = vmatpush1.bf16.msra.mxu1 %v12970_v19  ;;  %12637 = vmatprep.subr.bf16.mxu0 %v12636_v36  ;;  %v8017_v19 = vld [vmem:[#allocation21 + $0x15e8] sm:$0xff]  ;;  %v8022_v36 = vld [vmem:[#allocation21 + $0x1610] sm:$0xff]  ;;  %v8088_v46 = vld [vmem:[#allocation21 + $0x1820] sm:$0xff] }
 0xe35   :  { %12973 = vmatprep.subr.bf16.mxu1 %v12972_v11  ;;  %v12986_v11 = vpack.c.bf16 %v8013_v8, %v8008_v63  ;;  %v12652_v50 = vpack.c.bf16 %v8022_v36, %v8017_v19  ;;  %v8049_v43 = vld [vmem:[#allocation21 + $0x16e8] sm:$0xff]  ;;  %v12662_v63 = vpack.c.bf16 %v8041_v10, %v8036_v7  ;;  %v8046_v19 = vld [vmem:[#allocation21 + $0x16d0] sm:$0xff]  ;;  %v8051_v36 = vld [vmem:[#allocation21 + $0x16f8] sm:$0xff] }
 0xe36   :  { %v13000_v60 = vpack.c.bf16 %v8054_v53, %v8049_v43  ;;  %v8079_v7 = vld [vmem:[#allocation21 + $0x17d8] sm:$0xff]  ;;  %v8084_v10 = vld [vmem:[#allocation21 + $0x1800] sm:$0xff]  ;;  %v8078_v43 = vld [vmem:[#allocation21 + $0x17d0] sm:$0xff] }
 0xe37   :  { %12639 = vmatpush1.bf16.msra.mxu0 %v12638_v54  ;;  %v8023_v54 = vld [vmem:[#allocation21 + $0x1618] sm:$0xff]  ;;  %v13012_v53 = vpack.c.bf16 %v8084_v10, %v8079_v7  ;;  %v8101_v30 = vld [vmem:[#allocation21 + $0x1888] sm:$0xff]  ;;  %v8098_v4 = vld [vmem:[#allocation21 + $0x1870] sm:$0xff] }
 0xe38   :  { %12975 = vmatpush1.bf16.msra.mxu1 %v12974_v9  ;;  %12641 = vmatprep.subr.bf16.mxu0 %v12640_v26  ;;  %v8027_v9 = vld [vmem:[#allocation21 + $0x1638] sm:$0xff]  ;;  %v8032_v26 = vld [vmem:[#allocation21 + $0x1660] sm:$0xff]  ;;  %v8106_v7 = vld [vmem:[#allocation21 + $0x18b0] sm:$0xff] }
 0xe39   :  { %12977 = vmatprep.subr.bf16.mxu1 %v12976_v52  ;;  %v12990_v52 = vpack.c.bf16 %v8023_v54, %v8018_v58  ;;  %v12656_v61 = vpack.c.bf16 %v8032_v26, %v8027_v9  ;;  %v12666_v58 = vpack.c.bf16 %v8051_v36, %v8046_v19  ;;  %v8056_v9 = vld [vmem:[#allocation21 + $0x1720] sm:$0xff]  ;;  %v8061_v26 = vld [vmem:[#allocation21 + $0x1748] sm:$0xff]  ;;  %v8094_v36 = vld [vmem:[#allocation21 + $0x1850] sm:$0xff] }
 0xe3a   :  { %v8089_v19 = vld [vmem:[#allocation21 + $0x1828] sm:$0xff]  ;;  %v8111_v10 = vld [vmem:[#allocation21 + $0x18d8] sm:$0xff] }
 0xe3b   :  { %12643 = vmatpush1.bf16.msra.mxu0 %v12642_v28  ;;  %v8033_v28 = vld [vmem:[#allocation21 + $0x1668] sm:$0xff]  ;;  %v13016_v18 = vpack.c.bf16 %v8094_v36, %v8089_v19  ;;  %v8118_v36 = vld [vmem:[#allocation21 + $0x1910] sm:$0xff] }
 0xe3c   :  { %12979 = vmatpush1.bf16.msra.mxu1 %v12978_v16  ;;  %12645 = vmatprep.subr.bf16.mxu0 %v12644_v44  ;;  %v8037_v16 = vld [vmem:[#allocation21 + $0x1688] sm:$0xff]  ;;  %v8042_v44 = vld [vmem:[#allocation21 + $0x16b0] sm:$0xff] }
 0xe3d   :  { %12981 = vmatprep.subr.bf16.mxu1 %v12980_v22  ;;  %v12994_v22 = vpack.c.bf16 %v8033_v28, %v8028_v6  ;;  %v12660_v45 = vpack.c.bf16 %v8042_v44, %v8037_v16  ;;  %v12670_v6 = vpack.c.bf16 %v8061_v26, %v8056_v9  ;;  %v8066_v16 = vld [vmem:[#allocation21 + $0x1770] sm:$0xff]  ;;  %v8071_v44 = vld [vmem:[#allocation21 + $0x1798] sm:$0xff]  ;;  %v8104_v26 = vld [vmem:[#allocation21 + $0x18a0] sm:$0xff] }
 0xe3e   :  { %v8099_v9 = vld [vmem:[#allocation21 + $0x1878] sm:$0xff]  ;;  %v8121_v19 = vld [vmem:[#allocation21 + $0x1928] sm:$0xff] }
 0xe3f   :  { %12647 = vmatpush1.bf16.msra.mxu0 %v12646_v31  ;;  %v8043_v31 = vld [vmem:[#allocation21 + $0x16b8] sm:$0xff] }
 0xe40   :  { %12983 = vmatpush1.bf16.msra.mxu1 %v12982_v56  ;;  %12649 = vmatprep.subr.bf16.mxu0 %v12648_v3  ;;  %v8047_v56 = vld [vmem:[#allocation21 + $0x16d8] sm:$0xff]  ;;  %v8052_v3 = vld [vmem:[#allocation21 + $0x1700] sm:$0xff] }
 0xe41   :  { %12985 = vmatprep.subr.bf16.mxu1 %v12984_v21  ;;  %v12998_v21 = vpack.c.bf16 %v8043_v31, %v8038_v17  ;;  %v12664_v8 = vpack.c.bf16 %v8052_v3, %v8047_v56  ;;  %v12674_v17 = vpack.c.bf16 %v8071_v44, %v8066_v16  ;;  %v8076_v56 = vld [vmem:[#allocation21 + $0x17c0] sm:$0xff]  ;;  %v8081_v3 = vld [vmem:[#allocation21 + $0x17e8] sm:$0xff] }
 0xe42   :  { %v8112_v16 = vld [vmem:[#allocation21 + $0x18e0] sm:$0xff]  ;;  %v8109_v44 = vld [vmem:[#allocation21 + $0x18c8] sm:$0xff] }
 0xe43   :  { %12651 = vmatpush1.bf16.msra.mxu0 %v12650_v57  ;;  %v8053_v57 = vld [vmem:[#allocation21 + $0x1708] sm:$0xff] }
 0xe44   :  { %12987 = vmatpush1.bf16.msra.mxu1 %v12986_v11  ;;  %12653 = vmatprep.subr.bf16.mxu0 %v12652_v50  ;;  %v8057_v11 = vld [vmem:[#allocation21 + $0x1728] sm:$0xff]  ;;  %v8062_v50 = vld [vmem:[#allocation21 + $0x1750] sm:$0xff] }
 0xe45   :  { %12989 = vmatprep.subr.bf16.mxu1 %v12988_v48  ;;  %v13002_v48 = vpack.c.bf16 %v8053_v57, %v8048_v41  ;;  %v12668_v54 = vpack.c.bf16 %v8062_v50, %v8057_v11  ;;  %v12678_v41 = vpack.c.bf16 %v8081_v3, %v8076_v56  ;;  %v8086_v11 = vld [vmem:[#allocation21 + $0x1810] sm:$0xff]  ;;  %v8091_v50 = vld [vmem:[#allocation21 + $0x1838] sm:$0xff]  ;;  %v8117_v56 = vld [vmem:[#allocation21 + $0x1908] sm:$0xff] }
 0xe46   :  { %v8122_v3 = vld [vmem:[#allocation21 + $0x1930] sm:$0xff] }
 0xe47   :  { %12655 = vmatpush1.bf16.msra.mxu0 %v12654_v32  ;;  %v8063_v32 = vld [vmem:[#allocation21 + $0x1758] sm:$0xff] }
 0xe48   :  { %12991 = vmatpush1.bf16.msra.mxu1 %v12990_v52  ;;  %12657 = vmatprep.subr.bf16.mxu0 %v12656_v61  ;;  %v8067_v52 = vld [vmem:[#allocation21 + $0x1778] sm:$0xff]  ;;  %v8072_v61 = vld [vmem:[#allocation21 + $0x17a0] sm:$0xff] }
 0xe49   :  { %12993 = vmatprep.subr.bf16.mxu1 %v12992_v49  ;;  %v13006_v49 = vpack.c.bf16 %v8063_v32, %v8058_v5  ;;  %v12672_v28 = vpack.c.bf16 %v8072_v61, %v8067_v52  ;;  %v12682_v5 = vpack.c.bf16 %v8091_v50, %v8086_v11  ;;  %v8096_v61 = vld [vmem:[#allocation21 + $0x1860] sm:$0xff]  ;;  %v8129_v50 = vld [vmem:[#allocation21 + $0x1968] sm:$0xff] }
 0xe4a   :  { %v8132_v11 = vld [vmem:[#allocation21 + $0x1980] sm:$0xff] }
 0xe4b   :  { %12659 = vmatpush1.bf16.msra.mxu0 %v12658_v38  ;;  %v8073_v38 = vld [vmem:[#allocation21 + $0x17a8] sm:$0xff] }
 0xe4c   :  { %12995 = vmatpush1.bf16.msra.mxu1 %v12994_v22  ;;  %12661 = vmatprep.subr.bf16.mxu0 %v12660_v45  ;;  %v8077_v22 = vld [vmem:[#allocation21 + $0x17c8] sm:$0xff]  ;;  %v8082_v45 = vld [vmem:[#allocation21 + $0x17f0] sm:$0xff] }
 0xe4d   :  { %12997 = vmatprep.subr.bf16.mxu1 %v12996_v34  ;;  %v13010_v34 = vpack.c.bf16 %v8073_v38, %v8068_v15  ;;  %v12676_v31 = vpack.c.bf16 %v8082_v45, %v8077_v22  ;;  %v8114_v15 = vld [vmem:[#allocation21 + $0x18f0] sm:$0xff]  ;;  %v12686_v38 = vpack.c.bf16 %v8101_v30, %v8096_v61  ;;  %v8139_v30 = vld [vmem:[#allocation21 + $0x19b8] sm:$0xff] }
 0xe4e   :  { %v8142_v61 = vld [vmem:[#allocation21 + $0x19d0] sm:$0xff] }
 0xe4f   :  { %12663 = vmatpush1.bf16.msra.mxu0 %v12662_v63  ;;  %v8083_v63 = vld [vmem:[#allocation21 + $0x17f8] sm:$0xff] }
 0xe50   :  { %12999 = vmatpush1.bf16.msra.mxu1 %v12998_v21  ;;  %12665 = vmatprep.subr.bf16.mxu0 %v12664_v8  ;;  %v8087_v21 = vld [vmem:[#allocation21 + $0x1818] sm:$0xff]  ;;  %v8092_v8 = vld [vmem:[#allocation21 + $0x1840] sm:$0xff] }
 0xe51   :  { %13001 = vmatprep.subr.bf16.mxu1 %v13000_v60  ;;  %v13014_v60 = vpack.c.bf16 %v8083_v63, %v8078_v43  ;;  %v12680_v57 = vpack.c.bf16 %v8092_v8, %v8087_v21  ;;  %v8119_v43 = vld [vmem:[#allocation21 + $0x1918] sm:$0xff]  ;;  %v12692_v21 = vpack.c.bf16 %v8122_v3, %v8117_v56  ;;  %v8116_v8 = vld [vmem:[#allocation21 + $0x1900] sm:$0xff] }
 0xe52   :  { %v8151_v56 = vld [vmem:[#allocation21 + $0x1a18] sm:$0xff] }
 0xe53   :  { %12667 = vmatpush1.bf16.msra.mxu0 %v12666_v58  ;;  %v8093_v58 = vld [vmem:[#allocation21 + $0x1848] sm:$0xff] }
 0xe54   :  { %13003 = vmatpush1.bf16.msra.mxu1 %v13002_v48  ;;  %12669 = vmatprep.subr.bf16.mxu0 %v12668_v54  ;;  %v8097_v48 = vld [vmem:[#allocation21 + $0x1868] sm:$0xff]  ;;  %v8102_v54 = vld [vmem:[#allocation21 + $0x1890] sm:$0xff]  ;;  %v13018_v32 = vpack.c.bf16 %v8093_v58, %v8088_v46 }
 0xe55   :  { %13005 = vmatprep.subr.bf16.mxu1 %v13004_v1  ;;  %v7217_v1 = vrot.slane %v16163_v42, %v14581_v47  ;;  %v12684_v52 = vpack.c.bf16 %v8102_v54, %v8097_v48  ;;  %v8134_v46 = vld [vmem:[#allocation21 + $0x1990] sm:$0xff] }
 0xe57   :  { %12671 = vmatpush1.bf16.msra.mxu0 %v12670_v6  ;;  %v13020_v6 = vpack.c.bf16 %v8104_v26, %v8099_v9  ;;  %v7234_v42 = vmul.f32 %v7217_v1, %v16094_v0  ;;  %v8126_v9 = vld [vmem:[#allocation21 + $0x1950] sm:$0xff]  ;;  %v8131_v26 = vld [vmem:[#allocation21 + $0x1978] sm:$0xff]  ;;  %v13032_v1 = vpack.c.bf16 %v8134_v46, %v8129_v50  ;;  %v7480_v50 = vld [vmem:[#allocation21 + $0x520] sm:$0xff] }
 0xe58   :  { %13007 = vmatpush1.bf16.msra.mxu1 %v13006_v49  ;;  %12673 = vmatprep.subr.bf16.mxu0 %v12672_v28  ;;  %v8103_v49 = vld [vmem:[#allocation21 + $0x1898] sm:$0xff]  ;;  %v7485_v46 = vld [vmem:[#allocation21 + $0x548] sm:$0xff] }
 0xe59   :  { %13009 = vmatprep.subr.bf16.mxu1 %v13008_v13  ;;  %v8107_v28 = vld [vmem:[#allocation21 + $0x18b8] sm:$0xff]  ;;  %v7274_v13 = vrot.slane %v16250_v23, %v14581_v47  ;;  %v13022_v22 = vpack.c.bf16 %v8103_v49, %v8098_v4  ;;  %v12690_v23 = vpack.c.bf16 %v8111_v10, %v8106_v7  ;;  %v8144_v4 = vld [vmem:[#allocation21 + $0x19e0] sm:$0xff]  ;;  %v8154_v7 = vld [vmem:[#allocation21 + $0x1a30] sm:$0xff] }
 0xe5a   :  { %v12688_v45 = vpack.c.bf16 %v8112_v16, %v8107_v28  ;;  %v8136_v16 = vld [vmem:[#allocation21 + $0x19a0] sm:$0xff] }
 0xe5b   :  { %12675 = vmatpush1.bf16.msra.mxu0 %v12674_v17  ;;  %v8108_v17 = vld [vmem:[#allocation21 + $0x18c0] sm:$0xff]  ;;  %v7302_v63 = vadd.f32 %v7274_v13, %v7234_v42  ;;  %v13036_v13 = vpack.c.bf16 %v8144_v4, %v8139_v30  ;;  %v8147_v42 = vld [vmem:[#allocation21 + $0x19f8] sm:$0xff]  ;;  %v7330_v30 = vld [vmem:[#allocation21 + $0x70] sm:$0xff] }
 0xe5c   :  { %13011 = vmatpush1.bf16.msra.mxu1 %v13010_v34  ;;  %12677 = vmatprep.subr.bf16.mxu0 %v12676_v31  ;;  %v13024_v34 = vpack.c.bf16 %v8114_v15, %v8109_v44  ;;  %v8113_v31 = vld [vmem:[#allocation21 + $0x18e8] sm:$0xff]  ;;  %v8138_v15 = vld [vmem:[#allocation21 + $0x19b0] sm:$0xff]  ;;  %v7335_v4 = vld [vmem:[#allocation21 + $0x98] sm:$0xff] }
 0xe5d   :  { %13013 = vmatprep.subr.bf16.mxu1 %v13012_v53  ;;  %v8124_v53 = vld [vmem:[#allocation21 + $0x1940] sm:$0xff]  ;;  %v13026_v0 = vpack.c.bf16 %v8113_v31, %v8108_v17  ;;  %v16268_v58 = vmax.f32 %v7302_v63, 0.0  ;;  %v8141_v44 = vld [vmem:[#allocation21 + $0x19c8] sm:$0xff]  ;;  %v8146_v31 = vld [vmem:[#allocation21 + $0x19f0] sm:$0xff] }
 0xe5e   :  { %v12702_v10 = vpack.c.bf16 %v8141_v44, %v8136_v16  ;;  %v7420_v16 = vld [vmem:[#allocation21 + $0x340] sm:$0xff]  ;;  %v7425_v44 = vld [vmem:[#allocation21 + $0x368] sm:$0xff] }
 0xe5f   :  { %12679 = vmatpush1.bf16.msra.mxu0 %v12678_v41  ;;  %v13028_v41 = vpack.c.bf16 %v8124_v53, %v8119_v43  ;;  %v8148_v43 = vld [vmem:[#allocation21 + $0x1a00] sm:$0xff]  ;;  %v8153_v53 = vld [vmem:[#allocation21 + $0x1a28] sm:$0xff] }
 0xe60   :  { %13015 = vmatpush1.bf16.msra.mxu1 %v13014_v60  ;;  %12681 = vmatprep.subr.bf16.mxu0 %v12680_v57  ;;  %v8123_v60 = vld [vmem:[#allocation21 + $0x1938] sm:$0xff]  ;;  %v13042_v63 = vpack.c.bf16 %v8153_v53, %v8148_v43 }
 0xe61   :  { %13017 = vmatprep.subr.bf16.mxu1 %v13016_v18  ;;  %v8127_v57 = vld [vmem:[#allocation21 + $0x1958] sm:$0xff]  ;;  %v12694_v18 = vpack.c.bf16 %v8121_v19, %v8116_v8  ;;  %v13030_v48 = vpack.c.bf16 %v8123_v60, %v8118_v36  ;;  %v7400_v8 = vld [vmem:[#allocation21 + $0x2a0] sm:$0xff]  ;;  %v7405_v19 = vld [vmem:[#allocation21 + $0x2c8] sm:$0xff] }
 0xe62   :  { %v12696_v54 = vpack.c.bf16 %v8132_v11, %v8127_v57  ;;  %v7560_v36 = vld [vmem:[#allocation21 + $0x7a0] sm:$0xff]  ;;  %v7325_v57 = vld [vmem:[#allocation21 + $0x48] sm:$0xff]  ;;  %v7595_v43 = vld [vmem:[#allocation21 + $0x8b8] sm:$0xff] }
 0xe63   :  { %12683 = vmatpush1.bf16.msra.mxu0 %v12682_v5  ;;  %v8128_v5 = vld [vmem:[#allocation21 + $0x1960] sm:$0xff] }
 0xe64   :  { %13019 = vmatpush1.bf16.msra.mxu1 %v13018_v32  ;;  %12685 = vmatprep.subr.bf16.mxu0 %v12684_v52  ;;  %v8133_v32 = vld [vmem:[#allocation21 + $0x1988] sm:$0xff]  ;;  %v7320_v60 = vld [vmem:[#allocation21 + $0x20] sm:$0xff] }
 0xe65   :  { %13021 = vmatprep.subr.bf16.mxu1 %v13020_v6  ;;  %v8137_v52 = vld [vmem:[#allocation21 + $0x19a8] sm:$0xff]  ;;  %v12698_v6 = vpack.c.bf16 %v8131_v26, %v8126_v9  ;;  %v13034_v49 = vpack.c.bf16 %v8133_v32, %v8128_v5  ;;  %v8156_v11 = vld [vmem:[#allocation21 + $0x1a40] sm:$0xff]  ;;  %v7415_v9 = vld [vmem:[#allocation21 + $0x318] sm:$0xff]  ;;  %v16275_v26 = vmax.f32 %v16225_v33, 0.0 }
 0xe66   :  { %v12700_v28 = vpack.c.bf16 %v8142_v61, %v8137_v52  ;;  %v7570_v32 = vld [vmem:[#allocation21 + $0x7f0] sm:$0xff]  ;;  %v7575_v52 = vld [vmem:[#allocation21 + $0x818] sm:$0xff]  ;;  %v13078_v61 = vpack.c.bf16 %v7485_v46, %v7480_v50  ;;  %v7360_v46 = vld [vmem:[#allocation21 + $0x160] sm:$0xff] }
 0xe67   :  { %12687 = vmatpush1.bf16.msra.mxu0 %v12686_v38  ;;  %v8143_v38 = vld [vmem:[#allocation21 + $0x19d8] sm:$0xff]  ;;  %v13080_v33 = vpack.c.bf16 %v7575_v52, %v7570_v32  ;;  %v7610_v32 = vld [vmem:[#allocation21 + $0x930] sm:$0xff] }
 0xe68   :  { %13023 = vmatpush1.bf16.msra.mxu1 %v13022_v22  ;;  %12689 = vmatprep.subr.bf16.mxu0 %v12688_v45  ;;  %v8152_v22 = vld [vmem:[#allocation21 + $0x1a20] sm:$0xff]  ;;  %v8149_v45 = vld [vmem:[#allocation21 + $0x1a08] sm:$0xff]  ;;  %v13038_v17 = vpack.c.bf16 %v8143_v38, %v8138_v15  ;;  %v13050_v38 = vpack.c.bf16 %v7335_v4, %v7330_v30  ;;  %v7615_v52 = vld [vmem:[#allocation21 + $0x958] sm:$0xff] }
 0xe69   :  { %13025 = vmatprep.subr.bf16.mxu1 %v13024_v34  ;;  %v12704_v34 = vpack.c.bf16 %v8152_v22, %v8147_v42  ;;  %v13040_v3 = vpack.c.bf16 %v8154_v7, %v8149_v45  ;;  %v7580_v15 = vld [vmem:[#allocation21 + $0x840] sm:$0xff]  ;;  %v13052_v22 = vpack.c.bf16 %v7425_v44, %v7420_v16  ;;  %v7345_v7 = vld [vmem:[#allocation21 + $0xe8] sm:$0xff]  ;;  %v13096_v16 = vpack.c.bf16 %v7615_v52, %v7610_v32  ;;  %v7535_v44 = vld [vmem:[#allocation21 + $0x6d8] sm:$0xff] }
 0xe6a   :  { %v7340_v45 = vld [vmem:[#allocation21 + $0xc0] sm:$0xff]  ;;  %v7735_v32 = vld [vmem:[#allocation21 + $0xd18] sm:$0xff] }
 0xe6b   :  { %12691 = vmatpush1.bf16.msra.mxu0 %v12690_v23  ;;  %v12706_v23 = vpack.c.bf16 %v8151_v56, %v8146_v31  ;;  %v7430_v31 = vld [vmem:[#allocation21 + $0x390] sm:$0xff]  ;;  %v7435_v56 = vld [vmem:[#allocation21 + $0x3b8] sm:$0xff]  ;;  %v13054_v53 = vpack.c.bf16 %v7345_v7, %v7340_v45  ;;  %v7380_v7 = vld [vmem:[#allocation21 + $0x200] sm:$0xff] }
 0xe6c   :  { %13027 = vmatpush1.bf16.msra.mxu1 %v13026_v0  ;;  %12693 = vmatprep.subr.bf16.mxu0 %v12692_v21  ;;  %v8157_v0 = vld [vmem:[#allocation21 + $0x1a48] sm:$0xff]  ;;  %v8159_v21 = vld [vmem:[#allocation21 + $0x1a58] sm:$0xff] }
 0xe6d   :  { %13029 = vmatprep.subr.bf16.mxu1 %v13028_v41  ;;  %v7565_v41 = vld [vmem:[#allocation21 + $0x7c8] sm:$0xff] }
 0xe6e   :  { %8540 = vmatmul.mubr.f32.vlgmr.msra.gmra.mrb[56].mxu0 %v16268_v58  ;;  %v13076_v5 = vpack.c.bf16 %v7565_v41, %v7560_v36  ;;  %v7445_v36 = vld [vmem:[#allocation21 + $0x408] sm:$0xff]  ;;  %v7600_v41 = vld [vmem:[#allocation21 + $0x8e0] sm:$0xff] }
 0xe6f   :  { %8966 = vmatmul.mubr.f32.vlgmr.msra.gmra.mrb[52].mxu1 %v16268_v58  ;;  %12695 = vmatpush1.bf16.msra.mxu0 %v12694_v18  ;;  %v8158_v18 = vld [vmem:[#allocation21 + $0x1a50] sm:$0xff] }
 0xe70   :  { %13031 = vmatpush1.bf16.msra.mxu1 %v13030_v48  ;;  %12697 = vmatprep.subr.bf16.mxu0 %v12696_v54  ;;  %v13044_v48 = vpack.c.bf16 %v7405_v19, %v7400_v8  ;;  %v7410_v54 = vld [vmem:[#allocation21 + $0x2f0] sm:$0xff]  ;;  %v7440_v19 = vld [vmem:[#allocation21 + $0x3e0] sm:$0xff] }
 0xe71   :  { %13033 = vmatprep.subr.bf16.mxu1 %v13032_v1  ;;  %8610 = vmatprep.mubr.f32.mxu0 %v16431_v55  ;;  %v13046_v1 = vpack.c.bf16 %v7325_v57, %v7320_v60  ;;  %v7605_v60 = vld [vmem:[#allocation21 + $0x908] sm:$0xff]  ;;  %v13060_v50 = vpack.c.bf16 %v7445_v36, %v7440_v19  ;;  %v7555_v19 = vld [vmem:[#allocation21 + $0x778] sm:$0xff]  ;;  %v7720_v36 = vld [vmem:[#allocation21 + $0xca0] sm:$0xff] }
 0xe72   :  { %9036 = vmatprep.mubr.f32.mxu1 %v16431_v55 }
 0xe73   :  { %12699 = vmatpush1.bf16.msra.mxu0 %v12698_v6  ;;  %v7490_v6 = vld [vmem:[#allocation21 + $0x570] sm:$0xff] }
 0xe74   :  { %13035 = vmatpush1.bf16.msra.mxu1 %v13034_v49  ;;  %12701 = vmatprep.subr.bf16.mxu0 %v12700_v28  ;;  %v13048_v49 = vpack.c.bf16 %v7415_v9, %v7410_v54  ;;  %v7495_v28 = vld [vmem:[#allocation21 + $0x598] sm:$0xff]  ;;  %v13092_v54 = vpack.c.bf16 %v7605_v60, %v7600_v41  ;;  %v7525_v9 = vld [vmem:[#allocation21 + $0x688] sm:$0xff]  ;;  %v7880_v60 = vld [vmem:[#allocation21 + $0x11a0] sm:$0xff] }
 0xe75   :  { %13037 = vmatprep.subr.bf16.mxu1 %v13036_v13  ;;  %v7585_v13 = vld [vmem:[#allocation21 + $0x868] sm:$0xff]  ;;  %v13082_v42 = vpack.c.bf16 %v7495_v28, %v7490_v6  ;;  %v7370_v6 = vld [vmem:[#allocation21 + $0x1b0] sm:$0xff] }
 0xe76   :  { %v7530_v28 = vld [vmem:[#allocation21 + $0x6b0] sm:$0xff]  ;;  %v7725_v41 = vld [vmem:[#allocation21 + $0xcc8] sm:$0xff] }
 0xe77   :  { %12703 = vmatpush1.bf16.msra.mxu0 %v12702_v10  ;;  %v7500_v10 = vld [vmem:[#allocation21 + $0x5c0] sm:$0xff] }
 0xe78   :  { %13039 = vmatpush1.bf16.msra.mxu1 %v13038_v17  ;;  %12705 = vmatprep.subr.bf16.mxu0 %v12704_v34  ;;  %v13084_v17 = vpack.c.bf16 %v7585_v13, %v7580_v15  ;;  %v7505_v34 = vld [vmem:[#allocation21 + $0x5e8] sm:$0xff]  ;;  %v7620_v13 = vld [vmem:[#allocation21 + $0x980] sm:$0xff] }
 0xe79   :  { %13041 = vmatprep.subr.bf16.mxu1 %v13040_v3  ;;  %v7590_v3 = vld [vmem:[#allocation21 + $0x890] sm:$0xff]  ;;  %v7465_v15 = vld [vmem:[#allocation21 + $0x4a8] sm:$0xff] }
 0xe7a   :  { %v13088_v8 = vpack.c.bf16 %v7595_v43, %v7590_v3  ;;  %v7475_v3 = vld [vmem:[#allocation21 + $0x4f8] sm:$0xff]  ;;  %v7630_v43 = vld [vmem:[#allocation21 + $0x9d0] sm:$0xff] }
 0xe7b   :  { %12707 = vmatpush1.bf16.msra.mxu0 %v12706_v23  ;;  %v13056_v23 = vpack.c.bf16 %v7435_v56, %v7430_v31  ;;  %v7545_v31 = vld [vmem:[#allocation21 + $0x728] sm:$0xff]  ;;  %v7470_v56 = vld [vmem:[#allocation21 + $0x4d0] sm:$0xff] }
 0xe7c   :  { %13043 = vmatpush1.bf16.msra.mxu1 %v13042_v63  ;;  %8562 = vmatprep.subr.mxu0 %v8157_v0  ;;  %v7350_v63 = vld [vmem:[#allocation21 + $0x110] sm:$0xff]  ;;  %v7355_v0 = vld [vmem:[#allocation21 + $0x138] sm:$0xff] }
 0xe7d   :  { %8988 = vmatprep.subr.mxu1 %v8159_v21  ;;  %v7510_v21 = vld [vmem:[#allocation21 + $0x610] sm:$0xff]  ;;  %v13058_v57 = vpack.c.bf16 %v7355_v0, %v7350_v63  ;;  %v13072_v63 = vpack.c.bf16 %v7475_v3, %v7470_v56  ;;  %v7755_v3 = vld [vmem:[#allocation21 + $0xdb8] sm:$0xff] }
 0xe7e   :  { %v7390_v0 = vld [vmem:[#allocation21 + $0x250] sm:$0xff] }
 0xe7f   :  { %8563 = vmatpush1.msra.mxu0 %v8156_v11  ;;  %v7750_v56 = vld [vmem:[#allocation21 + $0xd90] sm:$0xff] }
 0xe80   :  { %8989 = vmatpush1.msra.mxu1 %v8158_v18  ;;  %9542 = vmatmul.mubr.msk.f32.vlgmr.msra.gmra.mrb[56].mxu0 %vm5330_vm7, %v16275_v26  ;;  %v7365_v18 = vld [vmem:[#allocation21 + $0x188] sm:$0xff] }
 0xe81   :  { %9543 = vmatmul.mubr.msk.f32.vlgmr.msra.gmra.mrb[52].mxu1 %vm5330_vm7, %v16275_v26  ;;  %13045 = vmatprep.subr.bf16.mxu0 %v13044_v48  ;;  %v7520_v48 = vld [vmem:[#allocation21 + $0x660] sm:$0xff] }
 0xe82   :  { %13077 = vmatprep.subr.bf16.mxu1 %v13076_v5  ;;  %13047 = vmatpush3.bf16.msra.mxu0 %v13046_v1  ;;  %v7450_v5 = vld [vmem:[#allocation21 + $0x430] sm:$0xff]  ;;  %v7455_v1 = vld [vmem:[#allocation21 + $0x458] sm:$0xff]  ;;  %v13094_v30 = vpack.c.bf16 %v7525_v9, %v7520_v48  ;;  %v7645_v48 = vld [vmem:[#allocation21 + $0xa48] sm:$0xff] }
 0xe83   :  { %9107 = vmatprep.mubr.f32.mxu0 %v16185_v2  ;;  %13079 = vmatpush3.bf16.msra.mxu1 %v13078_v61  ;;  %v13086_v2 = vpack.c.bf16 %v7505_v34, %v7500_v10  ;;  %v13062_v61 = vpack.c.bf16 %v7365_v18, %v7360_v46  ;;  %v13064_v4 = vpack.c.bf16 %v7455_v1, %v7450_v5  ;;  %v7385_v10 = vld [vmem:[#allocation21 + $0x228] sm:$0xff]  ;;  %v7640_v18 = vld [vmem:[#allocation21 + $0xa20] sm:$0xff]  ;;  %v7730_v1 = vld [vmem:[#allocation21 + $0xcf0] sm:$0xff] }
 0xe84   :  { %9177 = vmatprep.mubr.f32.mxu1 %v16203_v51  ;;  %13049 = vmatprep.subr.bf16.mxu0 %v13048_v49  ;;  %v7515_v51 = vld [vmem:[#allocation21 + $0x638] sm:$0xff]  ;;  %v13108_v46 = vpack.c.bf16 %v7725_v41, %v7720_v36  ;;  %v7800_v9 = vld [vmem:[#allocation21 + $0xf20] sm:$0xff]  ;;  %v7805_v5 = vld [vmem:[#allocation21 + $0xf48] sm:$0xff]  ;;  %v13110_v52 = vpack.c.bf16 %v7645_v48, %v7640_v18 }
 0xe85   :  { %13081 = vmatprep.subr.bf16.mxu1 %v13080_v33  ;;  %v13090_v11 = vpack.c.bf16 %v7515_v51, %v7510_v21  ;;  %v7375_v49 = vld [vmem:[#allocation21 + $0x1d8] sm:$0xff]  ;;  %v7460_v33 = vld [vmem:[#allocation21 + $0x480] sm:$0xff]  ;;  %v7925_v36 = vld [vmem:[#allocation21 + $0x1308] sm:$0xff] }
 0xe86   :  { %13051 = vmatpush3.bf16.msra.mxu0 %v13050_v38  ;;  %v7625_v38 = vld [vmem:[#allocation21 + $0x9a8] sm:$0xff]  ;;  %v13068_v45 = vpack.c.bf16 %v7465_v15, %v7460_v33  ;;  %v7395_v21 = vld [vmem:[#allocation21 + $0x278] sm:$0xff]  ;;  %v7740_v33 = vld [vmem:[#allocation21 + $0xd40] sm:$0xff] }
 0xe87   :  { %13083 = vmatpush3.bf16.msra.mxu1 %v13082_v42  ;;  %13053 = vmatprep.subr.bf16.mxu0 %v13052_v22  ;;  %v13066_v42 = vpack.c.bf16 %v7375_v49, %v7370_v6  ;;  %v13098_v22 = vpack.c.bf16 %v7535_v44, %v7530_v28  ;;  %v13100_v34 = vpack.c.bf16 %v7625_v38, %v7620_v13  ;;  %v7650_v6 = vld [vmem:[#allocation21 + $0xa70] sm:$0xff]  ;;  %v7655_v49 = vld [vmem:[#allocation21 + $0xa98] sm:$0xff]  ;;  %v7745_v15 = vld [vmem:[#allocation21 + $0xd68] sm:$0xff] }
 0xe88   :  { %13085 = vmatprep.subr.bf16.mxu1 %v13084_v17  ;;  %v7540_v17 = vld [vmem:[#allocation21 + $0x700] sm:$0xff]  ;;  %v7810_v28 = vld [vmem:[#allocation21 + $0xf70] sm:$0xff]  ;;  %v7815_v44 = vld [vmem:[#allocation21 + $0xf98] sm:$0xff] }
 0xe89   :  { %v7900_v38 = vld [vmem:[#allocation21 + $0x1240] sm:$0xff]  ;;  %v7845_v48 = vld [vmem:[#allocation21 + $0x1088] sm:$0xff] }
 0xe8a   :  { %13055 = vmatpush3.bf16.msra.mxu0 %v13054_v53  ;;  %v7635_v53 = vld [vmem:[#allocation21 + $0x9f8] sm:$0xff] }
 0xe8b   :  { %13087 = vmatpush3.bf16.msra.mxu1 %v13086_v2  ;;  %13057 = vmatprep.subr.bf16.mxu0 %v13056_v23  ;;  %v13070_v2 = vpack.c.bf16 %v7385_v10, %v7380_v7  ;;  %v13102_v23 = vpack.c.bf16 %v7545_v31, %v7540_v17  ;;  %v13104_v51 = vpack.c.bf16 %v7635_v53, %v7630_v43  ;;  %v7660_v10 = vld [vmem:[#allocation21 + $0xac0] sm:$0xff]  ;;  %v7665_v17 = vld [vmem:[#allocation21 + $0xae8] sm:$0xff]  ;;  %v7910_v43 = vld [vmem:[#allocation21 + $0x1290] sm:$0xff] }
 0xe8c   :  { %13089 = vmatprep.subr.bf16.mxu1 %v13088_v8  ;;  %v7550_v8 = vld [vmem:[#allocation21 + $0x750] sm:$0xff]  ;;  %v13116_v7 = vpack.c.bf16 %v7745_v15, %v7740_v33  ;;  %v13118_v53 = vpack.c.bf16 %v7665_v17, %v7660_v10  ;;  %v7940_v33 = vld [vmem:[#allocation21 + $0x1380] sm:$0xff]  ;;  %v7945_v15 = vld [vmem:[#allocation21 + $0x13a8] sm:$0xff] }
 0xe8d   :  { %v13164_v10 = vpack.c.bf16 %v7945_v15, %v7940_v33  ;;  %v7865_v17 = vld [vmem:[#allocation21 + $0x1128] sm:$0xff]  ;;  %v7990_v33 = vld [vmem:[#allocation21 + $0x1510] sm:$0xff]  ;;  %v7995_v15 = vld [vmem:[#allocation21 + $0x1538] sm:$0xff] }
 0xe8e   :  { %13059 = vmatpush3.bf16.msra.mxu0 %v13058_v57  ;;  %v7885_v57 = vld [vmem:[#allocation21 + $0x11c8] sm:$0xff] }
 0xe8f   :  { %13091 = vmatpush3.bf16.msra.mxu1 %v13090_v11  ;;  %13061 = vmatprep.subr.bf16.mxu0 %v13060_v50  ;;  %v13074_v11 = vpack.c.bf16 %v7395_v21, %v7390_v0  ;;  %v13106_v50 = vpack.c.bf16 %v7555_v19, %v7550_v8  ;;  %v7830_v0 = vld [vmem:[#allocation21 + $0x1010] sm:$0xff]  ;;  %v7760_v8 = vld [vmem:[#allocation21 + $0xde0] sm:$0xff] }
 0xe90   :  { %13093 = vmatprep.subr.bf16.mxu1 %v13092_v54  ;;  %v13140_v54 = vpack.c.bf16 %v7885_v57, %v7880_v60  ;;  %v7920_v19 = vld [vmem:[#allocation21 + $0x12e0] sm:$0xff] }
 0xe91   :  { %v13156_v18 = vpack.c.bf16 %v7925_v36, %v7920_v19  ;;  %v7960_v19 = vld [vmem:[#allocation21 + $0x1420] sm:$0xff]  ;;  %v7965_v36 = vld [vmem:[#allocation21 + $0x1448] sm:$0xff] }
 0xe92   :  { %13063 = vmatpush3.bf16.msra.mxu0 %v13062_v61  ;;  %v7890_v61 = vld [vmem:[#allocation21 + $0x11f0] sm:$0xff] }
 0xe93   :  { %13095 = vmatpush3.bf16.msra.mxu1 %v13094_v30  ;;  %13065 = vmatprep.subr.bf16.mxu0 %v13064_v4  ;;  %v7895_v30 = vld [vmem:[#allocation21 + $0x1218] sm:$0xff]  ;;  %v13142_v4 = vpack.c.bf16 %v7805_v5, %v7800_v9  ;;  %v7930_v5 = vld [vmem:[#allocation21 + $0x1330] sm:$0xff] }
 0xe94   :  { %13097 = vmatprep.subr.bf16.mxu1 %v13096_v16  ;;  %v13112_v16 = vpack.c.bf16 %v7735_v32, %v7730_v1  ;;  %v13144_v13 = vpack.c.bf16 %v7895_v30, %v7890_v61  ;;  %v7775_v9 = vld [vmem:[#allocation21 + $0xe58] sm:$0xff]  ;;  %v7690_v30 = vld [vmem:[#allocation21 + $0xbb0] sm:$0xff] }
 0xe95   :  { %v7935_v1 = vld [vmem:[#allocation21 + $0x1358] sm:$0xff] }
 0xe96   :  { %13067 = vmatpush3.bf16.msra.mxu0 %v13066_v42  ;;  %v7905_v42 = vld [vmem:[#allocation21 + $0x1268] sm:$0xff] }
 0xe97   :  { %13099 = vmatpush3.bf16.msra.mxu1 %v13098_v22  ;;  %13069 = vmatprep.subr.bf16.mxu0 %v13068_v45  ;;  %v13114_v22 = vpack.c.bf16 %v7655_v49, %v7650_v6  ;;  %v13146_v45 = vpack.c.bf16 %v7815_v44, %v7810_v28  ;;  %v13148_v31 = vpack.c.bf16 %v7905_v42, %v7900_v38  ;;  %v7850_v6 = vld [vmem:[#allocation21 + $0x10b0] sm:$0xff]  ;;  %v7855_v28 = vld [vmem:[#allocation21 + $0x10d8] sm:$0xff]  ;;  %v7785_v44 = vld [vmem:[#allocation21 + $0xea8] sm:$0xff] }
 0xe98   :  { %13101 = vmatprep.subr.bf16.mxu1 %v13100_v34  ;;  %v7820_v34 = vld [vmem:[#allocation21 + $0xfc0] sm:$0xff]  ;;  %v13160_v49 = vpack.c.bf16 %v7935_v1, %v7930_v5  ;;  %v13162_v38 = vpack.c.bf16 %v7855_v28, %v7850_v6  ;;  %v8135_v5 = vld [vmem:[#allocation21 + $0x1998] sm:$0xff]  ;;  %v7985_v6 = vld [vmem:[#allocation21 + $0x14e8] sm:$0xff] }
 0xe99   :  { %v8060_v1 = vld [vmem:[#allocation21 + $0x1740] sm:$0xff]  ;;  %v8145_v28 = vld [vmem:[#allocation21 + $0x19e8] sm:$0xff] }
 0xe9a   :  { %13071 = vmatpush3.bf16.msra.mxu0 %v13070_v2  ;;  %v13120_v2 = vpack.c.bf16 %v7755_v3, %v7750_v56  ;;  %v7955_v56 = vld [vmem:[#allocation21 + $0x13f8] sm:$0xff] }
 0xe9b   :  { %13103 = vmatpush3.bf16.msra.mxu1 %v13102_v23  ;;  %13073 = vmatprep.subr.bf16.mxu0 %v13072_v63  ;;  %v7670_v23 = vld [vmem:[#allocation21 + $0xb10] sm:$0xff]  ;;  %v7675_v63 = vld [vmem:[#allocation21 + $0xb38] sm:$0xff] }
 0xe9c   :  { %13105 = vmatprep.subr.bf16.mxu1 %v13104_v51  ;;  %v7765_v51 = vld [vmem:[#allocation21 + $0xe08] sm:$0xff]  ;;  %v13122_v41 = vpack.c.bf16 %v7675_v63, %v7670_v23  ;;  %v7875_v63 = vld [vmem:[#allocation21 + $0x1178] sm:$0xff] }
 0xe9d   :  { %v13124_v57 = vpack.c.bf16 %v7765_v51, %v7760_v8 }
 0xe9e   :  { %13075 = vmatpush3.bf16.msra.mxu0 %v13074_v11  ;;  %v7680_v11 = vld [vmem:[#allocation21 + $0xb60] sm:$0xff] }
 0xe9f   :  { %13107 = vmatpush3.bf16.msra.mxu1 %v13106_v50  ;;  %13109 = vmatprep.subr.bf16.mxu0 %v13108_v46  ;;  %v7685_v50 = vld [vmem:[#allocation21 + $0xb88] sm:$0xff]  ;;  %v7840_v46 = vld [vmem:[#allocation21 + $0x1060] sm:$0xff] }
 0xea0   :  { %13141 = vmatprep.subr.bf16.mxu1 %v13140_v54  ;;  %v7770_v54 = vld [vmem:[#allocation21 + $0xe30] sm:$0xff]  ;;  %v13126_v32 = vpack.c.bf16 %v7685_v50, %v7680_v11  ;;  %v8055_v11 = vld [vmem:[#allocation21 + $0x1718] sm:$0xff]  ;;  %v13174_v50 = vpack.c.bf16 %v7965_v36, %v7960_v19 }
 0xea1   :  { %9108 = vmatmul.mubr.f32.vlgmr.msra.gmra.mrb[58].mxu0 %v16187_v62  ;;  %v7825_v62 = vld [vmem:[#allocation21 + $0xfe8] sm:$0xff]  ;;  %v13128_v61 = vpack.c.bf16 %v7775_v9, %v7770_v54  ;;  %v8130_v54 = vld [vmem:[#allocation21 + $0x1970] sm:$0xff]  ;;  %v8035_v19 = vld [vmem:[#allocation21 + $0x1678] sm:$0xff] }
 0xea2   :  { %9178 = vmatmul.mubr.f32.vlgmr.msra.gmra.mrb[54].mxu1 %v16228_v37  ;;  %13111 = vmatpush3.bf16.msra.mxu0 %v13110_v52  ;;  %v7915_v37 = vld [vmem:[#allocation21 + $0x12b8] sm:$0xff]  ;;  %v13158_v52 = vpack.c.bf16 %v7845_v48, %v7840_v46 }
 0xea3   :  { %9247 = vmatprep.mubr.f32.mxu0 %v16231_v20  ;;  %13143 = vmatpush3.bf16.msra.mxu1 %v13142_v4  ;;  %v13150_v20 = vpack.c.bf16 %v7825_v62, %v7820_v34  ;;  %v13152_v21 = vpack.c.bf16 %v7915_v37, %v7910_v43  ;;  %v7695_v4 = vld [vmem:[#allocation21 + $0xbd8] sm:$0xff]  ;;  %v7790_v34 = vld [vmem:[#allocation21 + $0xed0] sm:$0xff] }
 0xea4   :  { %9317 = vmatprep.mubr.f32.mxu1 %v16242_v39  ;;  %13113 = vmatprep.subr.bf16.mxu0 %v13112_v16  ;;  %v7835_v39 = vld [vmem:[#allocation21 + $0x1038] sm:$0xff]  ;;  %v7780_v16 = vld [vmem:[#allocation21 + $0xe80] sm:$0xff]  ;;  %v7950_v62 = vld [vmem:[#allocation21 + $0x13d0] sm:$0xff] }
 0xea5   :  { %13145 = vmatprep.subr.bf16.mxu1 %v13144_v13  ;;  %v13154_v60 = vpack.c.bf16 %v7835_v39, %v7830_v0  ;;  %v13130_v13 = vpack.c.bf16 %v7695_v4, %v7690_v30  ;;  %v13132_v42 = vpack.c.bf16 %v7785_v44, %v7780_v16  ;;  %v13168_v23 = vpack.c.bf16 %v7955_v56, %v7950_v62  ;;  %v8040_v0 = vld [vmem:[#allocation21 + $0x16a0] sm:$0xff]  ;;  %v7975_v48 = vld [vmem:[#allocation21 + $0x1498] sm:$0xff]  ;;  %v8070_v16 = vld [vmem:[#allocation21 + $0x1790] sm:$0xff] }
 0xea6   :  { %13115 = vmatpush3.bf16.msra.mxu0 %v13114_v22  ;;  %v7700_v22 = vld [vmem:[#allocation21 + $0xc00] sm:$0xff]  ;;  %v8075_v44 = vld [vmem:[#allocation21 + $0x17b8] sm:$0xff] }
 0xea7   :  { %13147 = vmatpush3.bf16.msra.mxu1 %v13146_v45  ;;  %13117 = vmatprep.subr.bf16.mxu0 %v13116_v7  ;;  %v7705_v45 = vld [vmem:[#allocation21 + $0xc28] sm:$0xff]  ;;  %v7860_v7 = vld [vmem:[#allocation21 + $0x1100] sm:$0xff]  ;;  %v8095_v62 = vld [vmem:[#allocation21 + $0x1858] sm:$0xff] }
 0xea8   :  { %13149 = vmatprep.subr.bf16.mxu1 %v13148_v31  ;;  %v7795_v31 = vld [vmem:[#allocation21 + $0xef8] sm:$0xff]  ;;  %v13134_v3 = vpack.c.bf16 %v7705_v45, %v7700_v22  ;;  %v13166_v43 = vpack.c.bf16 %v7865_v17, %v7860_v7  ;;  %v7980_v4 = vld [vmem:[#allocation21 + $0x14c0] sm:$0xff]  ;;  %v8085_v22 = vld [vmem:[#allocation21 + $0x1808] sm:$0xff]  ;;  %v13186_v45 = vpack.c.bf16 %v7995_v15, %v7990_v33 }
 0xea9   :  { %v13136_v37 = vpack.c.bf16 %v7795_v31, %v7790_v34  ;;  %v8000_v17 = vld [vmem:[#allocation21 + $0x1560] sm:$0xff]  ;;  %v8005_v34 = vld [vmem:[#allocation21 + $0x1588] sm:$0xff]  ;;  %v8090_v31 = vld [vmem:[#allocation21 + $0x1830] sm:$0xff] }
 0xeaa   :  { %13119 = vmatpush3.bf16.msra.mxu0 %v13118_v53  ;;  %v7710_v53 = vld [vmem:[#allocation21 + $0xc50] sm:$0xff]  ;;  %v13190_v56 = vpack.c.bf16 %v8005_v34, %v8000_v17 }
 0xeab   :  { %13151 = vmatpush3.bf16.msra.mxu1 %v13150_v20  ;;  %13121 = vmatprep.subr.bf16.mxu0 %v13120_v2  ;;  %v7715_v20 = vld [vmem:[#allocation21 + $0xc78] sm:$0xff]  ;;  %v7870_v2 = vld [vmem:[#allocation21 + $0x1150] sm:$0xff] }
 0xeac   :  { %13153 = vmatprep.subr.bf16.mxu1 %v13152_v21  ;;  %v8045_v21 = vld [vmem:[#allocation21 + $0x16c8] sm:$0xff]  ;;  %v13138_v39 = vpack.c.bf16 %v7715_v20, %v7710_v53  ;;  %v13170_v8 = vpack.c.bf16 %v7875_v63, %v7870_v2  ;;  %v8160_v53 = vld [vmem:[#allocation21 + $0x1a60] sm:$0xff] }
 0xead   :  { %v13172_v51 = vpack.c.bf16 %v8045_v21, %v8040_v0  ;;  %v8100_v20 = vld [vmem:[#allocation21 + $0x1880] sm:$0xff]  ;;  %v8105_v2 = vld [vmem:[#allocation21 + $0x18a8] sm:$0xff]  ;;  %v8110_v21 = vld [vmem:[#allocation21 + $0x18d0] sm:$0xff] }
 0xeae   :  { %13123 = vmatpush3.bf16.msra.mxu0 %v13122_v41  ;;  %v8120_v41 = vld [vmem:[#allocation21 + $0x1920] sm:$0xff]  ;;  %v13196_v63 = vpack.c.bf16 %v8105_v2, %v8100_v20  ;;  %v8025_v0 = vld [vmem:[#allocation21 + $0x1628] sm:$0xff] }
 0xeaf   :  { %13155 = vmatpush3.bf16.msra.mxu1 %v13154_v60  ;;  %13125 = vmatprep.subr.bf16.mxu0 %v13124_v57  ;;  %v8125_v60 = vld [vmem:[#allocation21 + $0x1948] sm:$0xff]  ;;  %v8050_v57 = vld [vmem:[#allocation21 + $0x16f0] sm:$0xff] }
 0xeb0   :  { %13157 = vmatprep.subr.bf16.mxu1 %v13156_v18  ;;  %v13205_v46 = vpack.c.bf16 %v8125_v60, %v8120_v41  ;;  %v7970_v18 = vld [vmem:[#allocation21 + $0x1470] sm:$0xff]  ;;  %v13176_v9 = vpack.c.bf16 %v8055_v11, %v8050_v57  ;;  %v8161_v41 = vld [vmem:[#allocation22] sm:$0x1f]  ;;  %v13657_v60 = vmov 1983009808  }
 0xeb1   :  { %v9471_v57 = vunpack.c.l.s4 %v13657_v60  ;;  %v8166_v11 = vrot.slane %v8161_v41, %v14581_v47 }
 0xeb2   :  { %13127 = vmatpush3.bf16.msra.mxu0 %v13126_v32  ;;  %v8065_v32 = vld [vmem:[#allocation21 + $0x1768] sm:$0xff] }
 0xeb3   :  { %13159 = vmatpush3.bf16.msra.mxu1 %v13158_v52  ;;  %13129 = vmatprep.subr.bf16.mxu0 %v13128_v61  ;;  %v13178_v52 = vpack.c.bf16 %v7975_v48, %v7970_v18  ;;  %v13208_v61 = vpack.c.bf16 %v8135_v5, %v8130_v54  ;;  %v13180_v30 = vpack.c.bf16 %v8065_v32, %v8060_v1 }
 0xeb4   :  { %13161 = vmatprep.subr.bf16.mxu1 %v13160_v49  ;;  %v8140_v49 = vld [vmem:[#allocation21 + $0x19c0] sm:$0xff]  ;;  %v8178_v18 = vrot.slane %v8161_v41, %v16571_v29  ;;  %v8182_v29 = vrot.slane %v8161_v41, %v16572_v24 }
 0xeb6   :  { %13131 = vmatpush3.bf16.msra.mxu0 %v13130_v13  ;;  %v8150_v13 = vld [vmem:[#allocation21 + $0x1a10] sm:$0xff] }
 0xeb7   :  { %13163 = vmatpush3.bf16.msra.mxu1 %v13162_v38  ;;  %13133 = vmatprep.subr.bf16.mxu0 %v13132_v42  ;;  %v8155_v38 = vld [vmem:[#allocation21 + $0x1a38] sm:$0xff]  ;;  %v8080_v42 = vld [vmem:[#allocation21 + $0x17e0] sm:$0xff] }
 0xeb8   :  { %13165 = vmatprep.subr.bf16.mxu1 %v13164_v10  ;;  %v13214_v7 = vpack.c.bf16 %v8155_v38, %v8150_v13  ;;  %v13188_v10 = vpack.c.bf16 %v8085_v22, %v8080_v42 }
 0xeba   :  { %13135 = vmatpush3.bf16.msra.mxu0 %v13134_v3  ;;  %v13192_v3 = vpack.c.bf16 %v8095_v62, %v8090_v31 }
 0xebb   :  { %13167 = vmatpush3.bf16.msra.mxu1 %v13166_v43  ;;  %13137 = vmatprep.subr.bf16.mxu0 %v13136_v37  ;;  %v8010_v43 = vld [vmem:[#allocation21 + $0x15b0] sm:$0xff]  ;;  %v8015_v37 = vld [vmem:[#allocation21 + $0x15d8] sm:$0xff] }
 0xebc   :  { %13169 = vmatprep.subr.bf16.mxu1 %v13168_v23  ;;  %v13194_v23 = vpack.c.bf16 %v8015_v37, %v8010_v43 }
 0xebe   :  { %13139 = vmatpush3.bf16.msra.mxu0 %v13138_v39  ;;  %v8115_v39 = vld [vmem:[#allocation21 + $0x18f8] sm:$0xff] }
 0xebf   :  { %13171 = vmatpush3.bf16.msra.mxu1 %v13170_v8  ;;  %13173 = vmatprep.subr.bf16.mxu0 %v13172_v51  ;;  %v13200_v51 = vpack.c.bf16 %v8115_v39, %v8110_v21 }
 0xec0   :  { %13204 = vmatprep.subr.bf16.mxu1 %v16550_v12 }
 0xec1   :  { %9248 = vmatmul.mubr.f32.vlgmr.msra.gmra.mrb[60].mxu0 %v16238_v35  ;;  %v13182_v35 = vpack.c.bf16 %v7985_v6, %v7980_v4 }
 0xec2   :  { %9318 = vmatmul.mubr.f32.vlgmr.msra.gmra.mrb[56].mxu1 %v16255_v59  ;;  %13175 = vmatpush3.bf16.msra.mxu0 %v13174_v50  ;;  %v13211_v59 = vpack.c.bf16 %v8145_v28, %v8140_v49  ;;  %v8170_v50 = vrot.slane %v8161_v41, %v16569_v25 }
 0xec3   :  { %9387 = vmatprep.mubr.f32.mxu0 %v16258_v40  ;;  %13206 = vmatpush3.bf16.msra.mxu1 %v13205_v46  ;;  %v13184_v40 = vpack.c.bf16 %v8075_v44, %v8070_v16  ;;  %v9472_v46 = vunpack.c.0.s8 %v9471_v57 }
 0xec4   :  { %13177 = vmatprep.subr.bf16.mxu0 %v13176_v9  ;;  %13207 = vmatprep.subr.bf16.mxu1 %v16550_v12 }
 0xec5   :  { %10598 = vmatprep.mubr.msk.f32.mxu1 %vm13655_vm0, %v16431_v55 }
 0xec6   :  { %13179 = vmatpush3.bf16.msra.mxu0 %v13178_v52 }
 0xec7   :  { %13209 = vmatpush3.bf16.msra.mxu1 %v13208_v61  ;;  %13181 = vmatprep.subr.bf16.mxu0 %v13180_v30 }
 0xec8   :  { %13210 = vmatprep.subr.bf16.mxu1 %v16550_v12 }
 0xeca   :  { %13183 = vmatpush3.bf16.msra.mxu0 %v13182_v35 }
 0xecb   :  { %13212 = vmatpush3.bf16.msra.mxu1 %v13211_v59  ;;  %13185 = vmatprep.subr.bf16.mxu0 %v13184_v40 }
 0xecc   :  { %13213 = vmatprep.subr.bf16.mxu1 %v16550_v12  ;;  %v8020_v12 = vld [vmem:[#allocation21 + $0x1600] sm:$0xff] }
 0xecd   :  { %v13198_v8 = vpack.c.bf16 %v8025_v0, %v8020_v12 }
 0xece   :  { %13187 = vmatpush3.bf16.msra.mxu0 %v13186_v45 }
 0xecf   :  { %13215 = vmatpush3.bf16.msra.mxu1 %v13214_v7  ;;  %13189 = vmatprep.subr.bf16.mxu0 %v13188_v10 }
 0xed0   :  { %10596 = vmatprep.subr.mxu1 %v16431_v55  ;;  %v8030_v55 = vld [vmem:[#allocation21 + $0x1650] sm:$0xff] }
 0xed1   :  { %v13202_v36 = vpack.c.bf16 %v8035_v19, %v8030_v55 }
 0xed2   :  { %13191 = vmatpush3.bf16.msra.mxu0 %v13190_v56 }
 0xed3   :  { %10597 = vmatpush3.msra.mxu1 %v8160_v53  ;;  %13193 = vmatprep.subr.bf16.mxu0 %v13192_v3 }
 0xed4   :  { %10599 = vmatmul.mubr.msk.f32.vlgmr.msra.gmra.mrb[58].mxu1 %vm5330_vm7, %v16275_v26  ;;  %v8174_v26 = vrot.slane %v8161_v41, %v16570_v14 }
 0xed6   :  { %13195 = vmatpush3.bf16.msra.mxu0 %v13194_v23 }
 0xed7   :  { %13197 = vmatprep.subr.bf16.mxu0 %v13196_v63 }
 0xeda   :  { %13199 = vmatpush3.bf16.msra.mxu0 %v13198_v8 }
 0xedb   :  { %13201 = vmatprep.subr.bf16.mxu0 %v13200_v51 }
 0xede   :  { %13203 = vmatpush3.bf16.msra.mxu0 %v13202_v36 }
 0xee1   :  { %9388 = vmatmul.mubr.f32.vlgmr.msra.gmra.mrb[62].mxu0 %v16268_v58  ;;  %v9475_v58 = vsub.s32 %v9472_v46, %v16575_v27 }
 0xf53   :  { %v8612_v48 = vpop.f32.mrb[56].mxu0 }
 0xf54   :  { %v13226_v54 = vadd.f32 %v8612_v48, %v8166_v11  ;;  %v9038_v9 = vpop.f32.mrb[52].mxu1  ;;  %v8614_v5 = vpop.f32.mrb[57].mxu0 }
 0xf55   :  { %v13228_v1 = vadd.f32 %v9038_v9, %v8174_v26  ;;  %v13227_v32 = vadd.f32 %v8614_v5, %v8170_v50  ;;  %v9040_v52 = vpop.f32.mrb[53].mxu1 }
 0xf56   :  { %v13229_v61 = vadd.f32 %v9040_v52, %v8178_v18 }
 0xf57   :  { %v9468_v30 = vcombine.low %v13226_v54, %v13227_v32 }
 0xf58   :  { %v9469_v4 = vcombine.low %v13228_v1, %v13229_v61 }
 0xf59   :  { %v9476_v47 = vrot.slane %v9468_v30, %v9475_v58 }
 0xf5a   :  { %v9483_v6 = vrot.slane %v9469_v4, %v9475_v58 }
 0xf5c   :  { %v9484_v14 = vcombine.low %v9476_v47, %v9483_v6 }
 0xf5e   :  { %9494 = vst [vmem:[%s16329_s17] sm:$0xff] %v9484_v14 }
 0xf74   :  { %v10300_v25 = vpop.f32.mrb[58].mxu0 }
 0xf75   :  { %v10335_v49 = vpop.f32.mrb[54].mxu1  ;;  %v10301_v28 = vpop.f32.mrb[59].mxu0 }
 0xf76   :  { %v10302_v16 = vadd.f32 %v10301_v28, %v10300_v25  ;;  %v10336_v44 = vpop.f32.mrb[55].mxu1 }
 0xf77   :  { %v10337_v35 = vadd.f32 %v10336_v44, %v10335_v49 }
 0xf78   :  { %v9110_v27 = vadd.f32 %v10302_v16, %v8182_v29 }
 0xf7a   :  { %v9180_v59 = vadd.f32 %v10337_v35, %v9110_v27 }
 0xf94   :  { %v10370_v40 = vpop.f32.mrb[60].mxu0 }
 0xf95   :  { %v10405_v33 = vpop.f32.mrb[56].mxu1  ;;  %v10371_v15 = vpop.f32.mrb[61].mxu0 }
 0xf96   :  { %v10372_v13 = vadd.f32 %v10371_v15, %v10370_v40  ;;  %v10406_v38 = vpop.f32.mrb[57].mxu1 }
 0xf97   :  { %v10407_v42 = vadd.f32 %v10406_v38, %v10405_v33 }
 0xf98   :  { %v9250_v22 = vadd.f32 %v10372_v13, %v9180_v59 }
 0xf9a   :  { %v9320_v45 = vadd.f32 %v10407_v42, %v9250_v22 }
 0xfa7   :  { %v9459_v7 = vpop.f32.mrb[58].mxu1 }
 0xfa8   :  { %v10600_v10 = vpop.f32.mrb[59].mxu1 }
 0xfb4   :  { %v10440_v17 = vpop.f32.mrb[62].mxu0 }
 0xfb5   :  { %v10441_v34 = vpop.f32.mrb[63].mxu0 }
 0xfb6   :  { %v10442_v24 = vadd.f32 %v10441_v34, %v10440_v17 }
 0xfb8   :  { %v9390_v31 = vadd.f32 %v10442_v24, %v9320_v45 }
 0xfba   :  { %v9460_v62 = vadd.f32 %v9459_v7, %v9390_v31 }
 0xfbc   :  { %v9491_v56 = vrot.slane %v9460_v62, %v9475_v58 }
 0xfbe   :  { %9496 = vst.msk [vmem:[%s16329_s17 + $0x8] sm:$0x3] %vm9495_vm9, %v9491_v56 }
 0xfbf   :  { %9501 = vsyncpa [#allocation3], 1 }
 0xfc0   :  { %9502 = vsyncpa [#allocation5], 1 }
 0xfc1   :  { %9503 = vsyncpa [#allocation8], 1 }
 0xfc2   :  { %9504 = vsyncpa [#allocation11], 1 }
 0xfc3   :  { %9505 = vsyncpa [#allocation14], 1 }
 0xfc4   :  { %9506 = vsyncpa [#allocation17], 1 }
 0xfc5   :  { %9507 = vsyncpa [#allocation20], 1 }
 0xfc6   :  { %9508 = vsyncpa [#allocation23], 1 }

</bundles_post_ra>
